<compile_context>
chip_gen: v7x
topology: tpu7x:2x2x1
jax: 0.10.0
libtpu: 0.0.40
codegen_flags: <defaults>
</compile_context>

<pallas_src>
import functools

import jax
import jax.numpy as jnp
from jax.experimental import pallas as pl
from jax.experimental.pallas import tpu as pltpu


def _focal_loss_kernel(logits_ref, targets_ref, out_ref, *,
                       total_n, total_blocks, blocks_per_shard, block_rows,
                       gamma, has_tail, has_oob):
    p = pl.program_id(0)            # shard axis ("parallel"; 2 TCs on v7x)
    j = pl.program_id(1)            # row-block within shard (reduction axis)
    gb = p * blocks_per_shard + j   # global row-block index

    @pl.when(j == 0)
    def _():
        out_ref[...] = jnp.zeros_like(out_ref)

    def compute_and_accumulate():
        x = logits_ref[...].astype(jnp.float32)           # (block_rows, C)
        t = targets_ref[...]                              # (block_rows, 1) int32

        # Numerically stable log-sum-exp over the class axis (tile-wide work).
        m = jnp.max(x, axis=-1, keepdims=True)
        lse = m + jnp.log(jnp.sum(jnp.exp(x - m), axis=-1, keepdims=True))

        # Target-class logit via a (1, C) iota + broadcasting compare
        # (no full-tile iota materialized, no scatter/gather).
        cls_ids = jax.lax.broadcasted_iota(jnp.int32, (1, x.shape[-1]), 1)
        tgt_logit = jnp.sum(jnp.where(cls_ids == t, x, 0.0),
                            axis=-1, keepdims=True)

        ce = lse - tgt_logit                              # per-row CE (>= 0)
        pt = jnp.exp(-ce)
        q = 1.0 - pt
        if float(gamma) == 2.0:
            focal = q * q                                 # VPU mul, no EUP pow
        else:
            focal = q ** jnp.float32(gamma)
        loss = focal * ce               # (block_rows, 1); alpha folded in wrapper

        # One XLU reduce per step into a tiny VMEM-resident (1, 1) accumulator
        # (same output block across the j axis).  Tail masking only runs on the
        # single block that can contain padding rows, and uses a select (NOT a
        # multiply) because padded rows may carry Inf/NaN garbage.
        if not has_tail:
            out_ref[...] += jnp.sum(loss, keepdims=True)
        else:
            @pl.when(gb < total_blocks - 1)
            def _():
                out_ref[...] += jnp.sum(loss, keepdims=True)

            tail_rows = total_n - (total_blocks - 1) * block_rows  # static int
            @pl.when(gb == total_blocks - 1)
            def _():
                ridx = jax.lax.broadcasted_iota(jnp.int32, (block_rows, 1), 0)
                masked = jnp.where(ridx < tail_rows, loss, 0.0)
                out_ref[...] += jnp.sum(masked, keepdims=True)

    if has_oob:
        # Shard padding: at most (num_shards - 1) grid steps land past the last
        # real block; their input index is clamped in the index_map and the
        # whole step is skipped here, so they contribute nothing.
        @pl.when(gb < total_blocks)
        def _():
            compute_and_accumulate()
    else:
        compute_and_accumulate()


def _round_up(x, m):
    return ((x + m - 1) // m) * m


def _default_num_shards():
    # v7x has 2 TensorCores per chip; v5e/v6e have 1, where a second shard is
    # just a longer sequential loop plus extra edge blocks.
    try:
        kind = jax.devices()[0].device_kind.lower()
        if "v7" in kind:
            return 2
    except Exception:
        pass
    return 1


def focal_loss(logits, targets, *, alpha=1.0, gamma=2.0,
               block_rows=2048, num_shards=None):
    """Mean focal loss.  logits: (N, C) float (f32/bf16); targets: (N,) int."""
    # TODO(synk): only reduction='mean' (the module default) is implemented;
    # reduction='none' would need a per-row output kernel.
    n, c = logits.shape

    # Row-block size: big enough to amortize per-grid-step overhead, small
    # enough that the double-buffered logits + lane-padded targets tiles fit
    # the default scoped VMEM on all generations (~4 MiB at 2048 rows).
    block_rows = max(8, (int(block_rows) // 8) * 8)
    block_rows = min(block_rows, _round_up(n, 8))

    total_blocks = pl.cdiv(n, block_rows)
    if num_shards is None:
        num_shards = _default_num_shards()
    num_shards = max(1, min(int(num_shards), total_blocks))
    blocks_per_shard = pl.cdiv(total_blocks, num_shards)
    has_oob = num_shards * blocks_per_shard > total_blocks
    has_tail = (n % block_rows) != 0

    targets2d = targets.astype(jnp.int32).reshape(n, 1)

    if has_oob:
        def row_block_map(p, j):
            # Clamp so no block index is ever past the array; the kernel skips
            # the (at most num_shards-1) clamped steps via pl.when.
            return (jnp.minimum(p * blocks_per_shard + j, total_blocks - 1), 0)
    else:
        def row_block_map(p, j):
            return (p * blocks_per_shard + j, 0)

    kernel = functools.partial(
        _focal_loss_kernel, total_n=n, total_blocks=total_blocks,
        blocks_per_shard=blocks_per_shard, block_rows=block_rows,
        gamma=float(gamma), has_tail=has_tail, has_oob=has_oob)

    partial_sums = pl.pallas_call(
        kernel,
        out_shape=jax.ShapeDtypeStruct((num_shards, 1, 1), jnp.float32),
        grid=(num_shards, blocks_per_shard),
        in_specs=[
            pl.BlockSpec((block_rows, c), row_block_map),
            pl.BlockSpec((block_rows, 1), row_block_map),
        ],
        # Same tiny (1,1) output block across the j (reduction) axis -> a
        # VMEM-resident scalar accumulator per shard.
        out_specs=pl.BlockSpec((None, 1, 1), lambda p, j: (p, 0, 0)),
        compiler_params=pltpu.CompilerParams(
            # "parallel" lets megacore parts (v7x) split the shard axis.
            # TODO(synk): if profiling on v7x shows both TensorCores idle on
            # one shard, switch axis 0 to pltpu.CORE_PARALLEL.
            dimension_semantics=("parallel", "arbitrary")),
    )(logits, targets2d)

    # Tiny final reduction; alpha and the mean's 1/N are folded in here so the
    # kernel performs no per-row alpha multiply.
    return jnp.sum(partial_sums) * jnp.float32(float(alpha) / n)


def _focal_loss_ref(logits, targets, alpha=1.0, gamma=2.0):
    # Pure-JAX reference (matches torch cross_entropy + focal modulation).
    x = logits.astype(jnp.float32)
    lse = jax.nn.logsumexp(x, axis=-1)
    tgt = jnp.take_along_axis(x, targets[:, None].astype(jnp.int32), axis=-1)[:, 0]
    ce = lse - tgt
    pt = jnp.exp(-ce)
    return jnp.mean(alpha * (1.0 - pt) ** gamma * ce)


if __name__ == "__main__":
    key = jax.random.PRNGKey(0)
    k1, k2 = jax.random.split(key)

    # 80 classes (RetinaNet); N deliberately not a "nice" multiple.
    N, C = 1000, 80
    logits = jax.random.normal(k1, (N, C), dtype=jnp.float32) * 2.0
    targets = jax.random.randint(k2, (N,), 0, C, dtype=jnp.int32)

    ref = _focal_loss_ref(logits, targets)

    # Default path: single block, no tail mask, single shard (on 1-TC chips).
    loss = focal_loss(logits, targets)
    jax.block_until_ready(loss)
    assert jnp.allclose(loss, ref, rtol=1e-4, atol=1e-6), (loss, ref)

    # Exercise the gated tail-mask path.
    loss_tail = focal_loss(logits, targets, block_rows=256)
    jax.block_until_ready(loss_tail)
    assert jnp.allclose(loss_tail, ref, rtol=1e-4, atol=1e-6), (loss_tail, ref)

    # Exercise the shard axis + clamped/guarded shard-padding step + tail mask.
    loss_shard = focal_loss(logits, targets, block_rows=384, num_shards=2)
    jax.block_until_ready(loss_shard)
    assert jnp.allclose(loss_shard, ref, rtol=1e-4, atol=1e-6), (loss_shard, ref)

    print("KERNEL_OK")
</pallas_src>

<mosaic_0001>
module attributes {stable_mosaic.version = 11 : i64} {
  func.func @_focal_loss_kernel(%arg0: i32, %arg1: i32, %arg2: memref<1000x80xf32, #tpu.memory_space<vmem>>, %arg3: memref<1000x1xi32, #tpu.memory_space<vmem>>, %arg4: memref<1x1x1xf32, #tpu.memory_space<vmem>>) attributes {dimension_semantics = [#tpu.dimension_semantics<parallel>, #tpu.dimension_semantics<arbitrary>], iteration_bounds = array<i64: 1, 1>, scalar_prefetch = 0 : i64, scratch_operands = 0 : i64, tpu.core_type = #tpu.core_type<tc>, window_params = [{transform_indices = @transform_0, window_bounds = array<i64: 1000, 80>}, {transform_indices = @transform_1, window_bounds = array<i64: 1000, 1>}, {transform_indices = @transform_2, window_bounds = array<i64: 1, 1, 1>}]} {
    %c0_i32 = arith.constant 0 : i32
    %0 = arith.cmpi eq, %arg1, %c0_i32 : i32
    %1 = arith.extui %0 : i1 to i32
    %c0_i32_0 = arith.constant 0 : i32
    %2 = arith.cmpi ne, %1, %c0_i32_0 : i32
    scf.if %2 {
      %cst_16 = arith.constant 0.000000e+00 : f32
      %41 = vector.broadcast %cst_16 : f32 to vector<1x1xf32>
      %c0_17 = arith.constant 0 : index
      %c0_18 = arith.constant 0 : index
      %c0_19 = arith.constant 0 : index
      %42 = vector.load %arg4[%c0_17, %c0_18, %c0_19] : memref<1x1x1xf32, #tpu.memory_space<vmem>>, vector<1x1x1xf32>
      %43 = vector.shape_cast %42 : vector<1x1x1xf32> to vector<1x1xf32>
      %44 = vector.shape_cast %41 : vector<1x1xf32> to vector<1x1x1xf32>
      tpu.vector_store %arg4[%c0_17, %c0_18, %c0_19], %44 {strides = array<i32>} : memref<1x1x1xf32, #tpu.memory_space<vmem>>, vector<1x1x1xf32>,
    } else {
    }
    %c0 = arith.constant 0 : index
    %c0_1 = arith.constant 0 : index
    %3 = vector.load %arg2[%c0, %c0_1] : memref<1000x80xf32, #tpu.memory_space<vmem>>, vector<1000x80xf32>
    %c0_2 = arith.constant 0 : index
    %c0_3 = arith.constant 0 : index
    %4 = vector.load %arg3[%c0_2, %c0_3] : memref<1000x1xi32, #tpu.memory_space<vmem>>, vector<1000x1xi32>
    %cst = arith.constant dense<0xFF800000> : vector<1000xf32>
    %5 = vector.multi_reduction <maximumf>, %3, %cst [1] : vector<1000x80xf32> to vector<1000xf32>
    %6 = vector.shape_cast %5 : vector<1000xf32> to vector<1000x1xf32>
    %7 = vector.broadcast %6 : vector<1000x1xf32> to vector<1000x80xf32>
    %8 = arith.subf %3, %7 : vector<1000x80xf32>
    %9 = math.exp %8 : vector<1000x80xf32>
    %cst_4 = arith.constant dense<0.000000e+00> : vector<1000xf32>
    %10 = vector.multi_reduction <add>, %9, %cst_4 [1] : vector<1000x80xf32> to vector<1000xf32>
    %11 = vector.shape_cast %10 : vector<1000xf32> to vector<1000x1xf32>
    %12 = math.log %11 : vector<1000x1xf32>
    %13 = arith.addf %6, %12 : vector<1000x1xf32>
    %14 = tpu.iota {dimensions = array<i32: 1>} : vector<1x80xi32>
    %15 = vector.broadcast %14 : vector<1x80xi32> to vector<1000x80xi32>
    %16 = vector.broadcast %4 : vector<1000x1xi32> to vector<1000x80xi32>
    %17 = arith.cmpi eq, %15, %16 : vector<1000x80xi32>
    %cst_5 = arith.constant 0.000000e+00 : f32
    %18 = vector.broadcast %cst_5 : f32 to vector<1000x80xf32>
    %19 = arith.select %17, %3, %18 : vector<1000x80xi1>, vector<1000x80xf32>
    %cst_6 = arith.constant dense<0.000000e+00> : vector<1000xf32>
    %20 = vector.multi_reduction <add>, %19, %cst_6 [1] : vector<1000x80xf32> to vector<1000xf32>
    %21 = vector.shape_cast %20 : vector<1000xf32> to vector<1000x1xf32>
    %22 = arith.subf %13, %21 : vector<1000x1xf32>
    %cst_7 = arith.constant 0.000000e+00 : f32
    %23 = vector.broadcast %cst_7 : f32 to vector<1000x1xf32>
    %24 = arith.subf %23, %22 : vector<1000x1xf32>
    %25 = math.exp %24 : vector<1000x1xf32>
    %cst_8 = arith.constant 1.000000e+00 : f32
    %26 = vector.broadcast %cst_8 : f32 to vector<1000x1xf32>
    %27 = arith.subf %26, %25 : vector<1000x1xf32>
    %28 = arith.mulf %27, %27 : vector<1000x1xf32>
    %29 = arith.mulf %28, %22 : vector<1000x1xf32>
    %c0_9 = arith.constant 0 : index
    %c0_10 = arith.constant 0 : index
    %c0_11 = arith.constant 0 : index
    %30 = vector.load %arg4[%c0_9, %c0_10, %c0_11] : memref<1x1x1xf32, #tpu.memory_space<vmem>>, vector<1x1x1xf32>
    %31 = vector.shape_cast %30 : vector<1x1x1xf32> to vector<1x1xf32>
    %32 = vector.shape_cast %29 : vector<1000x1xf32> to vector<1x1000x1xf32>
    %cst_12 = arith.constant dense<0.000000e+00> : vector<1xf32>
    %33 = vector.multi_reduction <add>, %32, %cst_12 [1, 2] : vector<1x1000x1xf32> to vector<1xf32>
    %34 = vector.shape_cast %33 : vector<1xf32> to vector<1x1x1xf32>
    %35 = vector.extract %34[0, 0, 0] : f32 from vector<1x1x1xf32>
    %36 = vector.broadcast %35 : f32 to vector<1x1xf32>
    %37 = arith.addf %31, %36 : vector<1x1xf32>
    %c0_13 = arith.constant 0 : index
    %c0_14 = arith.constant 0 : index
    %c0_15 = arith.constant 0 : index
    %38 = vector.load %arg4[%c0_13, %c0_14, %c0_15] : memref<1x1x1xf32, #tpu.memory_space<vmem>>, vector<1x1x1xf32>
    %39 = vector.shape_cast %38 : vector<1x1x1xf32> to vector<1x1xf32>
    %40 = vector.shape_cast %37 : vector<1x1xf32> to vector<1x1x1xf32>
    tpu.vector_store %arg4[%c0_13, %c0_14, %c0_15], %40 {strides = array<i32>} : memref<1x1x1xf32, #tpu.memory_space<vmem>>, vector<1x1x1xf32>,
    return
  }
  func.func @transform_0(%arg0: i32, %arg1: i32) -> (i32, i32) {
    %c1_i32 = arith.constant 1 : i32
    %0 = arith.muli %arg0, %c1_i32 : i32
    %1 = arith.addi %0, %arg1 : i32
    %c0_i32 = arith.constant 0 : i32
    %c0_i32_0 = arith.constant 0 : i32
    return %1, %c0_i32 : i32, i32
  }
  func.func @transform_1(%arg0: i32, %arg1: i32) -> (i32, i32) {
    %c1_i32 = arith.constant 1 : i32
    %0 = arith.muli %arg0, %c1_i32 : i32
    %1 = arith.addi %0, %arg1 : i32
    %c0_i32 = arith.constant 0 : i32
    %c0_i32_0 = arith.constant 0 : i32
    return %1, %c0_i32 : i32, i32
  }
  func.func @transform_2(%arg0: i32, %arg1: i32) -> (i32, i32, i32) {
    %c0_i32 = arith.constant 0 : i32
    %c0_i32_0 = arith.constant 0 : i32
    %c0_i32_1 = arith.constant 0 : i32
    return %arg0, %c0_i32, %c0_i32_0 : i32, i32, i32
  }
}

</mosaic_0001>

<bundles_post_ra>
// kernel: tpu_custom_call.1
= control target key start
LH: loop header
LB: loop body
LE: loop exit
PB: predicated region body
PF: predicated region fallthrough
CT: control target
= control target key end

     0   :  { %vm312_vm0 = vcmask 654336   ;;  %s9207_s0 = inlined_call_operand.vmem [shape: f32[1000,80], index: 0, kind: input, shape index: {}]   ;;  %s9208_s1 = inlined_call_operand.vmem [shape: s32[1000,1], index: 1, kind: input, shape index: {}]   ;;  %s9209_s2 = inlined_call_operand.hbm [shape: f32[1,1,1], index: 2, kind: output, shape index: {}]  }
   0x1   :  { %v5001_v0 = vld [vmem:[%s9207_s0 + $0x10] sm:$0xff]  ;;  %v5006_v1 = vld [vmem:[%s9207_s0] sm:$0xff]  ;;  %v5011_v2 = vld [vmem:[%s9207_s0 + $0x18] sm:$0xff] }
   0x2   :  { %v319_v3 = vsel %vm312_vm0, %v5001_v0, -inf  ;;  %v313_v4 = vsel %vm312_vm0, %v5006_v1, -inf  ;;  %v5020_v5 = vld [vmem:[%s9207_s0 + $0x8] sm:$0xff]  ;;  %v322_v6 = vsel %vm312_vm0, %v5011_v2, -inf  ;;  %v5034_v9 = vld [vmem:[%s9207_s0 + $0x20] sm:$0xff]  ;;  %v5043_v12 = vld [vmem:[%s9207_s0 + $0x38] sm:$0xff] }
   0x3   :  { %320 = vmax.xlane.f32.xlu1 %v319_v3  ;;  %314 = vmax.xlane.f32.xlu0 %v313_v4  ;;  %v316_v7 = vsel %vm312_vm0, %v5020_v5, -inf  ;;  %v5029_v8 = vld [vmem:[%s9207_s0 + $0x28] sm:$0xff]  ;;  %v325_v11 = vsel %vm312_vm0, %v5034_v9, -inf  ;;  %v5048_v13 = vld [vmem:[%s9207_s0 + $0x30] sm:$0xff]  ;;  %v334_v14 = vsel %vm312_vm0, %v5043_v12, -inf  ;;  %v5062_v17 = vld [vmem:[%s9207_s0 + $0x40] sm:$0xff] }
   0x4   :  { %v328_v10 = vsel %vm312_vm0, %v5029_v8, -inf  ;;  %v331_v15 = vsel %vm312_vm0, %v5048_v13, -inf  ;;  %v5057_v16 = vld [vmem:[%s9207_s0 + $0x48] sm:$0xff]  ;;  %v337_v19 = vsel %vm312_vm0, %v5062_v17, -inf  ;;  %v5071_v20 = vld [vmem:[%s9207_s0 + $0x58] sm:$0xff]  ;;  %v5076_v21 = vld [vmem:[%s9207_s0 + $0x50] sm:$0xff] }
   0x5   :  { %v340_v18 = vsel %vm312_vm0, %v5057_v16, -inf  ;;  %v346_v22 = vsel %vm312_vm0, %v5071_v20, -inf  ;;  %v343_v23 = vsel %vm312_vm0, %v5076_v21, -inf  ;;  %v5085_v24 = vld [vmem:[%s9207_s0 + $0x68] sm:$0xff]  ;;  %v5090_v25 = vld [vmem:[%s9207_s0 + $0x60] sm:$0xff]  ;;  %v5099_v28 = vld [vmem:[%s9207_s0 + $0x78] sm:$0xff] }
   0x6   :  { %v352_v26 = vsel %vm312_vm0, %v5085_v24, -inf  ;;  %v349_v27 = vsel %vm312_vm0, %v5090_v25, -inf  ;;  %v5104_v29 = vld [vmem:[%s9207_s0 + $0x70] sm:$0xff] }
   0x7   :  { %323 = vmax.xlane.f32.xlu1 %v322_v6  ;;  %317 = vmax.xlane.f32.xlu0 %v316_v7 }
   0xb   :  { %329 = vmax.xlane.f32.xlu1 %v328_v10  ;;  %326 = vmax.xlane.f32.xlu0 %v325_v11 }
   0xf   :  { %335 = vmax.xlane.f32.xlu1 %v334_v14  ;;  %332 = vmax.xlane.f32.xlu0 %v331_v15 }
  0x13   :  { %341 = vmax.xlane.f32.xlu1 %v340_v18  ;;  %338 = vmax.xlane.f32.xlu0 %v337_v19 }
  0x17   :  { %347 = vmax.xlane.f32.xlu1 %v346_v22  ;;  %344 = vmax.xlane.f32.xlu0 %v343_v23 }
  0x1b   :  { %353 = vmax.xlane.f32.xlu1 %v352_v26  ;;  %350 = vmax.xlane.f32.xlu0 %v349_v27 }
  0x1c   :  { %7 = vsyncpa [#allocation3], 0  ;;  %v358_v30 = vsel %vm312_vm0, %v5099_v28, -inf  ;;  %v355_v31 = vsel %vm312_vm0, %v5104_v29, -inf  ;;  %v5113_v32 = vld [vmem:[%s9207_s0 + $0x88] sm:$0xff]  ;;  %v5118_v33 = vld [vmem:[%s9207_s0 + $0x80] sm:$0xff] }
  0x1d   :  { %v364_v34 = vsel %vm312_vm0, %v5113_v32, -inf  ;;  %v361_v35 = vsel %vm312_vm0, %v5118_v33, -inf  ;;  %v5127_v36 = vld [vmem:[%s9207_s0 + $0x98] sm:$0xff]  ;;  %v5132_v37 = vld [vmem:[%s9207_s0 + $0x90] sm:$0xff]  ;;  %v5141_v40 = vld [vmem:[%s9207_s0 + $0xa8] sm:$0xff] }
  0x1e   :  { %v370_v38 = vsel %vm312_vm0, %v5127_v36, -inf  ;;  %v367_v39 = vsel %vm312_vm0, %v5132_v37, -inf  ;;  %v5146_v41 = vld [vmem:[%s9207_s0 + $0xa0] sm:$0xff]  ;;  %v376_v42 = vsel %vm312_vm0, %v5141_v40, -inf  ;;  %v5155_v44 = vld [vmem:[%s9207_s0 + $0xb8] sm:$0xff]  ;;  %v5160_v45 = vld [vmem:[%s9207_s0 + $0xb0] sm:$0xff] }
  0x1f   :  { %359 = vmax.xlane.f32.xlu1 %v358_v30  ;;  %356 = vmax.xlane.f32.xlu0 %v355_v31  ;;  %v373_v43 = vsel %vm312_vm0, %v5146_v41, -inf  ;;  %v382_v46 = vsel %vm312_vm0, %v5155_v44, -inf  ;;  %v379_v47 = vsel %vm312_vm0, %v5160_v45, -inf  ;;  %v5169_v48 = vld [vmem:[%s9207_s0 + $0xc8] sm:$0xff]  ;;  %v5174_v49 = vld [vmem:[%s9207_s0 + $0xc0] sm:$0xff]  ;;  %v5183_v52 = vld [vmem:[%s9207_s0 + $0xd8] sm:$0xff] }
  0x20   :  { %v388_v50 = vsel %vm312_vm0, %v5169_v48, -inf  ;;  %v385_v51 = vsel %vm312_vm0, %v5174_v49, -inf  ;;  %9335 = vst [vmem:[#allocation5_spill] sm:$0xff] %v5183_v52  ;;  %v5188_v53 = vld [vmem:[%s9207_s0 + $0xd0] sm:$0xff]  ;;  %v394_v54 = vsel %vm312_vm0, %v5183_v52, -inf  ;;  %v5197_v56 = vld [vmem:[%s9207_s0 + $0xe8] sm:$0xff] }
  0x21   :  { %v391_v55 = vsel %vm312_vm0, %v5188_v53, -inf  ;;  %9336 = vst [vmem:[#allocation6_spill] sm:$0xff] %v5197_v56  ;;  %v5202_v57 = vld [vmem:[%s9207_s0 + $0xe0] sm:$0xff]  ;;  %v400_v58 = vsel %vm312_vm0, %v5197_v56, -inf  ;;  %v93_v60 = vld [vmem:[%s9207_s0 + $0xf8] sm:$0xff]  ;;  %v5214_v61 = vld [vmem:[%s9207_s0 + $0xf0] sm:$0xff] }
  0x22   :  { %9337 = vst [vmem:[#allocation7_spill] sm:$0xff] %v5202_v57  ;;  %v397_v59 = vsel %vm312_vm0, %v5202_v57, -inf  ;;  %9338 = vst [vmem:[#allocation8_spill] sm:$0xff] %v5214_v61  ;;  %v406_v62 = vsel %vm312_vm0, %v93_v60, -inf  ;;  %v403_v63 = vsel %vm312_vm0, %v5214_v61, -inf  ;;  %v95_v3 = vld [vmem:[%s9207_s0 + $0x108] sm:$0xff] }
  0x23   :  { %365 = vmax.xlane.f32.xlu1 %v364_v34  ;;  %362 = vmax.xlane.f32.xlu0 %v361_v35  ;;  %v94_v4 = vld [vmem:[%s9207_s0 + $0x100] sm:$0xff]  ;;  %v412_v6 = vsel %vm312_vm0, %v95_v3, -inf  ;;  %v97_v10 = vld [vmem:[%s9207_s0 + $0x118] sm:$0xff]  ;;  %v96_v11 = vld [vmem:[%s9207_s0 + $0x110] sm:$0xff] }
  0x24   :  { %v409_v7 = vsel %vm312_vm0, %v94_v4, -inf  ;;  %v418_v14 = vsel %vm312_vm0, %v97_v10, -inf  ;;  %v415_v15 = vsel %vm312_vm0, %v96_v11, -inf  ;;  %v99_v18 = vld [vmem:[%s9207_s0 + $0x128] sm:$0xff]  ;;  %v98_v19 = vld [vmem:[%s9207_s0 + $0x120] sm:$0xff]  ;;  %v101_v26 = vld [vmem:[%s9207_s0 + $0x138] sm:$0xff] }
  0x25   :  { %v424_v22 = vsel %vm312_vm0, %v99_v18, -inf  ;;  %v421_v23 = vsel %vm312_vm0, %v98_v19, -inf  ;;  %v100_v27 = vld [vmem:[%s9207_s0 + $0x130] sm:$0xff]  ;;  %v430_v30 = vsel %vm312_vm0, %v101_v26, -inf  ;;  %v103_v34 = vld [vmem:[%s9207_s0 + $0x148] sm:$0xff]  ;;  %v102_v35 = vld [vmem:[%s9207_s0 + $0x140] sm:$0xff] }
  0x26   :  { %v427_v31 = vsel %vm312_vm0, %v100_v27, -inf  ;;  %v110_v3 = vld [vmem:[%s9207_s0 + $0x180] sm:$0xff]  ;;  %v112_v10 = vld [vmem:[%s9207_s0 + $0x190] sm:$0xff] }
  0x27   :  { %371 = vmax.xlane.f32.xlu1 %v370_v38  ;;  %368 = vmax.xlane.f32.xlu0 %v367_v39  ;;  %v436_v38 = vsel %vm312_vm0, %v103_v34, -inf  ;;  %v433_v39 = vsel %vm312_vm0, %v102_v35, -inf  ;;  %v114_v18 = vld [vmem:[%s9207_s0 + $0x1a0] sm:$0xff]  ;;  %v116_v26 = vld [vmem:[%s9207_s0 + $0x1b0] sm:$0xff] }
  0x28   :  { %v118_v34 = vld [vmem:[%s9207_s0 + $0x1c0] sm:$0xff]  ;;  %v160_v61 = vld [vmem:[%s9207_s0 + $0x310] sm:$0xff] }
  0x29   :  { %v162_v57 = vld [vmem:[%s9207_s0 + $0x320] sm:$0xff] }
  0x2b   :  { %377 = vmax.xlane.f32.xlu1 %v376_v42  ;;  %374 = vmax.xlane.f32.xlu0 %v373_v43  ;;  %v105_v42 = vld [vmem:[%s9207_s0 + $0x158] sm:$0xff]  ;;  %v104_v43 = vld [vmem:[%s9207_s0 + $0x150] sm:$0xff] }
  0x2f   :  { %383 = vmax.xlane.f32.xlu1 %v382_v46  ;;  %380 = vmax.xlane.f32.xlu0 %v379_v47  ;;  %v442_v46 = vsel %vm312_vm0, %v105_v42, -inf  ;;  %v439_v47 = vsel %vm312_vm0, %v104_v43, -inf  ;;  %v120_v42 = vld [vmem:[%s9207_s0 + $0x1d0] sm:$0xff] }
  0x33   :  { %389 = vmax.xlane.f32.xlu1 %v388_v50  ;;  %386 = vmax.xlane.f32.xlu0 %v385_v51  ;;  %v107_v50 = vld [vmem:[%s9207_s0 + $0x168] sm:$0xff]  ;;  %v106_v51 = vld [vmem:[%s9207_s0 + $0x160] sm:$0xff] }
  0x37   :  { %395 = vmax.xlane.f32.xlu1 %v394_v54  ;;  %392 = vmax.xlane.f32.xlu0 %v391_v55  ;;  %v448_v54 = vsel %vm312_vm0, %v107_v50, -inf  ;;  %v445_v55 = vsel %vm312_vm0, %v106_v51, -inf  ;;  %v122_v50 = vld [vmem:[%s9207_s0 + $0x1e0] sm:$0xff] }
  0x3b   :  { %401 = vmax.xlane.f32.xlu1 %v400_v58  ;;  %398 = vmax.xlane.f32.xlu0 %v397_v59  ;;  %v109_v58 = vld [vmem:[%s9207_s0 + $0x178] sm:$0xff]  ;;  %v108_v59 = vld [vmem:[%s9207_s0 + $0x170] sm:$0xff] }
  0x3c   :  { %v454_v60 = vsel %vm312_vm0, %v109_v58, -inf  ;;  %v124_v58 = vld [vmem:[%s9207_s0 + $0x1f0] sm:$0xff] }
  0x3f   :  { %407 = vmax.xlane.f32.xlu1 %v406_v62  ;;  %404 = vmax.xlane.f32.xlu0 %v403_v63  ;;  %v451_v62 = vsel %vm312_vm0, %v108_v59, -inf  ;;  %v111_v63 = vld [vmem:[%s9207_s0 + $0x188] sm:$0xff] }
  0x40   :  { %v460_v4 = vsel %vm312_vm0, %v111_v63, -inf  ;;  %v126_v63 = vld [vmem:[%s9207_s0 + $0x200] sm:$0xff] }
  0x43   :  { %413 = vmax.xlane.f32.xlu1 %v412_v6  ;;  %410 = vmax.xlane.f32.xlu0 %v409_v7  ;;  %v457_v6 = vsel %vm312_vm0, %v110_v3, -inf  ;;  %v113_v7 = vld [vmem:[%s9207_s0 + $0x198] sm:$0xff] }
  0x44   :  { %v466_v11 = vsel %vm312_vm0, %v113_v7, -inf  ;;  %v128_v7 = vld [vmem:[%s9207_s0 + $0x210] sm:$0xff] }
  0x47   :  { %419 = vmax.xlane.f32.xlu1 %v418_v14  ;;  %416 = vmax.xlane.f32.xlu0 %v415_v15  ;;  %v463_v14 = vsel %vm312_vm0, %v112_v10, -inf  ;;  %v115_v15 = vld [vmem:[%s9207_s0 + $0x1a8] sm:$0xff] }
  0x48   :  { %v472_v19 = vsel %vm312_vm0, %v115_v15, -inf  ;;  %v130_v15 = vld [vmem:[%s9207_s0 + $0x220] sm:$0xff] }
  0x4b   :  { %425 = vmax.xlane.f32.xlu1 %v424_v22  ;;  %422 = vmax.xlane.f32.xlu0 %v421_v23  ;;  %v469_v22 = vsel %vm312_vm0, %v114_v18, -inf  ;;  %v117_v23 = vld [vmem:[%s9207_s0 + $0x1b8] sm:$0xff] }
  0x4c   :  { %v478_v27 = vsel %vm312_vm0, %v117_v23, -inf  ;;  %v132_v23 = vld [vmem:[%s9207_s0 + $0x230] sm:$0xff] }
  0x4f   :  { %431 = vmax.xlane.f32.xlu1 %v430_v30  ;;  %428 = vmax.xlane.f32.xlu0 %v427_v31  ;;  %v475_v30 = vsel %vm312_vm0, %v116_v26, -inf  ;;  %v119_v31 = vld [vmem:[%s9207_s0 + $0x1c8] sm:$0xff] }
  0x50   :  { %v484_v35 = vsel %vm312_vm0, %v119_v31, -inf  ;;  %v134_v31 = vld [vmem:[%s9207_s0 + $0x240] sm:$0xff] }
  0x53   :  { %437 = vmax.xlane.f32.xlu1 %v436_v38  ;;  %434 = vmax.xlane.f32.xlu0 %v433_v39  ;;  %v481_v38 = vsel %vm312_vm0, %v118_v34, -inf  ;;  %v121_v39 = vld [vmem:[%s9207_s0 + $0x1d8] sm:$0xff] }
  0x54   :  { %v490_v43 = vsel %vm312_vm0, %v121_v39, -inf  ;;  %v529_v39 = vsel %vm312_vm0, %v134_v31, -inf }
  0x57   :  { %443 = vmax.xlane.f32.xlu1 %v442_v46  ;;  %440 = vmax.xlane.f32.xlu0 %v439_v47  ;;  %v487_v46 = vsel %vm312_vm0, %v120_v42, -inf  ;;  %v123_v47 = vld [vmem:[%s9207_s0 + $0x1e8] sm:$0xff]  ;;  %v137_v42 = vld [vmem:[%s9207_s0 + $0x258] sm:$0xff] }
  0x58   :  { %v496_v51 = vsel %vm312_vm0, %v123_v47, -inf }
  0x5b   :  { %449 = vmax.xlane.f32.xlu1 %v448_v54  ;;  %446 = vmax.xlane.f32.xlu0 %v445_v55  ;;  %v493_v54 = vsel %vm312_vm0, %v122_v50, -inf  ;;  %v125_v55 = vld [vmem:[%s9207_s0 + $0x1f8] sm:$0xff]  ;;  %v538_v50 = vsel %vm312_vm0, %v137_v42, -inf  ;;  %v146_v42 = vld [vmem:[%s9207_s0 + $0x2a0] sm:$0xff] }
  0x5c   :  { %v502_v59 = vsel %vm312_vm0, %v125_v55, -inf  ;;  %v138_v55 = vld [vmem:[%s9207_s0 + $0x260] sm:$0xff] }
  0x5f   :  { %455 = vmax.xlane.f32.xlu1 %v454_v60  ;;  %452 = vmax.xlane.f32.xlu0 %v451_v62  ;;  %v499_v60 = vsel %vm312_vm0, %v124_v58, -inf  ;;  %v127_v62 = vld [vmem:[%s9207_s0 + $0x208] sm:$0xff] }
  0x60   :  { %v508_v3 = vsel %vm312_vm0, %v127_v62, -inf  ;;  %v541_v62 = vsel %vm312_vm0, %v138_v55, -inf  ;;  %v149_v55 = vld [vmem:[%s9207_s0 + $0x2b8] sm:$0xff] }
  0x63   :  { %461 = vmax.xlane.f32.xlu1 %v460_v4  ;;  %458 = vmax.xlane.f32.xlu0 %v457_v6  ;;  %v505_v4 = vsel %vm312_vm0, %v126_v63, -inf  ;;  %v129_v6 = vld [vmem:[%s9207_s0 + $0x218] sm:$0xff] }
  0x64   :  { %v514_v10 = vsel %vm312_vm0, %v129_v6, -inf  ;;  %v141_v63 = vld [vmem:[%s9207_s0 + $0x278] sm:$0xff] }
  0x67   :  { %467 = vmax.xlane.f32.xlu1 %v466_v11  ;;  %464 = vmax.xlane.f32.xlu0 %v463_v14  ;;  %v511_v11 = vsel %vm312_vm0, %v128_v7, -inf  ;;  %v131_v14 = vld [vmem:[%s9207_s0 + $0x228] sm:$0xff]  ;;  %v550_v7 = vsel %vm312_vm0, %v141_v63, -inf }
  0x68   :  { %v520_v18 = vsel %vm312_vm0, %v131_v14, -inf  ;;  %v142_v14 = vld [vmem:[%s9207_s0 + $0x280] sm:$0xff] }
  0x6b   :  { %473 = vmax.xlane.f32.xlu1 %v472_v19  ;;  %470 = vmax.xlane.f32.xlu0 %v469_v22  ;;  %v517_v19 = vsel %vm312_vm0, %v130_v15, -inf  ;;  %v133_v22 = vld [vmem:[%s9207_s0 + $0x238] sm:$0xff] }
  0x6c   :  { %v526_v26 = vsel %vm312_vm0, %v133_v22, -inf  ;;  %v553_v22 = vsel %vm312_vm0, %v142_v14, -inf }
  0x6f   :  { %479 = vmax.xlane.f32.xlu1 %v478_v27  ;;  %476 = vmax.xlane.f32.xlu0 %v475_v30  ;;  %v523_v27 = vsel %vm312_vm0, %v132_v23, -inf  ;;  %v135_v30 = vld [vmem:[%s9207_s0 + $0x248] sm:$0xff]  ;;  %v145_v23 = vld [vmem:[%s9207_s0 + $0x298] sm:$0xff] }
  0x70   :  { %v562_v31 = vsel %vm312_vm0, %v145_v23, -inf }
  0x73   :  { %485 = vmax.xlane.f32.xlu1 %v484_v35  ;;  %482 = vmax.xlane.f32.xlu0 %v481_v38  ;;  %v532_v38 = vsel %vm312_vm0, %v135_v30, -inf }
  0x77   :  { %491 = vmax.xlane.f32.xlu1 %v490_v43  ;;  %488 = vmax.xlane.f32.xlu0 %v487_v46  ;;  %v136_v43 = vld [vmem:[%s9207_s0 + $0x250] sm:$0xff] }
  0x7b   :  { %497 = vmax.xlane.f32.xlu1 %v496_v51  ;;  %494 = vmax.xlane.f32.xlu0 %v493_v54  ;;  %v535_v51 = vsel %vm312_vm0, %v136_v43, -inf  ;;  %v139_v54 = vld [vmem:[%s9207_s0 + $0x268] sm:$0xff] }
  0x7f   :  { %503 = vmax.xlane.f32.xlu1 %v502_v59  ;;  %500 = vmax.xlane.f32.xlu0 %v499_v60  ;;  %v544_v60 = vsel %vm312_vm0, %v139_v54, -inf  ;;  %v565_v54 = vsel %vm312_vm0, %v146_v42, -inf }
  0x83   :  { %509 = vmax.xlane.f32.xlu1 %v508_v3  ;;  %506 = vmax.xlane.f32.xlu0 %v505_v4  ;;  %v140_v3 = vld [vmem:[%s9207_s0 + $0x270] sm:$0xff] }
  0x87   :  { %515 = vmax.xlane.f32.xlu1 %v514_v10  ;;  %512 = vmax.xlane.f32.xlu0 %v511_v11  ;;  %v547_v10 = vsel %vm312_vm0, %v140_v3, -inf  ;;  %v143_v11 = vld [vmem:[%s9207_s0 + $0x288] sm:$0xff]  ;;  %v574_v3 = vsel %vm312_vm0, %v149_v55, -inf  ;;  %v154_v55 = vld [vmem:[%s9207_s0 + $0x2e0] sm:$0xff] }
  0x8b   :  { %521 = vmax.xlane.f32.xlu1 %v520_v18  ;;  %518 = vmax.xlane.f32.xlu0 %v517_v19  ;;  %v556_v19 = vsel %vm312_vm0, %v143_v11, -inf  ;;  %v150_v11 = vld [vmem:[%s9207_s0 + $0x2c0] sm:$0xff] }
  0x8c   :  { %v577_v23 = vsel %vm312_vm0, %v150_v11, -inf  ;;  %v157_v11 = vld [vmem:[%s9207_s0 + $0x2f8] sm:$0xff] }
  0x8f   :  { %527 = vmax.xlane.f32.xlu1 %v526_v26  ;;  %524 = vmax.xlane.f32.xlu0 %v523_v27  ;;  %v144_v26 = vld [vmem:[%s9207_s0 + $0x290] sm:$0xff] }
  0x90   :  { %v5385_v34 = vpop.xlane.xlu1 %320  ;;  %v5387_v35 = vpop.xlane.xlu0 %314 }
  0x91   :  { %9339 = vst [vmem:[#allocation9_spill] sm:$0xff] %v5385_v34  ;;  %9340 = vst [vmem:[#allocation10_spill] sm:$0xff] %v5387_v35 }
  0x93   :  { %533 = vmax.xlane.f32.xlu1 %v532_v38  ;;  %530 = vmax.xlane.f32.xlu0 %v529_v39  ;;  %v559_v38 = vsel %vm312_vm0, %v144_v26, -inf  ;;  %v147_v39 = vld [vmem:[%s9207_s0 + $0x2a8] sm:$0xff]  ;;  %v153_v26 = vld [vmem:[%s9207_s0 + $0x2d8] sm:$0xff] }
  0x94   :  { %v5397_v46 = vpop.xlane.xlu1 %323  ;;  %v5399_v47 = vpop.xlane.xlu0 %317  ;;  %v586_v42 = vsel %vm312_vm0, %v153_v26, -inf }
  0x95   :  { %9341 = vst [vmem:[#allocation11_spill] sm:$0xff] %v5399_v47 }
  0x97   :  { %539 = vmax.xlane.f32.xlu1 %v538_v50  ;;  %536 = vmax.xlane.f32.xlu0 %v535_v51  ;;  %v568_v51 = vsel %vm312_vm0, %v147_v39, -inf }
  0x98   :  { %v5409_v58 = vpop.xlane.xlu1 %329  ;;  %v5411_v59 = vpop.xlane.xlu0 %326 }
  0x9b   :  { %545 = vmax.xlane.f32.xlu1 %v544_v60  ;;  %542 = vmax.xlane.f32.xlu0 %v541_v62  ;;  %v148_v60 = vld [vmem:[%s9207_s0 + $0x2b0] sm:$0xff] }
  0x9c   :  { %v5421_v4 = vpop.xlane.xlu1 %335  ;;  %v5423_v6 = vpop.xlane.xlu0 %332 }
  0x9d   :  { %9342 = vst [vmem:[#allocation12_spill] sm:$0xff] %v5423_v6 }
  0x9f   :  { %551 = vmax.xlane.f32.xlu1 %v550_v7  ;;  %548 = vmax.xlane.f32.xlu0 %v547_v10  ;;  %v571_v7 = vsel %vm312_vm0, %v148_v60, -inf  ;;  %v151_v10 = vld [vmem:[%s9207_s0 + $0x2c8] sm:$0xff] }
  0xa0   :  { %v5433_v15 = vpop.xlane.xlu1 %341  ;;  %v5435_v18 = vpop.xlane.xlu0 %338 }
  0xa1   :  { %9343 = vst [vmem:[#allocation13_spill] sm:$0xff] %v5433_v15  ;;  %9344 = vst [vmem:[#allocation14_spill] sm:$0xff] %v5435_v18 }
  0xa3   :  { %557 = vmax.xlane.f32.xlu1 %v556_v19  ;;  %554 = vmax.xlane.f32.xlu0 %v553_v22  ;;  %v580_v22 = vsel %vm312_vm0, %v151_v10, -inf  ;;  %v589_v10 = vsel %vm312_vm0, %v154_v55, -inf }
  0xa4   :  { %v5445_v27 = vpop.xlane.xlu1 %347  ;;  %v5447_v30 = vpop.xlane.xlu0 %344 }
  0xa5   :  { %9345 = vst [vmem:[#allocation15_spill] sm:$0xff] %v5445_v27  ;;  %9346 = vst [vmem:[#allocation16_spill] sm:$0xff] %v5447_v30 }
  0xa7   :  { %563 = vmax.xlane.f32.xlu1 %v562_v31  ;;  %560 = vmax.xlane.f32.xlu0 %v559_v38  ;;  %v152_v31 = vld [vmem:[%s9207_s0 + $0x2d0] sm:$0xff] }
  0xa8   :  { %v5457_v43 = vpop.xlane.xlu1 %353  ;;  %v5459_v50 = vpop.xlane.xlu0 %350 }
  0xa9   :  { %9347 = vst [vmem:[#allocation17_spill] sm:$0xff] %v5457_v43  ;;  %9348 = vst [vmem:[#allocation18_spill] sm:$0xff] %v5459_v50 }
  0xab   :  { %569 = vmax.xlane.f32.xlu1 %v568_v51  ;;  %566 = vmax.xlane.f32.xlu0 %v565_v54  ;;  %v583_v51 = vsel %vm312_vm0, %v152_v31, -inf  ;;  %v155_v54 = vld [vmem:[%s9207_s0 + $0x2e8] sm:$0xff]  ;;  %v598_v31 = vsel %vm312_vm0, %v157_v11, -inf }
  0xac   :  { %v5469_v62 = vpop.xlane.xlu1 %359  ;;  %v5471_v63 = vpop.xlane.xlu0 %356 }
  0xad   :  { %9349 = vst [vmem:[#allocation19_spill] sm:$0xff] %v5469_v62  ;;  %9350 = vst [vmem:[#allocation20_spill] sm:$0xff] %v5471_v63 }
  0xaf   :  { %575 = vmax.xlane.f32.xlu1 %v574_v3  ;;  %572 = vmax.xlane.f32.xlu0 %v571_v7  ;;  %v592_v7 = vsel %vm312_vm0, %v155_v54, -inf  ;;  %v158_v54 = vld [vmem:[%s9207_s0 + $0x300] sm:$0xff] }
  0xb0   :  { %v5481_v14 = vpop.xlane.xlu1 %365  ;;  %v5483_v19 = vpop.xlane.xlu0 %362  ;;  %v601_v11 = vsel %vm312_vm0, %v158_v54, -inf  ;;  %v163_v54 = vld [vmem:[%s9207_s0 + $0x328] sm:$0xff] }
  0xb1   :  { %9351 = vst [vmem:[#allocation21_spill] sm:$0xff] %v5481_v14  ;;  %9352 = vst [vmem:[#allocation22_spill] sm:$0xff] %v5483_v19  ;;  %v616_v52 = vsel %vm312_vm0, %v163_v54, -inf }
  0xb3   :  { %581 = vmax.xlane.f32.xlu1 %v580_v22  ;;  %578 = vmax.xlane.f32.xlu0 %v577_v23  ;;  %v156_v22 = vld [vmem:[%s9207_s0 + $0x2f0] sm:$0xff] }
  0xb4   :  { %v5493_v38 = vpop.xlane.xlu1 %371  ;;  %v5495_v39 = vpop.xlane.xlu0 %368 }
  0xb5   :  { %9353 = vst [vmem:[#allocation23_spill] sm:$0xff] %v5493_v38  ;;  %9354 = vst [vmem:[#allocation24_spill] sm:$0xff] %v5495_v39 }
  0xb7   :  { %587 = vmax.xlane.f32.xlu1 %v586_v42  ;;  %584 = vmax.xlane.f32.xlu0 %v583_v51  ;;  %v595_v42 = vsel %vm312_vm0, %v156_v22, -inf  ;;  %v159_v51 = vld [vmem:[%s9207_s0 + $0x308] sm:$0xff]  ;;  %v161_v22 = vld [vmem:[%s9207_s0 + $0x318] sm:$0xff] }
  0xb8   :  { %v5505_v60 = vpop.xlane.xlu1 %377  ;;  %v5507_v3 = vpop.xlane.xlu0 %374  ;;  %v610_v56 = vsel %vm312_vm0, %v161_v22, -inf  ;;  %v613_v22 = vsel %vm312_vm0, %v162_v57, -inf  ;;  %v167_v57 = vld [vmem:[%s9207_s0 + $0x348] sm:$0xff] }
  0xb9   :  { %9355 = vst [vmem:[#allocation25_spill] sm:$0xff] %v5505_v60  ;;  %9356 = vst [vmem:[#allocation26_spill] sm:$0xff] %v5507_v3 }
  0xbb   :  { %593 = vmax.xlane.f32.xlu1 %v592_v7  ;;  %590 = vmax.xlane.f32.xlu0 %v589_v10  ;;  %v604_v10 = vsel %vm312_vm0, %v159_v51, -inf  ;;  %v607_v51 = vsel %vm312_vm0, %v160_v61, -inf  ;;  %v165_v61 = vld [vmem:[%s9207_s0 + $0x338] sm:$0xff] }
  0xbc   :  { %v5517_v23 = vpop.xlane.xlu1 %383  ;;  %v5519_v26 = vpop.xlane.xlu0 %380 }
  0xbd   :  { %9357 = vst [vmem:[#allocation27_spill] sm:$0xff] %v5517_v23  ;;  %9358 = vst [vmem:[#allocation28_spill] sm:$0xff] %v5519_v26 }
  0xbf   :  { %599 = vmax.xlane.f32.xlu1 %v598_v31  ;;  %596 = vmax.xlane.f32.xlu0 %v595_v42 }
  0xc0   :  { %v5529_v55 = vpop.xlane.xlu1 %389  ;;  %v5531_v7 = vpop.xlane.xlu0 %386 }
  0xc1   :  { %9359 = vst [vmem:[#allocation29_spill] sm:$0xff] %v5529_v55  ;;  %9360 = vst [vmem:[#allocation30_spill] sm:$0xff] %v5531_v7 }
  0xc3   :  { %605 = vmax.xlane.f32.xlu1 %v604_v10  ;;  %602 = vmax.xlane.f32.xlu0 %v601_v11 }
  0xc4   :  { %v5541_v31 = vpop.xlane.xlu1 %395  ;;  %v5543_v42 = vpop.xlane.xlu0 %392 }
  0xc5   :  { %9361 = vst [vmem:[#allocation31_spill] sm:$0xff] %v5541_v31  ;;  %9362 = vst [vmem:[#allocation32_spill] sm:$0xff] %v5543_v42  ;;  %v164_v31 = vld [vmem:[%s9207_s0 + $0x330] sm:$0xff] }
  0xc6   :  { %v619_v54 = vsel %vm312_vm0, %v164_v31, -inf  ;;  %v169_v31 = vld [vmem:[%s9207_s0 + $0x358] sm:$0xff] }
  0xc7   :  { %611 = vmax.xlane.f32.xlu1 %v610_v56  ;;  %608 = vmax.xlane.f32.xlu0 %v607_v51 }
  0xc8   :  { %v5553_v10 = vpop.xlane.xlu1 %401  ;;  %v5555_v11 = vpop.xlane.xlu0 %398 }
  0xc9   :  { %9363 = vst [vmem:[#allocation33_spill] sm:$0xff] %v5553_v10  ;;  %9364 = vst [vmem:[#allocation34_spill] sm:$0xff] %v5555_v11  ;;  %v622_v10 = vsel %vm312_vm0, %v165_v61, -inf  ;;  %v166_v11 = vld [vmem:[%s9207_s0 + $0x340] sm:$0xff] }
  0xca   :  { %v625_v61 = vsel %vm312_vm0, %v166_v11, -inf  ;;  %v171_v11 = vld [vmem:[%s9207_s0 + $0x368] sm:$0xff] }
  0xcb   :  { %617 = vmax.xlane.f32.xlu1 %v616_v52  ;;  %614 = vmax.xlane.f32.xlu0 %v613_v22 }
  0xcc   :  { %v5565_v56 = vpop.xlane.xlu1 %407  ;;  %v5567_v51 = vpop.xlane.xlu0 %404 }
  0xcd   :  { %9365 = vst [vmem:[#allocation35_spill] sm:$0xff] %v5565_v56  ;;  %9366 = vst [vmem:[#allocation36_spill] sm:$0xff] %v5567_v51  ;;  %v628_v56 = vsel %vm312_vm0, %v167_v57, -inf  ;;  %v168_v51 = vld [vmem:[%s9207_s0 + $0x350] sm:$0xff] }
  0xce   :  { %v631_v57 = vsel %vm312_vm0, %v168_v51, -inf  ;;  %v173_v51 = vld [vmem:[%s9207_s0 + $0x378] sm:$0xff] }
  0xcf   :  { %623 = vmax.xlane.f32.xlu1 %v622_v10  ;;  %620 = vmax.xlane.f32.xlu0 %v619_v54 }
  0xd0   :  { %v5577_v52 = vpop.xlane.xlu1 %413  ;;  %v5579_v22 = vpop.xlane.xlu0 %410 }
  0xd1   :  { %9367 = vst [vmem:[#allocation37_spill] sm:$0xff] %v5577_v52  ;;  %9368 = vst [vmem:[#allocation38_spill] sm:$0xff] %v5579_v22  ;;  %v634_v52 = vsel %vm312_vm0, %v169_v31, -inf  ;;  %v170_v22 = vld [vmem:[%s9207_s0 + $0x360] sm:$0xff] }
  0xd2   :  { %v637_v31 = vsel %vm312_vm0, %v170_v22, -inf  ;;  %v175_v22 = vld [vmem:[%s9207_s0 + $0x388] sm:$0xff] }
  0xd3   :  { %629 = vmax.xlane.f32.xlu1 %v628_v56  ;;  %626 = vmax.xlane.f32.xlu0 %v625_v61 }
  0xd4   :  { %v5589_v10 = vpop.xlane.xlu1 %419  ;;  %v5591_v54 = vpop.xlane.xlu0 %416 }
  0xd5   :  { %9369 = vst [vmem:[#allocation39_spill] sm:$0xff] %v5589_v10  ;;  %9370 = vst [vmem:[#allocation40_spill] sm:$0xff] %v5591_v54  ;;  %v640_v10 = vsel %vm312_vm0, %v171_v11, -inf  ;;  %v172_v54 = vld [vmem:[%s9207_s0 + $0x370] sm:$0xff] }
  0xd6   :  { %v643_v11 = vsel %vm312_vm0, %v172_v54, -inf  ;;  %v177_v54 = vld [vmem:[%s9207_s0 + $0x398] sm:$0xff] }
  0xd7   :  { %635 = vmax.xlane.f32.xlu1 %v634_v52  ;;  %632 = vmax.xlane.f32.xlu0 %v631_v57 }
  0xd8   :  { %v5601_v56 = vpop.xlane.xlu1 %425  ;;  %v5603_v61 = vpop.xlane.xlu0 %422 }
  0xd9   :  { %9371 = vst [vmem:[#allocation41_spill] sm:$0xff] %v5601_v56  ;;  %9372 = vst [vmem:[#allocation42_spill] sm:$0xff] %v5603_v61  ;;  %v646_v56 = vsel %vm312_vm0, %v173_v51, -inf  ;;  %v174_v61 = vld [vmem:[%s9207_s0 + $0x380] sm:$0xff] }
  0xda   :  { %v649_v51 = vsel %vm312_vm0, %v174_v61, -inf  ;;  %v688_v61 = vsub.f32 %v5006_v1, %v5387_v35 }
  0xdb   :  { %641 = vmax.xlane.f32.xlu1 %v640_v10  ;;  %638 = vmax.xlane.f32.xlu0 %v637_v31 }
  0xdc   :  { %v5613_v52 = vpop.xlane.xlu1 %431  ;;  %v5615_v57 = vpop.xlane.xlu0 %428  ;;  %v813_v35 = vmul.f32 1.442695, %v688_v61 }
  0xdd   :  { %9373 = vst [vmem:[#allocation43_spill] sm:$0xff] %v5613_v52  ;;  %9374 = vst [vmem:[#allocation44_spill] sm:$0xff] %v5615_v57  ;;  %v652_v52 = vsel %vm312_vm0, %v175_v22, -inf  ;;  %v176_v57 = vld [vmem:[%s9207_s0 + $0x390] sm:$0xff] }
  0xde   :  { %v655_v22 = vsel %vm312_vm0, %v176_v57, -inf  ;;  %3987 = vpow2.f32 %v813_v35 }
  0xdf   :  { %647 = vmax.xlane.f32.xlu1 %v646_v56  ;;  %644 = vmax.xlane.f32.xlu0 %v643_v11 }
  0xe0   :  { %v5625_v10 = vpop.xlane.xlu1 %437  ;;  %v5627_v31 = vpop.xlane.xlu0 %434 }
  0xe1   :  { %9375 = vst [vmem:[#allocation45_spill] sm:$0xff] %v5625_v10  ;;  %9376 = vst [vmem:[#allocation46_spill] sm:$0xff] %v5627_v31  ;;  %v658_v10 = vsel %vm312_vm0, %v177_v54, -inf  ;;  %v179_v31 = vld [vmem:[%s9207_s0 + $0x3a8] sm:$0xff] }
  0xe2   :  { %v664_v57 = vsel %vm312_vm0, %v179_v31, -inf  ;;  %v691_v31 = vsub.f32 %v5011_v2, %v5397_v46  ;;  %v182_v2 = vld [vmem:[%s9207_s0 + $0x3c0] sm:$0xff] }
  0xe3   :  { %653 = vmax.xlane.f32.xlu1 %v652_v52  ;;  %650 = vmax.xlane.f32.xlu0 %v649_v51  ;;  %v178_v52 = vld [vmem:[%s9207_s0 + $0x3a0] sm:$0xff]  ;;  %v690_v51 = vsub.f32 %v5001_v0, %v5385_v34  ;;  %v180_v0 = vld [vmem:[%s9207_s0 + $0x3b0] sm:$0xff] }
  0xe4   :  { %v5637_v56 = vpop.xlane.xlu1 %443  ;;  %v5639_v11 = vpop.xlane.xlu0 %440  ;;  %v661_v1 = vsel %vm312_vm0, %v178_v52, -inf  ;;  %v667_v52 = vsel %vm312_vm0, %v180_v0, -inf }
  0xe5   :  { %9377 = vst [vmem:[#allocation47_spill] sm:$0xff] %v5637_v56  ;;  %9378 = vst [vmem:[#allocation48_spill] sm:$0xff] %v5639_v11  ;;  %v689_v11 = vsub.f32 %v5020_v5, %v5399_v47  ;;  %v183_v47 = vld [vmem:[%s9207_s0 + $0x3c8] sm:$0xff] }
  0xe7   :  { %659 = vmax.xlane.f32.xlu1 %v658_v10  ;;  %656 = vmax.xlane.f32.xlu0 %v655_v22  ;;  %v181_v10 = vld [vmem:[%s9207_s0 + $0x3b8] sm:$0xff]  ;;  %v817_v22 = vmul.f32 1.442695, %v690_v51  ;;  %v692_v51 = vsub.f32 %v5034_v9, %v5411_v59 }
  0xe8   :  { %v5653_v56 = vpop.xlane.xlu1 %449  ;;  %v5655_v54 = vpop.xlane.xlu0 %446  ;;  %v670_v5 = vsel %vm312_vm0, %v181_v10, -inf  ;;  %v693_v10 = vsub.f32 %v5029_v8, %v5409_v58  ;;  %v185_v9 = vld [vmem:[%s9207_s0 + $0x3d8] sm:$0xff] }
  0xe9   :  { %9379 = vst [vmem:[#allocation49_spill] sm:$0xff] %v5653_v56  ;;  %9380 = vst [vmem:[#allocation50_spill] sm:$0xff] %v5655_v54  ;;  %v815_v56 = vmul.f32 1.442695, %v689_v11  ;;  %3989 = vpow2.f32 %v817_v22  ;;  %v673_v11 = vsel %vm312_vm0, %v182_v2, -inf  ;;  %v184_v22 = vld [vmem:[%s9207_s0 + $0x3d0] sm:$0xff] }
  0xea   :  { %v682_v8 = vsel %vm312_vm0, %v185_v9, -inf }
  0xeb   :  { %665 = vmax.xlane.f32.xlu1 %v664_v57  ;;  %662 = vmax.xlane.f32.xlu0 %v661_v1  ;;  %v676_v57 = vsel %vm312_vm0, %v183_v47, -inf  ;;  %v819_v1 = vmul.f32 1.442695, %v691_v31  ;;  %3991 = vpow2.f32 %v815_v56  ;;  %v694_v47 = vsub.f32 %v5048_v13, %v5423_v6 }
  0xec   :  { %v5669_v34 = vpop.xlane.xlu1 %455  ;;  %v5671_v61 = vpop.xlane.xlu0 %452  ;;  %v823_v31 = vmul.f32 1.442695, %v693_v10  ;;  %v696_v6 = vsub.f32 %v5062_v17, %v5435_v18  ;;  %v697_v10 = vsub.f32 %v5057_v16, %v5433_v15  ;;  %v699_v16 = vsub.f32 %v5071_v20, %v5445_v27 }
  0xed   :  { %9381 = vst [vmem:[#allocation51_spill] sm:$0xff] %v5669_v34  ;;  %9382 = vst [vmem:[#allocation52_spill] sm:$0xff] %v5671_v61  ;;  %3993 = vpow2.f32 %v819_v1  ;;  %v825_v13 = vmul.f32 1.442695, %v694_v47  ;;  %v3988_v1 = vpop.eup %3987  ;;  %v698_v47 = vsub.f32 %v5076_v21, %v5447_v30  ;;  %v700_v21 = vsub.f32 %v5090_v25, %v5459_v50 }
  0xee   :  { %v829_v17 = vmul.f32 1.442695, %v696_v6  ;;  %v701_v20 = vsub.f32 %v5085_v24, %v5457_v43  ;;  %v702_v25 = vsub.f32 %v5104_v29, %v5471_v63  ;;  %v703_v24 = vsub.f32 %v5099_v28, %v5469_v62 }
  0xef   :  { %671 = vmax.xlane.f32.xlu1 %v670_v5  ;;  %668 = vmax.xlane.f32.xlu0 %v667_v52  ;;  %v821_v5 = vmul.f32 1.442695, %v692_v51  ;;  %v695_v52 = vsub.f32 %v5043_v12, %v5421_v4  ;;  %v679_v51 = vsel %vm312_vm0, %v184_v22, -inf  ;;  %v833_v6 = vmul.f32 1.442695, %v698_v47 }
  0xf0   :  { %v5686_v0 = vpop.xlane.xlu1 %461  ;;  %v5688_v35 = vpop.xlane.xlu0 %458  ;;  %v837_v47 = vmul.f32 1.442695, %v700_v21  ;;  %v841_v21 = vmul.f32 1.442695, %v702_v25  ;;  %v704_v29 = vsub.f32 %v5118_v33, %v5483_v19  ;;  %v705_v28 = vsub.f32 %v5113_v32, %v5481_v14 }
  0xf1   :  { %9383 = vst [vmem:[#allocation53_spill] sm:$0xff] %v5686_v0  ;;  %9384 = vst [vmem:[#allocation54_spill] sm:$0xff] %v5688_v35  ;;  %3995 = vpow2.f32 %v821_v5  ;;  %v827_v12 = vmul.f32 1.442695, %v695_v52  ;;  %v706_v33 = vsub.f32 %v5132_v37, %v5495_v39  ;;  %v707_v32 = vsub.f32 %v5127_v36, %v5493_v38 }
  0xf2   :  { %3997 = vpow2.f32 %v823_v31  ;;  %v831_v31 = vmul.f32 1.442695, %v697_v10  ;;  %v845_v25 = vmul.f32 1.442695, %v704_v29  ;;  %v708_v37 = vsub.f32 %v5146_v41, %v5507_v3 }
  0xf3   :  { %677 = vmax.xlane.f32.xlu1 %v676_v57  ;;  %674 = vmax.xlane.f32.xlu0 %v673_v11  ;;  %v186_v57 = vld [vmem:[%s9207_s0 + $0x3e0] sm:$0xff]  ;;  %3999 = vpow2.f32 %v825_v13  ;;  %v3990_v22 = vpop.eup %3989  ;;  %v849_v29 = vmul.f32 1.442695, %v706_v33  ;;  %v709_v36 = vsub.f32 %v5141_v40, %v5505_v60  ;;  %v710_v41 = vsub.f32 %v5160_v45, %v5519_v26 }
  0xf4   :  { %v5702_v2 = vpop.xlane.xlu1 %467  ;;  %v5704_v56 = vpop.xlane.xlu0 %464  ;;  %v685_v5 = vsel %vm312_vm0, %v186_v57, -inf  ;;  %4001 = vpow2.f32 %v827_v12  ;;  %v1069_v57 = vsel %vm312_vm0, %v3990_v22, 0.0  ;;  %v835_v12 = vmul.f32 1.442695, %v699_v16 }
  0xf5   :  { %9385 = vst [vmem:[#allocation55_spill] sm:$0xff] %v5702_v2  ;;  %9386 = vst [vmem:[#allocation56_spill] sm:$0xff] %v5704_v56  ;;  %4003 = vpow2.f32 %v829_v17  ;;  %v853_v33 = vmul.f32 1.442695, %v708_v37  ;;  %v711_v40 = vsub.f32 %v5155_v44, %v5517_v23  ;;  %v857_v37 = vmul.f32 1.442695, %v710_v41 }
  0xf6   :  { %4005 = vpow2.f32 %v831_v31  ;;  %v839_v31 = vmul.f32 1.442695, %v701_v20  ;;  %v712_v45 = vsub.f32 %v5174_v49, %v5531_v7  ;;  %v713_v44 = vsub.f32 %v5169_v48, %v5529_v55  ;;  %v9405_v48 = vld [vmem:[#allocation31_spill] sm:$0xff] }
  0xf7   :  { %683 = vmax.xlane.f32.xlu1 %v682_v8  ;;  %680 = vmax.xlane.f32.xlu0 %v679_v51  ;;  %v1063_v8 = vsel %vm312_vm0, %v3988_v1, 0.0  ;;  %v3992_v51 = vpop.eup %3991  ;;  %4007 = vpow2.f32 %v833_v6  ;;  %v714_v49 = vsub.f32 %v5188_v53, %v5543_v42  ;;  %v9409_v53 = vld [vmem:[#allocation34_spill] sm:$0xff]  ;;  %v9410_v42 = vld [vmem:[#allocation7_spill] sm:$0xff] }
  0xf8   :  { %v5714_v11 = vpop.xlane.xlu1 %473  ;;  %v5716_v9 = vpop.xlane.xlu0 %470  ;;  %v1066_v1 = vsel %vm312_vm0, %v3992_v51, 0.0  ;;  %4009 = vpow2.f32 %v835_v12  ;;  %v843_v12 = vmul.f32 1.442695, %v703_v24  ;;  %v861_v41 = vmul.f32 1.442695, %v712_v45 }
  0xf9   :  { %9387 = vst [vmem:[#allocation57_spill] sm:$0xff] %v5714_v11  ;;  %9388 = vst [vmem:[#allocation58_spill] sm:$0xff] %v5716_v9  ;;  %v3994_v13 = vpop.eup %3993  ;;  %4011 = vpow2.f32 %v837_v47  ;;  %v865_v45 = vmul.f32 1.442695, %v714_v49  ;;  %v716_v23 = vsub.f32 %v9410_v42, %v9409_v53  ;;  %v9415_v42 = vld [vmem:[#allocation36_spill] sm:$0xff] }
  0xfa   :  { %v1072_v51 = vsel %vm312_vm0, %v3994_v13, 0.0  ;;  %4013 = vpow2.f32 %v839_v31  ;;  %v847_v31 = vmul.f32 1.442695, %v705_v28  ;;  %v9416_v53 = vld [vmem:[#allocation8_spill] sm:$0xff] }
  0xfb   :  { %1064 = vadd.xlane.f32.xlu1 %v1063_v8  ;;  %686 = vmax.xlane.f32.xlu0 %v685_v5  ;;  %v3996_v5 = vpop.eup %3995  ;;  %4015 = vpow2.f32 %v841_v21  ;;  %v869_v49 = vmul.f32 1.442695, %v716_v23  ;;  %v718_v60 = vsub.f32 %v9416_v53, %v9415_v42 }
  0xfc   :  { %v5724_v52 = vpop.xlane.xlu1 %479  ;;  %v5726_v15 = vpop.xlane.xlu0 %476  ;;  %v1075_v8 = vsel %vm312_vm0, %v3996_v5, 0.0  ;;  %4017 = vpow2.f32 %v843_v12  ;;  %v851_v12 = vmul.f32 1.442695, %v707_v32 }
  0xfd   :  { %9389 = vst [vmem:[#allocation59_spill] sm:$0xff] %v5724_v52  ;;  %9390 = vst [vmem:[#allocation60_spill] sm:$0xff] %v5726_v15  ;;  %v3998_v22 = vpop.eup %3997  ;;  %4019 = vpow2.f32 %v845_v25  ;;  %v873_v53 = vmul.f32 1.442695, %v718_v60  ;;  %v4739_v60 = vld [vmem:[%s9207_s0 + $0x108] sm:$0xff] }
  0xfe   :  { %v1078_v5 = vsel %vm312_vm0, %v3998_v22, 0.0  ;;  %4021 = vpow2.f32 %v847_v31  ;;  %v855_v31 = vmul.f32 1.442695, %v709_v36 }
  0xff   :  { %1070 = vadd.xlane.f32.xlu1 %v1069_v57  ;;  %1067 = vadd.xlane.f32.xlu0 %v1066_v1  ;;  %v4000_v57 = vpop.eup %3999  ;;  %4023 = vpow2.f32 %v849_v29 }
 0x100   :  { %v5734_v10 = vpop.xlane.xlu1 %485  ;;  %v5736_v17 = vpop.xlane.xlu0 %482  ;;  %v1081_v13 = vsel %vm312_vm0, %v4000_v57, 0.0  ;;  %4025 = vpow2.f32 %v851_v12  ;;  %v859_v12 = vmul.f32 1.442695, %v711_v40  ;;  %v9406_v40 = vld [vmem:[#allocation5_spill] sm:$0xff] }
 0x101   :  { %9391 = vst [vmem:[#allocation61_spill] sm:$0xff] %v5734_v10  ;;  %9392 = vst [vmem:[#allocation62_spill] sm:$0xff] %v5736_v17  ;;  %v4002_v1 = vpop.eup %4001  ;;  %4027 = vpow2.f32 %v853_v33 }
 0x102   :  { %v1084_v57 = vsel %vm312_vm0, %v4002_v1, 0.0  ;;  %4029 = vpow2.f32 %v855_v31  ;;  %v863_v31 = vmul.f32 1.442695, %v713_v44  ;;  %v9411_v44 = vld [vmem:[#allocation33_spill] sm:$0xff] }
 0x103   :  { %1076 = vadd.xlane.f32.xlu1 %v1075_v8  ;;  %1073 = vadd.xlane.f32.xlu0 %v1072_v51  ;;  %v4004_v8 = vpop.eup %4003  ;;  %4031 = vpow2.f32 %v857_v37 }
 0x104   :  { %v5744_v16 = vpop.xlane.xlu1 %491  ;;  %v5746_v6 = vpop.xlane.xlu0 %488  ;;  %v1087_v22 = vsel %vm312_vm0, %v4004_v8, 0.0  ;;  %4033 = vpow2.f32 %v859_v12 }
 0x105   :  { %9393 = vst [vmem:[#allocation63_spill] sm:$0xff] %v5744_v16  ;;  %9394 = vst [vmem:[#allocation64_spill] sm:$0xff] %v5746_v6  ;;  %v4006_v51 = vpop.eup %4005  ;;  %4035 = vpow2.f32 %v861_v41 }
 0x106   :  { %v1090_v8 = vsel %vm312_vm0, %v4006_v51, 0.0  ;;  %4037 = vpow2.f32 %v863_v31 }
 0x107   :  { %1082 = vadd.xlane.f32.xlu1 %v1081_v13  ;;  %1079 = vadd.xlane.f32.xlu0 %v1078_v5  ;;  %v4008_v13 = vpop.eup %4007  ;;  %4039 = vpow2.f32 %v865_v45 }
 0x108   :  { %v5754_v20 = vpop.xlane.xlu1 %497  ;;  %v5756_v47 = vpop.xlane.xlu0 %494  ;;  %v1093_v1 = vsel %vm312_vm0, %v4008_v13, 0.0 }
 0x109   :  { %9395 = vst [vmem:[#allocation65_spill] sm:$0xff] %v5754_v20  ;;  %9396 = vst [vmem:[#allocation66_spill] sm:$0xff] %v5756_v47  ;;  %v4010_v5 = vpop.eup %4009 }
 0x10a   :  { %v1096_v13 = vsel %vm312_vm0, %v4010_v5, 0.0 }
 0x10b   :  { %1088 = vadd.xlane.f32.xlu1 %v1087_v22  ;;  %1085 = vadd.xlane.f32.xlu0 %v1084_v57  ;;  %v4012_v22 = vpop.eup %4011 }
 0x10c   :  { %v5764_v24 = vpop.xlane.xlu1 %503  ;;  %v5766_v21 = vpop.xlane.xlu0 %500  ;;  %v1099_v51 = vsel %vm312_vm0, %v4012_v22, 0.0 }
 0x10d   :  { %9397 = vst [vmem:[#allocation67_spill] sm:$0xff] %v5764_v24  ;;  %9398 = vst [vmem:[#allocation68_spill] sm:$0xff] %v5766_v21  ;;  %v4014_v57 = vpop.eup %4013 }
 0x10e   :  { %v1102_v22 = vsel %vm312_vm0, %v4014_v57, 0.0 }
 0x10f   :  { %1094 = vadd.xlane.f32.xlu1 %v1093_v1  ;;  %1091 = vadd.xlane.f32.xlu0 %v1090_v8  ;;  %v4016_v1 = vpop.eup %4015 }
 0x110   :  { %v5774_v28 = vpop.xlane.xlu1 %509  ;;  %v5776_v25 = vpop.xlane.xlu0 %506  ;;  %v1105_v5 = vsel %vm312_vm0, %v4016_v1, 0.0 }
 0x111   :  { %9399 = vst [vmem:[#allocation69_spill] sm:$0xff] %v5774_v28  ;;  %9400 = vst [vmem:[#allocation70_spill] sm:$0xff] %v5776_v25  ;;  %v4018_v8 = vpop.eup %4017 }
 0x112   :  { %v1108_v1 = vsel %vm312_vm0, %v4018_v8, 0.0 }
 0x113   :  { %1100 = vadd.xlane.f32.xlu1 %v1099_v51  ;;  %1097 = vadd.xlane.f32.xlu0 %v1096_v13  ;;  %v4020_v51 = vpop.eup %4019 }
 0x114   :  { %v5784_v32 = vpop.xlane.xlu1 %515  ;;  %v5786_v29 = vpop.xlane.xlu0 %512  ;;  %v1111_v57 = vsel %vm312_vm0, %v4020_v51, 0.0 }
 0x115   :  { %9401 = vst [vmem:[#allocation71_spill] sm:$0xff] %v5784_v32  ;;  %9402 = vst [vmem:[#allocation72_spill] sm:$0xff] %v5786_v29  ;;  %v4022_v13 = vpop.eup %4021 }
 0x117   :  { %1106 = vadd.xlane.f32.xlu1 %v1105_v5  ;;  %1103 = vadd.xlane.f32.xlu0 %v1102_v22  ;;  %v4024_v5 = vpop.eup %4023  ;;  %v715_v22 = vsub.f32 %v9406_v40, %v9405_v48  ;;  %v9412_v40 = vld [vmem:[#allocation6_spill] sm:$0xff] }
 0x118   :  { %v5794_v36 = vpop.xlane.xlu1 %521  ;;  %v5796_v33 = vpop.xlane.xlu0 %518  ;;  %v1117_v8 = vsel %vm312_vm0, %v4024_v5, 0.0  ;;  %v717_v48 = vsub.f32 %v9412_v40, %v9411_v44  ;;  %v9417_v40 = vld [vmem:[#allocation35_spill] sm:$0xff] }
 0x119   :  { %9403 = vst [vmem:[#allocation73_spill] sm:$0xff] %v5794_v36  ;;  %9404 = vst [vmem:[#allocation74_spill] sm:$0xff] %v5796_v33  ;;  %v4026_v51 = vpop.eup %4025  ;;  %v867_v12 = vmul.f32 1.442695, %v715_v22  ;;  %v4737_v22 = vld [vmem:[%s9207_s0 + $0xf8] sm:$0xff] }
 0x11a   :  { %v871_v31 = vmul.f32 1.442695, %v717_v48  ;;  %v719_v45 = vsub.f32 %v4737_v22, %v9417_v40 }
 0x11b   :  { %1112 = vadd.xlane.f32.xlu1 %v1111_v57  ;;  %1109 = vadd.xlane.f32.xlu0 %v1108_v1  ;;  %v1114_v57 = vsel %vm312_vm0, %v4022_v13, 0.0  ;;  %v4028_v1 = vpop.eup %4027  ;;  %4041 = vpow2.f32 %v867_v12 }
 0x11c   :  { %v5804_v55 = vpop.xlane.xlu1 %527  ;;  %v5806_v37 = vpop.xlane.xlu0 %524  ;;  %v1123_v13 = vsel %vm312_vm0, %v4028_v1, 0.0  ;;  %4043 = vpow2.f32 %v869_v49  ;;  %v9420_v1 = vld [vmem:[#allocation38_spill] sm:$0xff]  ;;  %v875_v22 = vmul.f32 1.442695, %v719_v45  ;;  %v9421_v49 = vld [vmem:[#allocation37_spill] sm:$0xff] }
 0x11d   :  { %9407 = vst [vmem:[#allocation5_spill] sm:$0xff] %v5804_v55  ;;  %9408 = vst [vmem:[#allocation75_spill] sm:$0xff] %v5806_v37  ;;  %v4030_v5 = vpop.eup %4029  ;;  %4045 = vpow2.f32 %v871_v31  ;;  %v721_v40 = vsub.f32 %v4739_v60, %v9421_v49 }
 0x11e   :  { %4047 = vpow2.f32 %v873_v53  ;;  %v4741_v53 = vld [vmem:[%s9207_s0 + $0x118] sm:$0xff] }
 0x11f   :  { %1118 = vadd.xlane.f32.xlu1 %v1117_v8  ;;  %1115 = vadd.xlane.f32.xlu0 %v1114_v57  ;;  %v1120_v8 = vsel %vm312_vm0, %v4026_v51, 0.0  ;;  %v4032_v57 = vpop.eup %4031  ;;  %v4738_v51 = vld [vmem:[%s9207_s0 + $0x100] sm:$0xff]  ;;  %4049 = vpow2.f32 %v875_v22  ;;  %v879_v60 = vmul.f32 1.442695, %v721_v40 }
 0x120   :  { %v5814_v7 = vpop.xlane.xlu1 %533  ;;  %v5816_v41 = vpop.xlane.xlu0 %530  ;;  %v1129_v48 = vsel %vm312_vm0, %v4032_v57, 0.0  ;;  %v9424_v57 = vld [vmem:[#allocation40_spill] sm:$0xff] }
 0x121   :  { %9413 = vst [vmem:[#allocation7_spill] sm:$0xff] %v5814_v7  ;;  %9414 = vst [vmem:[#allocation6_spill] sm:$0xff] %v5816_v41  ;;  %v4034_v12 = vpop.eup %4033 }
 0x122   :  { %v4036_v42 = vpop.eup %4035 }
 0x123   :  { %1124 = vadd.xlane.f32.xlu1 %v1123_v13  ;;  %1121 = vadd.xlane.f32.xlu0 %v1120_v8  ;;  %v720_v13 = vsub.f32 %v4738_v51, %v9420_v1  ;;  %v1126_v8 = vsel %vm312_vm0, %v4030_v5, 0.0  ;;  %v4740_v5 = vld [vmem:[%s9207_s0 + $0x110] sm:$0xff]  ;;  %v4038_v31 = vpop.eup %4037  ;;  %v1135_v45 = vsel %vm312_vm0, %v4036_v42, 0.0  ;;  %v4742_v42 = vld [vmem:[%s9207_s0 + $0x120] sm:$0xff] }
 0x124   :  { %v5826_v23 = vpop.xlane.xlu1 %539  ;;  %v5828_v44 = vpop.xlane.xlu0 %536 }
 0x125   :  { %9418 = vst [vmem:[#allocation8_spill] sm:$0xff] %v5826_v23  ;;  %9419 = vst [vmem:[#allocation76_spill] sm:$0xff] %v5828_v44  ;;  %v877_v51 = vmul.f32 1.442695, %v720_v13  ;;  %v4040_v1 = vpop.eup %4039  ;;  %v9425_v13 = vld [vmem:[#allocation39_spill] sm:$0xff] }
 0x126   :  { %v723_v49 = vsub.f32 %v4741_v53, %v9425_v13  ;;  %v4042_v22 = vpop.eup %4041  ;;  %v1141_v40 = vsel %vm312_vm0, %v4040_v1, 0.0  ;;  %v4744_v1 = vld [vmem:[%s9207_s0 + $0x130] sm:$0xff] }
 0x127   :  { %1130 = vadd.xlane.f32.xlu1 %v1129_v48  ;;  %1127 = vadd.xlane.f32.xlu0 %v1126_v8  ;;  %v722_v48 = vsub.f32 %v4740_v5, %v9424_v57  ;;  %v1132_v8 = vsel %vm312_vm0, %v4034_v12, 0.0  ;;  %4051 = vpow2.f32 %v877_v51  ;;  %v9428_v12 = vld [vmem:[#allocation42_spill] sm:$0xff]  ;;  %v4044_v57 = vpop.eup %4043 }
 0x128   :  { %v5840_v26 = vpop.xlane.xlu1 %545  ;;  %v5842_v38 = vpop.xlane.xlu0 %542  ;;  %4053 = vpow2.f32 %v879_v60  ;;  %v883_v53 = vmul.f32 1.442695, %v723_v49  ;;  %v4743_v51 = vld [vmem:[%s9207_s0 + $0x128] sm:$0xff]  ;;  %v1147_v49 = vsel %vm312_vm0, %v4044_v57, 0.0  ;;  %v4746_v57 = vld [vmem:[%s9207_s0 + $0x140] sm:$0xff] }
 0x129   :  { %9422 = vst [vmem:[#allocation77_spill] sm:$0xff] %v5840_v26  ;;  %9423 = vst [vmem:[#allocation78_spill] sm:$0xff] %v5842_v38  ;;  %v881_v5 = vmul.f32 1.442695, %v722_v48  ;;  %v9429_v48 = vld [vmem:[#allocation41_spill] sm:$0xff]  ;;  %v4046_v60 = vpop.eup %4045 }
 0x12a   :  { %v725_v13 = vsub.f32 %v4743_v51, %v9429_v48 }
 0x12b   :  { %1136 = vadd.xlane.f32.xlu1 %v1135_v45  ;;  %1133 = vadd.xlane.f32.xlu0 %v1132_v8  ;;  %v724_v45 = vsub.f32 %v4742_v42, %v9428_v12  ;;  %v1138_v8 = vsel %vm312_vm0, %v4038_v31, 0.0  ;;  %4055 = vpow2.f32 %v881_v5  ;;  %v9432_v31 = vld [vmem:[#allocation44_spill] sm:$0xff]  ;;  %v4048_v12 = vpop.eup %4047 }
 0x12c   :  { %v5854_v3 = vpop.xlane.xlu1 %551  ;;  %v5856_v14 = vpop.xlane.xlu0 %548  ;;  %4057 = vpow2.f32 %v883_v53  ;;  %v887_v51 = vmul.f32 1.442695, %v725_v13  ;;  %v4745_v5 = vld [vmem:[%s9207_s0 + $0x138] sm:$0xff]  ;;  %v1153_v13 = vsel %vm312_vm0, %v4048_v12, 0.0  ;;  %v4748_v12 = vld [vmem:[%s9207_s0 + $0x150] sm:$0xff] }
 0x12d   :  { %9426 = vst [vmem:[#allocation79_spill] sm:$0xff] %v5854_v3  ;;  %9427 = vst [vmem:[#allocation80_spill] sm:$0xff] %v5856_v14  ;;  %v885_v42 = vmul.f32 1.442695, %v724_v45  ;;  %v9433_v45 = vld [vmem:[#allocation43_spill] sm:$0xff]  ;;  %v4050_v53 = vpop.eup %4049 }
 0x12e   :  { %v727_v48 = vsub.f32 %v4745_v5, %v9433_v45 }
 0x12f   :  { %1142 = vadd.xlane.f32.xlu1 %v1141_v40  ;;  %1139 = vadd.xlane.f32.xlu0 %v1138_v8  ;;  %v726_v40 = vsub.f32 %v4744_v1, %v9432_v31  ;;  %v1144_v8 = vsel %vm312_vm0, %v4042_v22, 0.0  ;;  %4059 = vpow2.f32 %v885_v42  ;;  %v9436_v22 = vld [vmem:[#allocation46_spill] sm:$0xff] }
 0x130   :  { %v5868_v39 = vpop.xlane.xlu1 %557  ;;  %v5870_v62 = vpop.xlane.xlu0 %554  ;;  %4061 = vpow2.f32 %v887_v51  ;;  %v891_v5 = vmul.f32 1.442695, %v727_v48  ;;  %v4747_v42 = vld [vmem:[%s9207_s0 + $0x148] sm:$0xff] }
 0x131   :  { %9430 = vst [vmem:[#allocation81_spill] sm:$0xff] %v5868_v39  ;;  %9431 = vst [vmem:[#allocation82_spill] sm:$0xff] %v5870_v62  ;;  %v889_v1 = vmul.f32 1.442695, %v726_v40  ;;  %v4052_v31 = vpop.eup %4051  ;;  %v9437_v40 = vld [vmem:[#allocation45_spill] sm:$0xff] }
 0x132   :  { %v729_v45 = vsub.f32 %v4747_v42, %v9437_v40  ;;  %v4054_v51 = vpop.eup %4053  ;;  %v1159_v48 = vsel %vm312_vm0, %v4052_v31, 0.0  ;;  %v4750_v31 = vld [vmem:[%s9207_s0 + $0x160] sm:$0xff] }
 0x133   :  { %1148 = vadd.xlane.f32.xlu1 %v1147_v49  ;;  %1145 = vadd.xlane.f32.xlu0 %v1144_v8  ;;  %v728_v49 = vsub.f32 %v4746_v57, %v9436_v22  ;;  %v1150_v8 = vsel %vm312_vm0, %v4046_v60, 0.0  ;;  %4063 = vpow2.f32 %v889_v1  ;;  %v9440_v60 = vld [vmem:[#allocation48_spill] sm:$0xff] }
 0x134   :  { %v5882_v19 = vpop.xlane.xlu1 %563  ;;  %v5884_v63 = vpop.xlane.xlu0 %560  ;;  %4065 = vpow2.f32 %v891_v5  ;;  %v895_v42 = vmul.f32 1.442695, %v729_v45  ;;  %v4749_v1 = vld [vmem:[%s9207_s0 + $0x158] sm:$0xff] }
 0x135   :  { %9434 = vst [vmem:[#allocation83_spill] sm:$0xff] %v5882_v19  ;;  %9435 = vst [vmem:[#allocation84_spill] sm:$0xff] %v5884_v63  ;;  %v893_v57 = vmul.f32 1.442695, %v728_v49  ;;  %v4056_v22 = vpop.eup %4055  ;;  %v9441_v49 = vld [vmem:[#allocation47_spill] sm:$0xff] }
 0x136   :  { %v731_v40 = vsub.f32 %v4749_v1, %v9441_v49  ;;  %v4058_v5 = vpop.eup %4057  ;;  %v1165_v45 = vsel %vm312_vm0, %v4056_v22, 0.0  ;;  %v4752_v22 = vld [vmem:[%s9207_s0 + $0x170] sm:$0xff] }
 0x137   :  { %1154 = vadd.xlane.f32.xlu1 %v1153_v13  ;;  %1151 = vadd.xlane.f32.xlu0 %v1150_v8  ;;  %v730_v13 = vsub.f32 %v4748_v12, %v9440_v60  ;;  %v1156_v8 = vsel %vm312_vm0, %v4050_v53, 0.0  ;;  %4067 = vpow2.f32 %v893_v57  ;;  %v732_v53 = vsub.f32 %v4750_v31, %v5655_v54  ;;  %v4751_v57 = vld [vmem:[%s9207_s0 + $0x168] sm:$0xff] }
 0x138   :  { %v5896_v43 = vpop.xlane.xlu1 %569  ;;  %v5898_v27 = vpop.xlane.xlu0 %566  ;;  %4069 = vpow2.f32 %v895_v42  ;;  %v899_v1 = vmul.f32 1.442695, %v731_v40 }
 0x139   :  { %9438 = vst [vmem:[#allocation85_spill] sm:$0xff] %v5896_v43  ;;  %9439 = vst [vmem:[#allocation86_spill] sm:$0xff] %v5898_v27  ;;  %v897_v12 = vmul.f32 1.442695, %v730_v13  ;;  %v9444_v13 = vld [vmem:[#allocation49_spill] sm:$0xff] }
 0x13a   :  { %v733_v49 = vsub.f32 %v4751_v57, %v9444_v13  ;;  %v901_v31 = vmul.f32 1.442695, %v732_v53 }
 0x13b   :  { %1160 = vadd.xlane.f32.xlu1 %v1159_v48  ;;  %1157 = vadd.xlane.f32.xlu0 %v1156_v8  ;;  %v1162_v48 = vsel %vm312_vm0, %v4054_v51, 0.0  ;;  %v4060_v8 = vpop.eup %4059  ;;  %4071 = vpow2.f32 %v897_v12  ;;  %v734_v51 = vsub.f32 %v4752_v22, %v5671_v61  ;;  %v4753_v12 = vld [vmem:[%s9207_s0 + $0x178] sm:$0xff] }
 0x13c   :  { %v5910_v50 = vpop.xlane.xlu1 %575  ;;  %v5912_v30 = vpop.xlane.xlu0 %572  ;;  %v1171_v40 = vsel %vm312_vm0, %v4060_v8, 0.0  ;;  %4073 = vpow2.f32 %v899_v1  ;;  %v903_v57 = vmul.f32 1.442695, %v733_v49  ;;  %v735_v53 = vsub.f32 %v4753_v12, %v5669_v34 }
 0x13d   :  { %9442 = vst [vmem:[#allocation87_spill] sm:$0xff] %v5910_v50  ;;  %9443 = vst [vmem:[#allocation88_spill] sm:$0xff] %v5912_v30  ;;  %v4062_v42 = vpop.eup %4061  ;;  %4075 = vpow2.f32 %v901_v31  ;;  %v905_v22 = vmul.f32 1.442695, %v734_v51  ;;  %v4755_v31 = vld [vmem:[%s9207_s0 + $0x188] sm:$0xff] }
 0x13e   :  { %4077 = vpow2.f32 %v903_v57  ;;  %v907_v12 = vmul.f32 1.442695, %v735_v53  ;;  %v737_v51 = vsub.f32 %v4755_v31, %v5686_v0 }
 0x13f   :  { %1166 = vadd.xlane.f32.xlu1 %v1165_v45  ;;  %1163 = vadd.xlane.f32.xlu0 %v1162_v48  ;;  %v1168_v45 = vsel %vm312_vm0, %v4058_v5, 0.0  ;;  %v4064_v48 = vpop.eup %4063  ;;  %v4754_v5 = vld [vmem:[%s9207_s0 + $0x180] sm:$0xff]  ;;  %4079 = vpow2.f32 %v905_v22  ;;  %v4757_v22 = vld [vmem:[%s9207_s0 + $0x198] sm:$0xff] }
 0x140   :  { %v5924_v60 = vpop.xlane.xlu1 %581  ;;  %v5926_v18 = vpop.xlane.xlu0 %578  ;;  %v736_v8 = vsub.f32 %v4754_v5, %v5688_v35  ;;  %v1177_v49 = vsel %vm312_vm0, %v4064_v48, 0.0  ;;  %4081 = vpow2.f32 %v907_v12  ;;  %v911_v31 = vmul.f32 1.442695, %v737_v51 }
 0x141   :  { %9445 = vst [vmem:[#allocation89_spill] sm:$0xff] %v5924_v60  ;;  %9446 = vst [vmem:[#allocation90_spill] sm:$0xff] %v5926_v18  ;;  %v4066_v1 = vpop.eup %4065 }
 0x142   :  { %v909_v5 = vmul.f32 1.442695, %v736_v8  ;;  %v739_v8 = vsub.f32 %v4757_v22, %v5702_v2 }
 0x143   :  { %1172 = vadd.xlane.f32.xlu1 %v1171_v40  ;;  %1169 = vadd.xlane.f32.xlu0 %v1168_v45  ;;  %v1174_v40 = vsel %vm312_vm0, %v4062_v42, 0.0  ;;  %v4068_v45 = vpop.eup %4067  ;;  %v4756_v42 = vld [vmem:[%s9207_s0 + $0x190] sm:$0xff] }
 0x144   :  { %v5938_v13 = vpop.xlane.xlu1 %587  ;;  %v5940_v54 = vpop.xlane.xlu0 %584  ;;  %v738_v48 = vsub.f32 %v4756_v42, %v5704_v56  ;;  %v1183_v53 = vsel %vm312_vm0, %v4068_v45, 0.0  ;;  %4083 = vpow2.f32 %v909_v5  ;;  %v915_v22 = vmul.f32 1.442695, %v739_v8  ;;  %v4759_v5 = vld [vmem:[%s9207_s0 + $0x1a8] sm:$0xff] }
 0x145   :  { %9447 = vst [vmem:[#allocation91_spill] sm:$0xff] %v5938_v13  ;;  %9448 = vst [vmem:[#allocation92_spill] sm:$0xff] %v5940_v54  ;;  %v4070_v57 = vpop.eup %4069  ;;  %4085 = vpow2.f32 %v911_v31 }
 0x146   :  { %v913_v42 = vmul.f32 1.442695, %v738_v48  ;;  %v741_v48 = vsub.f32 %v4759_v5, %v5714_v11 }
 0x147   :  { %1178 = vadd.xlane.f32.xlu1 %v1177_v49  ;;  %1175 = vadd.xlane.f32.xlu0 %v1174_v40  ;;  %v1180_v49 = vsel %vm312_vm0, %v4066_v1, 0.0  ;;  %v4072_v40 = vpop.eup %4071  ;;  %v4758_v1 = vld [vmem:[%s9207_s0 + $0x1a0] sm:$0xff] }
 0x148   :  { %v5952_v34 = vpop.xlane.xlu1 %593  ;;  %v5954_v61 = vpop.xlane.xlu0 %590  ;;  %v740_v45 = vsub.f32 %v4758_v1, %v5716_v9  ;;  %v1189_v51 = vsel %vm312_vm0, %v4072_v40, 0.0  ;;  %4087 = vpow2.f32 %v913_v42  ;;  %v919_v5 = vmul.f32 1.442695, %v741_v48  ;;  %v4761_v42 = vld [vmem:[%s9207_s0 + $0x1b8] sm:$0xff] }
 0x149   :  { %9449 = vst [vmem:[#allocation93_spill] sm:$0xff] %v5952_v34  ;;  %9450 = vst [vmem:[#allocation94_spill] sm:$0xff] %v5954_v61  ;;  %v4074_v12 = vpop.eup %4073  ;;  %4089 = vpow2.f32 %v915_v22 }
 0x14a   :  { %v917_v1 = vmul.f32 1.442695, %v740_v45  ;;  %v743_v45 = vsub.f32 %v4761_v42, %v5724_v52 }
 0x14b   :  { %1184 = vadd.xlane.f32.xlu1 %v1183_v53  ;;  %1181 = vadd.xlane.f32.xlu0 %v1180_v49  ;;  %v1186_v53 = vsel %vm312_vm0, %v4070_v57, 0.0  ;;  %v4076_v49 = vpop.eup %4075  ;;  %v4760_v57 = vld [vmem:[%s9207_s0 + $0x1b0] sm:$0xff] }
 0x14c   :  { %v5966_v0 = vpop.xlane.xlu1 %599  ;;  %v5968_v35 = vpop.xlane.xlu0 %596  ;;  %v742_v40 = vsub.f32 %v4760_v57, %v5726_v15  ;;  %v1195_v8 = vsel %vm312_vm0, %v4076_v49, 0.0  ;;  %4091 = vpow2.f32 %v917_v1  ;;  %v923_v42 = vmul.f32 1.442695, %v743_v45  ;;  %v4763_v1 = vld [vmem:[%s9207_s0 + $0x1c8] sm:$0xff] }
 0x14d   :  { %9451 = vst [vmem:[#allocation95_spill] sm:$0xff] %v5966_v0  ;;  %9452 = vst [vmem:[#allocation96_spill] sm:$0xff] %v5968_v35  ;;  %v4078_v31 = vpop.eup %4077  ;;  %4093 = vpow2.f32 %v919_v5 }
 0x14e   :  { %v921_v57 = vmul.f32 1.442695, %v742_v40  ;;  %v745_v40 = vsub.f32 %v4763_v1, %v5734_v10 }
 0x14f   :  { %1190 = vadd.xlane.f32.xlu1 %v1189_v51  ;;  %1187 = vadd.xlane.f32.xlu0 %v1186_v53  ;;  %v1192_v51 = vsel %vm312_vm0, %v4074_v12, 0.0  ;;  %v4080_v53 = vpop.eup %4079  ;;  %v4762_v12 = vld [vmem:[%s9207_s0 + $0x1c0] sm:$0xff] }
 0x150   :  { %v5980_v2 = vpop.xlane.xlu1 %605  ;;  %v5982_v56 = vpop.xlane.xlu0 %602  ;;  %v744_v49 = vsub.f32 %v4762_v12, %v5736_v17  ;;  %v1201_v48 = vsel %vm312_vm0, %v4080_v53, 0.0  ;;  %4095 = vpow2.f32 %v921_v57  ;;  %v927_v1 = vmul.f32 1.442695, %v745_v40  ;;  %v4765_v57 = vld [vmem:[%s9207_s0 + $0x1d8] sm:$0xff] }
 0x151   :  { %9453 = vst [vmem:[#allocation97_spill] sm:$0xff] %v5980_v2  ;;  %9454 = vst [vmem:[#allocation98_spill] sm:$0xff] %v5982_v56  ;;  %v4082_v22 = vpop.eup %4081  ;;  %4097 = vpow2.f32 %v923_v42 }
 0x152   :  { %v925_v12 = vmul.f32 1.442695, %v744_v49  ;;  %v747_v49 = vsub.f32 %v4765_v57, %v5744_v16 }
 0x153   :  { %1196 = vadd.xlane.f32.xlu1 %v1195_v8  ;;  %1193 = vadd.xlane.f32.xlu0 %v1192_v51  ;;  %v1198_v8 = vsel %vm312_vm0, %v4078_v31, 0.0  ;;  %v4084_v51 = vpop.eup %4083  ;;  %v4764_v31 = vld [vmem:[%s9207_s0 + $0x1d0] sm:$0xff] }
 0x154   :  { %v5994_v11 = vpop.xlane.xlu1 %611  ;;  %v5996_v9 = vpop.xlane.xlu0 %608  ;;  %v746_v53 = vsub.f32 %v4764_v31, %v5746_v6  ;;  %v1207_v45 = vsel %vm312_vm0, %v4084_v51, 0.0  ;;  %4099 = vpow2.f32 %v925_v12  ;;  %v931_v57 = vmul.f32 1.442695, %v747_v49  ;;  %v4767_v12 = vld [vmem:[%s9207_s0 + $0x1e8] sm:$0xff] }
 0x155   :  { %9455 = vst [vmem:[#allocation99_spill] sm:$0xff] %v5994_v11  ;;  %9456 = vst [vmem:[#allocation100_spill] sm:$0xff] %v5996_v9  ;;  %v4086_v5 = vpop.eup %4085  ;;  %4101 = vpow2.f32 %v927_v1 }
 0x156   :  { %v929_v31 = vmul.f32 1.442695, %v746_v53  ;;  %v749_v53 = vsub.f32 %v4767_v12, %v5754_v20 }
 0x157   :  { %1202 = vadd.xlane.f32.xlu1 %v1201_v48  ;;  %1199 = vadd.xlane.f32.xlu0 %v1198_v8  ;;  %v1204_v48 = vsel %vm312_vm0, %v4082_v22, 0.0  ;;  %v4088_v8 = vpop.eup %4087  ;;  %v4766_v22 = vld [vmem:[%s9207_s0 + $0x1e0] sm:$0xff] }
 0x158   :  { %v6008_v52 = vpop.xlane.xlu1 %617  ;;  %v6010_v15 = vpop.xlane.xlu0 %614  ;;  %v748_v51 = vsub.f32 %v4766_v22, %v5756_v47  ;;  %v1213_v40 = vsel %vm312_vm0, %v4088_v8, 0.0  ;;  %4103 = vpow2.f32 %v929_v31  ;;  %v935_v12 = vmul.f32 1.442695, %v749_v53  ;;  %v4769_v31 = vld [vmem:[%s9207_s0 + $0x1f8] sm:$0xff] }
 0x159   :  { %9457 = vst [vmem:[#allocation101_spill] sm:$0xff] %v6008_v52  ;;  %9458 = vst [vmem:[#allocation102_spill] sm:$0xff] %v6010_v15  ;;  %v4090_v42 = vpop.eup %4089  ;;  %4105 = vpow2.f32 %v931_v57 }
 0x15a   :  { %v933_v22 = vmul.f32 1.442695, %v748_v51  ;;  %v751_v51 = vsub.f32 %v4769_v31, %v5764_v24 }
 0x15b   :  { %1208 = vadd.xlane.f32.xlu1 %v1207_v45  ;;  %1205 = vadd.xlane.f32.xlu0 %v1204_v48  ;;  %v1210_v45 = vsel %vm312_vm0, %v4086_v5, 0.0  ;;  %v4092_v48 = vpop.eup %4091  ;;  %v4768_v5 = vld [vmem:[%s9207_s0 + $0x1f0] sm:$0xff] }
 0x15c   :  { %v6022_v10 = vpop.xlane.xlu1 %623  ;;  %v6024_v17 = vpop.xlane.xlu0 %620  ;;  %v750_v8 = vsub.f32 %v4768_v5, %v5766_v21  ;;  %v1219_v49 = vsel %vm312_vm0, %v4092_v48, 0.0  ;;  %4107 = vpow2.f32 %v933_v22  ;;  %v939_v31 = vmul.f32 1.442695, %v751_v51  ;;  %v4771_v22 = vld [vmem:[%s9207_s0 + $0x208] sm:$0xff] }
 0x15d   :  { %9459 = vst [vmem:[#allocation103_spill] sm:$0xff] %v6022_v10  ;;  %9460 = vst [vmem:[#allocation104_spill] sm:$0xff] %v6024_v17  ;;  %v4094_v1 = vpop.eup %4093  ;;  %4109 = vpow2.f32 %v935_v12 }
 0x15e   :  { %v937_v5 = vmul.f32 1.442695, %v750_v8  ;;  %v753_v8 = vsub.f32 %v4771_v22, %v5774_v28 }
 0x15f   :  { %1214 = vadd.xlane.f32.xlu1 %v1213_v40  ;;  %1211 = vadd.xlane.f32.xlu0 %v1210_v45  ;;  %v1216_v40 = vsel %vm312_vm0, %v4090_v42, 0.0  ;;  %v4096_v45 = vpop.eup %4095  ;;  %v4770_v42 = vld [vmem:[%s9207_s0 + $0x200] sm:$0xff] }
 0x160   :  { %v6036_v16 = vpop.xlane.xlu1 %629  ;;  %v6038_v6 = vpop.xlane.xlu0 %626  ;;  %v752_v48 = vsub.f32 %v4770_v42, %v5776_v25  ;;  %v1225_v53 = vsel %vm312_vm0, %v4096_v45, 0.0  ;;  %4111 = vpow2.f32 %v937_v5  ;;  %v943_v22 = vmul.f32 1.442695, %v753_v8  ;;  %v4773_v5 = vld [vmem:[%s9207_s0 + $0x218] sm:$0xff] }
 0x161   :  { %9461 = vst [vmem:[#allocation105_spill] sm:$0xff] %v6036_v16  ;;  %9462 = vst [vmem:[#allocation106_spill] sm:$0xff] %v6038_v6  ;;  %v4098_v57 = vpop.eup %4097  ;;  %4113 = vpow2.f32 %v939_v31 }
 0x162   :  { %v941_v42 = vmul.f32 1.442695, %v752_v48  ;;  %v755_v48 = vsub.f32 %v4773_v5, %v5784_v32 }
 0x163   :  { %1220 = vadd.xlane.f32.xlu1 %v1219_v49  ;;  %1217 = vadd.xlane.f32.xlu0 %v1216_v40  ;;  %v1222_v49 = vsel %vm312_vm0, %v4094_v1, 0.0  ;;  %v4100_v40 = vpop.eup %4099  ;;  %v4772_v1 = vld [vmem:[%s9207_s0 + $0x210] sm:$0xff] }
 0x164   :  { %v6050_v20 = vpop.xlane.xlu1 %635  ;;  %v6052_v47 = vpop.xlane.xlu0 %632  ;;  %v754_v45 = vsub.f32 %v4772_v1, %v5786_v29  ;;  %v1231_v51 = vsel %vm312_vm0, %v4100_v40, 0.0  ;;  %4115 = vpow2.f32 %v941_v42  ;;  %v947_v5 = vmul.f32 1.442695, %v755_v48  ;;  %v4775_v42 = vld [vmem:[%s9207_s0 + $0x228] sm:$0xff] }
 0x165   :  { %9463 = vst [vmem:[#allocation107_spill] sm:$0xff] %v6050_v20  ;;  %9464 = vst [vmem:[#allocation108_spill] sm:$0xff] %v6052_v47  ;;  %v4102_v12 = vpop.eup %4101  ;;  %4117 = vpow2.f32 %v943_v22 }
 0x166   :  { %v945_v1 = vmul.f32 1.442695, %v754_v45  ;;  %v757_v45 = vsub.f32 %v4775_v42, %v5794_v36 }
 0x167   :  { %1226 = vadd.xlane.f32.xlu1 %v1225_v53  ;;  %1223 = vadd.xlane.f32.xlu0 %v1222_v49  ;;  %v1228_v53 = vsel %vm312_vm0, %v4098_v57, 0.0  ;;  %v4104_v49 = vpop.eup %4103  ;;  %v4774_v57 = vld [vmem:[%s9207_s0 + $0x220] sm:$0xff] }
 0x168   :  { %v6064_v24 = vpop.xlane.xlu1 %641  ;;  %v6066_v21 = vpop.xlane.xlu0 %638  ;;  %v756_v40 = vsub.f32 %v4774_v57, %v5796_v33  ;;  %v1237_v8 = vsel %vm312_vm0, %v4104_v49, 0.0  ;;  %4119 = vpow2.f32 %v945_v1  ;;  %v951_v42 = vmul.f32 1.442695, %v757_v45  ;;  %v4777_v1 = vld [vmem:[%s9207_s0 + $0x238] sm:$0xff] }
 0x169   :  { %9465 = vst [vmem:[#allocation109_spill] sm:$0xff] %v6064_v24  ;;  %9466 = vst [vmem:[#allocation110_spill] sm:$0xff] %v6066_v21  ;;  %v4106_v31 = vpop.eup %4105  ;;  %4121 = vpow2.f32 %v947_v5 }
 0x16a   :  { %v949_v57 = vmul.f32 1.442695, %v756_v40  ;;  %v759_v40 = vsub.f32 %v4777_v1, %v5804_v55 }
 0x16b   :  { %1232 = vadd.xlane.f32.xlu1 %v1231_v51  ;;  %1229 = vadd.xlane.f32.xlu0 %v1228_v53  ;;  %v1234_v51 = vsel %vm312_vm0, %v4102_v12, 0.0  ;;  %v4108_v53 = vpop.eup %4107  ;;  %v4776_v12 = vld [vmem:[%s9207_s0 + $0x230] sm:$0xff] }
 0x16c   :  { %v6078_v28 = vpop.xlane.xlu1 %647  ;;  %v6080_v25 = vpop.xlane.xlu0 %644  ;;  %v758_v49 = vsub.f32 %v4776_v12, %v5806_v37  ;;  %v1243_v48 = vsel %vm312_vm0, %v4108_v53, 0.0  ;;  %4123 = vpow2.f32 %v949_v57  ;;  %v955_v1 = vmul.f32 1.442695, %v759_v40  ;;  %v4779_v57 = vld [vmem:[%s9207_s0 + $0x248] sm:$0xff] }
 0x16d   :  { %9467 = vst [vmem:[#allocation111_spill] sm:$0xff] %v6078_v28  ;;  %9468 = vst [vmem:[#allocation112_spill] sm:$0xff] %v6080_v25  ;;  %v4110_v22 = vpop.eup %4109  ;;  %4125 = vpow2.f32 %v951_v42 }
 0x16e   :  { %v953_v12 = vmul.f32 1.442695, %v758_v49  ;;  %v761_v49 = vsub.f32 %v4779_v57, %v5814_v7 }
 0x16f   :  { %1238 = vadd.xlane.f32.xlu1 %v1237_v8  ;;  %1235 = vadd.xlane.f32.xlu0 %v1234_v51  ;;  %v1240_v8 = vsel %vm312_vm0, %v4106_v31, 0.0  ;;  %v4112_v51 = vpop.eup %4111  ;;  %v4778_v31 = vld [vmem:[%s9207_s0 + $0x240] sm:$0xff] }
 0x170   :  { %v6092_v32 = vpop.xlane.xlu1 %653  ;;  %v6094_v29 = vpop.xlane.xlu0 %650  ;;  %v760_v53 = vsub.f32 %v4778_v31, %v5816_v41  ;;  %v1249_v45 = vsel %vm312_vm0, %v4112_v51, 0.0  ;;  %4127 = vpow2.f32 %v953_v12  ;;  %v959_v57 = vmul.f32 1.442695, %v761_v49  ;;  %v4781_v12 = vld [vmem:[%s9207_s0 + $0x258] sm:$0xff] }
 0x171   :  { %9469 = vst [vmem:[#allocation113_spill] sm:$0xff] %v6092_v32  ;;  %9470 = vst [vmem:[#allocation114_spill] sm:$0xff] %v6094_v29  ;;  %v4114_v5 = vpop.eup %4113  ;;  %4129 = vpow2.f32 %v955_v1 }
 0x172   :  { %v957_v31 = vmul.f32 1.442695, %v760_v53  ;;  %v763_v53 = vsub.f32 %v4781_v12, %v5826_v23 }
 0x173   :  { %1244 = vadd.xlane.f32.xlu1 %v1243_v48  ;;  %1241 = vadd.xlane.f32.xlu0 %v1240_v8  ;;  %v1246_v48 = vsel %vm312_vm0, %v4110_v22, 0.0  ;;  %v4116_v8 = vpop.eup %4115  ;;  %v4780_v22 = vld [vmem:[%s9207_s0 + $0x250] sm:$0xff] }
 0x174   :  { %v6106_v36 = vpop.xlane.xlu1 %659  ;;  %v6108_v33 = vpop.xlane.xlu0 %656  ;;  %v762_v51 = vsub.f32 %v4780_v22, %v5828_v44  ;;  %v1255_v40 = vsel %vm312_vm0, %v4116_v8, 0.0  ;;  %4131 = vpow2.f32 %v957_v31  ;;  %v963_v12 = vmul.f32 1.442695, %v763_v53  ;;  %v4783_v31 = vld [vmem:[%s9207_s0 + $0x268] sm:$0xff] }
 0x175   :  { %9471 = vst [vmem:[#allocation115_spill] sm:$0xff] %v6106_v36  ;;  %9472 = vst [vmem:[#allocation116_spill] sm:$0xff] %v6108_v33  ;;  %v4118_v42 = vpop.eup %4117  ;;  %4133 = vpow2.f32 %v959_v57 }
 0x176   :  { %v961_v22 = vmul.f32 1.442695, %v762_v51  ;;  %v765_v51 = vsub.f32 %v4783_v31, %v5840_v26 }
 0x177   :  { %1250 = vadd.xlane.f32.xlu1 %v1249_v45  ;;  %1247 = vadd.xlane.f32.xlu0 %v1246_v48  ;;  %v1252_v45 = vsel %vm312_vm0, %v4114_v5, 0.0  ;;  %v4120_v48 = vpop.eup %4119  ;;  %v4782_v5 = vld [vmem:[%s9207_s0 + $0x260] sm:$0xff] }
 0x178   :  { %v6120_v55 = vpop.xlane.xlu1 %665  ;;  %v6122_v37 = vpop.xlane.xlu0 %662  ;;  %v764_v8 = vsub.f32 %v4782_v5, %v5842_v38  ;;  %v1261_v49 = vsel %vm312_vm0, %v4120_v48, 0.0  ;;  %4135 = vpow2.f32 %v961_v22  ;;  %v967_v31 = vmul.f32 1.442695, %v765_v51  ;;  %v4785_v22 = vld [vmem:[%s9207_s0 + $0x278] sm:$0xff] }
 0x179   :  { %9473 = vst [vmem:[#allocation117_spill] sm:$0xff] %v6120_v55  ;;  %9474 = vst [vmem:[#allocation118_spill] sm:$0xff] %v6122_v37  ;;  %v4122_v1 = vpop.eup %4121  ;;  %4137 = vpow2.f32 %v963_v12  ;;  %v4980_v12 = vmov 0  }
 0x17a   :  { %v965_v5 = vmul.f32 1.442695, %v764_v8  ;;  %v767_v8 = vsub.f32 %v4785_v22, %v5854_v3  ;;  %3986 = vset.pattern.permute.xlu1 %v4980_v12  ;;  %3985 = vset.pattern.permute.xlu0 %v4980_v12 }
 0x17b   :  { %1256 = vadd.xlane.f32.xlu1 %v1255_v40  ;;  %1253 = vadd.xlane.f32.xlu0 %v1252_v45  ;;  %v1258_v40 = vsel %vm312_vm0, %v4118_v42, 0.0  ;;  %v4124_v45 = vpop.eup %4123  ;;  %v4784_v42 = vld [vmem:[%s9207_s0 + $0x270] sm:$0xff] }
 0x17c   :  { %v6134_v7 = vpop.xlane.xlu1 %671  ;;  %v6136_v41 = vpop.xlane.xlu0 %668  ;;  %v766_v48 = vsub.f32 %v4784_v42, %v5856_v14  ;;  %v1267_v53 = vsel %vm312_vm0, %v4124_v45, 0.0  ;;  %4139 = vpow2.f32 %v965_v5  ;;  %v971_v5 = vmul.f32 1.442695, %v767_v8 }
 0x17d   :  { %9475 = vst [vmem:[#allocation119_spill] sm:$0xff] %v6134_v7  ;;  %9476 = vst [vmem:[#allocation120_spill] sm:$0xff] %v6136_v41  ;;  %v4126_v57 = vpop.eup %4125  ;;  %4141 = vpow2.f32 %v967_v31 }
 0x17e   :  { %v969_v42 = vmul.f32 1.442695, %v766_v48  ;;  %v4787_v48 = vld [vmem:[%s9207_s0 + $0x288] sm:$0xff] }
 0x17f   :  { %1262 = vadd.xlane.f32.xlu1 %v1261_v49  ;;  %1259 = vadd.xlane.f32.xlu0 %v1258_v40  ;;  %v1264_v49 = vsel %vm312_vm0, %v4122_v1, 0.0  ;;  %v4128_v40 = vpop.eup %4127  ;;  %v4786_v1 = vld [vmem:[%s9207_s0 + $0x280] sm:$0xff]  ;;  %v769_v3 = vsub.f32 %v4787_v48, %v5868_v39 }
 0x180   :  { %v6148_v23 = vpop.xlane.xlu1 %677  ;;  %v6150_v44 = vpop.xlane.xlu0 %674  ;;  %v768_v45 = vsub.f32 %v4786_v1, %v5870_v62  ;;  %4143 = vpow2.f32 %v969_v42  ;;  %v4789_v42 = vld [vmem:[%s9207_s0 + $0x298] sm:$0xff] }
 0x181   :  { %9477 = vst [vmem:[#allocation121_spill] sm:$0xff] %v6148_v23  ;;  %9478 = vst [vmem:[#allocation122_spill] sm:$0xff] %v6150_v44  ;;  %v4130_v51 = vpop.eup %4129  ;;  %4145 = vpow2.f32 %v971_v5  ;;  %v975_v48 = vmul.f32 1.442695, %v769_v3 }
 0x182   :  { %v4132_v22 = vpop.eup %4131  ;;  %v973_v12 = vmul.f32 1.442695, %v768_v45  ;;  %v771_v45 = vsub.f32 %v4789_v42, %v5882_v19 }
 0x183   :  { %1268 = vadd.xlane.f32.xlu1 %v1267_v53  ;;  %1265 = vadd.xlane.f32.xlu0 %v1264_v49  ;;  %v1273_v53 = vsel %vm312_vm0, %v4128_v40, 0.0  ;;  %v1270_v49 = vsel %vm312_vm0, %v4126_v57, 0.0  ;;  %v4788_v57 = vld [vmem:[%s9207_s0 + $0x290] sm:$0xff]  ;;  %v4134_v31 = vpop.eup %4133  ;;  %v1279_v8 = vsel %vm312_vm0, %v4132_v22, 0.0 }
 0x184   :  { %v6162_v26 = vpop.xlane.xlu1 %683  ;;  %v6164_v38 = vpop.xlane.xlu0 %680  ;;  %v770_v40 = vsub.f32 %v4788_v57, %v5884_v63  ;;  %4147 = vpow2.f32 %v973_v12  ;;  %v979_v42 = vmul.f32 1.442695, %v771_v45  ;;  %v4791_v12 = vld [vmem:[%s9207_s0 + $0x2a8] sm:$0xff] }
 0x185   :  { %9479 = vst [vmem:[#allocation123_spill] sm:$0xff] %v6162_v26  ;;  %9480 = vst [vmem:[#allocation124_spill] sm:$0xff] %v6164_v38  ;;  %4149 = vpow2.f32 %v975_v48 }
 0x186   :  { %v977_v57 = vmul.f32 1.442695, %v770_v40  ;;  %v773_v40 = vsub.f32 %v4791_v12, %v5896_v43 }
 0x187   :  { %1274 = vadd.xlane.f32.xlu1 %v1273_v53  ;;  %1271 = vadd.xlane.f32.xlu0 %v1270_v49  ;;  %v1276_v53 = vsel %vm312_vm0, %v4130_v51, 0.0  ;;  %v4136_v49 = vpop.eup %4135  ;;  %v4790_v51 = vld [vmem:[%s9207_s0 + $0x2a0] sm:$0xff] }
 0x188   :  { %v6176_v1 = vpop.xlane.xlu1 %1064  ;;  %v6178_v62 = vpop.xlane.xlu0 %686  ;;  %v772_v22 = vsub.f32 %v4790_v51, %v5898_v27  ;;  %v1285_v3 = vsel %vm312_vm0, %v4136_v49, 0.0  ;;  %4151 = vpow2.f32 %v977_v57  ;;  %v983_v12 = vmul.f32 1.442695, %v773_v40  ;;  %v4793_v57 = vld [vmem:[%s9207_s0 + $0x2b8] sm:$0xff] }
 0x189   :  { %9481 = vst [vmem:[#allocation125_spill] sm:$0xff] %v6178_v62  ;;  %v4138_v5 = vpop.eup %4137  ;;  %4153 = vpow2.f32 %v979_v42 }
 0x18a   :  { %v981_v51 = vmul.f32 1.442695, %v772_v22  ;;  %v775_v22 = vsub.f32 %v4793_v57, %v5910_v50 }
 0x18b   :  { %1280 = vadd.xlane.f32.xlu1 %v1279_v8  ;;  %1277 = vadd.xlane.f32.xlu0 %v1276_v53  ;;  %v1282_v8 = vsel %vm312_vm0, %v4134_v31, 0.0  ;;  %v4140_v53 = vpop.eup %4139  ;;  %v4792_v31 = vld [vmem:[%s9207_s0 + $0x2b0] sm:$0xff] }
 0x18c   :  { %v6190_v39 = vpop.xlane.xlu1 %1070  ;;  %v6192_v14 = vpop.xlane.xlu0 %1067  ;;  %v774_v49 = vsub.f32 %v4792_v31, %v5912_v30  ;;  %v1291_v45 = vsel %vm312_vm0, %v4140_v53, 0.0  ;;  %4155 = vpow2.f32 %v981_v51  ;;  %v987_v57 = vmul.f32 1.442695, %v775_v22  ;;  %v4795_v51 = vld [vmem:[%s9207_s0 + $0x2c8] sm:$0xff] }
 0x18d   :  { %v4142_v48 = vpop.eup %4141  ;;  %4157 = vpow2.f32 %v983_v12 }
 0x18e   :  { %v985_v31 = vmul.f32 1.442695, %v774_v49  ;;  %v777_v49 = vsub.f32 %v4795_v51, %v5924_v60 }
 0x18f   :  { %1286 = vadd.xlane.f32.xlu1 %v1285_v3  ;;  %1283 = vadd.xlane.f32.xlu0 %v1282_v8  ;;  %v1288_v3 = vsel %vm312_vm0, %v4138_v5, 0.0  ;;  %v4144_v8 = vpop.eup %4143  ;;  %v4794_v5 = vld [vmem:[%s9207_s0 + $0x2c0] sm:$0xff] }
 0x190   :  { %v6204_v19 = vpop.xlane.xlu1 %1076  ;;  %v6206_v63 = vpop.xlane.xlu0 %1073  ;;  %v776_v53 = vsub.f32 %v4794_v5, %v5926_v18  ;;  %v1297_v40 = vsel %vm312_vm0, %v4144_v8, 0.0  ;;  %4159 = vpow2.f32 %v985_v31  ;;  %v991_v51 = vmul.f32 1.442695, %v777_v49  ;;  %v4797_v31 = vld [vmem:[%s9207_s0 + $0x2d8] sm:$0xff] }
 0x191   :  { %v4146_v42 = vpop.eup %4145  ;;  %4161 = vpow2.f32 %v987_v57 }
 0x192   :  { %v989_v5 = vmul.f32 1.442695, %v776_v53  ;;  %v779_v53 = vsub.f32 %v4797_v31, %v5938_v13 }
 0x193   :  { %1292 = vadd.xlane.f32.xlu1 %v1291_v45  ;;  %1289 = vadd.xlane.f32.xlu0 %v1288_v3  ;;  %v1294_v45 = vsel %vm312_vm0, %v4142_v48, 0.0  ;;  %v4148_v3 = vpop.eup %4147  ;;  %v4796_v48 = vld [vmem:[%s9207_s0 + $0x2d0] sm:$0xff] }
 0x194   :  { %v6218_v43 = vpop.xlane.xlu1 %1082  ;;  %v6220_v27 = vpop.xlane.xlu0 %1079  ;;  %v778_v8 = vsub.f32 %v4796_v48, %v5940_v54  ;;  %v1303_v22 = vsel %vm312_vm0, %v4148_v3, 0.0  ;;  %4163 = vpow2.f32 %v989_v5  ;;  %v995_v31 = vmul.f32 1.442695, %v779_v53  ;;  %v4799_v5 = vld [vmem:[%s9207_s0 + $0x2e8] sm:$0xff] }
 0x195   :  { %v4150_v12 = vpop.eup %4149  ;;  %4165 = vpow2.f32 %v991_v51 }
 0x196   :  { %v993_v48 = vmul.f32 1.442695, %v778_v8  ;;  %v781_v8 = vsub.f32 %v4799_v5, %v5952_v34 }
 0x197   :  { %1298 = vadd.xlane.f32.xlu1 %v1297_v40  ;;  %1295 = vadd.xlane.f32.xlu0 %v1294_v45  ;;  %v1300_v40 = vsel %vm312_vm0, %v4146_v42, 0.0  ;;  %v4152_v45 = vpop.eup %4151  ;;  %v4798_v42 = vld [vmem:[%s9207_s0 + $0x2e0] sm:$0xff] }
 0x198   :  { %v6232_v50 = vpop.xlane.xlu1 %1088  ;;  %v6234_v30 = vpop.xlane.xlu0 %1085  ;;  %v780_v3 = vsub.f32 %v4798_v42, %v5954_v61  ;;  %v1309_v49 = vsel %vm312_vm0, %v4152_v45, 0.0  ;;  %4167 = vpow2.f32 %v993_v48  ;;  %v999_v5 = vmul.f32 1.442695, %v781_v8  ;;  %v4801_v48 = vld [vmem:[%s9207_s0 + $0x2f8] sm:$0xff] }
 0x199   :  { %v4154_v57 = vpop.eup %4153  ;;  %4169 = vpow2.f32 %v995_v31 }
 0x19a   :  { %v997_v42 = vmul.f32 1.442695, %v780_v3  ;;  %v783_v3 = vsub.f32 %v4801_v48, %v5966_v0 }
 0x19b   :  { %1304 = vadd.xlane.f32.xlu1 %v1303_v22  ;;  %1301 = vadd.xlane.f32.xlu0 %v1300_v40  ;;  %v1306_v22 = vsel %vm312_vm0, %v4150_v12, 0.0  ;;  %v4156_v40 = vpop.eup %4155  ;;  %v4800_v12 = vld [vmem:[%s9207_s0 + $0x2f0] sm:$0xff] }
 0x19c   :  { %v6246_v60 = vpop.xlane.xlu1 %1094  ;;  %v6248_v18 = vpop.xlane.xlu0 %1091  ;;  %v782_v45 = vsub.f32 %v4800_v12, %v5968_v35  ;;  %v1315_v53 = vsel %vm312_vm0, %v4156_v40, 0.0  ;;  %4171 = vpow2.f32 %v997_v42  ;;  %v1003_v48 = vmul.f32 1.442695, %v783_v3  ;;  %v4803_v42 = vld [vmem:[%s9207_s0 + $0x308] sm:$0xff] }
 0x19d   :  { %v4158_v51 = vpop.eup %4157  ;;  %4173 = vpow2.f32 %v999_v5 }
 0x19e   :  { %v1001_v12 = vmul.f32 1.442695, %v782_v45  ;;  %v785_v45 = vsub.f32 %v4803_v42, %v5980_v2 }
 0x19f   :  { %1310 = vadd.xlane.f32.xlu1 %v1309_v49  ;;  %1307 = vadd.xlane.f32.xlu0 %v1306_v22  ;;  %v1312_v49 = vsel %vm312_vm0, %v4154_v57, 0.0  ;;  %v4160_v22 = vpop.eup %4159  ;;  %v4802_v57 = vld [vmem:[%s9207_s0 + $0x300] sm:$0xff] }
 0x1a0   :  { %v6260_v13 = vpop.xlane.xlu1 %1100  ;;  %v6262_v54 = vpop.xlane.xlu0 %1097  ;;  %v784_v40 = vsub.f32 %v4802_v57, %v5982_v56  ;;  %v1321_v8 = vsel %vm312_vm0, %v4160_v22, 0.0  ;;  %4175 = vpow2.f32 %v1001_v12  ;;  %v1007_v42 = vmul.f32 1.442695, %v785_v45  ;;  %v4805_v12 = vld [vmem:[%s9207_s0 + $0x318] sm:$0xff] }
 0x1a1   :  { %v4162_v31 = vpop.eup %4161  ;;  %4177 = vpow2.f32 %v1003_v48 }
 0x1a2   :  { %v1005_v57 = vmul.f32 1.442695, %v784_v40  ;;  %v787_v40 = vsub.f32 %v4805_v12, %v5994_v11 }
 0x1a3   :  { %1316 = vadd.xlane.f32.xlu1 %v1315_v53  ;;  %1313 = vadd.xlane.f32.xlu0 %v1312_v49  ;;  %v1318_v53 = vsel %vm312_vm0, %v4158_v51, 0.0  ;;  %v4164_v49 = vpop.eup %4163  ;;  %v4804_v51 = vld [vmem:[%s9207_s0 + $0x310] sm:$0xff] }
 0x1a4   :  { %v6274_v34 = vpop.xlane.xlu1 %1106  ;;  %v6276_v61 = vpop.xlane.xlu0 %1103  ;;  %v786_v22 = vsub.f32 %v4804_v51, %v5996_v9  ;;  %v1327_v3 = vsel %vm312_vm0, %v4164_v49, 0.0  ;;  %4179 = vpow2.f32 %v1005_v57  ;;  %v1011_v12 = vmul.f32 1.442695, %v787_v40  ;;  %v4807_v57 = vld [vmem:[%s9207_s0 + $0x328] sm:$0xff] }
 0x1a5   :  { %v4166_v5 = vpop.eup %4165  ;;  %4181 = vpow2.f32 %v1007_v42 }
 0x1a6   :  { %v1009_v51 = vmul.f32 1.442695, %v786_v22  ;;  %v789_v22 = vsub.f32 %v4807_v57, %v6008_v52 }
 0x1a7   :  { %1322 = vadd.xlane.f32.xlu1 %v1321_v8  ;;  %1319 = vadd.xlane.f32.xlu0 %v1318_v53  ;;  %v1324_v8 = vsel %vm312_vm0, %v4162_v31, 0.0  ;;  %v4168_v53 = vpop.eup %4167  ;;  %v4806_v31 = vld [vmem:[%s9207_s0 + $0x320] sm:$0xff] }
 0x1a8   :  { %v6288_v0 = vpop.xlane.xlu1 %1112  ;;  %v6290_v35 = vpop.xlane.xlu0 %1109  ;;  %v788_v49 = vsub.f32 %v4806_v31, %v6010_v15  ;;  %v1333_v45 = vsel %vm312_vm0, %v4168_v53, 0.0  ;;  %4183 = vpow2.f32 %v1009_v51  ;;  %v1015_v57 = vmul.f32 1.442695, %v789_v22  ;;  %v4809_v51 = vld [vmem:[%s9207_s0 + $0x338] sm:$0xff] }
 0x1a9   :  { %v4170_v48 = vpop.eup %4169  ;;  %4185 = vpow2.f32 %v1011_v12 }
 0x1aa   :  { %v1013_v31 = vmul.f32 1.442695, %v788_v49  ;;  %v791_v49 = vsub.f32 %v4809_v51, %v6022_v10 }
 0x1ab   :  { %1328 = vadd.xlane.f32.xlu1 %v1327_v3  ;;  %1325 = vadd.xlane.f32.xlu0 %v1324_v8  ;;  %v1330_v3 = vsel %vm312_vm0, %v4166_v5, 0.0  ;;  %v4172_v8 = vpop.eup %4171  ;;  %v4808_v5 = vld [vmem:[%s9207_s0 + $0x330] sm:$0xff] }
 0x1ac   :  { %v6302_v2 = vpop.xlane.xlu1 %1118  ;;  %v6304_v56 = vpop.xlane.xlu0 %1115  ;;  %v790_v53 = vsub.f32 %v4808_v5, %v6024_v17  ;;  %v1339_v40 = vsel %vm312_vm0, %v4172_v8, 0.0  ;;  %4187 = vpow2.f32 %v1013_v31  ;;  %v1019_v51 = vmul.f32 1.442695, %v791_v49  ;;  %v4811_v31 = vld [vmem:[%s9207_s0 + $0x348] sm:$0xff] }
 0x1ad   :  { %v4174_v42 = vpop.eup %4173  ;;  %4189 = vpow2.f32 %v1015_v57 }
 0x1ae   :  { %v1017_v5 = vmul.f32 1.442695, %v790_v53  ;;  %v793_v53 = vsub.f32 %v4811_v31, %v6036_v16 }
 0x1af   :  { %1334 = vadd.xlane.f32.xlu1 %v1333_v45  ;;  %1331 = vadd.xlane.f32.xlu0 %v1330_v3  ;;  %v1336_v45 = vsel %vm312_vm0, %v4170_v48, 0.0  ;;  %v4176_v3 = vpop.eup %4175  ;;  %v4810_v48 = vld [vmem:[%s9207_s0 + $0x340] sm:$0xff] }
 0x1b0   :  { %v6316_v11 = vpop.xlane.xlu1 %1124  ;;  %v6318_v9 = vpop.xlane.xlu0 %1121  ;;  %v792_v8 = vsub.f32 %v4810_v48, %v6038_v6  ;;  %v1345_v22 = vsel %vm312_vm0, %v4176_v3, 0.0  ;;  %4191 = vpow2.f32 %v1017_v5  ;;  %v1023_v31 = vmul.f32 1.442695, %v793_v53  ;;  %v4813_v5 = vld [vmem:[%s9207_s0 + $0x358] sm:$0xff] }
 0x1b1   :  { %v4178_v12 = vpop.eup %4177  ;;  %4193 = vpow2.f32 %v1019_v51 }
 0x1b2   :  { %v1021_v48 = vmul.f32 1.442695, %v792_v8  ;;  %v795_v8 = vsub.f32 %v4813_v5, %v6050_v20 }
 0x1b3   :  { %1340 = vadd.xlane.f32.xlu1 %v1339_v40  ;;  %1337 = vadd.xlane.f32.xlu0 %v1336_v45  ;;  %v1342_v40 = vsel %vm312_vm0, %v4174_v42, 0.0  ;;  %v4180_v45 = vpop.eup %4179  ;;  %v4812_v42 = vld [vmem:[%s9207_s0 + $0x350] sm:$0xff] }
 0x1b4   :  { %v6330_v52 = vpop.xlane.xlu1 %1130  ;;  %v6332_v15 = vpop.xlane.xlu0 %1127  ;;  %v794_v3 = vsub.f32 %v4812_v42, %v6052_v47  ;;  %v1351_v49 = vsel %vm312_vm0, %v4180_v45, 0.0  ;;  %4195 = vpow2.f32 %v1021_v48  ;;  %v1027_v5 = vmul.f32 1.442695, %v795_v8  ;;  %v4815_v48 = vld [vmem:[%s9207_s0 + $0x368] sm:$0xff] }
 0x1b5   :  { %v4182_v57 = vpop.eup %4181  ;;  %4197 = vpow2.f32 %v1023_v31 }
 0x1b6   :  { %v1025_v42 = vmul.f32 1.442695, %v794_v3  ;;  %v797_v3 = vsub.f32 %v4815_v48, %v6064_v24 }
 0x1b7   :  { %1346 = vadd.xlane.f32.xlu1 %v1345_v22  ;;  %1343 = vadd.xlane.f32.xlu0 %v1342_v40  ;;  %v1348_v22 = vsel %vm312_vm0, %v4178_v12, 0.0  ;;  %v4184_v40 = vpop.eup %4183  ;;  %v4814_v12 = vld [vmem:[%s9207_s0 + $0x360] sm:$0xff] }
 0x1b8   :  { %v6344_v10 = vpop.xlane.xlu1 %1136  ;;  %v6346_v17 = vpop.xlane.xlu0 %1133  ;;  %v796_v45 = vsub.f32 %v4814_v12, %v6066_v21  ;;  %v1357_v53 = vsel %vm312_vm0, %v4184_v40, 0.0  ;;  %4199 = vpow2.f32 %v1025_v42  ;;  %v1031_v48 = vmul.f32 1.442695, %v797_v3  ;;  %v4817_v42 = vld [vmem:[%s9207_s0 + $0x378] sm:$0xff] }
 0x1b9   :  { %v4186_v51 = vpop.eup %4185  ;;  %4201 = vpow2.f32 %v1027_v5 }
 0x1ba   :  { %v1029_v12 = vmul.f32 1.442695, %v796_v45  ;;  %v799_v45 = vsub.f32 %v4817_v42, %v6078_v28 }
 0x1bb   :  { %1352 = vadd.xlane.f32.xlu1 %v1351_v49  ;;  %1349 = vadd.xlane.f32.xlu0 %v1348_v22  ;;  %v1354_v49 = vsel %vm312_vm0, %v4182_v57, 0.0  ;;  %v4188_v22 = vpop.eup %4187  ;;  %v4816_v57 = vld [vmem:[%s9207_s0 + $0x370] sm:$0xff] }
 0x1bc   :  { %v6358_v16 = vpop.xlane.xlu1 %1142  ;;  %v6360_v6 = vpop.xlane.xlu0 %1139  ;;  %v798_v40 = vsub.f32 %v4816_v57, %v6080_v25  ;;  %v1363_v8 = vsel %vm312_vm0, %v4188_v22, 0.0  ;;  %4203 = vpow2.f32 %v1029_v12  ;;  %v1035_v42 = vmul.f32 1.442695, %v799_v45  ;;  %v4819_v12 = vld [vmem:[%s9207_s0 + $0x388] sm:$0xff] }
 0x1bd   :  { %v4190_v31 = vpop.eup %4189  ;;  %4205 = vpow2.f32 %v1031_v48 }
 0x1be   :  { %v1033_v57 = vmul.f32 1.442695, %v798_v40  ;;  %v801_v40 = vsub.f32 %v4819_v12, %v6092_v32 }
 0x1bf   :  { %1358 = vadd.xlane.f32.xlu1 %v1357_v53  ;;  %1355 = vadd.xlane.f32.xlu0 %v1354_v49  ;;  %v1360_v53 = vsel %vm312_vm0, %v4186_v51, 0.0  ;;  %v4192_v49 = vpop.eup %4191  ;;  %v4818_v51 = vld [vmem:[%s9207_s0 + $0x380] sm:$0xff] }
 0x1c0   :  { %v6372_v20 = vpop.xlane.xlu1 %1148  ;;  %v6374_v47 = vpop.xlane.xlu0 %1145  ;;  %v800_v22 = vsub.f32 %v4818_v51, %v6094_v29  ;;  %v1369_v3 = vsel %vm312_vm0, %v4192_v49, 0.0  ;;  %4207 = vpow2.f32 %v1033_v57  ;;  %v1039_v12 = vmul.f32 1.442695, %v801_v40  ;;  %v4821_v57 = vld [vmem:[%s9207_s0 + $0x398] sm:$0xff] }
 0x1c1   :  { %v4194_v5 = vpop.eup %4193  ;;  %4209 = vpow2.f32 %v1035_v42 }
 0x1c2   :  { %v1037_v51 = vmul.f32 1.442695, %v800_v22  ;;  %v803_v22 = vsub.f32 %v4821_v57, %v6106_v36 }
 0x1c3   :  { %1364 = vadd.xlane.f32.xlu1 %v1363_v8  ;;  %1361 = vadd.xlane.f32.xlu0 %v1360_v53  ;;  %v1366_v8 = vsel %vm312_vm0, %v4190_v31, 0.0  ;;  %v4196_v53 = vpop.eup %4195  ;;  %v4820_v31 = vld [vmem:[%s9207_s0 + $0x390] sm:$0xff] }
 0x1c4   :  { %v6386_v24 = vpop.xlane.xlu1 %1154  ;;  %v6388_v21 = vpop.xlane.xlu0 %1151  ;;  %v802_v49 = vsub.f32 %v4820_v31, %v6108_v33  ;;  %v1375_v45 = vsel %vm312_vm0, %v4196_v53, 0.0  ;;  %4211 = vpow2.f32 %v1037_v51  ;;  %v1043_v57 = vmul.f32 1.442695, %v803_v22  ;;  %v4823_v51 = vld [vmem:[%s9207_s0 + $0x3a8] sm:$0xff] }
 0x1c5   :  { %v4198_v48 = vpop.eup %4197  ;;  %4213 = vpow2.f32 %v1039_v12 }
 0x1c6   :  { %v1041_v31 = vmul.f32 1.442695, %v802_v49  ;;  %v805_v49 = vsub.f32 %v4823_v51, %v6120_v55 }
 0x1c7   :  { %1370 = vadd.xlane.f32.xlu1 %v1369_v3  ;;  %1367 = vadd.xlane.f32.xlu0 %v1366_v8  ;;  %v1372_v3 = vsel %vm312_vm0, %v4194_v5, 0.0  ;;  %v4200_v8 = vpop.eup %4199  ;;  %v4822_v5 = vld [vmem:[%s9207_s0 + $0x3a0] sm:$0xff] }
 0x1c8   :  { %v6400_v28 = vpop.xlane.xlu1 %1160  ;;  %v6402_v25 = vpop.xlane.xlu0 %1157  ;;  %v804_v53 = vsub.f32 %v4822_v5, %v6122_v37  ;;  %v1381_v40 = vsel %vm312_vm0, %v4200_v8, 0.0  ;;  %4215 = vpow2.f32 %v1041_v31  ;;  %v1047_v51 = vmul.f32 1.442695, %v805_v49  ;;  %v4825_v31 = vld [vmem:[%s9207_s0 + $0x3b8] sm:$0xff] }
 0x1c9   :  { %v4202_v42 = vpop.eup %4201  ;;  %4217 = vpow2.f32 %v1043_v57 }
 0x1ca   :  { %v1045_v5 = vmul.f32 1.442695, %v804_v53  ;;  %v807_v53 = vsub.f32 %v4825_v31, %v6134_v7 }
 0x1cb   :  { %1376 = vadd.xlane.f32.xlu1 %v1375_v45  ;;  %1373 = vadd.xlane.f32.xlu0 %v1372_v3  ;;  %v1378_v45 = vsel %vm312_vm0, %v4198_v48, 0.0  ;;  %v4204_v3 = vpop.eup %4203  ;;  %v4824_v48 = vld [vmem:[%s9207_s0 + $0x3b0] sm:$0xff] }
 0x1cc   :  { %v6414_v32 = vpop.xlane.xlu1 %1166  ;;  %v6416_v29 = vpop.xlane.xlu0 %1163  ;;  %v806_v8 = vsub.f32 %v4824_v48, %v6136_v41  ;;  %v1387_v22 = vsel %vm312_vm0, %v4204_v3, 0.0  ;;  %4219 = vpow2.f32 %v1045_v5  ;;  %v1051_v31 = vmul.f32 1.442695, %v807_v53  ;;  %v4827_v5 = vld [vmem:[%s9207_s0 + $0x3c8] sm:$0xff] }
 0x1cd   :  { %v4206_v12 = vpop.eup %4205  ;;  %4221 = vpow2.f32 %v1047_v51 }
 0x1ce   :  { %v1049_v48 = vmul.f32 1.442695, %v806_v8  ;;  %v809_v8 = vsub.f32 %v4827_v5, %v6148_v23 }
 0x1cf   :  { %1382 = vadd.xlane.f32.xlu1 %v1381_v40  ;;  %1379 = vadd.xlane.f32.xlu0 %v1378_v45  ;;  %v1384_v40 = vsel %vm312_vm0, %v4202_v42, 0.0  ;;  %v4208_v45 = vpop.eup %4207  ;;  %v4826_v42 = vld [vmem:[%s9207_s0 + $0x3c0] sm:$0xff] }
 0x1d0   :  { %v6428_v36 = vpop.xlane.xlu1 %1172  ;;  %v6430_v33 = vpop.xlane.xlu0 %1169  ;;  %v808_v3 = vsub.f32 %v4826_v42, %v6150_v44  ;;  %v1393_v49 = vsel %vm312_vm0, %v4208_v45, 0.0  ;;  %4223 = vpow2.f32 %v1049_v48  ;;  %v1055_v5 = vmul.f32 1.442695, %v809_v8  ;;  %v4829_v48 = vld [vmem:[%s9207_s0 + $0x3d8] sm:$0xff] }
 0x1d1   :  { %v4210_v57 = vpop.eup %4209  ;;  %4225 = vpow2.f32 %v1051_v31 }
 0x1d2   :  { %v1053_v42 = vmul.f32 1.442695, %v808_v3  ;;  %v811_v3 = vsub.f32 %v4829_v48, %v6162_v26 }
 0x1d3   :  { %1388 = vadd.xlane.f32.xlu1 %v1387_v22  ;;  %1385 = vadd.xlane.f32.xlu0 %v1384_v40  ;;  %v1390_v22 = vsel %vm312_vm0, %v4206_v12, 0.0  ;;  %v4212_v40 = vpop.eup %4211  ;;  %v4828_v12 = vld [vmem:[%s9207_s0 + $0x3d0] sm:$0xff] }
 0x1d4   :  { %v6442_v55 = vpop.xlane.xlu1 %1178  ;;  %v6444_v37 = vpop.xlane.xlu0 %1175  ;;  %v810_v45 = vsub.f32 %v4828_v12, %v6164_v38  ;;  %v1399_v53 = vsel %vm312_vm0, %v4212_v40, 0.0  ;;  %4227 = vpow2.f32 %v1053_v42  ;;  %v1059_v48 = vmul.f32 1.442695, %v811_v3 }
 0x1d5   :  { %v4214_v51 = vpop.eup %4213  ;;  %4229 = vpow2.f32 %v1055_v5 }
 0x1d6   :  { %v1057_v12 = vmul.f32 1.442695, %v810_v45 }
 0x1d7   :  { %1394 = vadd.xlane.f32.xlu1 %v1393_v49  ;;  %1391 = vadd.xlane.f32.xlu0 %v1390_v22  ;;  %v1396_v49 = vsel %vm312_vm0, %v4210_v57, 0.0  ;;  %v4216_v22 = vpop.eup %4215  ;;  %v4830_v57 = vld [vmem:[%s9207_s0 + $0x3e0] sm:$0xff] }
 0x1d8   :  { %v6456_v7 = vpop.xlane.xlu1 %1184  ;;  %v6458_v41 = vpop.xlane.xlu0 %1181  ;;  %v812_v40 = vsub.f32 %v4830_v57, %v6178_v62  ;;  %v1405_v8 = vsel %vm312_vm0, %v4216_v22, 0.0  ;;  %4231 = vpow2.f32 %v1057_v12 }
 0x1d9   :  { %v4218_v31 = vpop.eup %4217  ;;  %4233 = vpow2.f32 %v1059_v48 }
 0x1da   :  { %v1061_v45 = vmul.f32 1.442695, %v812_v40  ;;  %v1408_v57 = vsel %vm312_vm0, %v4218_v31, 0.0 }
 0x1db   :  { %1400 = vadd.xlane.f32.xlu1 %v1399_v53  ;;  %1397 = vadd.xlane.f32.xlu0 %v1396_v49  ;;  %v1402_v53 = vsel %vm312_vm0, %v4214_v51, 0.0  ;;  %v4220_v49 = vpop.eup %4219 }
 0x1dc   :  { %v6470_v23 = vpop.xlane.xlu1 %1190  ;;  %v6472_v44 = vpop.xlane.xlu0 %1187  ;;  %4235 = vpow2.f32 %v1061_v45 }
 0x1dd   :  { %9482 = vst [vmem:[#allocation126_spill] sm:$0xff] %v6470_v23  ;;  %v4222_v38 = vpop.eup %4221  ;;  %v1411_v23 = vsel %vm312_vm0, %v4220_v49, 0.0  ;;  %4237 = vlog2.f32 %v6192_v14  ;;  %v239_v14 = vld [vmem:[%s9208_s1 + $0x1a0] sm:$0xff] }
 0x1de   :  { %v4224_v62 = vpop.eup %4223  ;;  %v1414_v12 = vsel %vm312_vm0, %v4222_v38, 0.0  ;;  %4239 = vlog2.f32 %v6176_v1  ;;  %v242_v1 = vld [vmem:[%s9208_s1 + $0x1b8] sm:$0xff] }
 0x1df   :  { %1406 = vadd.xlane.f32.xlu1 %v1405_v8  ;;  %1403 = vadd.xlane.f32.xlu0 %v1402_v53  ;;  %v4226_v5 = vpop.eup %4225  ;;  %v1417_v3 = vsel %vm312_vm0, %v4224_v62, 0.0  ;;  %4241 = vlog2.f32 %v6190_v39  ;;  %v241_v39 = vld [vmem:[%s9208_s1 + $0x1b0] sm:$0xff] }
 0x1e0   :  { %v6480_v26 = vpop.xlane.xlu1 %1196  ;;  %v6482_v42 = vpop.xlane.xlu0 %1193  ;;  %v1420_v49 = vsel %vm312_vm0, %v4226_v5, 0.0  ;;  %4243 = vlog2.f32 %v6204_v19 }
 0x1e1   :  { %v4228_v40 = vpop.eup %4227  ;;  %4245 = vlog2.f32 %v6206_v63  ;;  %v243_v63 = vld [vmem:[%s9208_s1 + $0x1c0] sm:$0xff] }
 0x1e2   :  { %v1423_v53 = vsel %vm312_vm0, %v4228_v40, 0.0  ;;  %4247 = vlog2.f32 %v6218_v43  ;;  %v244_v43 = vld [vmem:[%s9208_s1 + $0x1c8] sm:$0xff] }
 0x1e3   :  { %1412 = vadd.xlane.f32.xlu1 %v1411_v23  ;;  %1409 = vadd.xlane.f32.xlu0 %v1408_v57  ;;  %v4230_v23 = vpop.eup %4229  ;;  %4249 = vlog2.f32 %v6220_v27  ;;  %v9562_v27 = vld [vmem:[#allocation11_spill] sm:$0xff] }
 0x1e4   :  { %v6486_v51 = vpop.xlane.xlu1 %1202  ;;  %v6488_v22 = vpop.xlane.xlu0 %1199  ;;  %4251 = vlog2.f32 %v6232_v50 }
 0x1e5   :  { %9483 = vst [vmem:[#allocation127_spill] sm:$0xff] %v6488_v22  ;;  %v4232_v48 = vpop.eup %4231  ;;  %4253 = vlog2.f32 %v6234_v30 }
 0x1e6   :  { %v4234_v38 = vpop.eup %4233  ;;  %v1429_v57 = vsel %vm312_vm0, %v4232_v48, 0.0  ;;  %4255 = vlog2.f32 %v6246_v60  ;;  %v245_v60 = vld [vmem:[%s9208_s1 + $0x1d0] sm:$0xff] }
 0x1e7   :  { %1418 = vadd.xlane.f32.xlu1 %v1417_v3  ;;  %1415 = vadd.xlane.f32.xlu0 %v1414_v12  ;;  %v1426_v3 = vsel %vm312_vm0, %v4230_v23, 0.0  ;;  %v4236_v12 = vpop.eup %4235  ;;  %4257 = vlog2.f32 %v6248_v18  ;;  %v246_v18 = vld [vmem:[%s9208_s1 + $0x1d8] sm:$0xff] }
 0x1e8   :  { %v6492_v8 = vpop.xlane.xlu1 %1208  ;;  %v6494_v31 = vpop.xlane.xlu0 %1205  ;;  %v1435_v5 = vsel %vm312_vm0, %v4236_v12, 0.0  ;;  %4259 = vlog2.f32 %v6260_v13 }
 0x1e9   :  { %9484 = vst [vmem:[#allocation128_spill] sm:$0xff] %v6492_v8  ;;  %9485 = vst [vmem:[#allocation129_spill] sm:$0xff] %v6494_v31  ;;  %4261 = vlog2.f32 %v6262_v54 }
 0x1ea   :  { %4263 = vlog2.f32 %v6274_v34 }
 0x1eb   :  { %1424 = vadd.xlane.f32.xlu1 %v1423_v53  ;;  %1421 = vadd.xlane.f32.xlu0 %v1420_v49  ;;  %v1432_v53 = vsel %vm312_vm0, %v4234_v38, 0.0  ;;  %v188_v38 = vld [vmem:[%s9208_s1 + $0x8] sm:$0xff]  ;;  %4265 = vlog2.f32 %v6276_v61  ;;  %v247_v61 = vld [vmem:[%s9208_s1 + $0x1e0] sm:$0xff] }
 0x1ec   :  { %v6498_v45 = vpop.xlane.xlu1 %1214  ;;  %v6500_v62 = vpop.xlane.xlu0 %1211  ;;  %4267 = vlog2.f32 %v6288_v0  ;;  %v248_v0 = vld [vmem:[%s9208_s1 + $0x1e8] sm:$0xff] }
 0x1ed   :  { %9486 = vst [vmem:[#allocation130_spill] sm:$0xff] %v6498_v45  ;;  %9487 = vst [vmem:[#allocation131_spill] sm:$0xff] %v6500_v62 }
 0x1ef   :  { %1430 = vadd.xlane.f32.xlu1 %v1429_v57  ;;  %1427 = vadd.xlane.f32.xlu0 %v1426_v3 }
 0x1f0   :  { %v6504_v31 = vpop.xlane.xlu1 %1220  ;;  %v6506_v40 = vpop.xlane.xlu0 %1217 }
 0x1f1   :  { %9488 = vst [vmem:[#allocation132_spill] sm:$0xff] %v6504_v31  ;;  %9489 = vst [vmem:[#allocation133_spill] sm:$0xff] %v6506_v40 }
 0x1f3   :  { %1436 = vadd.xlane.f32.xlu1 %v1435_v5  ;;  %1433 = vadd.xlane.f32.xlu0 %v1432_v53  ;;  %v189_v53 = vld [vmem:[%s9208_s1 + $0x10] sm:$0xff] }
 0x1f4   :  { %v6510_v49 = vpop.xlane.xlu1 %1226  ;;  %v6512_v62 = vpop.xlane.xlu0 %1223 }
 0x1f5   :  { %9490 = vst [vmem:[#allocation134_spill] sm:$0xff] %v6510_v49  ;;  %9491 = vst [vmem:[#allocation135_spill] sm:$0xff] %v6512_v62 }
 0x1f8   :  { %v6514_v48 = vpop.xlane.xlu1 %1232  ;;  %v6516_v23 = vpop.xlane.xlu0 %1229 }
 0x1f9   :  { %9492 = vst [vmem:[#allocation136_spill] sm:$0xff] %v6514_v48  ;;  %9493 = vst [vmem:[#allocation137_spill] sm:$0xff] %v6516_v23 }
 0x1fc   :  { %v6518_v57 = vpop.xlane.xlu1 %1238  ;;  %v6520_v3 = vpop.xlane.xlu0 %1235 }
 0x1fd   :  { %9494 = vst [vmem:[#allocation138_spill] sm:$0xff] %v6518_v57  ;;  %9495 = vst [vmem:[#allocation139_spill] sm:$0xff] %v6520_v3  ;;  %v187_v3 = vld [vmem:[%s9208_s1] sm:$0xff] }
 0x200   :  { %v6522_v31 = vpop.xlane.xlu1 %1244  ;;  %v6524_v40 = vpop.xlane.xlu0 %1241 }
 0x201   :  { %9496 = vst [vmem:[#allocation140_spill] sm:$0xff] %v6522_v31  ;;  %9497 = vst [vmem:[#allocation141_spill] sm:$0xff] %v6524_v40 }
 0x204   :  { %v6529_v12 = vpop.xlane.xlu1 %1250  ;;  %1819 = vperm.xlu1 %3986, %v188_v38   ;;  %v6531_v5 = vpop.xlane.xlu0 %1247  ;;  %v190_v38 = vld [vmem:[%s9208_s1 + $0x18] sm:$0xff] }
 0x205   :  { %9498 = vst [vmem:[#allocation142_spill] sm:$0xff] %v6529_v12  ;;  %9499 = vst [vmem:[#allocation143_spill] sm:$0xff] %v6531_v5  ;;  %v196_v5 = vld [vmem:[%s9208_s1 + $0x48] sm:$0xff] }
 0x208   :  { %v6539_v31 = vpop.xlane.xlu1 %1256  ;;  %1822 = vperm.xlu1 %3986, %v189_v53   ;;  %v6541_v40 = vpop.xlane.xlu0 %1253  ;;  %v191_v53 = vld [vmem:[%s9208_s1 + $0x20] sm:$0xff] }
 0x209   :  { %9500 = vst [vmem:[#allocation144_spill] sm:$0xff] %v6539_v31  ;;  %9501 = vst [vmem:[#allocation145_spill] sm:$0xff] %v6541_v40  ;;  %1816 = vperm.xlu0 %3985, %v187_v3   ;;  %v198_v3 = vld [vmem:[%s9208_s1 + $0x58] sm:$0xff] }
 0x20c   :  { %v6549_v12 = vpop.xlane.xlu1 %1262  ;;  %1825 = vperm.xlu1 %3986, %v190_v38   ;;  %v6551_v57 = vpop.xlane.xlu0 %1259  ;;  %v192_v38 = vld [vmem:[%s9208_s1 + $0x28] sm:$0xff] }
 0x20d   :  { %9502 = vst [vmem:[#allocation146_spill] sm:$0xff] %v6549_v12  ;;  %9503 = vst [vmem:[#allocation147_spill] sm:$0xff] %v6551_v57  ;;  %1843 = vperm.xlu0 %3985, %v196_v5   ;;  %v200_v5 = vld [vmem:[%s9208_s1 + $0x68] sm:$0xff] }
 0x210   :  { %v6559_v40 = vpop.xlane.xlu1 %1268  ;;  %1828 = vperm.xlu1 %3986, %v191_v53   ;;  %v6561_v31 = vpop.xlane.xlu0 %1265  ;;  %v193_v53 = vld [vmem:[%s9208_s1 + $0x30] sm:$0xff] }
 0x211   :  { %9504 = vst [vmem:[#allocation148_spill] sm:$0xff] %v6559_v40  ;;  %9505 = vst [vmem:[#allocation149_spill] sm:$0xff] %v6561_v31  ;;  %1849 = vperm.xlu0 %3985, %v198_v3   ;;  %v202_v3 = vld [vmem:[%s9208_s1 + $0x78] sm:$0xff] }
 0x214   :  { %v6569_v12 = vpop.xlane.xlu1 %1274  ;;  %1831 = vperm.xlu1 %3986, %v192_v38   ;;  %v6571_v57 = vpop.xlane.xlu0 %1271  ;;  %v194_v38 = vld [vmem:[%s9208_s1 + $0x38] sm:$0xff] }
 0x215   :  { %9506 = vst [vmem:[#allocation150_spill] sm:$0xff] %v6569_v12  ;;  %9507 = vst [vmem:[#allocation151_spill] sm:$0xff] %v6571_v57  ;;  %1855 = vperm.xlu0 %3985, %v200_v5   ;;  %v204_v5 = vld [vmem:[%s9208_s1 + $0x88] sm:$0xff] }
 0x218   :  { %v6579_v31 = vpop.xlane.xlu1 %1280  ;;  %1834 = vperm.xlu1 %3986, %v193_v53   ;;  %v6581_v40 = vpop.xlane.xlu0 %1277  ;;  %v195_v53 = vld [vmem:[%s9208_s1 + $0x40] sm:$0xff] }
 0x219   :  { %9508 = vst [vmem:[#allocation152_spill] sm:$0xff] %v6579_v31  ;;  %9509 = vst [vmem:[#allocation153_spill] sm:$0xff] %v6581_v40  ;;  %1861 = vperm.xlu0 %3985, %v202_v3   ;;  %v206_v3 = vld [vmem:[%s9208_s1 + $0x98] sm:$0xff] }
 0x21c   :  { %v6589_v57 = vpop.xlane.xlu1 %1286  ;;  %1837 = vperm.xlu1 %3986, %v194_v38   ;;  %v6591_v12 = vpop.xlane.xlu0 %1283  ;;  %v197_v38 = vld [vmem:[%s9208_s1 + $0x50] sm:$0xff] }
 0x21d   :  { %9510 = vst [vmem:[#allocation154_spill] sm:$0xff] %v6589_v57  ;;  %9511 = vst [vmem:[#allocation155_spill] sm:$0xff] %v6591_v12  ;;  %1867 = vperm.xlu0 %3985, %v204_v5   ;;  %v208_v5 = vld [vmem:[%s9208_s1 + $0xa8] sm:$0xff] }
 0x220   :  { %v6599_v40 = vpop.xlane.xlu1 %1292  ;;  %1840 = vperm.xlu1 %3986, %v195_v53   ;;  %v6601_v31 = vpop.xlane.xlu0 %1289  ;;  %v199_v53 = vld [vmem:[%s9208_s1 + $0x60] sm:$0xff] }
 0x221   :  { %9512 = vst [vmem:[#allocation156_spill] sm:$0xff] %v6599_v40  ;;  %9513 = vst [vmem:[#allocation157_spill] sm:$0xff] %v6601_v31  ;;  %1873 = vperm.xlu0 %3985, %v206_v3   ;;  %v210_v3 = vld [vmem:[%s9208_s1 + $0xb8] sm:$0xff] }
 0x224   :  { %v6609_v12 = vpop.xlane.xlu1 %1298  ;;  %1846 = vperm.xlu1 %3986, %v197_v38   ;;  %v6611_v57 = vpop.xlane.xlu0 %1295  ;;  %v201_v38 = vld [vmem:[%s9208_s1 + $0x70] sm:$0xff] }
 0x225   :  { %9514 = vst [vmem:[#allocation158_spill] sm:$0xff] %v6609_v12  ;;  %9515 = vst [vmem:[#allocation159_spill] sm:$0xff] %v6611_v57  ;;  %1879 = vperm.xlu0 %3985, %v208_v5   ;;  %v212_v5 = vld [vmem:[%s9208_s1 + $0xc8] sm:$0xff] }
 0x228   :  { %v6619_v31 = vpop.xlane.xlu1 %1304  ;;  %1852 = vperm.xlu1 %3986, %v199_v53   ;;  %v6621_v40 = vpop.xlane.xlu0 %1301  ;;  %v203_v53 = vld [vmem:[%s9208_s1 + $0x80] sm:$0xff] }
 0x229   :  { %9516 = vst [vmem:[#allocation160_spill] sm:$0xff] %v6619_v31  ;;  %9517 = vst [vmem:[#allocation161_spill] sm:$0xff] %v6621_v40  ;;  %1885 = vperm.xlu0 %3985, %v210_v3   ;;  %v214_v3 = vld [vmem:[%s9208_s1 + $0xd8] sm:$0xff] }
 0x22c   :  { %v6629_v57 = vpop.xlane.xlu1 %1310  ;;  %1858 = vperm.xlu1 %3986, %v201_v38   ;;  %v6631_v12 = vpop.xlane.xlu0 %1307  ;;  %v205_v38 = vld [vmem:[%s9208_s1 + $0x90] sm:$0xff] }
 0x22d   :  { %9518 = vst [vmem:[#allocation162_spill] sm:$0xff] %v6629_v57  ;;  %9519 = vst [vmem:[#allocation163_spill] sm:$0xff] %v6631_v12  ;;  %1891 = vperm.xlu0 %3985, %v212_v5   ;;  %v216_v5 = vld [vmem:[%s9208_s1 + $0xe8] sm:$0xff] }
 0x230   :  { %v6639_v40 = vpop.xlane.xlu1 %1316  ;;  %1864 = vperm.xlu1 %3986, %v203_v53   ;;  %v6641_v31 = vpop.xlane.xlu0 %1313  ;;  %v207_v53 = vld [vmem:[%s9208_s1 + $0xa0] sm:$0xff] }
 0x231   :  { %9520 = vst [vmem:[#allocation164_spill] sm:$0xff] %v6639_v40  ;;  %9521 = vst [vmem:[#allocation165_spill] sm:$0xff] %v6641_v31  ;;  %1897 = vperm.xlu0 %3985, %v214_v3   ;;  %v218_v3 = vld [vmem:[%s9208_s1 + $0xf8] sm:$0xff] }
 0x234   :  { %v6649_v12 = vpop.xlane.xlu1 %1322  ;;  %1870 = vperm.xlu1 %3986, %v205_v38   ;;  %v6651_v57 = vpop.xlane.xlu0 %1319  ;;  %v209_v38 = vld [vmem:[%s9208_s1 + $0xb0] sm:$0xff] }
 0x235   :  { %9522 = vst [vmem:[#allocation166_spill] sm:$0xff] %v6649_v12  ;;  %9523 = vst [vmem:[#allocation167_spill] sm:$0xff] %v6651_v57  ;;  %1903 = vperm.xlu0 %3985, %v216_v5   ;;  %v220_v5 = vld [vmem:[%s9208_s1 + $0x108] sm:$0xff] }
 0x238   :  { %v6659_v31 = vpop.xlane.xlu1 %1328  ;;  %1876 = vperm.xlu1 %3986, %v207_v53   ;;  %v6661_v40 = vpop.xlane.xlu0 %1325  ;;  %v211_v53 = vld [vmem:[%s9208_s1 + $0xc0] sm:$0xff] }
 0x239   :  { %9524 = vst [vmem:[#allocation168_spill] sm:$0xff] %v6659_v31  ;;  %9525 = vst [vmem:[#allocation169_spill] sm:$0xff] %v6661_v40  ;;  %1909 = vperm.xlu0 %3985, %v218_v3   ;;  %v222_v3 = vld [vmem:[%s9208_s1 + $0x118] sm:$0xff] }
 0x23c   :  { %v6669_v57 = vpop.xlane.xlu1 %1334  ;;  %1882 = vperm.xlu1 %3986, %v209_v38   ;;  %v6671_v12 = vpop.xlane.xlu0 %1331  ;;  %v213_v38 = vld [vmem:[%s9208_s1 + $0xd0] sm:$0xff] }
 0x23d   :  { %9526 = vst [vmem:[#allocation170_spill] sm:$0xff] %v6669_v57  ;;  %9527 = vst [vmem:[#allocation171_spill] sm:$0xff] %v6671_v12  ;;  %1915 = vperm.xlu0 %3985, %v220_v5   ;;  %v224_v5 = vld [vmem:[%s9208_s1 + $0x128] sm:$0xff] }
 0x240   :  { %v6679_v40 = vpop.xlane.xlu1 %1340  ;;  %1888 = vperm.xlu1 %3986, %v211_v53   ;;  %v6681_v31 = vpop.xlane.xlu0 %1337  ;;  %v215_v53 = vld [vmem:[%s9208_s1 + $0xe0] sm:$0xff] }
 0x241   :  { %9528 = vst [vmem:[#allocation172_spill] sm:$0xff] %v6679_v40  ;;  %9529 = vst [vmem:[#allocation173_spill] sm:$0xff] %v6681_v31  ;;  %1921 = vperm.xlu0 %3985, %v222_v3   ;;  %v226_v3 = vld [vmem:[%s9208_s1 + $0x138] sm:$0xff] }
 0x244   :  { %v6689_v12 = vpop.xlane.xlu1 %1346  ;;  %1894 = vperm.xlu1 %3986, %v213_v38   ;;  %v6691_v57 = vpop.xlane.xlu0 %1343  ;;  %v217_v38 = vld [vmem:[%s9208_s1 + $0xf0] sm:$0xff] }
 0x245   :  { %9530 = vst [vmem:[#allocation174_spill] sm:$0xff] %v6689_v12  ;;  %9531 = vst [vmem:[#allocation175_spill] sm:$0xff] %v6691_v57  ;;  %1927 = vperm.xlu0 %3985, %v224_v5   ;;  %v228_v5 = vld [vmem:[%s9208_s1 + $0x148] sm:$0xff] }
 0x248   :  { %v6699_v31 = vpop.xlane.xlu1 %1352  ;;  %1900 = vperm.xlu1 %3986, %v215_v53   ;;  %v6701_v40 = vpop.xlane.xlu0 %1349  ;;  %v219_v53 = vld [vmem:[%s9208_s1 + $0x100] sm:$0xff] }
 0x249   :  { %9532 = vst [vmem:[#allocation176_spill] sm:$0xff] %v6699_v31  ;;  %9533 = vst [vmem:[#allocation177_spill] sm:$0xff] %v6701_v40  ;;  %1933 = vperm.xlu0 %3985, %v226_v3   ;;  %v221_v31 = vld [vmem:[%s9208_s1 + $0x110] sm:$0xff] }
 0x24c   :  { %v6709_v57 = vpop.xlane.xlu1 %1358  ;;  %1906 = vperm.xlu1 %3986, %v217_v38   ;;  %v6711_v12 = vpop.xlane.xlu0 %1355 }
 0x24d   :  { %9534 = vst [vmem:[#allocation178_spill] sm:$0xff] %v6709_v57  ;;  %9535 = vst [vmem:[#allocation179_spill] sm:$0xff] %v6711_v12  ;;  %1939 = vperm.xlu0 %3985, %v228_v5   ;;  %v223_v5 = vld [vmem:[%s9208_s1 + $0x120] sm:$0xff] }
 0x250   :  { %v6716_v40 = vpop.xlane.xlu1 %1364  ;;  %1912 = vperm.xlu1 %3986, %v219_v53   ;;  %v6718_v3 = vpop.xlane.xlu0 %1361  ;;  %v225_v53 = vld [vmem:[%s9208_s1 + $0x130] sm:$0xff] }
 0x251   :  { %9536 = vst [vmem:[#allocation180_spill] sm:$0xff] %v6716_v40  ;;  %9537 = vst [vmem:[#allocation181_spill] sm:$0xff] %v6718_v3 }
 0x254   :  { %v6723_v23 = vpop.xlane.xlu1 %1370  ;;  %1918 = vperm.xlu1 %3986, %v221_v31   ;;  %v6725_v38 = vpop.xlane.xlu0 %1367  ;;  %v227_v31 = vld [vmem:[%s9208_s1 + $0x140] sm:$0xff] }
 0x255   :  { %9538 = vst [vmem:[#allocation182_spill] sm:$0xff] %v6723_v23  ;;  %9539 = vst [vmem:[#allocation183_spill] sm:$0xff] %v6725_v38 }
 0x258   :  { %v6730_v12 = vpop.xlane.xlu1 %1376  ;;  %1924 = vperm.xlu1 %3986, %v223_v5   ;;  %v6732_v40 = vpop.xlane.xlu0 %1373 }
 0x259   :  { %9540 = vst [vmem:[#allocation184_spill] sm:$0xff] %v6730_v12  ;;  %9541 = vst [vmem:[#allocation185_spill] sm:$0xff] %v6732_v40 }
 0x25c   :  { %v6737_v3 = vpop.xlane.xlu1 %1382  ;;  %1930 = vperm.xlu1 %3986, %v225_v53   ;;  %v6739_v23 = vpop.xlane.xlu0 %1379 }
 0x25d   :  { %9542 = vst [vmem:[#allocation186_spill] sm:$0xff] %v6737_v3  ;;  %9543 = vst [vmem:[#allocation187_spill] sm:$0xff] %v6739_v23 }
 0x260   :  { %v6744_v38 = vpop.xlane.xlu1 %1388  ;;  %1936 = vperm.xlu1 %3986, %v227_v31   ;;  %v6746_v12 = vpop.xlane.xlu0 %1385 }
 0x261   :  { %9544 = vst [vmem:[#allocation188_spill] sm:$0xff] %v6744_v38  ;;  %9545 = vst [vmem:[#allocation189_spill] sm:$0xff] %v6746_v12 }
 0x264   :  { %v6748_v5 = vpop.xlane.xlu1 %1394  ;;  %v6750_v40 = vpop.xlane.xlu0 %1391 }
 0x265   :  { %9546 = vst [vmem:[#allocation190_spill] sm:$0xff] %v6748_v5  ;;  %9547 = vst [vmem:[#allocation191_spill] sm:$0xff] %v6750_v40 }
 0x268   :  { %v6752_v57 = vpop.xlane.xlu1 %1400  ;;  %v6754_v48 = vpop.xlane.xlu0 %1397 }
 0x269   :  { %9548 = vst [vmem:[#allocation192_spill] sm:$0xff] %v6752_v57  ;;  %9549 = vst [vmem:[#allocation193_spill] sm:$0xff] %v6754_v48  ;;  %v1813_v57 = vlaneseq }
 0x26c   :  { %v6756_v53 = vpop.xlane.xlu1 %1406  ;;  %v6758_v23 = vpop.xlane.xlu0 %1403 }
 0x26d   :  { %9550 = vst [vmem:[#allocation194_spill] sm:$0xff] %v6756_v53  ;;  %9551 = vst [vmem:[#allocation195_spill] sm:$0xff] %v6758_v23  ;;  %v6778_v23 = vand.u32 127, %v1813_v57  ;;  %v4832_v57 = vld [vmem:[%s9207_s0] sm:$0xff] }
 0x270   :  { %v6760_v3 = vpop.xlane.xlu1 %1412  ;;  %v6762_v62 = vpop.xlane.xlu0 %1409 }
 0x271   :  { %9552 = vst [vmem:[#allocation196_spill] sm:$0xff] %v6760_v3  ;;  %9553 = vst [vmem:[#allocation197_spill] sm:$0xff] %v6762_v62 }
 0x274   :  { %v6764_v38 = vpop.xlane.xlu1 %1418  ;;  %v6766_v31 = vpop.xlane.xlu0 %1415 }
 0x275   :  { %9554 = vst [vmem:[#allocation198_spill] sm:$0xff] %v6764_v38  ;;  %9555 = vst [vmem:[#allocation199_spill] sm:$0xff] %v6766_v31 }
 0x278   :  { %v6768_v12 = vpop.xlane.xlu1 %1424  ;;  %v6770_v5 = vpop.xlane.xlu0 %1421 }
 0x279   :  { %9556 = vst [vmem:[#allocation200_spill] sm:$0xff] %v6768_v12  ;;  %9557 = vst [vmem:[#allocation201_spill] sm:$0xff] %v6770_v5  ;;  %v4831_v12 = vld [vmem:[%s9207_s0 + $0x8] sm:$0xff] }
 0x27c   :  { %v6772_v40 = vpop.xlane.xlu1 %1430  ;;  %v6774_v48 = vpop.xlane.xlu0 %1427 }
 0x27d   :  { %9558 = vst [vmem:[#allocation202_spill] sm:$0xff] %v6772_v40  ;;  %9559 = vst [vmem:[#allocation203_spill] sm:$0xff] %v6774_v48 }
 0x280   :  { %v6776_v53 = vpop.xlane.xlu1 %1436  ;;  %v6780_v3 = vpop.xlane.xlu0 %1433 }
 0x281   :  { %9560 = vst [vmem:[#allocation204_spill] sm:$0xff] %v6776_v53  ;;  %9561 = vst [vmem:[#allocation205_spill] sm:$0xff] %v6780_v3 }
 0x284   :  { %v1820_v62 = vpop.permute.xlu1 %1819 }
 0x285   :  { %vm2191_vm1 = vcmp.eq.s32.totalorder %v6778_v23, %v1820_v62 }
 0x286   :  { %v2316_v31 = vsel %vm2191_vm1, %v4831_v12, 0.0  ;;  %v4833_v12 = vld [vmem:[%s9207_s0 + $0x10] sm:$0xff] }
 0x287   :  { %v2443_v5 = vsel %vm312_vm0, %v2316_v31, 0.0 }
 0x288   :  { %2444 = vadd.xlane.f32.xlu1 %v2443_v5  ;;  %v1823_v40 = vpop.permute.xlu1 %1822  ;;  %v1817_v38 = vpop.permute.xlu0 %1816 }
 0x289   :  { %vm2192_vm2 = vcmp.eq.s32.totalorder %v6778_v23, %v1823_v40  ;;  %vm2190_vm3 = vcmp.eq.s32.totalorder %v6778_v23, %v1817_v38 }
 0x28a   :  { %v2315_v3 = vsel %vm2190_vm3, %v4832_v57, 0.0  ;;  %v2317_v5 = vsel %vm2192_vm2, %v4833_v12, 0.0  ;;  %v4834_v57 = vld [vmem:[%s9207_s0 + $0x18] sm:$0xff] }
 0x28b   :  { %v2440_v62 = vsel %vm312_vm0, %v2315_v3, 0.0  ;;  %v2446_v40 = vsel %vm312_vm0, %v2317_v5, 0.0 }
 0x28c   :  { %v1826_v53 = vpop.permute.xlu1 %1825  ;;  %2441 = vadd.xlane.f32.xlu0 %v2440_v62  ;;  %v1844_v48 = vpop.permute.xlu0 %1843  ;;  %v4835_v62 = vld [vmem:[%s9207_s0 + $0x20] sm:$0xff] }
 0x28d   :  { %vm2193_vm4 = vcmp.eq.s32.totalorder %v6778_v23, %v1826_v53  ;;  %vm2199_vm8 = vcmp.eq.s32.totalorder %v6778_v23, %v1844_v48  ;;  %v4840_v48 = vld [vmem:[%s9207_s0 + $0x40] sm:$0xff] }
 0x28e   :  { %v2318_v3 = vsel %vm2193_vm4, %v4834_v57, 0.0  ;;  %v4836_v57 = vld [vmem:[%s9207_s0 + $0x28] sm:$0xff] }
 0x28f   :  { %v2449_v53 = vsel %vm312_vm0, %v2318_v3, 0.0 }
 0x290   :  { %v1829_v38 = vpop.permute.xlu1 %1828  ;;  %2447 = vadd.xlane.f32.xlu0 %v2446_v40  ;;  %v1850_v31 = vpop.permute.xlu0 %1849 }
 0x291   :  { %vm2194_vm5 = vcmp.eq.s32.totalorder %v6778_v23, %v1829_v38  ;;  %vm2201_vm10 = vcmp.eq.s32.totalorder %v6778_v23, %v1850_v31 }
 0x292   :  { %v2319_v49 = vsel %vm2194_vm5, %v4835_v62, 0.0 }
 0x293   :  { %v2452_v12 = vsel %vm312_vm0, %v2319_v49, 0.0  ;;  %v4837_v49 = vld [vmem:[%s9207_s0 + $0x30] sm:$0xff] }
 0x294   :  { %2453 = vadd.xlane.f32.xlu1 %v2452_v12  ;;  %v1832_v5 = vpop.permute.xlu1 %1831  ;;  %2450 = vadd.xlane.f32.xlu0 %v2449_v53  ;;  %v1856_v40 = vpop.permute.xlu0 %1855 }
 0x295   :  { %vm2195_vm6 = vcmp.eq.s32.totalorder %v6778_v23, %v1832_v5  ;;  %vm2203_vm12 = vcmp.eq.s32.totalorder %v6778_v23, %v1856_v40 }
 0x296   :  { %v2320_v38 = vsel %vm2195_vm6, %v4836_v57, 0.0 }
 0x297   :  { %v2455_v45 = vsel %vm312_vm0, %v2320_v38, 0.0 }
 0x298   :  { %v1835_v8 = vpop.permute.xlu1 %1834  ;;  %2456 = vadd.xlane.f32.xlu0 %v2455_v45  ;;  %v1862_v62 = vpop.permute.xlu0 %1861  ;;  %v4838_v45 = vld [vmem:[%s9207_s0 + $0x38] sm:$0xff] }
 0x299   :  { %vm2196_vm7 = vcmp.eq.s32.totalorder %v6778_v23, %v1835_v8  ;;  %vm2205_vm14 = vcmp.eq.s32.totalorder %v6778_v23, %v1862_v62 }
 0x29a   :  { %v2321_v3 = vsel %vm2196_vm7, %v4837_v49, 0.0  ;;  %v4839_v49 = vld [vmem:[%s9207_s0 + $0x48] sm:$0xff] }
 0x29b   :  { %v2458_v12 = vsel %vm312_vm0, %v2321_v3, 0.0  ;;  %v2324_v3 = vsel %vm2199_vm8, %v4839_v49, 0.0  ;;  %v4841_v49 = vld [vmem:[%s9207_s0 + $0x58] sm:$0xff] }
 0x29c   :  { %2459 = vadd.xlane.f32.xlu1 %v2458_v12  ;;  %v1838_v53 = vpop.permute.xlu1 %1837  ;;  %v1868_v5 = vpop.permute.xlu0 %1867  ;;  %v2326_v31 = vsel %vm2201_vm10, %v4841_v49, 0.0  ;;  %v4843_v49 = vld [vmem:[%s9207_s0 + $0x68] sm:$0xff] }
 0x29d   :  { %vm2197_vm9 = vcmp.eq.s32.totalorder %v6778_v23, %v1838_v53  ;;  %v2328_v40 = vsel %vm2203_vm12, %v4843_v49, 0.0  ;;  %v4845_v49 = vld [vmem:[%s9207_s0 + $0x78] sm:$0xff]  ;;  %vm2207_vm1 = vcmp.eq.s32.totalorder %v6778_v23, %v1868_v5 }
 0x29e   :  { %v2322_v57 = vsel %vm2197_vm9, %v4838_v45, 0.0  ;;  %v2467_v45 = vsel %vm312_vm0, %v2324_v3, 0.0  ;;  %v2330_v62 = vsel %vm2205_vm14, %v4845_v49, 0.0  ;;  %v4847_v49 = vld [vmem:[%s9207_s0 + $0x88] sm:$0xff] }
 0x29f   :  { %v2461_v8 = vsel %vm312_vm0, %v2322_v57, 0.0  ;;  %v2332_v5 = vsel %vm2207_vm1, %v4847_v49, 0.0 }
 0x2a0   :  { %v1841_v38 = vpop.permute.xlu1 %1840  ;;  %2462 = vadd.xlane.f32.xlu0 %v2461_v8  ;;  %v1874_v22 = vpop.permute.xlu0 %1873 }
 0x2a1   :  { %vm2198_vm11 = vcmp.eq.s32.totalorder %v6778_v23, %v1841_v38  ;;  %v4842_v38 = vld [vmem:[%s9207_s0 + $0x50] sm:$0xff]  ;;  %vm2209_vm3 = vcmp.eq.s32.totalorder %v6778_v23, %v1874_v22 }
 0x2a2   :  { %v2323_v12 = vsel %vm2198_vm11, %v4840_v48, 0.0 }
 0x2a3   :  { %v2464_v53 = vsel %vm312_vm0, %v2323_v12, 0.0  ;;  %v2473_v12 = vsel %vm312_vm0, %v2326_v31, 0.0 }
 0x2a4   :  { %2465 = vadd.xlane.f32.xlu1 %v2464_v53  ;;  %v1847_v57 = vpop.permute.xlu1 %1846  ;;  %2468 = vadd.xlane.f32.xlu0 %v2467_v45  ;;  %v1880_v8 = vpop.permute.xlu0 %1879 }
 0x2a5   :  { %vm2200_vm13 = vcmp.eq.s32.totalorder %v6778_v23, %v1847_v57  ;;  %v4844_v57 = vld [vmem:[%s9207_s0 + $0x60] sm:$0xff]  ;;  %vm2211_vm5 = vcmp.eq.s32.totalorder %v6778_v23, %v1880_v8 }
 0x2a6   :  { %v2325_v48 = vsel %vm2200_vm13, %v4842_v38, 0.0 }
 0x2a7   :  { %v2470_v3 = vsel %vm312_vm0, %v2325_v48, 0.0  ;;  %v2479_v48 = vsel %vm312_vm0, %v2328_v40, 0.0 }
 0x2a8   :  { %2471 = vadd.xlane.f32.xlu1 %v2470_v3  ;;  %v1853_v53 = vpop.permute.xlu1 %1852  ;;  %2474 = vadd.xlane.f32.xlu0 %v2473_v12  ;;  %v1886_v45 = vpop.permute.xlu0 %1885 }
 0x2a9   :  { %vm2202_vm15 = vcmp.eq.s32.totalorder %v6778_v23, %v1853_v53  ;;  %v4846_v53 = vld [vmem:[%s9207_s0 + $0x70] sm:$0xff]  ;;  %vm2213_vm7 = vcmp.eq.s32.totalorder %v6778_v23, %v1886_v45 }
 0x2aa   :  { %v2327_v38 = vsel %vm2202_vm15, %v4844_v57, 0.0 }
 0x2ab   :  { %v2476_v31 = vsel %vm312_vm0, %v2327_v38, 0.0  ;;  %v2485_v38 = vsel %vm312_vm0, %v2330_v62, 0.0 }
 0x2ac   :  { %2477 = vadd.xlane.f32.xlu1 %v2476_v31  ;;  %v1859_v3 = vpop.permute.xlu1 %1858  ;;  %2480 = vadd.xlane.f32.xlu0 %v2479_v48  ;;  %v1892_v12 = vpop.permute.xlu0 %1891 }
 0x2ad   :  { %vm2204_vm2 = vcmp.eq.s32.totalorder %v6778_v23, %v1859_v3  ;;  %v4848_v3 = vld [vmem:[%s9207_s0 + $0x80] sm:$0xff]  ;;  %vm2215_vm9 = vcmp.eq.s32.totalorder %v6778_v23, %v1892_v12 }
 0x2ae   :  { %v2329_v57 = vsel %vm2204_vm2, %v4846_v53, 0.0 }
 0x2af   :  { %v2482_v40 = vsel %vm312_vm0, %v2329_v57, 0.0  ;;  %v2491_v57 = vsel %vm312_vm0, %v2332_v5, 0.0 }
 0x2b0   :  { %2483 = vadd.xlane.f32.xlu1 %v2482_v40  ;;  %v1865_v31 = vpop.permute.xlu1 %1864  ;;  %2486 = vadd.xlane.f32.xlu0 %v2485_v38  ;;  %v1898_v48 = vpop.permute.xlu0 %1897  ;;  %v4849_v38 = vld [vmem:[%s9207_s0 + $0x98] sm:$0xff] }
 0x2b1   :  { %vm2206_vm4 = vcmp.eq.s32.totalorder %v6778_v23, %v1865_v31  ;;  %v2334_v49 = vsel %vm2209_vm3, %v4849_v38, 0.0  ;;  %v4850_v31 = vld [vmem:[%s9207_s0 + $0x90] sm:$0xff]  ;;  %vm2217_vm11 = vcmp.eq.s32.totalorder %v6778_v23, %v1898_v48 }
 0x2b2   :  { %v2331_v53 = vsel %vm2206_vm4, %v4848_v3, 0.0 }
 0x2b3   :  { %v2488_v62 = vsel %vm312_vm0, %v2331_v53, 0.0  ;;  %v2497_v53 = vsel %vm312_vm0, %v2334_v49, 0.0 }
 0x2b4   :  { %2489 = vadd.xlane.f32.xlu1 %v2488_v62  ;;  %v1871_v40 = vpop.permute.xlu1 %1870  ;;  %2492 = vadd.xlane.f32.xlu0 %v2491_v57  ;;  %v1904_v22 = vpop.permute.xlu0 %1903  ;;  %v4851_v57 = vld [vmem:[%s9207_s0 + $0xa8] sm:$0xff] }
 0x2b5   :  { %vm2208_vm6 = vcmp.eq.s32.totalorder %v6778_v23, %v1871_v40  ;;  %v2336_v8 = vsel %vm2211_vm5, %v4851_v57, 0.0  ;;  %v4852_v40 = vld [vmem:[%s9207_s0 + $0xa0] sm:$0xff]  ;;  %vm2219_vm13 = vcmp.eq.s32.totalorder %v6778_v23, %v1904_v22 }
 0x2b6   :  { %v2333_v3 = vsel %vm2208_vm6, %v4850_v31, 0.0  ;;  %v2503_v49 = vsel %vm312_vm0, %v2336_v8, 0.0 }
 0x2b7   :  { %v2494_v5 = vsel %vm312_vm0, %v2333_v3, 0.0 }
 0x2b8   :  { %2495 = vadd.xlane.f32.xlu1 %v2494_v5  ;;  %v1877_v62 = vpop.permute.xlu1 %1876  ;;  %2498 = vadd.xlane.f32.xlu0 %v2497_v53  ;;  %v1910_v3 = vpop.permute.xlu0 %1909  ;;  %v4853_v53 = vld [vmem:[%s9207_s0 + $0xb8] sm:$0xff] }
 0x2b9   :  { %vm2210_vm8 = vcmp.eq.s32.totalorder %v6778_v23, %v1877_v62  ;;  %v2338_v45 = vsel %vm2213_vm7, %v4853_v53, 0.0  ;;  %v4854_v62 = vld [vmem:[%s9207_s0 + $0xb0] sm:$0xff]  ;;  %vm2221_vm15 = vcmp.eq.s32.totalorder %v6778_v23, %v1910_v3 }
 0x2ba   :  { %v2335_v38 = vsel %vm2210_vm8, %v4852_v40, 0.0  ;;  %v2509_v40 = vsel %vm312_vm0, %v2338_v45, 0.0 }
 0x2bb   :  { %v2500_v31 = vsel %vm312_vm0, %v2335_v38, 0.0 }
 0x2bc   :  { %2501 = vadd.xlane.f32.xlu1 %v2500_v31  ;;  %v1883_v5 = vpop.permute.xlu1 %1882  ;;  %2504 = vadd.xlane.f32.xlu0 %v2503_v49  ;;  %v4855_v31 = vld [vmem:[%s9207_s0 + $0xc8] sm:$0xff]  ;;  %v1916_v12 = vpop.permute.xlu0 %1915 }
 0x2bd   :  { %vm2212_vm10 = vcmp.eq.s32.totalorder %v6778_v23, %v1883_v5  ;;  %v2340_v49 = vsel %vm2215_vm9, %v4855_v31, 0.0  ;;  %v4856_v5 = vld [vmem:[%s9207_s0 + $0xc0] sm:$0xff]  ;;  %vm2223_vm2 = vcmp.eq.s32.totalorder %v6778_v23, %v1916_v12 }
 0x2be   :  { %v2337_v57 = vsel %vm2212_vm10, %v4854_v62, 0.0  ;;  %v2515_v62 = vsel %vm312_vm0, %v2340_v49, 0.0 }
 0x2bf   :  { %v2506_v8 = vsel %vm312_vm0, %v2337_v57, 0.0 }
 0x2c0   :  { %2507 = vadd.xlane.f32.xlu1 %v2506_v8  ;;  %v1889_v38 = vpop.permute.xlu1 %1888  ;;  %2510 = vadd.xlane.f32.xlu0 %v2509_v40  ;;  %v4857_v8 = vld [vmem:[%s9207_s0 + $0xd8] sm:$0xff]  ;;  %v4858_v40 = vld [vmem:[%s9207_s0 + $0xd0] sm:$0xff] }
 0x2c1   :  { %vm2214_vm12 = vcmp.eq.s32.totalorder %v6778_v23, %v1889_v38  ;;  %v2342_v48 = vsel %vm2217_vm11, %v4857_v8, 0.0 }
 0x2c2   :  { %v2339_v53 = vsel %vm2214_vm12, %v4856_v5, 0.0  ;;  %v2521_v49 = vsel %vm312_vm0, %v2342_v48, 0.0  ;;  %v1922_v5 = vpop.permute.xlu0 %1921 }
 0x2c3   :  { %v2512_v45 = vsel %vm312_vm0, %v2339_v53, 0.0  ;;  %vm2225_vm4 = vcmp.eq.s32.totalorder %v6778_v23, %v1922_v5 }
 0x2c4   :  { %2513 = vadd.xlane.f32.xlu1 %v2512_v45  ;;  %v1895_v57 = vpop.permute.xlu1 %1894  ;;  %2516 = vadd.xlane.f32.xlu0 %v2515_v62  ;;  %v4859_v45 = vld [vmem:[%s9207_s0 + $0xe8] sm:$0xff]  ;;  %v4860_v62 = vld [vmem:[%s9207_s0 + $0xe0] sm:$0xff] }
 0x2c5   :  { %vm2216_vm14 = vcmp.eq.s32.totalorder %v6778_v23, %v1895_v57  ;;  %v2344_v22 = vsel %vm2219_vm13, %v4859_v45, 0.0  ;;  %vm3691_vm13 = vcmask 7168  }
 0x2c6   :  { %v2341_v38 = vsel %vm2216_vm14, %v4858_v40, 0.0  ;;  %v2527_v48 = vsel %vm312_vm0, %v2344_v22, 0.0  ;;  %v1928_v3 = vpop.permute.xlu0 %1927 }
 0x2c7   :  { %v2518_v31 = vsel %vm312_vm0, %v2341_v38, 0.0  ;;  %v4861_v38 = vld [vmem:[%s9207_s0 + $0xf8] sm:$0xff]  ;;  %vm2227_vm7 = vcmp.eq.s32.totalorder %v6778_v23, %v1928_v3  ;;  %v4869_v3 = vld [vmem:[%s9207_s0 + $0x130] sm:$0xff] }
 0x2c8   :  { %2519 = vadd.xlane.f32.xlu1 %v2518_v31  ;;  %v1901_v53 = vpop.permute.xlu1 %1900  ;;  %2522 = vadd.xlane.f32.xlu0 %v2521_v49  ;;  %v2346_v31 = vsel %vm2221_vm15, %v4861_v38, 0.0  ;;  %v4862_v49 = vld [vmem:[%s9207_s0 + $0xf0] sm:$0xff] }
 0x2c9   :  { %vm2218_vm1 = vcmp.eq.s32.totalorder %v6778_v23, %v1901_v53  ;;  %v2533_v22 = vsel %vm312_vm0, %v2346_v31, 0.0 }
 0x2ca   :  { %v2343_v57 = vsel %vm2218_vm1, %v4860_v62, 0.0  ;;  %v1934_v31 = vpop.permute.xlu0 %1933 }
 0x2cb   :  { %v2524_v8 = vsel %vm312_vm0, %v2343_v57, 0.0  ;;  %v4863_v57 = vld [vmem:[%s9207_s0 + $0x108] sm:$0xff]  ;;  %vm2229_vm9 = vcmp.eq.s32.totalorder %v6778_v23, %v1934_v31  ;;  %v4870_v31 = vld [vmem:[%s9207_s0 + $0x138] sm:$0xff] }
 0x2cc   :  { %2525 = vadd.xlane.f32.xlu1 %v2524_v8  ;;  %v1907_v40 = vpop.permute.xlu1 %1906  ;;  %2528 = vadd.xlane.f32.xlu0 %v2527_v48  ;;  %v2348_v12 = vsel %vm2223_vm2, %v4863_v57, 0.0  ;;  %v4864_v8 = vld [vmem:[%s9207_s0 + $0x100] sm:$0xff] }
 0x2cd   :  { %vm2220_vm3 = vcmp.eq.s32.totalorder %v6778_v23, %v1907_v40  ;;  %v2539_v38 = vsel %vm312_vm0, %v2348_v12, 0.0 }
 0x2ce   :  { %v2345_v53 = vsel %vm2220_vm3, %v4862_v49, 0.0 }
 0x2cf   :  { %v2530_v45 = vsel %vm312_vm0, %v2345_v53, 0.0  ;;  %v4865_v53 = vld [vmem:[%s9207_s0 + $0x118] sm:$0xff] }
 0x2d0   :  { %2531 = vadd.xlane.f32.xlu1 %v2530_v45  ;;  %v1913_v62 = vpop.permute.xlu1 %1912  ;;  %2534 = vadd.xlane.f32.xlu0 %v2533_v22  ;;  %v2350_v5 = vsel %vm2225_vm4, %v4865_v53, 0.0  ;;  %v4866_v45 = vld [vmem:[%s9207_s0 + $0x110] sm:$0xff]  ;;  %v4868_v53 = vld [vmem:[%s9207_s0 + $0x128] sm:$0xff] }
 0x2d1   :  { %vm2222_vm5 = vcmp.eq.s32.totalorder %v6778_v23, %v1913_v62  ;;  %v2545_v57 = vsel %vm312_vm0, %v2350_v5, 0.0  ;;  %v2352_v5 = vsel %vm2227_vm7, %v4868_v53, 0.0 }
 0x2d2   :  { %v2347_v48 = vsel %vm2222_vm5, %v4864_v8, 0.0  ;;  %v1940_v8 = vpop.permute.xlu0 %1939 }
 0x2d3   :  { %v2536_v40 = vsel %vm312_vm0, %v2347_v48, 0.0  ;;  %v4867_v48 = vld [vmem:[%s9207_s0 + $0x120] sm:$0xff]  ;;  %vm2231_vm10 = vcmp.eq.s32.totalorder %v6778_v23, %v1940_v8  ;;  %v4871_v8 = vld [vmem:[%s9207_s0 + $0x148] sm:$0xff] }
 0x2d4   :  { %2537 = vadd.xlane.f32.xlu1 %v2536_v40  ;;  %v1919_v49 = vpop.permute.xlu1 %1918  ;;  %2540 = vadd.xlane.f32.xlu0 %v2539_v38 }
 0x2d5   :  { %vm2224_vm6 = vcmp.eq.s32.totalorder %v6778_v23, %v1919_v49 }
 0x2d6   :  { %v2349_v22 = vsel %vm2224_vm6, %v4866_v45, 0.0 }
 0x2d7   :  { %v2542_v62 = vsel %vm312_vm0, %v2349_v22, 0.0 }
 0x2d8   :  { %2543 = vadd.xlane.f32.xlu1 %v2542_v62  ;;  %v1925_v12 = vpop.permute.xlu1 %1924  ;;  %2546 = vadd.xlane.f32.xlu0 %v2545_v57  ;;  %v2551_v62 = vsel %vm312_vm0, %v2352_v5, 0.0 }
 0x2d9   :  { %vm2226_vm8 = vcmp.eq.s32.totalorder %v6778_v23, %v1925_v12  ;;  %v2354_v12 = vsel %vm2229_vm9, %v4870_v31, 0.0  ;;  %v234_v31 = vld [vmem:[%s9208_s1 + $0x178] sm:$0xff] }
 0x2da   :  { %v2351_v40 = vsel %vm2226_vm8, %v4867_v48, 0.0  ;;  %v2356_v48 = vsel %vm2231_vm10, %v4871_v8, 0.0  ;;  %v236_v8 = vld [vmem:[%s9208_s1 + $0x188] sm:$0xff] }
 0x2db   :  { %v2548_v38 = vsel %vm312_vm0, %v2351_v40, 0.0  ;;  %v2557_v40 = vsel %vm312_vm0, %v2354_v12, 0.0  ;;  %v235_v12 = vld [vmem:[%s9208_s1 + $0x180] sm:$0xff] }
 0x2dc   :  { %2549 = vadd.xlane.f32.xlu1 %v2548_v38  ;;  %v1931_v49 = vpop.permute.xlu1 %1930  ;;  %v2563_v38 = vsel %vm312_vm0, %v2356_v48, 0.0  ;;  %v237_v48 = vld [vmem:[%s9208_s1 + $0x190] sm:$0xff] }
 0x2dd   :  { %vm2228_vm11 = vcmp.eq.s32.totalorder %v6778_v23, %v1931_v49  ;;  %v4872_v49 = vld [vmem:[%s9207_s0 + $0x140] sm:$0xff] }
 0x2de   :  { %v2353_v45 = vsel %vm2228_vm11, %v4869_v3, 0.0  ;;  %v229_v3 = vld [vmem:[%s9208_s1 + $0x150] sm:$0xff] }
 0x2df   :  { %v2554_v22 = vsel %vm312_vm0, %v2353_v45, 0.0  ;;  %v230_v45 = vld [vmem:[%s9208_s1 + $0x158] sm:$0xff] }
 0x2e0   :  { %v1937_v57 = vpop.permute.xlu1 %1936  ;;  %2555 = vadd.xlane.f32.xlu0 %v2554_v22  ;;  %2552 = vadd.xlane.f32.xlu1 %v2551_v62  ;;  %v231_v22 = vld [vmem:[%s9208_s1 + $0x160] sm:$0xff]  ;;  %v232_v62 = vld [vmem:[%s9208_s1 + $0x168] sm:$0xff] }
 0x2e1   :  { %vm2230_vm12 = vcmp.eq.s32.totalorder %v6778_v23, %v1937_v57  ;;  %v233_v57 = vld [vmem:[%s9208_s1 + $0x170] sm:$0xff] }
 0x2e2   :  { %v2355_v53 = vsel %vm2230_vm12, %v4872_v49, 0.0  ;;  %v4238_v49 = vpop.eup %4237  ;;  %4269 = vlog2.f32 %v6290_v35 }
 0x2e3   :  { %v2560_v5 = vsel %vm312_vm0, %v2355_v53, 0.0  ;;  %v1441_v53 = vmul.f32 0.6931472, %v4238_v49 }
 0x2e4   :  { %2558 = vadd.xlane.f32.xlu1 %v2557_v40  ;;  %2564 = vadd.xlane.f32.xlu0 %v2563_v38  ;;  %v238_v40 = vld [vmem:[%s9208_s1 + $0x198] sm:$0xff]  ;;  %v240_v38 = vld [vmem:[%s9208_s1 + $0x1a8] sm:$0xff] }
 0x2e5   :  { %v1689_v50 = vadd.f32 %v1441_v53, %v9562_v27 }
 0x2e8   :  { %2561 = vadd.xlane.f32.xlu1 %v2560_v5  ;;  %v4240_v5 = vpop.eup %4239  ;;  %4271 = vlog2.f32 %v6302_v2  ;;  %v249_v2 = vld [vmem:[%s9208_s1 + $0x1f0] sm:$0xff] }
 0x2e9   :  { %v4242_v19 = vpop.eup %4241 }
 0x2f9   :  { %1942 = vperm.xlu1 %3986, %v229_v3   ;;  %v1439_v3 = vmul.f32 0.6931472, %v4240_v5 }
 0x2fa   :  { %1945 = vperm.xlu0 %3985, %v230_v45  }
 0x2fd   :  { %1948 = vperm.xlu1 %3986, %v231_v22   ;;  %v4244_v22 = vpop.eup %4243 }
 0x2fe   :  { %1951 = vperm.xlu0 %3985, %v232_v62   ;;  %v1443_v62 = vmul.f32 0.6931472, %v4242_v19  ;;  %v4246_v13 = vpop.eup %4245 }
 0x2ff   :  { %v1445_v35 = vmul.f32 0.6931472, %v4246_v13 }
 0x301   :  { %1954 = vperm.xlu1 %3986, %v233_v57   ;;  %v9563_v57 = vld [vmem:[#allocation10_spill] sm:$0xff]  ;;  %v1691_v13 = vadd.f32 %v1445_v35, %v5397_v46  ;;  %v251_v46 = vld [vmem:[%s9208_s1 + $0x200] sm:$0xff] }
 0x302   :  { %1957 = vperm.xlu0 %3985, %v234_v31   ;;  %v1688_v31 = vadd.f32 %v1439_v3, %v9563_v57 }
 0x305   :  { %1960 = vperm.xlu1 %3986, %v235_v12   ;;  %v4248_v12 = vpop.eup %4247 }
 0x306   :  { %1963 = vperm.xlu0 %3985, %v236_v8  }
 0x309   :  { %1966 = vperm.xlu1 %3986, %v237_v48   ;;  %v4250_v48 = vpop.eup %4249 }
 0x30a   :  { %1969 = vperm.xlu0 %3985, %v238_v40  }
 0x30d   :  { %1972 = vperm.xlu1 %3986, %v239_v14   ;;  %v4252_v14 = vpop.eup %4251 }
 0x30e   :  { %1975 = vperm.xlu0 %3985, %v240_v38   ;;  %v9564_v38 = vld [vmem:[#allocation9_spill] sm:$0xff]  ;;  %v1455_v57 = vmul.f32 0.6931472, %v4252_v14 }
 0x30f   :  { %v1690_v49 = vadd.f32 %v1443_v62, %v9564_v38 }
 0x311   :  { %1978 = vperm.xlu1 %3986, %v241_v39   ;;  %v4254_v39 = vpop.eup %4253 }
 0x312   :  { %1981 = vperm.xlu0 %3985, %v242_v1   ;;  %v1447_v1 = vmul.f32 0.6931472, %v4244_v22  ;;  %v4256_v5 = vpop.eup %4255 }
 0x315   :  { %v2445_v30 = vpop.xlane.xlu1 %2444  ;;  %1984 = vperm.xlu1 %3986, %v243_v63  }
 0x316   :  { %v7054_v45 = vsub.f32 %v1689_v50, %v2445_v30  ;;  %1987 = vperm.xlu0 %3985, %v244_v43   ;;  %v4258_v43 = vpop.eup %4257  ;;  %v1451_v50 = vmul.f32 0.6931472, %v4248_v12  ;;  %v1449_v30 = vmul.f32 0.6931472, %v4250_v48 }
 0x317   :  { %v4260_v27 = vpop.eup %4259  ;;  %v1457_v14 = vmul.f32 0.6931472, %v4258_v43 }
 0x318   :  { %v2941_v54 = vsub.f32 0.0, %v7054_v45  ;;  %v4262_v22 = vpop.eup %4261 }
 0x319   :  { %1990 = vperm.xlu1 %3986, %v245_v60   ;;  %v2442_v8 = vpop.xlane.xlu0 %2441  ;;  %v250_v60 = vld [vmem:[%s9208_s1 + $0x1f8] sm:$0xff] }
 0x31a   :  { %v3067_v34 = vmul.f32 1.442695, %v2941_v54  ;;  %v7068_v40 = vsub.f32 %v1688_v31, %v2442_v8  ;;  %1993 = vperm.xlu0 %3985, %v246_v18   ;;  %v1692_v18 = vadd.f32 %v1447_v1, %v5411_v59  ;;  %v4264_v54 = vpop.eup %4263  ;;  %v1453_v31 = vmul.f32 0.6931472, %v4254_v39 }
 0x31b   :  { %v1459_v8 = vmul.f32 0.6931472, %v4256_v5  ;;  %v4266_v48 = vpop.eup %4265  ;;  %v1463_v1 = vmul.f32 0.6931472, %v4260_v27 }
 0x31c   :  { %4273 = vpow2.f32 %v3067_v34  ;;  %v2940_v53 = vsub.f32 0.0, %v7068_v40  ;;  %v4268_v59 = vpop.eup %4267 }
 0x31d   :  { %1996 = vperm.xlu1 %3986, %v247_v61   ;;  %v2448_v63 = vpop.xlane.xlu0 %2447  ;;  %4275 = vlog2.f32 %v6304_v56  ;;  %v4270_v39 = vpop.eup %4269 }
 0x31e   :  { %v3065_v19 = vmul.f32 1.442695, %v2940_v53  ;;  %v7079_v3 = vsub.f32 %v1690_v49, %v2448_v63  ;;  %1999 = vperm.xlu0 %3985, %v248_v0   ;;  %v9565_v49 = vld [vmem:[#allocation12_spill] sm:$0xff]  ;;  %v4272_v5 = vpop.eup %4271  ;;  %v1461_v63 = vmul.f32 0.6931472, %v4262_v22  ;;  %v253_v22 = vld [vmem:[%s9208_s1 + $0x210] sm:$0xff] }
 0x31f   :  { %v1694_v0 = vadd.f32 %v1451_v50, %v9565_v49 }
 0x320   :  { %4277 = vpow2.f32 %v3065_v19  ;;  %v2942_v62 = vsub.f32 0.0, %v7079_v3 }
 0x321   :  { %4279 = vlog2.f32 %v6316_v11  ;;  %v2454_v12 = vpop.xlane.xlu1 %2453  ;;  %2002 = vperm.xlu1 %3986, %v249_v2   ;;  %v2451_v56 = vpop.xlane.xlu0 %2450  ;;  %v1693_v11 = vadd.f32 %v1449_v30, %v5409_v58  ;;  %v9566_v58 = vld [vmem:[#allocation14_spill] sm:$0xff]  ;;  %v9567_v2 = vld [vmem:[#allocation16_spill] sm:$0xff] }
 0x322   :  { %4281 = vlog2.f32 %v6318_v9  ;;  %v3069_v34 = vmul.f32 1.442695, %v2942_v62  ;;  %v7093_v61 = vsub.f32 %v1692_v18, %v2454_v12  ;;  %v7095_v38 = vsub.f32 %v1691_v13, %v2451_v56  ;;  %2005 = vperm.xlu0 %3985, %v250_v60   ;;  %v252_v9 = vld [vmem:[%s9208_s1 + $0x208] sm:$0xff] }
 0x323   :  { %4283 = vlog2.f32 %v6330_v52  ;;  %v1695_v52 = vadd.f32 %v1453_v31, %v5421_v4  ;;  %v7110_v19 = vadd.f32 %v1455_v57, %v9566_v58  ;;  %v7113_v30 = vadd.f32 %v1459_v8, %v9567_v2  ;;  %v254_v57 = vld [vmem:[%s9208_s1 + $0x218] sm:$0xff]  ;;  %v9568_v31 = vld [vmem:[#allocation13_spill] sm:$0xff]  ;;  %v9569_v56 = vld [vmem:[#allocation18_spill] sm:$0xff] }
 0x324   :  { %4285 = vpow2.f32 %v3069_v34  ;;  %v2944_v35 = vsub.f32 0.0, %v7093_v61  ;;  %v2943_v53 = vsub.f32 0.0, %v7095_v38  ;;  %v1467_v18 = vmul.f32 0.6931472, %v4264_v54 }
 0x325   :  { %2008 = vperm.xlu1 %3986, %v251_v46   ;;  %v2457_v43 = vpop.xlane.xlu0 %2456  ;;  %4287 = vlog2.f32 %v6332_v15  ;;  %v1465_v4 = vmul.f32 0.6931472, %v4266_v48  ;;  %v7125_v8 = vadd.f32 %v1457_v14, %v9568_v31  ;;  %v1471_v15 = vmul.f32 0.6931472, %v4268_v59  ;;  %v255_v59 = vld [vmem:[%s9208_s1 + $0x220] sm:$0xff] }
 0x326   :  { %v4274_v50 = vpop.eup %4273  ;;  %v3073_v27 = vmul.f32 1.442695, %v2944_v35  ;;  %v3071_v60 = vmul.f32 1.442695, %v2943_v53  ;;  %v7116_v62 = vsub.f32 %v1693_v11, %v2457_v43  ;;  %2011 = vperm.xlu0 %3985, %v252_v9   ;;  %v7129_v34 = vadd.f32 %v1463_v1, %v9569_v56  ;;  %v9570_v1 = vld [vmem:[#allocation15_spill] sm:$0xff]  ;;  %v256_v43 = vld [vmem:[%s9208_s1 + $0x228] sm:$0xff] }
 0x327   :  { %v3316_v13 = vsub.f32 1.0, %v4274_v50  ;;  %v4276_v46 = vpop.eup %4275  ;;  %v1469_v11 = vmul.f32 0.6931472, %v4270_v39  ;;  %v1475_v9 = vmul.f32 0.6931472, %v4272_v5  ;;  %v7138_v53 = vadd.f32 %v1461_v63, %v9570_v1  ;;  %v9575_v56 = vld [vmem:[#allocation24_spill] sm:$0xff] }
 0x328   :  { %4289 = vpow2.f32 %v3073_v27  ;;  %v2945_v12 = vsub.f32 0.0, %v7116_v62  ;;  %v1473_v27 = vmul.f32 0.6931472, %v4276_v46 }
 0x329   :  { %v3441_v54 = vmul.f32 %v3316_v13, %v3316_v13  ;;  %4291 = vpow2.f32 %v3071_v60  ;;  %v2460_v48 = vpop.xlane.xlu1 %2459  ;;  %2014 = vperm.xlu1 %3986, %v253_v22   ;;  %v9573_v60 = vld [vmem:[#allocation22_spill] sm:$0xff] }
 0x32a   :  { %v4278_v49 = vpop.eup %4277  ;;  %4293 = vlog2.f32 %v6344_v10  ;;  %v3075_v35 = vmul.f32 1.442695, %v2945_v12  ;;  %v7132_v14 = vsub.f32 %v1694_v0, %v2460_v48  ;;  %2017 = vperm.xlu0 %3985, %v254_v57   ;;  %v9571_v10 = vld [vmem:[#allocation17_spill] sm:$0xff]  ;;  %v9572_v0 = vld [vmem:[#allocation20_spill] sm:$0xff]  ;;  %v7152_v22 = vadd.f32 %v1471_v15, %v9573_v60  ;;  %v9574_v12 = vld [vmem:[#allocation19_spill] sm:$0xff] }
 0x32b   :  { %v4280_v39 = vpop.eup %4279  ;;  %4295 = vlog2.f32 %v6346_v17  ;;  %v3315_v5 = vsub.f32 1.0, %v4278_v49  ;;  %v7145_v58 = vadd.f32 %v1465_v4, %v9571_v10  ;;  %v7148_v2 = vadd.f32 %v1467_v18, %v9572_v0 }
 0x32c   :  { %v4282_v50 = vpop.eup %4281  ;;  %4297 = vpow2.f32 %v3075_v35  ;;  %v2946_v63 = vsub.f32 0.0, %v7132_v14  ;;  %v3566_v13 = vmul.f32 %v3441_v54, %v7054_v45  ;;  %v7156_v4 = vadd.f32 %v1469_v11, %v9574_v12  ;;  %v257_v45 = vld [vmem:[%s9208_s1 + $0x230] sm:$0xff] }
 0x32d   :  { %v4284_v17 = vpop.eup %4283  ;;  %v3440_v57 = vmul.f32 %v3315_v5, %v3315_v5  ;;  %2020 = vperm.xlu1 %3986, %v255_v59   ;;  %v2463_v31 = vpop.xlane.xlu0 %2462  ;;  %v7159_v18 = vadd.f32 %v1475_v9, %v9575_v56  ;;  %4299 = vlog2.f32 %v6358_v16  ;;  %v1479_v15 = vmul.f32 0.6931472, %v4280_v39  ;;  %v258_v9 = vld [vmem:[%s9208_s1 + $0x238] sm:$0xff]  ;;  %v9576_v59 = vld [vmem:[#allocation21_spill] sm:$0xff]  ;;  %v261_v56 = vld [vmem:[%s9208_s1 + $0x250] sm:$0xff] }
 0x32e   :  { %v4286_v48 = vpop.eup %4285  ;;  %v3077_v46 = vmul.f32 1.442695, %v2946_v63  ;;  %v7162_v49 = vsub.f32 %v1695_v52, %v2463_v31  ;;  %2023 = vperm.xlu0 %3985, %v256_v43   ;;  %4301 = vlog2.f32 %v6360_v6  ;;  %v1477_v35 = vmul.f32 0.6931472, %v4282_v50 }
 0x32f   :  { %v3565_v11 = vmul.f32 %v3440_v57, %v7068_v40  ;;  %v3317_v54 = vsub.f32 1.0, %v4286_v48  ;;  %v4288_v16 = vpop.eup %4287  ;;  %v7174_v1 = vadd.f32 %v1473_v27, %v9576_v59  ;;  %v1483_v5 = vmul.f32 0.6931472, %v4284_v17  ;;  %v259_v27 = vld [vmem:[%s9208_s1 + $0x240] sm:$0xff]  ;;  %v9577_v48 = vld [vmem:[#allocation26_spill] sm:$0xff]  ;;  %v9578_v59 = vld [vmem:[#allocation23_spill] sm:$0xff] }
 0x330   :  { %4303 = vpow2.f32 %v3077_v46  ;;  %v2947_v52 = vsub.f32 0.0, %v7162_v49  ;;  %v3693_v39 = vsel %vm3691_vm13, %v3566_v13, 0.0  ;;  %v1481_v13 = vmul.f32 0.6931472, %v4288_v16 }
 0x331   :  { %v3692_v6 = vsel %vm3691_vm13, %v3565_v11, 0.0  ;;  %v3442_v43 = vmul.f32 %v3317_v54, %v3317_v54  ;;  %v2466_v40 = vpop.xlane.xlu1 %2465  ;;  %2026 = vperm.xlu1 %3986, %v257_v45   ;;  %v2469_v10 = vpop.xlane.xlu0 %2468 }
 0x332   :  { %v4290_v0 = vpop.eup %4289  ;;  %v3694_v63 = vadd.f32 %v3693_v39, %v3692_v6  ;;  %v3079_v60 = vmul.f32 1.442695, %v2947_v52  ;;  %v7179_v50 = vsub.f32 %v7110_v19, %v2466_v40  ;;  %v7182_v57 = vsub.f32 %v7125_v8, %v2469_v10  ;;  %2029 = vperm.xlu0 %3985, %v258_v9   ;;  %v9579_v6 = vld [vmem:[#allocation28_spill] sm:$0xff] }
 0x333   :  { %v4292_v17 = vpop.eup %4291  ;;  %v3567_v31 = vmul.f32 %v3442_v43, %v7079_v3  ;;  %v3319_v12 = vsub.f32 1.0, %v4290_v0  ;;  %v7192_v19 = vadd.f32 %v1479_v15, %v9577_v48  ;;  %v7198_v39 = vadd.f32 %v1477_v35, %v9578_v59 }
 0x334   :  { %v4294_v46 = vpop.eup %4293  ;;  %v3318_v8 = vsub.f32 1.0, %v4292_v17  ;;  %4305 = vpow2.f32 %v3079_v60  ;;  %v2948_v45 = vsub.f32 0.0, %v7179_v50  ;;  %v2949_v11 = vsub.f32 0.0, %v7182_v57  ;;  %v260_v17 = vld [vmem:[%s9208_s1 + $0x248] sm:$0xff] }
 0x335   :  { %v4296_v54 = vpop.eup %4295  ;;  %v3695_v9 = vsel %vm3691_vm13, %v3567_v31, 0.0  ;;  %v3444_v16 = vmul.f32 %v3319_v12, %v3319_v12  ;;  %v2472_v3 = vpop.xlane.xlu1 %2471  ;;  %2032 = vperm.xlu1 %3986, %v259_v27   ;;  %v7201_v15 = vadd.f32 %v1483_v5, %v9579_v6  ;;  %v264_v5 = vld [vmem:[%s9208_s1 + $0x268] sm:$0xff] }
 0x336   :  { %v2475_v52 = vpop.xlane.xlu0 %2474  ;;  %v4298_v43 = vpop.eup %4297  ;;  %v3696_v40 = vadd.f32 %v3695_v9, %v3694_v63  ;;  %v3443_v10 = vmul.f32 %v3318_v8, %v3318_v8  ;;  %v3081_v0 = vmul.f32 1.442695, %v2948_v45  ;;  %v3083_v60 = vmul.f32 1.442695, %v2949_v11  ;;  %2038 = vperm.xlu0 %3985, %v261_v56   ;;  %v9580_v63 = vld [vmem:[#allocation25_spill] sm:$0xff] }
 0x337   :  { %v3320_v31 = vsub.f32 1.0, %v4298_v43  ;;  %v7207_v27 = vsub.f32 %v7113_v30, %v2472_v3  ;;  %v7210_v35 = vsub.f32 %v7138_v53, %v2475_v52  ;;  %v7216_v12 = vadd.f32 %v1481_v13, %v9580_v63  ;;  %v4300_v48 = vpop.eup %4299 }
 0x338   :  { %v1487_v56 = vmul.f32 0.6931472, %v4294_v46  ;;  %v3569_v8 = vmul.f32 %v3444_v16, %v7093_v61  ;;  %v3568_v45 = vmul.f32 %v3443_v10, %v7095_v38  ;;  %4307 = vpow2.f32 %v3081_v0  ;;  %v4302_v11 = vpop.eup %4301  ;;  %v265_v0 = vld [vmem:[%s9208_s1 + $0x270] sm:$0xff] }
 0x339   :  { %v7220_v30 = vmul.f32 0.6931472, %v4296_v54  ;;  %v3445_v9 = vmul.f32 %v3320_v31, %v3320_v31  ;;  %4309 = vpow2.f32 %v3083_v60  ;;  %v2950_v53 = vsub.f32 0.0, %v7207_v27  ;;  %v2478_v3 = vpop.xlane.xlu1 %2477  ;;  %2035 = vperm.xlu1 %3986, %v260_v17   ;;  %v262_v54 = vld [vmem:[%s9208_s1 + $0x258] sm:$0xff] }
 0x33a   :  { %v2481_v52 = vpop.xlane.xlu0 %2480  ;;  %v4304_v59 = vpop.eup %4303  ;;  %v3697_v13 = vsel %vm3691_vm13, %v3568_v45, 0.0  ;;  %v2951_v46 = vsub.f32 0.0, %v7210_v35  ;;  %v7226_v61 = vsub.f32 %v7129_v34, %v2478_v3  ;;  %2047 = vperm.xlu0 %3985, %v264_v5   ;;  %v3699_v34 = vsel %vm3691_vm13, %v3569_v8, 0.0  ;;  %v263_v8 = vld [vmem:[%s9208_s1 + $0x260] sm:$0xff] }
 0x33b   :  { %v7229_v38 = vsub.f32 %v7145_v58, %v2481_v52  ;;  %v3698_v16 = vadd.f32 %v3697_v13, %v3696_v40  ;;  %v3570_v6 = vmul.f32 %v3445_v9, %v7116_v62  ;;  %v3321_v43 = vsub.f32 1.0, %v4304_v59 }
 0x33c   :  { %v3085_v10 = vmul.f32 1.442695, %v2950_v53  ;;  %v3087_v60 = vmul.f32 1.442695, %v2951_v46  ;;  %v2952_v58 = vsub.f32 0.0, %v7226_v61 }
 0x33d   :  { %v2953_v17 = vsub.f32 0.0, %v7229_v38  ;;  %v3700_v31 = vadd.f32 %v3699_v34, %v3698_v16  ;;  %v3701_v5 = vsel %vm3691_vm13, %v3570_v6, 0.0  ;;  %v3446_v63 = vmul.f32 %v3321_v43, %v3321_v43  ;;  %v2484_v40 = vpop.xlane.xlu1 %2483  ;;  %2041 = vperm.xlu1 %3986, %v262_v54   ;;  %v266_v54 = vld [vmem:[%s9208_s1 + $0x278] sm:$0xff]  ;;  %v9581_v6 = vld [vmem:[#allocation30_spill] sm:$0xff] }
 0x33e   :  { %4311 = vpow2.f32 %v3085_v10  ;;  %v2487_v62 = vpop.xlane.xlu0 %2486  ;;  %v4306_v45 = vpop.eup %4305  ;;  %v3089_v9 = vmul.f32 1.442695, %v2952_v58  ;;  %v7243_v3 = vsub.f32 %v7148_v2, %v2484_v40  ;;  %2050 = vperm.xlu0 %3985, %v265_v0   ;;  %v1491_v16 = vmul.f32 0.6931472, %v4300_v48 }
 0x33f   :  { %4313 = vpow2.f32 %v3087_v60  ;;  %v3091_v53 = vmul.f32 1.442695, %v2953_v17  ;;  %v3702_v52 = vadd.f32 %v3701_v5, %v3700_v31  ;;  %v3571_v59 = vmul.f32 %v3446_v63, %v7132_v14 }
 0x340   :  { %v3322_v13 = vsub.f32 1.0, %v4306_v45  ;;  %v7250_v46 = vsub.f32 %v7156_v4, %v2487_v62  ;;  %4315 = vpow2.f32 %v3089_v9  ;;  %v2954_v2 = vsub.f32 0.0, %v7243_v3  ;;  %v267_v45 = vld [vmem:[%s9208_s1 + $0x280] sm:$0xff] }
 0x341   :  { %v7257_v43 = vadd.f32 %v1487_v56, %v9581_v6  ;;  %v3703_v10 = vsel %vm3691_vm13, %v3571_v59, 0.0  ;;  %4317 = vpow2.f32 %v3091_v53  ;;  %v2490_v34 = vpop.xlane.xlu1 %2489  ;;  %2044 = vperm.xlu1 %3986, %v263_v8   ;;  %v1489_v5 = vmul.f32 0.6931472, %v4302_v11  ;;  %v9582_v59 = vld [vmem:[#allocation27_spill] sm:$0xff] }
 0x342   :  { %v3447_v0 = vmul.f32 %v3322_v13, %v3322_v13  ;;  %v2955_v14 = vsub.f32 0.0, %v7250_v46  ;;  %v2493_v4 = vpop.xlane.xlu0 %2492  ;;  %v4308_v60 = vpop.eup %4307  ;;  %v3704_v58 = vadd.f32 %v3703_v10, %v3702_v52  ;;  %v3093_v17 = vmul.f32 1.442695, %v2954_v2  ;;  %2053 = vperm.xlu0 %3985, %v266_v54  }
 0x343   :  { %v7262_v48 = vsub.f32 %v7152_v22, %v2490_v34  ;;  %v7265_v31 = vsub.f32 %v7174_v1, %v2493_v4  ;;  %v4310_v56 = vpop.eup %4309  ;;  %v3323_v40 = vsub.f32 1.0, %v4308_v60  ;;  %v268_v4 = vld [vmem:[%s9208_s1 + $0x288] sm:$0xff] }
 0x344   :  { %v3572_v63 = vmul.f32 %v3447_v0, %v7162_v49  ;;  %v3095_v62 = vmul.f32 1.442695, %v2955_v14  ;;  %v3324_v9 = vsub.f32 1.0, %v4310_v56  ;;  %4319 = vpow2.f32 %v3093_v17 }
 0x345   :  { %v2956_v53 = vsub.f32 0.0, %v7262_v48  ;;  %v2957_v22 = vsub.f32 0.0, %v7265_v31  ;;  %v3448_v8 = vmul.f32 %v3323_v40, %v3323_v40  ;;  %v2496_v52 = vpop.xlane.xlu1 %2495  ;;  %v7276_v49 = vadd.f32 %v7220_v30, %v9582_v59  ;;  %v9583_v30 = vld [vmem:[#allocation32_spill] sm:$0xff]  ;;  %v269_v59 = vld [vmem:[%s9208_s1 + $0x290] sm:$0xff] }
 0x346   :  { %v3705_v1 = vsel %vm3691_vm13, %v3572_v63, 0.0  ;;  %4321 = vpow2.f32 %v3095_v62  ;;  %v2499_v11 = vpop.xlane.xlu0 %2498  ;;  %v3449_v54 = vmul.f32 %v3324_v9, %v3324_v9  ;;  %2056 = vperm.xlu0 %3985, %v267_v45   ;;  %v7280_v14 = vsub.f32 %v7159_v18, %v2496_v52  ;;  %v9584_v63 = vld [vmem:[#allocation29_spill] sm:$0xff] }
 0x347   :  { %v3706_v13 = vadd.f32 %v3705_v1, %v3704_v58  ;;  %v3097_v2 = vmul.f32 1.442695, %v2956_v53  ;;  %v3099_v6 = vmul.f32 1.442695, %v2957_v22  ;;  %v3573_v0 = vmul.f32 %v3448_v8, %v7179_v50 }
 0x348   :  { %v4312_v10 = vpop.eup %4311  ;;  %v7283_v34 = vsub.f32 %v7198_v39, %v2499_v11  ;;  %v7289_v60 = vadd.f32 %v1491_v16, %v9583_v30  ;;  %v3574_v17 = vmul.f32 %v3449_v54, %v7182_v57  ;;  %v7293_v50 = vadd.f32 %v1489_v5, %v9584_v63 }
 0x349   :  { %v4314_v58 = vpop.eup %4313  ;;  %v3325_v56 = vsub.f32 1.0, %v4312_v10  ;;  %4323 = vpow2.f32 %v3097_v2  ;;  %v3707_v18 = vsel %vm3691_vm13, %v3573_v0, 0.0  ;;  %v2958_v39 = vsub.f32 0.0, %v7280_v14  ;;  %v2502_v62 = vpop.xlane.xlu1 %2501 }
 0x34a   :  { %v3326_v40 = vsub.f32 1.0, %v4314_v58  ;;  %4325 = vpow2.f32 %v3099_v6  ;;  %v2505_v45 = vpop.xlane.xlu0 %2504  ;;  %v4316_v9 = vpop.eup %4315  ;;  %v3708_v53 = vadd.f32 %v3707_v18, %v3706_v13  ;;  %v3709_v16 = vsel %vm3691_vm13, %v3574_v17, 0.0  ;;  %2059 = vperm.xlu0 %3985, %v268_v4  }
 0x34b   :  { %v3450_v22 = vmul.f32 %v3325_v56, %v3325_v56  ;;  %v2959_v57 = vsub.f32 0.0, %v7283_v34  ;;  %v4318_v1 = vpop.eup %4317  ;;  %v3327_v5 = vsub.f32 1.0, %v4316_v9  ;;  %v3101_v52 = vmul.f32 1.442695, %v2958_v39 }
 0x34c   :  { %v3451_v8 = vmul.f32 %v3326_v40, %v3326_v40  ;;  %v7300_v11 = vsub.f32 %v7192_v19, %v2502_v62  ;;  %v3710_v54 = vadd.f32 %v3709_v16, %v3708_v53  ;;  %v3328_v2 = vsub.f32 1.0, %v4318_v1  ;;  %v270_v62 = vld [vmem:[%s9208_s1 + $0x298] sm:$0xff] }
 0x34d   :  { %v3575_v13 = vmul.f32 %v3450_v22, %v7207_v27  ;;  %v3103_v6 = vmul.f32 1.442695, %v2959_v57  ;;  %v3452_v0 = vmul.f32 %v3327_v5, %v3327_v5  ;;  %4327 = vpow2.f32 %v3101_v52  ;;  %v2508_v30 = vpop.xlane.xlu1 %2507 }
 0x34e   :  { %v3576_v10 = vmul.f32 %v3451_v8, %v7210_v35  ;;  %v2960_v4 = vsub.f32 0.0, %v7300_v11  ;;  %v2511_v58 = vpop.xlane.xlu0 %2510  ;;  %v4320_v17 = vpop.eup %4319  ;;  %v3453_v56 = vmul.f32 %v3328_v2, %v3328_v2  ;;  %v7310_v63 = vsub.f32 %v7216_v12, %v2505_v45  ;;  %2062 = vperm.xlu0 %3985, %v269_v59  }
 0x34f   :  { %v3711_v19 = vsel %vm3691_vm13, %v3575_v13, 0.0  ;;  %4329 = vpow2.f32 %v3103_v6  ;;  %v3577_v35 = vmul.f32 %v3452_v0, %v7226_v61  ;;  %v3329_v39 = vsub.f32 1.0, %v4320_v17 }
 0x350   :  { %v4322_v27 = vpop.eup %4321  ;;  %v3712_v18 = vadd.f32 %v3711_v19, %v3710_v54  ;;  %v3713_v40 = vsel %vm3691_vm13, %v3576_v10, 0.0  ;;  %v3578_v9 = vmul.f32 %v3453_v56, %v7229_v38  ;;  %v3105_v16 = vmul.f32 1.442695, %v2960_v4 }
 0x351   :  { %v3330_v53 = vsub.f32 1.0, %v4322_v27  ;;  %v2961_v22 = vsub.f32 0.0, %v7310_v63  ;;  %v3715_v45 = vsel %vm3691_vm13, %v3577_v35, 0.0  ;;  %v3454_v57 = vmul.f32 %v3329_v39, %v3329_v39  ;;  %v2514_v8 = vpop.xlane.xlu1 %2513 }
 0x352   :  { %v3714_v12 = vadd.f32 %v3713_v40, %v3712_v18  ;;  %v7321_v1 = vsub.f32 %v7201_v15, %v2508_v30  ;;  %v2517_v61 = vpop.xlane.xlu0 %2516  ;;  %v3717_v52 = vsel %vm3691_vm13, %v3578_v9, 0.0  ;;  %4331 = vpow2.f32 %v3105_v16  ;;  %2065 = vperm.xlu0 %3985, %v270_v62   ;;  %v271_v15 = vld [vmem:[%s9208_s1 + $0x2a0] sm:$0xff] }
 0x353   :  { %v4324_v5 = vpop.eup %4323  ;;  %v3455_v59 = vmul.f32 %v3330_v53, %v3330_v53  ;;  %v3107_v54 = vmul.f32 1.442695, %v2961_v22  ;;  %v3579_v2 = vmul.f32 %v3454_v57, %v7243_v3  ;;  %v7331_v30 = vsub.f32 %v7276_v49, %v2511_v58  ;;  %v272_v53 = vld [vmem:[%s9208_s1 + $0x2a8] sm:$0xff] }
 0x354   :  { %v4326_v38 = vpop.eup %4325  ;;  %v3716_v13 = vadd.f32 %v3715_v45, %v3714_v12  ;;  %v3331_v6 = vsub.f32 1.0, %v4324_v5  ;;  %v2962_v10 = vsub.f32 0.0, %v7321_v1  ;;  %v7343_v9 = vsub.f32 %v7293_v50, %v2517_v61 }
 0x355   :  { %v3580_v0 = vmul.f32 %v3455_v59, %v7250_v46  ;;  %v3332_v4 = vsub.f32 1.0, %v4326_v38  ;;  %4333 = vpow2.f32 %v3107_v54  ;;  %v3719_v19 = vsel %vm3691_vm13, %v3579_v2, 0.0  ;;  %v2520_v3 = vpop.xlane.xlu1 %2519  ;;  %v273_v2 = vld [vmem:[%s9208_s1 + $0x2b0] sm:$0xff] }
 0x356   :  { %v3718_v17 = vadd.f32 %v3717_v52, %v3716_v13  ;;  %v3456_v56 = vmul.f32 %v3331_v6, %v3331_v6  ;;  %v3109_v27 = vmul.f32 1.442695, %v2962_v10  ;;  %v7334_v18 = vpop.xlane.xlu0 %2522  ;;  %v2963_v39 = vsub.f32 0.0, %v7331_v30  ;;  %2068 = vperm.xlu0 %3985, %v271_v15  }
 0x357   :  { %v3721_v40 = vsel %vm3691_vm13, %v3580_v0, 0.0  ;;  %v3457_v35 = vmul.f32 %v3332_v4, %v3332_v4  ;;  %v7339_v46 = vsub.f32 %v7257_v43, %v2514_v8  ;;  %v4328_v62 = vpop.eup %4327  ;;  %v7357_v13 = vsub.f32 %v7289_v60, %v2520_v3 }
 0x358   :  { %v3720_v49 = vadd.f32 %v3719_v19, %v3718_v17  ;;  %v3581_v58 = vmul.f32 %v3456_v56, %v7262_v48  ;;  %4335 = vpow2.f32 %v3109_v27  ;;  %v3333_v12 = vsub.f32 1.0, %v4328_v62 }
 0x359   :  { %v4330_v16 = vpop.eup %4329  ;;  %v3582_v22 = vmul.f32 %v3457_v35, %v7265_v31  ;;  %v3111_v45 = vmul.f32 1.442695, %v2963_v39  ;;  %v2964_v43 = vsub.f32 0.0, %v7339_v46  ;;  %v2965_v48 = vsub.f32 0.0, %v7343_v9  ;;  %v7352_v52 = vpop.xlane.xlu1 %2525 }
 0x35a   :  { %v3722_v57 = vadd.f32 %v3721_v40, %v3720_v49  ;;  %v3723_v8 = vsel %vm3691_vm13, %v3581_v58, 0.0  ;;  %v3334_v5 = vsub.f32 1.0, %v4330_v16  ;;  %v7354_v50 = vpop.xlane.xlu0 %2528  ;;  %v3458_v61 = vmul.f32 %v3333_v12, %v3333_v12  ;;  %2071 = vperm.xlu0 %3985, %v272_v53  }
 0x35b   :  { %4337 = vpow2.f32 %v3111_v45  ;;  %v3113_v59 = vmul.f32 1.442695, %v2964_v43  ;;  %v3115_v38 = vmul.f32 1.442695, %v2965_v48  ;;  %v3725_v10 = vsel %vm3691_vm13, %v3582_v22, 0.0 }
 0x35c   :  { %v3724_v54 = vadd.f32 %v3723_v8, %v3722_v57  ;;  %v3459_v31 = vmul.f32 %v3334_v5, %v3334_v5  ;;  %v4332_v6 = vpop.eup %4331  ;;  %v3583_v15 = vmul.f32 %v3458_v61, %v7280_v14  ;;  %v2966_v27 = vsub.f32 0.0, %v7357_v13  ;;  %v274_v14 = vld [vmem:[%s9208_s1 + $0x2b8] sm:$0xff]  ;;  %v275_v57 = vld [vmem:[%s9208_s1 + $0x2c0] sm:$0xff] }
 0x35d   :  { %4339 = vpow2.f32 %v3113_v59  ;;  %v3335_v17 = vsub.f32 1.0, %v4332_v6  ;;  %v7365_v19 = vpop.xlane.xlu1 %2531 }
 0x35e   :  { %v3726_v0 = vadd.f32 %v3725_v10, %v3724_v54  ;;  %v3584_v4 = vmul.f32 %v3459_v31, %v7283_v34  ;;  %4341 = vpow2.f32 %v3115_v38  ;;  %v3727_v60 = vsel %vm3691_vm13, %v3583_v15, 0.0  ;;  %2074 = vperm.xlu0 %3985, %v273_v2   ;;  %v7369_v39 = vpop.xlane.xlu0 %2534  ;;  %v276_v15 = vld [vmem:[%s9208_s1 + $0x2c8] sm:$0xff] }
 0x35f   :  { %v4334_v56 = vpop.eup %4333  ;;  %v3460_v40 = vmul.f32 %v3335_v17, %v3335_v17  ;;  %v3117_v62 = vmul.f32 1.442695, %v2966_v27 }
 0x360   :  { %v3728_v3 = vadd.f32 %v3727_v60, %v3726_v0  ;;  %v3336_v35 = vsub.f32 1.0, %v4334_v56  ;;  %v3729_v34 = vsel %vm3691_vm13, %v3584_v4, 0.0 }
 0x361   :  { %v3585_v53 = vmul.f32 %v3460_v40, %v7300_v11  ;;  %v7376_v22 = vpop.xlane.xlu1 %2537  ;;  %4343 = vpow2.f32 %v3117_v62 }
 0x362   :  { %v4336_v49 = vpop.eup %4335  ;;  %v3730_v58 = vadd.f32 %v3729_v34, %v3728_v3  ;;  %v3461_v16 = vmul.f32 %v3336_v35, %v3336_v35  ;;  %2077 = vperm.xlu0 %3985, %v274_v14   ;;  %v7384_v59 = vpop.xlane.xlu0 %2540  ;;  %v277_v14 = vld [vmem:[%s9208_s1 + $0x2d0] sm:$0xff]  ;;  %4345 = vlog2.f32 %v6374_v47 }
 0x363   :  { %v3337_v12 = vsub.f32 1.0, %v4336_v49  ;;  %v3731_v45 = vsel %vm3691_vm13, %v3585_v53, 0.0  ;;  %4347 = vlog2.f32 %v6372_v20  ;;  %v4888_v20 = vld [vmem:[%s9207_s0 + $0x1c8] sm:$0xff] }
 0x364   :  { %v3586_v43 = vmul.f32 %v3461_v16, %v7310_v63  ;;  %v3732_v5 = vadd.f32 %v3731_v45, %v3730_v58  ;;  %4349 = vlog2.f32 %v6388_v21 }
 0x365   :  { %v4338_v8 = vpop.eup %4337  ;;  %v3462_v48 = vmul.f32 %v3337_v12, %v3337_v12  ;;  %v7386_v54 = vpop.xlane.xlu1 %2543  ;;  %4351 = vlog2.f32 %v6386_v24  ;;  %v299_v24 = vld [vmem:[%s9208_s1 + $0x380] sm:$0xff] }
 0x366   :  { %v3733_v61 = vsel %vm3691_vm13, %v3586_v43, 0.0  ;;  %v3338_v11 = vsub.f32 1.0, %v4338_v8  ;;  %2080 = vperm.xlu0 %3985, %v275_v57   ;;  %v7398_v35 = vpop.xlane.xlu0 %2546  ;;  %v278_v43 = vld [vmem:[%s9208_s1 + $0x2d8] sm:$0xff]  ;;  %4353 = vlog2.f32 %v6402_v25 }
 0x367   :  { %v4340_v31 = vpop.eup %4339  ;;  %v3734_v38 = vadd.f32 %v3733_v61, %v3732_v5  ;;  %v3587_v2 = vmul.f32 %v3462_v48, %v7321_v1  ;;  %v279_v48 = vld [vmem:[%s9208_s1 + $0x2e0] sm:$0xff]  ;;  %4355 = vlog2.f32 %v6400_v28 }
 0x368   :  { %v4342_v63 = vpop.eup %4341  ;;  %v3463_v6 = vmul.f32 %v3338_v11, %v3338_v11  ;;  %v3339_v10 = vsub.f32 1.0, %v4340_v31  ;;  %4357 = vlog2.f32 %v6416_v29 }
 0x369   :  { %v3735_v0 = vsel %vm3691_vm13, %v3587_v2, 0.0  ;;  %v3340_v4 = vsub.f32 1.0, %v4342_v63  ;;  %v7394_v27 = vpop.xlane.xlu1 %2549  ;;  %v281_v2 = vld [vmem:[%s9208_s1 + $0x2f0] sm:$0xff]  ;;  %4359 = vlog2.f32 %v6414_v32 }
 0x36a   :  { %v3736_v17 = vadd.f32 %v3735_v0, %v3734_v38  ;;  %v3588_v56 = vmul.f32 %v3463_v6, %v7331_v30  ;;  %v3464_v60 = vmul.f32 %v3339_v10, %v3339_v10  ;;  %2083 = vperm.xlu0 %3985, %v276_v15   ;;  %v282_v10 = vld [vmem:[%s9208_s1 + $0x2f8] sm:$0xff]  ;;  %v4873_v15 = vld [vmem:[%s9207_s0 + $0x150] sm:$0xff]  ;;  %4361 = vlog2.f32 %v6430_v33 }
 0x36b   :  { %v3465_v3 = vmul.f32 %v3340_v4, %v3340_v4  ;;  %v4344_v34 = vpop.eup %4343 }
 0x36c   :  { %v3737_v1 = vsel %vm3691_vm13, %v3588_v56, 0.0  ;;  %v3589_v40 = vmul.f32 %v3464_v60, %v7339_v46  ;;  %v3341_v58 = vsub.f32 1.0, %v4344_v34  ;;  %v283_v60 = vld [vmem:[%s9208_s1 + $0x300] sm:$0xff]  ;;  %v284_v34 = vld [vmem:[%s9208_s1 + $0x308] sm:$0xff] }
 0x36d   :  { %v3738_v62 = vadd.f32 %v3737_v1, %v3736_v17  ;;  %v3590_v49 = vmul.f32 %v3465_v3, %v7343_v9  ;;  %v7405_v53 = vpop.xlane.xlu1 %2552  ;;  %v7408_v45 = vpop.xlane.xlu0 %2555  ;;  %v4874_v3 = vld [vmem:[%s9207_s0 + $0x158] sm:$0xff] }
 0x36e   :  { %v3739_v30 = vsel %vm3691_vm13, %v3589_v40, 0.0  ;;  %2086 = vperm.xlu0 %3985, %v277_v14   ;;  %v3466_v46 = vmul.f32 %v3341_v58, %v3341_v58 }
 0x36f   :  { %v3740_v16 = vadd.f32 %v3739_v30, %v3738_v62  ;;  %v3741_v12 = vsel %vm3691_vm13, %v3590_v49, 0.0  ;;  %v4875_v62 = vld [vmem:[%s9207_s0 + $0x160] sm:$0xff] }
 0x370   :  { %v3591_v8 = vmul.f32 %v3466_v46, %v7357_v13  ;;  %v280_v13 = vld [vmem:[%s9208_s1 + $0x2e8] sm:$0xff] }
 0x371   :  { %v3742_v57 = vadd.f32 %v3741_v12, %v3740_v16  ;;  %v7414_v9 = vpop.xlane.xlu1 %2558  ;;  %v7422_v11 = vpop.xlane.xlu0 %2564  ;;  %v285_v12 = vld [vmem:[%s9208_s1 + $0x310] sm:$0xff]  ;;  %v4876_v46 = vld [vmem:[%s9207_s0 + $0x168] sm:$0xff] }
 0x372   :  { %2089 = vperm.xlu0 %3985, %v278_v43   ;;  %v3743_v5 = vsel %vm3691_vm13, %v3591_v8, 0.0 }
 0x373   :  { %v7420_v61 = vadd.f32 %v3743_v5, %v3742_v57  ;;  %v286_v5 = vld [vmem:[%s9208_s1 + $0x318] sm:$0xff] }
 0x375   :  { %v7424_v31 = vpop.xlane.xlu1 %2561 }
 0x376   :  { %2092 = vperm.xlu0 %3985, %v279_v48   ;;  %v4877_v48 = vld [vmem:[%s9207_s0 + $0x170] sm:$0xff] }
 0x379   :  { %v1946_v38 = vpop.permute.xlu0 %1945  ;;  %v1943_v63 = vpop.permute.xlu1 %1942 }
 0x37a   :  { %2095 = vperm.xlu0 %3985, %v280_v13   ;;  %vm2232_vm14 = vcmp.eq.s32.totalorder %v6778_v23, %v1943_v63  ;;  %vm2233_vm15 = vcmp.eq.s32.totalorder %v6778_v23, %v1946_v38 }
 0x37b   :  { %v2357_v0 = vsel %vm2232_vm14, %v4873_v15, 0.0  ;;  %v2358_v1 = vsel %vm2233_vm15, %v4874_v3, 0.0 }
 0x37c   :  { %v2566_v56 = vsel %vm312_vm0, %v2357_v0, 0.0  ;;  %v2569_v14 = vsel %vm312_vm0, %v2358_v1, 0.0 }
 0x37d   :  { %v1952_v6 = vpop.permute.xlu0 %1951  ;;  %v1949_v17 = vpop.permute.xlu1 %1948  ;;  %2567 = vadd.xlane.f32.xlu1 %v2566_v56  ;;  %v4879_v56 = vld [vmem:[%s9207_s0 + $0x180] sm:$0xff] }
 0x37e   :  { %2098 = vperm.xlu0 %3985, %v281_v2   ;;  %vm2234_vm1 = vcmp.eq.s32.totalorder %v6778_v23, %v1949_v17  ;;  %vm2235_vm2 = vcmp.eq.s32.totalorder %v6778_v23, %v1952_v6  ;;  %v287_v6 = vld [vmem:[%s9208_s1 + $0x320] sm:$0xff]  ;;  %v288_v17 = vld [vmem:[%s9208_s1 + $0x328] sm:$0xff] }
 0x37f   :  { %v2359_v49 = vsel %vm2234_vm1, %v4875_v62, 0.0  ;;  %v2360_v43 = vsel %vm2235_vm2, %v4876_v46, 0.0  ;;  %v4880_v62 = vld [vmem:[%s9207_s0 + $0x188] sm:$0xff] }
 0x380   :  { %v2572_v16 = vsel %vm312_vm0, %v2359_v49, 0.0  ;;  %v2575_v8 = vsel %vm312_vm0, %v2360_v43, 0.0 }
 0x381   :  { %v1958_v4 = vpop.permute.xlu0 %1957  ;;  %2570 = vadd.xlane.f32.xlu1 %v2569_v14  ;;  %v1955_v58 = vpop.permute.xlu1 %1954 }
 0x382   :  { %2101 = vperm.xlu0 %3985, %v282_v10   ;;  %vm2236_vm3 = vcmp.eq.s32.totalorder %v6778_v23, %v1955_v58  ;;  %vm2237_vm4 = vcmp.eq.s32.totalorder %v6778_v23, %v1958_v4  ;;  %v4878_v10 = vld [vmem:[%s9207_s0 + $0x178] sm:$0xff] }
 0x383   :  { %v2361_v13 = vsel %vm2236_vm3, %v4877_v48, 0.0  ;;  %v2362_v15 = vsel %vm2237_vm4, %v4878_v10, 0.0  ;;  %v291_v48 = vld [vmem:[%s9208_s1 + $0x340] sm:$0xff] }
 0x384   :  { %v2578_v63 = vsel %vm312_vm0, %v2361_v13, 0.0  ;;  %v2581_v4 = vsel %vm312_vm0, %v2362_v15, 0.0  ;;  %v4882_v13 = vld [vmem:[%s9207_s0 + $0x198] sm:$0xff]  ;;  %v4883_v10 = vld [vmem:[%s9207_s0 + $0x1a0] sm:$0xff] }
 0x385   :  { %v1964_v40 = vpop.permute.xlu0 %1963  ;;  %2573 = vadd.xlane.f32.xlu1 %v2572_v16  ;;  %v1961_v2 = vpop.permute.xlu1 %1960  ;;  %v290_v16 = vld [vmem:[%s9208_s1 + $0x338] sm:$0xff] }
 0x386   :  { %2104 = vperm.xlu0 %3985, %v283_v60   ;;  %vm2238_vm5 = vcmp.eq.s32.totalorder %v6778_v23, %v1961_v2  ;;  %vm2239_vm6 = vcmp.eq.s32.totalorder %v6778_v23, %v1964_v40 }
 0x387   :  { %v2363_v60 = vsel %vm2238_vm5, %v4879_v56, 0.0  ;;  %v2364_v49 = vsel %vm2239_vm6, %v4880_v62, 0.0  ;;  %v294_v62 = vld [vmem:[%s9208_s1 + $0x358] sm:$0xff] }
 0x388   :  { %v2584_v14 = vsel %vm312_vm0, %v2363_v60, 0.0  ;;  %v2587_v40 = vsel %vm312_vm0, %v2364_v49, 0.0  ;;  %v293_v60 = vld [vmem:[%s9208_s1 + $0x350] sm:$0xff] }
 0x389   :  { %v1970_v30 = vpop.permute.xlu0 %1969  ;;  %2576 = vadd.xlane.f32.xlu1 %v2575_v8  ;;  %v1967_v1 = vpop.permute.xlu1 %1966  ;;  %v4885_v49 = vld [vmem:[%s9207_s0 + $0x1b0] sm:$0xff] }
 0x38a   :  { %2107 = vperm.xlu0 %3985, %v284_v34   ;;  %v289_v34 = vld [vmem:[%s9208_s1 + $0x330] sm:$0xff]  ;;  %vm2240_vm7 = vcmp.eq.s32.totalorder %v6778_v23, %v1967_v1  ;;  %vm2241_vm8 = vcmp.eq.s32.totalorder %v6778_v23, %v1970_v30  ;;  %v4884_v1 = vld [vmem:[%s9207_s0 + $0x1a8] sm:$0xff] }
 0x38b   :  { %v2366_v2 = vsel %vm2241_vm8, %v4882_v13, 0.0 }
 0x38c   :  { %v2593_v30 = vsel %vm312_vm0, %v2366_v2, 0.0  ;;  %v296_v2 = vld [vmem:[%s9208_s1 + $0x368] sm:$0xff] }
 0x38d   :  { %v7464_v57 = vpop.permute.xlu0 %1975  ;;  %2579 = vadd.xlane.f32.xlu1 %v2578_v63  ;;  %v1973_v8 = vpop.permute.xlu1 %1972 }
 0x38e   :  { %2110 = vperm.xlu0 %3985, %v285_v12   ;;  %v4881_v12 = vld [vmem:[%s9207_s0 + $0x190] sm:$0xff]  ;;  %vm2242_vm9 = vcmp.eq.s32.totalorder %v6778_v23, %v1973_v8  ;;  %vm2243_vm10 = vcmp.eq.s32.totalorder %v6778_v23, %v7464_v57  ;;  %v295_v8 = vld [vmem:[%s9208_s1 + $0x360] sm:$0xff] }
 0x38f   :  { %v2365_v46 = vsel %vm2240_vm7, %v4881_v12, 0.0  ;;  %v2367_v15 = vsel %vm2242_vm9, %v4883_v10, 0.0 }
 0x390   :  { %v2596_v56 = vsel %vm312_vm0, %v2367_v15, 0.0 }
 0x391   :  { %v7474_v38 = vpop.permute.xlu0 %1981  ;;  %2582 = vadd.xlane.f32.xlu1 %v2581_v4 }
 0x392   :  { %2113 = vperm.xlu0 %3985, %v286_v5   ;;  %v2590_v5 = vsel %vm312_vm0, %v2365_v46, 0.0  ;;  %vm2245_vm12 = vcmp.eq.s32.totalorder %v6778_v23, %v7474_v38 }
 0x395   :  { %v7484_v0 = vpop.permute.xlu0 %1987  ;;  %2585 = vadd.xlane.f32.xlu1 %v2584_v14  ;;  %v2368_v14 = vsel %vm2243_vm10, %v4884_v1, 0.0  ;;  %v298_v1 = vld [vmem:[%s9208_s1 + $0x378] sm:$0xff] }
 0x396   :  { %2116 = vperm.xlu0 %3985, %v287_v6   ;;  %v292_v6 = vld [vmem:[%s9208_s1 + $0x348] sm:$0xff]  ;;  %v2599_v57 = vsel %vm312_vm0, %v2368_v14, 0.0  ;;  %vm2247_vm15 = vcmp.eq.s32.totalorder %v6778_v23, %v7484_v0  ;;  %v4346_v14 = vpop.eup %4345 }
 0x399   :  { %v7494_v3 = vpop.permute.xlu0 %1993  ;;  %2588 = vadd.xlane.f32.xlu1 %v2587_v40 }
 0x39a   :  { %2119 = vperm.xlu0 %3985, %v288_v17   ;;  %v1979_v17 = vpop.permute.xlu1 %1978  ;;  %vm2249_vm2 = vcmp.eq.s32.totalorder %v6778_v23, %v7494_v3 }
 0x39b   :  { %vm2244_vm11 = vcmp.eq.s32.totalorder %v6778_v23, %v1979_v17  ;;  %v297_v17 = vld [vmem:[%s9208_s1 + $0x370] sm:$0xff] }
 0x39c   :  { %v2369_v40 = vsel %vm2244_vm11, %v4885_v49, 0.0  ;;  %v4348_v49 = vpop.eup %4347 }
 0x39d   :  { %v7504_v58 = vpop.permute.xlu0 %1999  ;;  %2591 = vadd.xlane.f32.xlu1 %v2590_v5  ;;  %v2602_v46 = vsel %vm312_vm0, %v2369_v40, 0.0  ;;  %v4886_v5 = vld [vmem:[%s9207_s0 + $0x1b8] sm:$0xff] }
 0x39e   :  { %2122 = vperm.xlu0 %3985, %v289_v34   ;;  %v1985_v12 = vpop.permute.xlu1 %1984  ;;  %vm2251_vm4 = vcmp.eq.s32.totalorder %v6778_v23, %v7504_v58  ;;  %v4892_v58 = vld [vmem:[%s9207_s0 + $0x1e8] sm:$0xff] }
 0x39f   :  { %vm2246_vm14 = vcmp.eq.s32.totalorder %v6778_v23, %v1985_v12  ;;  %v1493_v12 = vmul.f32 0.6931472, %v4346_v14 }
 0x3a1   :  { %v7514_v43 = vpop.permute.xlu0 %2005  ;;  %2594 = vadd.xlane.f32.xlu1 %v2593_v30  ;;  %v4887_v30 = vld [vmem:[%s9207_s0 + $0x1c0] sm:$0xff] }
 0x3a2   :  { %2125 = vperm.xlu0 %3985, %v290_v16   ;;  %v1991_v47 = vpop.permute.xlu1 %1990  ;;  %vm2253_vm6 = vcmp.eq.s32.totalorder %v6778_v23, %v7514_v43  ;;  %v4894_v43 = vld [vmem:[%s9207_s0 + $0x1f8] sm:$0xff] }
 0x3a3   :  { %vm2248_vm1 = vcmp.eq.s32.totalorder %v6778_v23, %v1991_v47  ;;  %v4350_v47 = vpop.eup %4349 }
 0x3a4   :  { %v1497_v28 = vmul.f32 0.6931472, %v4350_v47  ;;  %v9588_v47 = vld [vmem:[#allocation36_spill] sm:$0xff] }
 0x3a5   :  { %v7524_v63 = vpop.permute.xlu0 %2011  ;;  %2597 = vadd.xlane.f32.xlu1 %v2596_v56  ;;  %v2372_v56 = vsel %vm2247_vm15, %v4888_v20, 0.0  ;;  %v9586_v20 = vld [vmem:[#allocation34_spill] sm:$0xff] }
 0x3a6   :  { %2128 = vperm.xlu0 %3985, %v291_v48   ;;  %v2370_v48 = vsel %vm2245_vm12, %v4886_v5, 0.0  ;;  %v2611_v0 = vsel %vm312_vm0, %v2372_v56, 0.0  ;;  %v1997_v40 = vpop.permute.xlu1 %1996  ;;  %vm2255_vm8 = vcmp.eq.s32.totalorder %v6778_v23, %v7524_v63  ;;  %v4896_v63 = vld [vmem:[%s9207_s0 + $0x208] sm:$0xff] }
 0x3a7   :  { %v2605_v38 = vsel %vm312_vm0, %v2370_v48, 0.0  ;;  %v1495_v48 = vmul.f32 0.6931472, %v4348_v49  ;;  %vm2250_vm3 = vcmp.eq.s32.totalorder %v6778_v23, %v1997_v40  ;;  %v2376_v49 = vsel %vm2251_vm4, %v4892_v58, 0.0 }
 0x3a9   :  { %v7535_v4 = vpop.permute.xlu0 %2017  ;;  %2600 = vadd.xlane.f32.xlu1 %v2599_v57  ;;  %v4889_v57 = vld [vmem:[%s9207_s0 + $0x1d0] sm:$0xff]  ;;  %v1716_v56 = vadd.f32 %v1495_v48, %v9586_v20  ;;  %v302_v48 = vld [vmem:[%s9208_s1 + $0x398] sm:$0xff] }
 0x3aa   :  { %2131 = vperm.xlu0 %3985, %v292_v6   ;;  %v2371_v6 = vsel %vm2246_vm14, %v4887_v30, 0.0  ;;  %v2003_v14 = vpop.permute.xlu1 %2002  ;;  %vm2257_vm10 = vcmp.eq.s32.totalorder %v6778_v23, %v7535_v4 }
 0x3ab   :  { %v2608_v15 = vsel %vm312_vm0, %v2371_v6, 0.0  ;;  %v300_v6 = vld [vmem:[%s9208_s1 + $0x388] sm:$0xff]  ;;  %vm2252_vm5 = vcmp.eq.s32.totalorder %v6778_v23, %v2003_v14 }
 0x3ad   :  { %v7545_v34 = vpop.permute.xlu0 %2023  ;;  %2603 = vadd.xlane.f32.xlu1 %v2602_v46 }
 0x3ae   :  { %2134 = vperm.xlu0 %3985, %v293_v60   ;;  %vm2259_vm12 = vcmp.eq.s32.totalorder %v6778_v23, %v7545_v34 }
 0x3b1   :  { %v7556_v16 = vpop.permute.xlu0 %2029  ;;  %2606 = vadd.xlane.f32.xlu1 %v2605_v38  ;;  %v9585_v38 = vld [vmem:[#allocation31_spill] sm:$0xff] }
 0x3b2   :  { %2137 = vperm.xlu0 %3985, %v294_v62   ;;  %v2373_v62 = vsel %vm2248_vm1, %v4889_v57, 0.0  ;;  %v7633_v57 = vsub.f32 %v1716_v56, %v7352_v52  ;;  %v2009_v56 = vpop.permute.xlu1 %2008  ;;  %vm2261_vm15 = vcmp.eq.s32.totalorder %v6778_v23, %v7556_v16 }
 0x3b3   :  { %v2614_v46 = vsel %vm312_vm0, %v2373_v62, 0.0  ;;  %vm2254_vm7 = vcmp.eq.s32.totalorder %v6778_v23, %v2009_v56 }
 0x3b4   :  { %v2968_v52 = vsub.f32 0.0, %v7633_v57 }
 0x3b5   :  { %v7566_v13 = vpop.permute.xlu0 %2038  ;;  %2609 = vadd.xlane.f32.xlu1 %v2608_v15  ;;  %v4891_v15 = vld [vmem:[%s9207_s0 + $0x1e0] sm:$0xff] }
 0x3b6   :  { %2140 = vperm.xlu0 %3985, %v295_v8   ;;  %v4890_v8 = vld [vmem:[%s9207_s0 + $0x1d8] sm:$0xff] }
 0x3b7   :  { %v2374_v5 = vsel %vm2249_vm2, %v4890_v8, 0.0 }
 0x3b8   :  { %v2617_v30 = vsel %vm312_vm0, %v2374_v5, 0.0  ;;  %v2623_v5 = vsel %vm312_vm0, %v2376_v49, 0.0 }
 0x3b9   :  { %v7579_v10 = vpop.permute.xlu0 %2047  ;;  %2612 = vadd.xlane.f32.xlu1 %v2611_v0 }
 0x3ba   :  { %2143 = vperm.xlu0 %3985, %v296_v2   ;;  %v1715_v2 = vadd.f32 %v1493_v12, %v9585_v38 }
 0x3bc   :  { %v7625_v25 = vsub.f32 %v1715_v2, %v7334_v18  ;;  %v301_v18 = vld [vmem:[%s9208_s1 + $0x390] sm:$0xff] }
 0x3bd   :  { %v7589_v60 = vpop.permute.xlu0 %2050  ;;  %2615 = vadd.xlane.f32.xlu1 %v2614_v46  ;;  %v4893_v2 = vld [vmem:[%s9207_s0 + $0x1f0] sm:$0xff] }
 0x3be   :  { %2146 = vperm.xlu0 %3985, %v297_v17   ;;  %v2375_v17 = vsel %vm2250_vm3, %v4891_v15, 0.0  ;;  %v2967_v12 = vsub.f32 0.0, %v7625_v25  ;;  %v2377_v29 = vsel %vm2252_vm5, %v4893_v2, 0.0  ;;  %v9590_v2 = vld [vmem:[#allocation38_spill] sm:$0xff]  ;;  %vm2264_vm3 = vcmp.eq.s32.totalorder %v6778_v23, %v7566_v13 }
 0x3bf   :  { %v2620_v62 = vsel %vm312_vm0, %v2375_v17, 0.0  ;;  %v4905_v13 = vld [vmem:[%s9207_s0 + $0x250] sm:$0xff] }
 0x3c1   :  { %v7602_v21 = vpop.permute.xlu0 %2053  ;;  %2618 = vadd.xlane.f32.xlu1 %v2617_v30  ;;  %v3119_v30 = vmul.f32 1.442695, %v2967_v12 }
 0x3c2   :  { %2149 = vperm.xlu0 %3985, %v298_v1   ;;  %v4352_v1 = vpop.eup %4351 }
 0x3c3   :  { %v1499_v40 = vmul.f32 0.6931472, %v4352_v1  ;;  %v4354_v38 = vpop.eup %4353  ;;  %v3121_v1 = vmul.f32 1.442695, %v2968_v52  ;;  %4363 = vpow2.f32 %v3119_v30  ;;  %v304_v52 = vld [vmem:[%s9208_s1 + $0x3a8] sm:$0xff] }
 0x3c4   :  { %v4356_v20 = vpop.eup %4355  ;;  %v1501_v32 = vmul.f32 0.6931472, %v4354_v38 }
 0x3c5   :  { %v7612_v3 = vpop.permute.xlu0 %2056  ;;  %2621 = vadd.xlane.f32.xlu1 %v2620_v62  ;;  %v1718_v15 = vadd.f32 %v1499_v40, %v9588_v47  ;;  %v2378_v62 = vsel %vm2253_vm6, %v4894_v43, 0.0  ;;  %4365 = vpow2.f32 %v3121_v1  ;;  %v9589_v40 = vld [vmem:[#allocation35_spill] sm:$0xff]  ;;  %v2380_v1 = vsel %vm2255_vm8, %v4896_v63, 0.0 }
 0x3c6   :  { %2152 = vperm.xlu0 %3985, %v299_v24   ;;  %v9587_v24 = vld [vmem:[#allocation33_spill] sm:$0xff]  ;;  %v1719_v33 = vadd.f32 %v1501_v32, %v9589_v40  ;;  %v2629_v12 = vsel %vm312_vm0, %v2378_v62, 0.0  ;;  %4367 = vlog2.f32 %v6428_v36  ;;  %v2015_v36 = vpop.permute.xlu1 %2014  ;;  %v305_v32 = vld [vmem:[%s9208_s1 + $0x3b0] sm:$0xff]  ;;  %v306_v40 = vld [vmem:[%s9208_s1 + $0x3b8] sm:$0xff]  ;;  %vm2267_vm6 = vcmp.eq.s32.totalorder %v6778_v23, %v7579_v10 }
 0x3c7   :  { %v1717_v8 = vadd.f32 %v1497_v28, %v9587_v24  ;;  %v7666_v14 = vsub.f32 %v1718_v15, %v7365_v19  ;;  %v2626_v28 = vsel %vm312_vm0, %v2377_v29, 0.0  ;;  %v4358_v24 = vpop.eup %4357  ;;  %4369 = vlog2.f32 %v6444_v37  ;;  %v4908_v10 = vld [vmem:[%s9207_s0 + $0x268] sm:$0xff] }
 0x3c8   :  { %v7691_v38 = vsub.f32 %v1719_v33, %v7369_v39  ;;  %v4360_v47 = vpop.eup %4359  ;;  %v1505_v15 = vmul.f32 0.6931472, %v4358_v24  ;;  %vm2256_vm9 = vcmp.eq.s32.totalorder %v6778_v23, %v2015_v36  ;;  %v4897_v33 = vld [vmem:[%s9207_s0 + $0x210] sm:$0xff] }
 0x3c9   :  { %v7630_v0 = vpop.permute.xlu0 %2059  ;;  %2624 = vadd.xlane.f32.xlu1 %v2623_v5  ;;  %v2970_v49 = vsub.f32 0.0, %v7666_v14  ;;  %v1507_v37 = vmul.f32 0.6931472, %v4360_v47 }
 0x3ca   :  { %2155 = vperm.xlu0 %3985, %v300_v6   ;;  %v7658_v6 = vsub.f32 %v1717_v8, %v7354_v50  ;;  %v303_v50 = vld [vmem:[%s9208_s1 + $0x3a0] sm:$0xff]  ;;  %v2021_v36 = vpop.permute.xlu1 %2020 }
 0x3cb   :  { %v4895_v8 = vld [vmem:[%s9207_s0 + $0x200] sm:$0xff]  ;;  %vm2258_vm11 = vcmp.eq.s32.totalorder %v6778_v23, %v2021_v36 }
 0x3cc   :  { %v2969_v58 = vsub.f32 0.0, %v7658_v6  ;;  %v2379_v5 = vsel %vm2254_vm7, %v4895_v8, 0.0  ;;  %vm2268_vm7 = vcmp.eq.s32.totalorder %v6778_v23, %v7589_v60 }
 0x3cd   :  { %v7644_v46 = vpop.permute.xlu0 %2062  ;;  %2627 = vadd.xlane.f32.xlu1 %v2626_v28  ;;  %v2632_v39 = vsel %vm312_vm0, %v2379_v5, 0.0  ;;  %v2971_v28 = vsub.f32 0.0, %v7691_v38  ;;  %v9592_v5 = vld [vmem:[#allocation40_spill] sm:$0xff] }
 0x3ce   :  { %2158 = vperm.xlu0 %3985, %v301_v18   ;;  %v1503_v18 = vmul.f32 0.6931472, %v4356_v20  ;;  %v3125_v20 = vmul.f32 1.442695, %v2970_v49  ;;  %v2635_v49 = vsel %vm312_vm0, %v2380_v1, 0.0  ;;  %v4898_v1 = vld [vmem:[%s9207_s0 + $0x218] sm:$0xff] }
 0x3cf   :  { %v3127_v24 = vmul.f32 1.442695, %v2971_v28 }
 0x3d0   :  { %v1720_v29 = vadd.f32 %v1503_v18, %v9590_v2  ;;  %v9591_v18 = vld [vmem:[#allocation37_spill] sm:$0xff] }
 0x3d1   :  { %v7663_v17 = vpop.permute.xlu0 %2065  ;;  %2630 = vadd.xlane.f32.xlu1 %v2629_v12  ;;  %v2381_v12 = vsel %vm2256_vm9, %v4897_v33, 0.0  ;;  %vm2269_vm9 = vcmp.eq.s32.totalorder %v6778_v23, %v7602_v21 }
 0x3d2   :  { %2161 = vperm.xlu0 %3985, %v302_v48   ;;  %v3123_v48 = vmul.f32 1.442695, %v2969_v58  ;;  %v7700_v56 = vsub.f32 %v1720_v29, %v7376_v22  ;;  %v1721_v58 = vadd.f32 %v1505_v15, %v9591_v18 }
 0x3d4   :  { %4371 = vpow2.f32 %v3123_v48  ;;  %v2972_v62 = vsub.f32 0.0, %v7700_v56  ;;  %v7724_v8 = vsub.f32 %v1721_v58, %v7384_v59  ;;  %v1722_v48 = vadd.f32 %v1507_v37, %v9592_v5 }
 0x3d5   :  { %v7678_v19 = vpop.permute.xlu0 %2068  ;;  %2633 = vadd.xlane.f32.xlu1 %v2632_v39  ;;  %4373 = vpow2.f32 %v3125_v20  ;;  %v2638_v59 = vsel %vm312_vm0, %v2381_v12, 0.0  ;;  %v307_v39 = vld [vmem:[%s9208_s1 + $0x3c0] sm:$0xff] }
 0x3d6   :  { %2164 = vperm.xlu0 %3985, %v303_v50   ;;  %v4362_v50 = vpop.eup %4361  ;;  %4375 = vlog2.f32 %v6442_v55  ;;  %v3129_v15 = vmul.f32 1.442695, %v2972_v62  ;;  %v7733_v20 = vsub.f32 %v1722_v48, %v7386_v54  ;;  %v2973_v54 = vsub.f32 0.0, %v7724_v8  ;;  %v9594_v48 = vld [vmem:[#allocation42_spill] sm:$0xff] }
 0x3d7   :  { %v4364_v43 = vpop.eup %4363  ;;  %v1509_v55 = vmul.f32 0.6931472, %v4362_v50  ;;  %4377 = vlog2.f32 %v6458_v41  ;;  %v2382_v41 = vsel %vm2257_vm10, %v4898_v1, 0.0  ;;  %vm2270_vm10 = vcmp.eq.s32.totalorder %v6778_v23, %v7612_v3 }
 0x3d8   :  { %v3342_v47 = vsub.f32 1.0, %v4364_v43  ;;  %4379 = vpow2.f32 %v3127_v24  ;;  %v9593_v43 = vld [vmem:[#allocation39_spill] sm:$0xff]  ;;  %v2974_v4 = vsub.f32 0.0, %v7733_v20  ;;  %v3131_v24 = vmul.f32 1.442695, %v2973_v54  ;;  %v4900_v54 = vld [vmem:[%s9207_s0 + $0x228] sm:$0xff] }
 0x3d9   :  { %v7696_v30 = vpop.permute.xlu0 %2071  ;;  %2636 = vadd.xlane.f32.xlu1 %v2635_v49  ;;  %4381 = vlog2.f32 %v6456_v7  ;;  %v1723_v62 = vadd.f32 %v1509_v55, %v9593_v43  ;;  %v2641_v49 = vsel %vm312_vm0, %v2382_v41, 0.0  ;;  %v4899_v7 = vld [vmem:[%s9207_s0 + $0x220] sm:$0xff]  ;;  %v309_v41 = vld [vmem:[%s9208_s1 + $0x3d0] sm:$0xff] }
 0x3da   :  { %2167 = vperm.xlu0 %3985, %v304_v52   ;;  %v4366_v52 = vpop.eup %4365  ;;  %v3467_v50 = vmul.f32 %v3342_v47, %v3342_v47  ;;  %4383 = vpow2.f32 %v3129_v15  ;;  %v2383_v12 = vsel %vm2258_vm11, %v4899_v7, 0.0 }
 0x3db   :  { %v4368_v29 = vpop.eup %4367  ;;  %v3343_v63 = vsub.f32 1.0, %v4366_v52  ;;  %v7760_v5 = vsub.f32 %v1723_v62, %v7398_v35  ;;  %v2644_v1 = vsel %vm312_vm0, %v2383_v12, 0.0  ;;  %4385 = vlog2.f32 %v6472_v44 }
 0x3dc   :  { %v1511_v37 = vmul.f32 0.6931472, %v4368_v29  ;;  %v3592_v36 = vmul.f32 %v3467_v50, %v7625_v25  ;;  %4387 = vpow2.f32 %v3131_v24 }
 0x3dd   :  { %v7711_v22 = vpop.permute.xlu0 %2074  ;;  %2639 = vadd.xlane.f32.xlu1 %v2638_v59  ;;  %v3468_v33 = vmul.f32 %v3343_v63, %v3343_v63  ;;  %v2027_v59 = vpop.permute.xlu1 %2026  ;;  %v9595_v63 = vld [vmem:[#allocation41_spill] sm:$0xff]  ;;  %v2975_v43 = vsub.f32 0.0, %v7760_v5 }
 0x3de   :  { %2170 = vperm.xlu0 %3985, %v305_v32   ;;  %v4370_v32 = vpop.eup %4369  ;;  %v1724_v29 = vadd.f32 %v1511_v37, %v9594_v48  ;;  %vm2260_vm14 = vcmp.eq.s32.totalorder %v6778_v23, %v2027_v59 }
 0x3df   :  { %v4372_v18 = vpop.eup %4371  ;;  %v1513_v58 = vmul.f32 0.6931472, %v4370_v32  ;;  %v3593_v37 = vmul.f32 %v3468_v33, %v7633_v57 }
 0x3e0   :  { %v4374_v52 = vpop.eup %4373  ;;  %v3344_v15 = vsub.f32 1.0, %v4372_v18  ;;  %v7769_v32 = vsub.f32 %v1724_v29, %v7394_v27  ;;  %v2384_v27 = vsel %vm2259_vm12, %v4900_v54, 0.0  ;;  %v3745_v18 = vsel %vm3691_vm13, %v3592_v36, 0.0  ;;  %v311_v54 = vld [vmem:[%s9208_s1 + $0x3e0] sm:$0xff] }
 0x3e1   :  { %v7729_v2 = vpop.permute.xlu0 %2077  ;;  %2642 = vadd.xlane.f32.xlu1 %v2641_v49  ;;  %v4376_v47 = vpop.eup %4375  ;;  %v1725_v35 = vadd.f32 %v1513_v58, %v9595_v63  ;;  %v3345_v25 = vsub.f32 1.0, %v4374_v52  ;;  %v3746_v34 = vadd.f32 %v3745_v18, %v7420_v61  ;;  %v3747_v12 = vsel %vm3691_vm13, %v3593_v37, 0.0  ;;  %v4901_v61 = vld [vmem:[%s9207_s0 + $0x230] sm:$0xff] }
 0x3e2   :  { %2173 = vperm.xlu0 %3985, %v306_v40   ;;  %v308_v40 = vld [vmem:[%s9208_s1 + $0x3c8] sm:$0xff]  ;;  %v4378_v50 = vpop.eup %4377  ;;  %v1515_v57 = vmul.f32 0.6931472, %v4376_v47  ;;  %v3469_v58 = vmul.f32 %v3344_v15, %v3344_v15  ;;  %v2976_v49 = vsub.f32 0.0, %v7769_v32  ;;  %v2033_v24 = vpop.permute.xlu1 %2032  ;;  %v2385_v48 = vsel %vm2260_vm14, %v4901_v61, 0.0 }
 0x3e3   :  { %v7786_v62 = vsub.f32 %v1725_v35, %v7405_v53  ;;  %v310_v53 = vld [vmem:[%s9208_s1 + $0x3d8] sm:$0xff]  ;;  %v1517_v7 = vmul.f32 0.6931472, %v4378_v50  ;;  %v3470_v52 = vmul.f32 %v3345_v25, %v3345_v25  ;;  %v3135_v47 = vmul.f32 1.442695, %v2975_v43  ;;  %v9598_v61 = vld [vmem:[#allocation46_spill] sm:$0xff] }
 0x3e4   :  { %v9596_v35 = vld [vmem:[#allocation44_spill] sm:$0xff]  ;;  %v3748_v37 = vadd.f32 %v3747_v12, %v3746_v34  ;;  %v3137_v25 = vmul.f32 1.442695, %v2976_v49  ;;  %v2650_v59 = vsel %vm312_vm0, %v2385_v48, 0.0  ;;  %v9597_v43 = vld [vmem:[#allocation43_spill] sm:$0xff]  ;;  %vm2262_vm1 = vcmp.eq.s32.totalorder %v6778_v23, %v2033_v24 }
 0x3e5   :  { %v7747_v28 = vpop.permute.xlu0 %2080  ;;  %2645 = vadd.xlane.f32.xlu1 %v2644_v1  ;;  %v2977_v36 = vsub.f32 0.0, %v7786_v62  ;;  %v1726_v1 = vadd.f32 %v1515_v57, %v9596_v35  ;;  %v1727_v18 = vadd.f32 %v1517_v7, %v9597_v43  ;;  %vm2271_vm12 = vcmp.eq.s32.totalorder %v6778_v23, %v7630_v0 }
 0x3e6   :  { %2176 = vperm.xlu0 %3985, %v307_v39   ;;  %v3133_v39 = vmul.f32 1.442695, %v2974_v4  ;;  %v4380_v4 = vpop.eup %4379  ;;  %vm2272_vm14 = vcmp.eq.s32.totalorder %v6778_v23, %v7644_v46 }
 0x3e7   :  { %v4382_v33 = vpop.eup %4381  ;;  %v3346_v63 = vsub.f32 1.0, %v4380_v4  ;;  %v7824_v4 = vsub.f32 %v1726_v1, %v7408_v45 }
 0x3e8   :  { %4389 = vpow2.f32 %v3133_v39  ;;  %v4384_v29 = vpop.eup %4383  ;;  %v3594_v39 = vmul.f32 %v3469_v58, %v7658_v6  ;;  %v4902_v6 = vld [vmem:[%s9207_s0 + $0x238] sm:$0xff]  ;;  %v3139_v58 = vmul.f32 1.442695, %v2977_v36 }
 0x3e9   :  { %v7765_v55 = vpop.permute.xlu0 %2083  ;;  %v3347_v50 = vsub.f32 1.0, %v4384_v29  ;;  %v2386_v57 = vsel %vm2261_vm15, %v4902_v6, 0.0  ;;  %4391 = vpow2.f32 %v3135_v47  ;;  %v4386_v34 = vpop.eup %4385  ;;  %v4903_v29 = vld [vmem:[%s9207_s0 + $0x240] sm:$0xff] }
 0x3ea   :  { %2179 = vperm.xlu0 %3985, %v308_v40   ;;  %v2647_v40 = vsel %vm312_vm0, %v2384_v27, 0.0  ;;  %v3595_v27 = vmul.f32 %v3470_v52, %v7666_v14  ;;  %v3749_v49 = vsel %vm3691_vm13, %v3594_v39, 0.0  ;;  %v4388_v16 = vpop.eup %4387  ;;  %4393 = vpow2.f32 %v3137_v25 }
 0x3eb   :  { %2648 = vadd.xlane.f32.xlu1 %v2647_v40  ;;  %v3471_v40 = vmul.f32 %v3346_v63, %v3346_v63  ;;  %v3750_v7 = vadd.f32 %v3749_v49, %v3748_v37  ;;  %v2653_v12 = vsel %vm312_vm0, %v2386_v57, 0.0  ;;  %v3472_v52 = vmul.f32 %v3347_v50, %v3347_v50 }
 0x3ec   :  { %v3751_v45 = vsel %vm3691_vm13, %v3595_v27, 0.0  ;;  %v1521_v36 = vmul.f32 0.6931472, %v4386_v34  ;;  %4395 = vpow2.f32 %v3139_v58  ;;  %v2978_v39 = vsub.f32 0.0, %v7824_v4 }
 0x3ed   :  { %v7789_v44 = vpop.permute.xlu0 %2086  ;;  %v3596_v35 = vmul.f32 %v3471_v40, %v7691_v38  ;;  %v3348_v1 = vsub.f32 1.0, %v4388_v16  ;;  %v3752_v25 = vadd.f32 %v3751_v45, %v3750_v7  ;;  %v4904_v38 = vld [vmem:[%s9207_s0 + $0x248] sm:$0xff]  ;;  %v2389_v45 = vsel %vm2264_vm3, %v4905_v13, 0.0 }
 0x3ee   :  { %2182 = vperm.xlu0 %3985, %v309_v41   ;;  %v1519_v41 = vmul.f32 0.6931472, %v4382_v33  ;;  %v2036_v33 = vpop.permute.xlu1 %2035 }
 0x3ef   :  { %2651 = vadd.xlane.f32.xlu1 %v2650_v59  ;;  %vm2263_vm2 = vcmp.eq.s32.totalorder %v6778_v23, %v2036_v33  ;;  %v9599_v59 = vld [vmem:[#allocation126_spill] sm:$0xff]  ;;  %v3473_v58 = vmul.f32 %v3348_v1, %v3348_v1 }
 0x3f0   :  { %v1728_v48 = vadd.f32 %v1519_v41, %v9598_v61  ;;  %4397 = vlog2.f32 %v9599_v59  ;;  %v2388_v43 = vsel %vm2263_vm2, %v4904_v38, 0.0  ;;  %vm2274_vm2 = vcmp.eq.s32.totalorder %v6778_v23, %v7678_v19 }
 0x3f1   :  { %v7807_v15 = vpop.permute.xlu0 %2089  ;;  %4399 = vlog2.f32 %v6480_v26  ;;  %v2659_v26 = vsel %vm312_vm0, %v2388_v43, 0.0  ;;  %v3598_v61 = vmul.f32 %v3473_v58, %v7724_v8  ;;  %v4906_v8 = vld [vmem:[%s9207_s0 + $0x258] sm:$0xff] }
 0x3f2   :  { %2185 = vperm.xlu0 %3985, %v310_v53   ;;  %v7831_v53 = vsub.f32 %v1727_v18, %v7414_v9  ;;  %v2387_v9 = vsel %vm2262_vm1, %v4903_v29, 0.0  ;;  %v4390_v47 = vpop.eup %4389  ;;  %v7848_v37 = vsub.f32 %v1728_v48, %v7424_v31  ;;  %v2042_v50 = vpop.permute.xlu1 %2041  ;;  %v3141_v18 = vmul.f32 1.442695, %v2978_v39  ;;  %v9600_v31 = vld [vmem:[#allocation45_spill] sm:$0xff] }
 0x3f3   :  { %2654 = vadd.xlane.f32.xlu1 %v2653_v12  ;;  %v2656_v24 = vsel %vm312_vm0, %v2387_v9, 0.0  ;;  %v3349_v27 = vsub.f32 1.0, %v4390_v47  ;;  %v1729_v6 = vadd.f32 %v1521_v36, %v9600_v31  ;;  %v4392_v40 = vpop.eup %4391  ;;  %4401 = vlog2.f32 %v6482_v42 }
 0x3f4   :  { %v2979_v41 = vsub.f32 0.0, %v7831_v53  ;;  %v2980_v49 = vsub.f32 0.0, %v7848_v37  ;;  %4403 = vpow2.f32 %v3141_v18  ;;  %vm2265_vm4 = vcmp.eq.s32.totalorder %v6778_v23, %v2042_v50 }
 0x3f5   :  { %v7827_v14 = vpop.permute.xlu0 %2092  ;;  %v3474_v7 = vmul.f32 %v3349_v27, %v3349_v27  ;;  %v7868_v12 = vsub.f32 %v1729_v6, %v7422_v11  ;;  %v3350_v48 = vsub.f32 1.0, %v4392_v40  ;;  %v2662_v36 = vsel %vm312_vm0, %v2389_v45, 0.0  ;;  %v4907_v6 = vld [vmem:[%s9207_s0 + $0x260] sm:$0xff] }
 0x3f6   :  { %2188 = vperm.xlu0 %3985, %v311_v54   ;;  %v3597_v54 = vmul.f32 %v3472_v52, %v7700_v56  ;;  %v3753_v56 = vsel %vm3691_vm13, %v3596_v35, 0.0  ;;  %v3143_v34 = vmul.f32 1.442695, %v2979_v41  ;;  %v4394_v52 = vpop.eup %4393  ;;  %v3145_v29 = vmul.f32 1.442695, %v2980_v49  ;;  %v2045_v9 = vpop.permute.xlu1 %2044 }
 0x3f7   :  { %2657 = vadd.xlane.f32.xlu1 %v2656_v24  ;;  %v3754_v33 = vadd.f32 %v3753_v56, %v3752_v25  ;;  %v4396_v11 = vpop.eup %4395  ;;  %v3599_v39 = vmul.f32 %v3474_v7, %v7733_v20  ;;  %v3351_v35 = vsub.f32 1.0, %v4394_v52  ;;  %v2981_v1 = vsub.f32 0.0, %v7868_v12  ;;  %v9601_v25 = vld [vmem:[#allocation127_spill] sm:$0xff] }
 0x3f8   :  { %v3755_v16 = vsel %vm3691_vm13, %v3597_v54, 0.0  ;;  %4405 = vpow2.f32 %v3143_v34  ;;  %v2390_v41 = vsel %vm2265_vm4, %v4906_v8, 0.0  ;;  %vm2266_vm5 = vcmp.eq.s32.totalorder %v6778_v23, %v2045_v9  ;;  %v9603_v9 = vld [vmem:[#allocation129_spill] sm:$0xff]  ;;  %v9605_v8 = vld [vmem:[#allocation130_spill] sm:$0xff] }
 0x3f9   :  { %v7843_v63 = vpop.permute.xlu0 %2095  ;;  %4407 = vlog2.f32 %v6486_v51  ;;  %v3756_v47 = vadd.f32 %v3755_v16, %v3754_v33  ;;  %v3757_v20 = vsel %vm3691_vm13, %v3598_v61, 0.0  ;;  %v3475_v59 = vmul.f32 %v3350_v48, %v3350_v48  ;;  %v9602_v16 = vld [vmem:[#allocation128_spill] sm:$0xff] }
 0x3fa   :  { %4409 = vlog2.f32 %v9601_v25  ;;  %v4398_v24 = vpop.eup %4397  ;;  %v3352_v54 = vsub.f32 1.0, %v4396_v11  ;;  %v2665_v43 = vsel %vm312_vm0, %v2390_v41, 0.0  ;;  %v3759_v18 = vsel %vm3691_vm13, %v3599_v39, 0.0  ;;  %v9604_v11 = vld [vmem:[#allocation48_spill] sm:$0xff] }
 0x3fb   :  { %2660 = vadd.xlane.f32.xlu1 %v2659_v26  ;;  %4411 = vpow2.f32 %v3145_v29  ;;  %v4400_v27 = vpop.eup %4399  ;;  %v3758_v38 = vadd.f32 %v3757_v20, %v3756_v47  ;;  %v3476_v50 = vmul.f32 %v3351_v35, %v3351_v35  ;;  %v3147_v31 = vmul.f32 1.442695, %v2981_v1 }
 0x3fc   :  { %v2391_v56 = vsel %vm2266_vm5, %v4907_v6, 0.0  ;;  %v1523_v34 = vmul.f32 0.6931472, %v4398_v24  ;;  %v3600_v40 = vmul.f32 %v3475_v59, %v7760_v5  ;;  %v3477_v33 = vmul.f32 %v3352_v54, %v3352_v54  ;;  %v9606_v59 = vld [vmem:[#allocation131_spill] sm:$0xff] }
 0x3fd   :  { %v7860_v57 = vpop.permute.xlu0 %2098  ;;  %v4402_v58 = vpop.eup %4401  ;;  %4413 = vlog2.f32 %v9602_v16  ;;  %v3760_v7 = vadd.f32 %v3759_v18, %v3758_v38  ;;  %v2668_v13 = vsel %vm312_vm0, %v2391_v56, 0.0  ;;  %v1527_v52 = vmul.f32 0.6931472, %v4400_v27  ;;  %v9607_v38 = vld [vmem:[#allocation50_spill] sm:$0xff]  ;;  %v9608_v56 = vld [vmem:[#allocation47_spill] sm:$0xff] }
 0x3fe   :  { %v4404_v26 = vpop.eup %4403  ;;  %v3601_v61 = vmul.f32 %v3476_v50, %v7769_v32  ;;  %4415 = vpow2.f32 %v3147_v31  ;;  %v2392_v48 = vsel %vm2267_vm6, %v4908_v10, 0.0  ;;  %v1525_v5 = vmul.f32 0.6931472, %v4402_v58  ;;  %v4910_v50 = vld [vmem:[%s9207_s0 + $0x2d8] sm:$0xff] }
 0x3ff   :  { %2663 = vadd.xlane.f32.xlu1 %v2662_v36  ;;  %4417 = vlog2.f32 %v9603_v9  ;;  %v1730_v47 = vadd.f32 %v1523_v34, %v9604_v11  ;;  %v3761_v32 = vsel %vm3691_vm13, %v3600_v40, 0.0  ;;  %v3602_v39 = vmul.f32 %v3477_v33, %v7786_v62  ;;  %v4909_v62 = vld [vmem:[%s9207_s0 + $0x270] sm:$0xff] }
 0x400   :  { %v3353_v35 = vsub.f32 1.0, %v4404_v26  ;;  %vm2281_vm8 = vcmp.eq.s32.totalorder %v6778_v23, %v7807_v15  ;;  %4419 = vlog2.f32 %v9605_v8  ;;  %v3762_v41 = vadd.f32 %v3761_v32, %v3760_v7  ;;  %v9611_v32 = vld [vmem:[#allocation52_spill] sm:$0xff] }
 0x401   :  { %v7874_v42 = vpop.permute.xlu0 %2101  ;;  %v2671_v24 = vsel %vm312_vm0, %v2392_v48, 0.0  ;;  %4421 = vlog2.f32 %v9606_v59  ;;  %v3763_v54 = vsel %vm3691_vm13, %v3601_v61, 0.0  ;;  %v2393_v27 = vsel %vm2268_vm7, %v4909_v62, 0.0  ;;  %v4911_v61 = vld [vmem:[%s9207_s0 + $0x278] sm:$0xff]  ;;  %v4912_v59 = vld [vmem:[%s9207_s0 + $0x320] sm:$0xff] }
 0x402   :  { %v4406_v45 = vpop.eup %4405  ;;  %v2406_v31 = vsel %vm2281_vm8, %v4910_v50, 0.0  ;;  %v1731_v58 = vadd.f32 %v1525_v5, %v9608_v56  ;;  %v3765_v40 = vsel %vm3691_vm13, %v3602_v39, 0.0  ;;  %v3478_v33 = vmul.f32 %v3353_v35, %v3353_v35  ;;  %v9610_v5 = vld [vmem:[#allocation133_spill] sm:$0xff] }
 0x403   :  { %2666 = vadd.xlane.f32.xlu1 %v2665_v43  ;;  %v4408_v29 = vpop.eup %4407  ;;  %v3354_v25 = vsub.f32 1.0, %v4406_v45  ;;  %v1732_v43 = vadd.f32 %v1527_v52, %v9607_v38  ;;  %v3764_v16 = vadd.f32 %v3763_v54, %v3762_v41  ;;  %v2674_v45 = vsel %vm312_vm0, %v2393_v27, 0.0  ;;  %v9609_v52 = vld [vmem:[#allocation132_spill] sm:$0xff] }
 0x404   :  { %v4410_v1 = vpop.eup %4409  ;;  %v1531_v18 = vmul.f32 0.6931472, %v4408_v29  ;;  %4423 = vlog2.f32 %v9609_v52  ;;  %v2394_v10 = vsel %vm2269_vm9, %v4911_v61, 0.0  ;;  %v2713_v48 = vsel %vm312_vm0, %v2406_v31, 0.0 }
 0x405   :  { %v7888_v51 = vpop.permute.xlu0 %2104  ;;  %v4412_v20 = vpop.eup %4411  ;;  %v1529_v60 = vmul.f32 0.6931472, %v4410_v1  ;;  %v3479_v7 = vmul.f32 %v3354_v25, %v3354_v25  ;;  %4425 = vlog2.f32 %v9610_v5  ;;  %v3766_v9 = vadd.f32 %v3765_v40, %v3764_v16 }
 0x406   :  { %v7956_v39 = vadd.f32 %v1531_v18, %v9611_v32  ;;  %v3603_v1 = vmul.f32 %v3478_v33, %v7824_v4  ;;  %v4913_v4 = vld [vmem:[%s9207_s0 + $0x280] sm:$0xff]  ;;  %vm2273_vm1 = vcmp.eq.s32.totalorder %v6778_v23, %v7663_v17  ;;  %vm2275_vm4 = vcmp.eq.s32.totalorder %v6778_v23, %v7696_v30 }
 0x407   :  { %2669 = vadd.xlane.f32.xlu1 %v2668_v13  ;;  %v3355_v13 = vsub.f32 1.0, %v4412_v20  ;;  %v4414_v29 = vpop.eup %4413  ;;  %v3604_v25 = vmul.f32 %v3479_v7, %v7831_v53  ;;  %v2677_v20 = vsel %vm312_vm0, %v2394_v10, 0.0  ;;  %v2395_v53 = vsel %vm2270_vm10, %v4913_v4, 0.0  ;;  %v4914_v10 = vld [vmem:[%s9207_s0 + $0x288] sm:$0xff] }
 0x408   :  { %v4416_v35 = vpop.eup %4415  ;;  %v1535_v18 = vmul.f32 0.6931472, %v4414_v29  ;;  %v3767_v16 = vsel %vm3691_vm13, %v3603_v1, 0.0  ;;  %v9614_v29 = vld [vmem:[#allocation135_spill] sm:$0xff]  ;;  %vm2276_vm5 = vcmp.eq.s32.totalorder %v6778_v23, %v7711_v22  ;;  %vm2277_vm7 = vcmp.eq.s32.totalorder %v6778_v23, %v7729_v2 }
 0x409   :  { %v7898_v49 = vpop.permute.xlu0 %2107  ;;  %v4418_v41 = vpop.eup %4417  ;;  %v3356_v50 = vsub.f32 1.0, %v4416_v35  ;;  %v3769_v61 = vsel %vm3691_vm13, %v3604_v25, 0.0  ;;  %v4915_v25 = vld [vmem:[%s9207_s0 + $0x330] sm:$0xff]  ;;  %vm2278_vm8 = vcmp.eq.s32.totalorder %v6778_v23, %v7747_v28  ;;  %vm2279_vm10 = vcmp.eq.s32.totalorder %v6778_v23, %v7765_v55 }
 0x40a   :  { %v2568_v6 = vpop.xlane.xlu1 %2567  ;;  %v4420_v38 = vpop.eup %4419  ;;  %v1533_v33 = vmul.f32 0.6931472, %v4418_v41 }
 0x40b   :  { %2672 = vadd.xlane.f32.xlu1 %v2671_v24  ;;  %v7940_v26 = vsub.f32 %v1730_v47, %v2568_v6  ;;  %v3480_v24 = vmul.f32 %v3355_v13, %v3355_v13  ;;  %v9612_v6 = vld [vmem:[#allocation49_spill] sm:$0xff]  ;;  %v4422_v40 = vpop.eup %4421  ;;  %v9613_v13 = vld [vmem:[#allocation134_spill] sm:$0xff] }
 0x40c   :  { %v1733_v56 = vadd.f32 %v1529_v60, %v9612_v6 }
 0x40d   :  { %v7911_v36 = vpop.permute.xlu0 %2110  ;;  %v2982_v15 = vsub.f32 0.0, %v7940_v26  ;;  %v3605_v52 = vmul.f32 %v3480_v24, %v7848_v37  ;;  %v3481_v37 = vmul.f32 %v3356_v50, %v3356_v50 }
 0x40e   :  { %v2571_v11 = vpop.xlane.xlu1 %2570 }
 0x40f   :  { %2675 = vadd.xlane.f32.xlu1 %v2674_v45  ;;  %v3149_v21 = vmul.f32 1.442695, %v2982_v15  ;;  %v7959_v8 = vsub.f32 %v1731_v58, %v2571_v11  ;;  %v3768_v45 = vadd.f32 %v3767_v16, %v3766_v9  ;;  %v2680_v15 = vsel %vm312_vm0, %v2395_v53, 0.0  ;;  %v4424_v11 = vpop.eup %4423 }
 0x410   :  { %v4426_v1 = vpop.eup %4425  ;;  %v3771_v0 = vsel %vm3691_vm13, %v3605_v52, 0.0  ;;  %v3606_v4 = vmul.f32 %v3481_v37, %v7868_v12  ;;  %v9618_v12 = vld [vmem:[#allocation137_spill] sm:$0xff]  ;;  %v9619_v52 = vld [vmem:[#allocation56_spill] sm:$0xff] }
 0x411   :  { %v7937_v34 = vpop.permute.xlu0 %2113  ;;  %4427 = vpow2.f32 %v3149_v21  ;;  %v2983_v62 = vsub.f32 0.0, %v7959_v8  ;;  %v3770_v21 = vadd.f32 %v3769_v61, %v3768_v45  ;;  %v9620_v61 = vld [vmem:[#allocation53_spill] sm:$0xff] }
 0x412   :  { %v2574_v31 = vpop.xlane.xlu1 %2573  ;;  %4429 = vlog2.f32 %v9613_v13 }
 0x413   :  { %2678 = vadd.xlane.f32.xlu1 %v2677_v20  ;;  %v3151_v3 = vmul.f32 1.442695, %v2983_v62  ;;  %v7981_v7 = vsub.f32 %v1732_v43, %v2574_v31  ;;  %v2396_v43 = vsel %vm2271_vm12, %v4914_v10, 0.0  ;;  %v9616_v31 = vld [vmem:[#allocation54_spill] sm:$0xff]  ;;  %v3772_v46 = vadd.f32 %v3771_v0, %v3770_v21 }
 0x414   :  { %v2683_v41 = vsel %vm312_vm0, %v2396_v43, 0.0  ;;  %v1736_v6 = vadd.f32 %v1535_v18, %v9616_v31  ;;  %v4917_v18 = vld [vmem:[%s9207_s0 + $0x298] sm:$0xff]  ;;  %v1543_v43 = vmul.f32 0.6931472, %v4424_v11 }
 0x415   :  { %2714 = vadd.xlane.f32.xlu0 %v2713_v48  ;;  %v2117_v47 = vpop.permute.xlu0 %2116  ;;  %4431 = vpow2.f32 %v3151_v3  ;;  %v2984_v60 = vsub.f32 0.0, %v7981_v7  ;;  %v1539_v48 = vmul.f32 0.6931472, %v4420_v38 }
 0x416   :  { %vm2290_vm11 = vcmp.eq.s32.totalorder %v6778_v23, %v2117_v47  ;;  %4433 = vlog2.f32 %v9614_v29  ;;  %v2577_v5 = vpop.xlane.xlu1 %2576  ;;  %v1537_v47 = vmul.f32 0.6931472, %v4422_v40  ;;  %v9617_v40 = vld [vmem:[#allocation136_spill] sm:$0xff] }
 0x417   :  { %v2415_v54 = vsel %vm2290_vm11, %v4912_v59, 0.0  ;;  %2681 = vadd.xlane.f32.xlu1 %v2680_v15  ;;  %v3153_v32 = vmul.f32 1.442695, %v2984_v60  ;;  %v7997_v35 = vsub.f32 %v1733_v56, %v2577_v5  ;;  %v4916_v59 = vld [vmem:[%s9207_s0 + $0x290] sm:$0xff]  ;;  %vm2280_vm11 = vcmp.eq.s32.totalorder %v6778_v23, %v7789_v44 }
 0x418   :  { %v2740_v27 = vsel %vm312_vm0, %v2415_v54, 0.0  ;;  %v2397_v54 = vsel %vm2272_vm14, %v4916_v59, 0.0  ;;  %v1737_v60 = vadd.f32 %v1537_v47, %v9620_v61  ;;  %v4919_v59 = vld [vmem:[%s9207_s0 + $0x2a0] sm:$0xff]  ;;  %vm2282_vm14 = vcmp.eq.s32.totalorder %v6778_v23, %v7827_v14 }
 0x419   :  { %2741 = vadd.xlane.f32.xlu0 %v2740_v27  ;;  %v7978_v58 = vpop.permute.xlu0 %2119  ;;  %4435 = vpow2.f32 %v3153_v32  ;;  %v2985_v20 = vsub.f32 0.0, %v7997_v35  ;;  %v9615_v27 = vld [vmem:[#allocation51_spill] sm:$0xff]  ;;  %v2686_v45 = vsel %vm312_vm0, %v2397_v54, 0.0 }
 0x41a   :  { %v2580_v53 = vpop.xlane.xlu1 %2579  ;;  %v1735_v38 = vadd.f32 %v1533_v33, %v9615_v27  ;;  %4437 = vlog2.f32 %v9617_v40  ;;  %v8027_v33 = vadd.f32 %v1539_v48, %v9619_v52  ;;  %v3773_v48 = vsel %vm3691_vm13, %v3606_v4, 0.0 }
 0x41b   :  { %2684 = vadd.xlane.f32.xlu1 %v2683_v41  ;;  %v4428_v56 = vpop.eup %4427  ;;  %v3155_v16 = vmul.f32 1.442695, %v2985_v20  ;;  %v8022_v3 = vsub.f32 %v7956_v39, %v2580_v53  ;;  %4439 = vlog2.f32 %v9618_v12  ;;  %v2398_v39 = vsel %vm2273_vm1, %v4917_v18, 0.0  ;;  %v9623_v18 = vld [vmem:[#allocation58_spill] sm:$0xff] }
 0x41c   :  { %v3357_v13 = vsub.f32 1.0, %v4428_v56  ;;  %v8037_v10 = vpop.eup %4429  ;;  %v3774_v32 = vadd.f32 %v3773_v48, %v3772_v46  ;;  %v2689_v41 = vsel %vm312_vm0, %v2398_v39, 0.0  ;;  %v9621_v56 = vld [vmem:[#allocation138_spill] sm:$0xff]  ;;  %v8081_v39 = vadd.f32 %v1543_v43, %v9623_v18 }
 0x41d   :  { %v2123_v9 = vpop.permute.xlu0 %2122  ;;  %4441 = vpow2.f32 %v3155_v16  ;;  %v2986_v15 = vsub.f32 0.0, %v8022_v3  ;;  %v9622_v16 = vld [vmem:[#allocation139_spill] sm:$0xff] }
 0x41e   :  { %vm2292_vm15 = vcmp.eq.s32.totalorder %v6778_v23, %v2123_v9  ;;  %v3482_v29 = vmul.f32 %v3357_v13, %v3357_v13  ;;  %v2583_v37 = vpop.xlane.xlu1 %2582 }
 0x41f   :  { %v2417_v24 = vsel %vm2292_vm15, %v4915_v25, 0.0  ;;  %2687 = vadd.xlane.f32.xlu1 %v2686_v45  ;;  %v4432_v9 = vpop.eup %4431  ;;  %v3157_v21 = vmul.f32 1.442695, %v2986_v15  ;;  %v8042_v0 = vsub.f32 %v1735_v38, %v2583_v37  ;;  %v4918_v25 = vld [vmem:[%s9207_s0 + $0x340] sm:$0xff]  ;;  %v4920_v15 = vld [vmem:[%s9207_s0 + $0x2a8] sm:$0xff]  ;;  %vm2283_vm15 = vcmp.eq.s32.totalorder %v6778_v23, %v7843_v63 }
 0x420   :  { %v2746_v62 = vsel %vm312_vm0, %v2417_v24, 0.0  ;;  %v8045_v17 = vpop.eup %4433  ;;  %v3607_v47 = vmul.f32 %v3482_v29, %v7940_v26  ;;  %v3358_v11 = vsub.f32 1.0, %v4432_v9  ;;  %v2399_v26 = vsel %vm2274_vm2, %v4919_v59, 0.0 }
 0x421   :  { %2747 = vadd.xlane.f32.xlu0 %v2746_v62  ;;  %v8017_v50 = vpop.permute.xlu0 %2125  ;;  %4443 = vpow2.f32 %v3157_v21  ;;  %v2987_v20 = vsub.f32 0.0, %v8042_v0  ;;  %v1541_v62 = vmul.f32 0.6931472, %v4426_v1  ;;  %v2692_v13 = vsel %vm312_vm0, %v2399_v26, 0.0 }
 0x422   :  { %v3775_v4 = vsel %vm3691_vm13, %v3607_v47, 0.0  ;;  %v3483_v53 = vmul.f32 %v3358_v11, %v3358_v11  ;;  %v2586_v27 = vpop.xlane.xlu1 %2585  ;;  %4445 = vlog2.f32 %v9621_v56  ;;  %v1547_v26 = vmul.f32 0.6931472, %v8037_v10 }
 0x423   :  { %2690 = vadd.xlane.f32.xlu1 %v2689_v41  ;;  %v4436_v31 = vpop.eup %4435  ;;  %v3776_v40 = vadd.f32 %v3775_v4, %v3774_v32  ;;  %v3159_v46 = vmul.f32 1.442695, %v2987_v20  ;;  %v8066_v19 = vsub.f32 %v1736_v6, %v2586_v27  ;;  %4447 = vlog2.f32 %v9622_v16 }
 0x424   :  { %v3608_v1 = vmul.f32 %v3483_v53, %v7959_v8  ;;  %v3359_v12 = vsub.f32 1.0, %v4436_v31  ;;  %v8071_v45 = vpop.eup %4437  ;;  %v2400_v6 = vsel %vm2275_vm4, %v4920_v15, 0.0  ;;  %v9625_v31 = vld [vmem:[#allocation140_spill] sm:$0xff]  ;;  %vm2284_vm2 = vcmp.eq.s32.totalorder %v6778_v23, %v7860_v57 }
 0x425   :  { %v2129_v5 = vpop.permute.xlu0 %2128  ;;  %4449 = vpow2.f32 %v3159_v46  ;;  %v2988_v52 = vsub.f32 0.0, %v8066_v19  ;;  %v8083_v8 = vpop.eup %4439  ;;  %v2695_v41 = vsel %vm312_vm0, %v2400_v6, 0.0  ;;  %v9626_v46 = vld [vmem:[#allocation141_spill] sm:$0xff] }
 0x426   :  { %vm2294_vm3 = vcmp.eq.s32.totalorder %v6778_v23, %v2129_v5  ;;  %v3777_v61 = vsel %vm3691_vm13, %v3608_v1, 0.0  ;;  %v3484_v48 = vmul.f32 %v3359_v12, %v3359_v12  ;;  %v2589_v29 = vpop.xlane.xlu1 %2588  ;;  %v9624_v5 = vld [vmem:[#allocation55_spill] sm:$0xff] }
 0x427   :  { %v2419_v24 = vsel %vm2294_vm3, %v4918_v25, 0.0  ;;  %2693 = vadd.xlane.f32.xlu1 %v2692_v13  ;;  %v1739_v9 = vadd.f32 %v1541_v62, %v9624_v5  ;;  %v4442_v32 = vpop.eup %4441  ;;  %v3778_v21 = vadd.f32 %v3777_v61, %v3776_v40  ;;  %v3161_v47 = vmul.f32 1.442695, %v2988_v52  ;;  %v4921_v25 = vld [vmem:[%s9207_s0 + $0x350] sm:$0xff] }
 0x428   :  { %v2752_v54 = vsel %vm312_vm0, %v2419_v24, 0.0  ;;  %v8089_v30 = vsub.f32 %v1737_v60, %v2589_v29  ;;  %v3609_v43 = vmul.f32 %v3484_v48, %v7981_v7  ;;  %v3360_v11 = vsub.f32 1.0, %v4442_v32  ;;  %v4922_v60 = vld [vmem:[%s9207_s0 + $0x2b0] sm:$0xff]  ;;  %v9627_v48 = vld [vmem:[#allocation60_spill] sm:$0xff] }
 0x429   :  { %2753 = vadd.xlane.f32.xlu0 %v2752_v54  ;;  %v8063_v38 = vpop.permute.xlu0 %2131  ;;  %4451 = vpow2.f32 %v3161_v47  ;;  %v2401_v7 = vsel %vm2276_vm5, %v4922_v60, 0.0  ;;  %v1545_v13 = vmul.f32 0.6931472, %v8045_v17  ;;  %v8134_v29 = vadd.f32 %v1547_v26, %v9627_v48 }
 0x42a   :  { %v2989_v20 = vsub.f32 0.0, %v8089_v30  ;;  %v3779_v54 = vsel %vm3691_vm13, %v3609_v43, 0.0  ;;  %v3485_v62 = vmul.f32 %v3360_v11, %v3360_v11  ;;  %v2592_v4 = vpop.xlane.xlu1 %2591  ;;  %4453 = vlog2.f32 %v9625_v31  ;;  %v4924_v11 = vld [vmem:[%s9207_s0 + $0x360] sm:$0xff] }
 0x42b   :  { %2696 = vadd.xlane.f32.xlu1 %v2695_v41  ;;  %v4444_v27 = vpop.eup %4443  ;;  %v3780_v56 = vadd.f32 %v3779_v54, %v3778_v21  ;;  %v8113_v40 = vsub.f32 %v8027_v33, %v2592_v4  ;;  %4455 = vlog2.f32 %v9626_v46  ;;  %v2698_v1 = vsel %vm312_vm0, %v2401_v7, 0.0  ;;  %v4923_v33 = vld [vmem:[%s9207_s0 + $0x2b8] sm:$0xff] }
 0x42c   :  { %v3163_v22 = vmul.f32 1.442695, %v2989_v20  ;;  %v3610_v10 = vmul.f32 %v3485_v62, %v7997_v35  ;;  %v3361_v16 = vsub.f32 1.0, %v4444_v27  ;;  %v8118_v12 = vpop.eup %4445  ;;  %v2402_v15 = vsel %vm2277_vm7, %v4923_v33, 0.0 }
 0x42d   :  { %v2135_v37 = vpop.permute.xlu0 %2134  ;;  %v2990_v52 = vsub.f32 0.0, %v8113_v40  ;;  %v8128_v35 = vpop.eup %4447  ;;  %v2701_v43 = vsel %vm312_vm0, %v2402_v15, 0.0  ;;  %v1551_v4 = vmul.f32 0.6931472, %v8071_v45  ;;  %v4926_v45 = vld [vmem:[%s9207_s0 + $0x2c8] sm:$0xff]  ;;  %vm2285_vm3 = vcmp.eq.s32.totalorder %v6778_v23, %v7874_v42 }
 0x42e   :  { %vm2296_vm6 = vcmp.eq.s32.totalorder %v6778_v23, %v2135_v37  ;;  %4457 = vpow2.f32 %v3163_v22  ;;  %v3781_v6 = vsel %vm3691_vm13, %v3610_v10, 0.0  ;;  %v3486_v17 = vmul.f32 %v3361_v16, %v3361_v16  ;;  %v2595_v18 = vpop.xlane.xlu1 %2594 }
 0x42f   :  { %v2421_v24 = vsel %vm2296_vm6, %v4921_v25, 0.0  ;;  %2699 = vadd.xlane.f32.xlu1 %v2698_v1  ;;  %v4450_v37 = vpop.eup %4449  ;;  %v3782_v5 = vadd.f32 %v3781_v6, %v3780_v56  ;;  %v3165_v32 = vmul.f32 1.442695, %v2990_v52  ;;  %v8136_v21 = vsub.f32 %v1739_v9, %v2595_v18  ;;  %v4925_v9 = vld [vmem:[%s9207_s0 + $0x2c0] sm:$0xff]  ;;  %v9629_v56 = vld [vmem:[#allocation142_spill] sm:$0xff]  ;;  %v9630_v52 = vld [vmem:[#allocation143_spill] sm:$0xff] }
 0x430   :  { %v2758_v59 = vsel %vm312_vm0, %v2421_v24, 0.0  ;;  %v3611_v2 = vmul.f32 %v3486_v17, %v8022_v3  ;;  %v3362_v47 = vsub.f32 1.0, %v4450_v37  ;;  %v2403_v3 = vsel %vm2278_vm8, %v4925_v9, 0.0 }
 0x431   :  { %2759 = vadd.xlane.f32.xlu0 %v2758_v59  ;;  %v8109_v53 = vpop.permute.xlu0 %2137  ;;  %4459 = vpow2.f32 %v3165_v32  ;;  %v2991_v25 = vsub.f32 0.0, %v8136_v21  ;;  %v9628_v59 = vld [vmem:[#allocation57_spill] sm:$0xff]  ;;  %v2704_v10 = vsel %vm312_vm0, %v2403_v3, 0.0  ;;  %v1549_v1 = vmul.f32 0.6931472, %v8083_v8  ;;  %v4927_v32 = vld [vmem:[%s9207_s0 + $0x370] sm:$0xff] }
 0x432   :  { %v3783_v20 = vsel %vm3691_vm13, %v3611_v2, 0.0  ;;  %v3487_v60 = vmul.f32 %v3362_v47, %v3362_v47  ;;  %v2598_v7 = vpop.xlane.xlu1 %2597  ;;  %v1741_v26 = vadd.f32 %v1545_v13, %v9628_v59  ;;  %4461 = vlog2.f32 %v9629_v56  ;;  %v4928_v47 = vld [vmem:[%s9207_s0 + $0x2d0] sm:$0xff] }
 0x433   :  { %2702 = vadd.xlane.f32.xlu1 %v2701_v43  ;;  %v4452_v62 = vpop.eup %4451  ;;  %v3784_v27 = vadd.f32 %v3783_v20, %v3782_v5  ;;  %v3167_v28 = vmul.f32 1.442695, %v2991_v25  ;;  %v8160_v31 = vsub.f32 %v8081_v39, %v2598_v7  ;;  %v2404_v39 = vsel %vm2279_vm10, %v4926_v45, 0.0 }
 0x434   :  { %v3612_v22 = vmul.f32 %v3487_v60, %v8042_v0  ;;  %v3363_v46 = vsub.f32 1.0, %v4452_v62  ;;  %v8165_v16 = vpop.eup %4453  ;;  %v2707_v5 = vsel %vm312_vm0, %v2404_v39, 0.0  ;;  %v2405_v43 = vsel %vm2280_vm11, %v4928_v47, 0.0 }
 0x435   :  { %v2141_v61 = vpop.permute.xlu0 %2140  ;;  %4463 = vpow2.f32 %v3167_v28  ;;  %v2992_v13 = vsub.f32 0.0, %v8160_v31  ;;  %v8175_v0 = vpop.eup %4455  ;;  %vm2286_vm5 = vcmp.eq.s32.totalorder %v6778_v23, %v7888_v51  ;;  %vm2287_vm6 = vcmp.eq.s32.totalorder %v6778_v23, %v7898_v49 }
 0x436   :  { %vm2298_vm9 = vcmp.eq.s32.totalorder %v6778_v23, %v2141_v61  ;;  %4465 = vlog2.f32 %v9630_v52  ;;  %v3785_v8 = vsel %vm3691_vm13, %v3612_v22, 0.0  ;;  %v3488_v33 = vmul.f32 %v3363_v46, %v3363_v46  ;;  %v2601_v15 = vpop.xlane.xlu1 %2600 }
 0x437   :  { %v2423_v41 = vsel %vm2298_vm9, %v4924_v11, 0.0  ;;  %2705 = vadd.xlane.f32.xlu1 %v2704_v10  ;;  %v3786_v18 = vadd.f32 %v3785_v8, %v3784_v27  ;;  %v3169_v61 = vmul.f32 1.442695, %v2992_v13  ;;  %v8181_v48 = vsub.f32 %v1741_v26, %v2601_v15  ;;  %v9632_v26 = vld [vmem:[#allocation59_spill] sm:$0xff] }
 0x438   :  { %v2764_v24 = vsel %vm312_vm0, %v2423_v41, 0.0  ;;  %v4458_v17 = vpop.eup %4457  ;;  %v3613_v55 = vmul.f32 %v3488_v33, %v8066_v19  ;;  %v1743_v62 = vadd.f32 %v1549_v1, %v9632_v26  ;;  %v1555_v27 = vmul.f32 0.6931472, %v8118_v12  ;;  %v9636_v26 = vld [vmem:[#allocation61_spill] sm:$0xff] }
 0x439   :  { %2765 = vadd.xlane.f32.xlu0 %v2764_v24  ;;  %v8156_v54 = vpop.permute.xlu0 %2143  ;;  %v3364_v37 = vsub.f32 1.0, %v4458_v17  ;;  %4467 = vpow2.f32 %v3169_v61  ;;  %v2993_v11 = vsub.f32 0.0, %v8181_v48  ;;  %v9631_v24 = vld [vmem:[#allocation62_spill] sm:$0xff]  ;;  %v2710_v22 = vsel %vm312_vm0, %v2405_v43, 0.0 }
 0x43a   :  { %v3787_v41 = vsel %vm3691_vm13, %v3613_v55, 0.0  ;;  %v2604_v9 = vpop.xlane.xlu1 %2603  ;;  %v1744_v20 = vadd.f32 %v1551_v4, %v9631_v24  ;;  %v1553_v46 = vmul.f32 0.6931472, %v8128_v35  ;;  %v4929_v4 = vld [vmem:[%s9207_s0 + $0x2e0] sm:$0xff]  ;;  %v4931_v55 = vld [vmem:[%s9207_s0 + $0x2e8] sm:$0xff]  ;;  %vm2288_vm8 = vcmp.eq.s32.totalorder %v6778_v23, %v7911_v36 }
 0x43b   :  { %2708 = vadd.xlane.f32.xlu1 %v2707_v5  ;;  %v3489_v25 = vmul.f32 %v3364_v37, %v3364_v37  ;;  %v4460_v44 = vpop.eup %4459  ;;  %v3788_v60 = vadd.f32 %v3787_v41, %v3786_v18  ;;  %v3171_v7 = vmul.f32 1.442695, %v2993_v11  ;;  %v8204_v59 = vsub.f32 %v8134_v29, %v2604_v9  ;;  %v4930_v18 = vld [vmem:[%s9207_s0 + $0x380] sm:$0xff] }
 0x43c   :  { %v3365_v56 = vsub.f32 1.0, %v4460_v44  ;;  %v2407_v29 = vsel %vm2282_vm14, %v4929_v4, 0.0  ;;  %v8218_v12 = vpop.eup %4461  ;;  %v2408_v37 = vsel %vm2283_vm15, %v4931_v55, 0.0  ;;  %v9635_v9 = vld [vmem:[#allocation64_spill] sm:$0xff]  ;;  %vm2289_vm9 = vcmp.eq.s32.totalorder %v6778_v23, %v7937_v34 }
 0x43d   :  { %v2147_v6 = vpop.permute.xlu0 %2146  ;;  %v3614_v28 = vmul.f32 %v3489_v25, %v8089_v30  ;;  %4469 = vpow2.f32 %v3171_v7  ;;  %v2994_v10 = vsub.f32 0.0, %v8204_v59  ;;  %v9633_v30 = vld [vmem:[#allocation144_spill] sm:$0xff]  ;;  %v2716_v17 = vsel %vm312_vm0, %v2407_v29, 0.0 }
 0x43e   :  { %vm2300_vm12 = vcmp.eq.s32.totalorder %v6778_v23, %v2147_v6  ;;  %4471 = vlog2.f32 %v9633_v30  ;;  %v3490_v1 = vmul.f32 %v3365_v56, %v3365_v56  ;;  %v2607_v13 = vpop.xlane.xlu1 %2606  ;;  %v1746_v24 = vadd.f32 %v1555_v27, %v9635_v9  ;;  %v4932_v56 = vld [vmem:[%s9207_s0 + $0x2f0] sm:$0xff] }
 0x43f   :  { %v2425_v2 = vsel %vm2300_vm12, %v4927_v32, 0.0  ;;  %2711 = vadd.xlane.f32.xlu1 %v2710_v22  ;;  %v3789_v35 = vsel %vm3691_vm13, %v3614_v28, 0.0  ;;  %v4464_v39 = vpop.eup %4463  ;;  %v3173_v14 = vmul.f32 1.442695, %v2994_v10  ;;  %v8224_v8 = vsub.f32 %v1743_v62, %v2607_v13  ;;  %v9634_v32 = vld [vmem:[#allocation145_spill] sm:$0xff] }
 0x440   :  { %v2770_v19 = vsel %vm312_vm0, %v2425_v2, 0.0  ;;  %v3790_v52 = vadd.f32 %v3789_v35, %v3788_v60  ;;  %v8227_v33 = vpop.eup %4465  ;;  %v3615_v15 = vmul.f32 %v3490_v1, %v8113_v40  ;;  %v3366_v6 = vsub.f32 1.0, %v4464_v39 }
 0x441   :  { %2771 = vadd.xlane.f32.xlu0 %v2770_v19  ;;  %v8200_v3 = vpop.permute.xlu0 %2149  ;;  %4473 = vpow2.f32 %v3173_v14  ;;  %v2995_v5 = vsub.f32 0.0, %v8224_v8  ;;  %v2719_v7 = vsel %vm312_vm0, %v2408_v37, 0.0  ;;  %v1745_v62 = vadd.f32 %v1553_v46, %v9636_v26 }
 0x442   :  { %4475 = vlog2.f32 %v9634_v32  ;;  %v3791_v2 = vsel %vm3691_vm13, %v3615_v15, 0.0  ;;  %v3491_v47 = vmul.f32 %v3366_v6, %v3366_v6  ;;  %v2610_v43 = vpop.xlane.xlu1 %2609  ;;  %v1559_v28 = vmul.f32 0.6931472, %v8165_v16  ;;  %v9637_v6 = vld [vmem:[#allocation147_spill] sm:$0xff]  ;;  %v9638_v32 = vld [vmem:[#allocation66_spill] sm:$0xff] }
 0x443   :  { %2717 = vadd.xlane.f32.xlu1 %v2716_v17  ;;  %v4468_v63 = vpop.eup %4467  ;;  %v3792_v19 = vadd.f32 %v3791_v2, %v3790_v52  ;;  %v3175_v41 = vmul.f32 1.442695, %v2995_v5  ;;  %v8248_v25 = vsub.f32 %v1744_v20, %v2610_v43  ;;  %v2409_v20 = vsel %vm2284_vm2, %v4932_v56, 0.0  ;;  %v4934_v52 = vld [vmem:[%s9207_s0 + $0x2f8] sm:$0xff] }
 0x444   :  { %v3616_v44 = vmul.f32 %v3491_v47, %v8136_v21  ;;  %v3367_v60 = vsub.f32 1.0, %v4468_v63  ;;  %v1557_v21 = vmul.f32 0.6931472, %v8175_v0  ;;  %v2722_v13 = vsel %vm312_vm0, %v2409_v20, 0.0 }
 0x445   :  { %v2153_v45 = vpop.permute.xlu0 %2152  ;;  %4477 = vpow2.f32 %v3175_v41  ;;  %v2996_v27 = vsub.f32 0.0, %v8248_v25  ;;  %v2410_v14 = vsel %vm2285_vm3, %v4934_v52, 0.0  ;;  %v1748_v2 = vadd.f32 %v1559_v28, %v9638_v32  ;;  %v9639_v41 = vld [vmem:[#allocation63_spill] sm:$0xff] }
 0x446   :  { %vm2302_vm1 = vcmp.eq.s32.totalorder %v6778_v23, %v2153_v45  ;;  %v3793_v22 = vsel %vm3691_vm13, %v3616_v44, 0.0  ;;  %v3492_v16 = vmul.f32 %v3367_v60, %v3367_v60  ;;  %v2613_v46 = vpop.xlane.xlu1 %2612  ;;  %v4933_v45 = vld [vmem:[%s9207_s0 + $0x390] sm:$0xff]  ;;  %v1747_v9 = vadd.f32 %v1557_v21, %v9639_v41  ;;  %v4935_v60 = vld [vmem:[%s9207_s0 + $0x300] sm:$0xff] }
 0x447   :  { %v2427_v61 = vsel %vm2302_vm1, %v4930_v18, 0.0  ;;  %2720 = vadd.xlane.f32.xlu1 %v2719_v7  ;;  %v4470_v29 = vpop.eup %4469  ;;  %v3794_v10 = vadd.f32 %v3793_v22, %v3792_v19  ;;  %v3177_v30 = vmul.f32 1.442695, %v2996_v27  ;;  %v8266_v35 = vsub.f32 %v1745_v62, %v2613_v46 }
 0x448   :  { %v2776_v40 = vsel %vm312_vm0, %v2427_v61, 0.0  ;;  %v8269_v57 = vpop.eup %4471  ;;  %v3617_v1 = vmul.f32 %v3492_v16, %v8160_v31  ;;  %v3368_v0 = vsub.f32 1.0, %v4470_v29  ;;  %v2725_v19 = vsel %vm312_vm0, %v2410_v14, 0.0  ;;  %v4936_v16 = vld [vmem:[%s9207_s0 + $0x3a0] sm:$0xff] }
 0x449   :  { %2777 = vadd.xlane.f32.xlu0 %v2776_v40  ;;  %v8246_v11 = vpop.permute.xlu0 %2155  ;;  %4479 = vpow2.f32 %v3177_v30  ;;  %v2997_v15 = vsub.f32 0.0, %v8266_v35  ;;  %v1563_v44 = vmul.f32 0.6931472, %v8218_v12  ;;  %v9640_v14 = vld [vmem:[#allocation68_spill] sm:$0xff]  ;;  %vm2291_vm11 = vcmp.eq.s32.totalorder %v6778_v23, %v7978_v58  ;;  %v4941_v58 = vld [vmem:[%s9207_s0 + $0x328] sm:$0xff] }
 0x44a   :  { %4481 = vlog2.f32 %v9637_v6  ;;  %v3795_v17 = vsel %vm3691_vm13, %v3617_v1, 0.0  ;;  %v3493_v18 = vmul.f32 %v3368_v0, %v3368_v0  ;;  %v2616_v61 = vpop.xlane.xlu1 %2615  ;;  %vm2293_vm12 = vcmp.eq.s32.totalorder %v6778_v23, %v8017_v50 }
 0x44b   :  { %2723 = vadd.xlane.f32.xlu1 %v2722_v13  ;;  %v4474_v42 = vpop.eup %4473  ;;  %v3796_v37 = vadd.f32 %v3795_v17, %v3794_v10  ;;  %v3179_v5 = vmul.f32 1.442695, %v2997_v15  ;;  %v8290_v40 = vsub.f32 %v1746_v24, %v2616_v61  ;;  %v2411_v24 = vsel %vm2286_vm5, %v4935_v60, 0.0  ;;  %v9641_v61 = vld [vmem:[#allocation65_spill] sm:$0xff] }
 0x44c   :  { %v4476_v47 = vpop.eup %4475  ;;  %v3618_v43 = vmul.f32 %v3493_v18, %v8181_v48  ;;  %v3369_v63 = vsub.f32 1.0, %v4474_v42  ;;  %v1561_v48 = vmul.f32 0.6931472, %v8227_v33  ;;  %v2728_v33 = vsel %vm312_vm0, %v2411_v24, 0.0 }
 0x44d   :  { %v2159_v4 = vpop.permute.xlu0 %2158  ;;  %4483 = vpow2.f32 %v3179_v5  ;;  %v2998_v7 = vsub.f32 0.0, %v8290_v40  ;;  %v1750_v15 = vadd.f32 %v1563_v44, %v9640_v14  ;;  %v1565_v41 = vmul.f32 0.6931472, %v4476_v47  ;;  %v4940_v47 = vld [vmem:[%s9207_s0 + $0x318] sm:$0xff] }
 0x44e   :  { %vm2304_vm4 = vcmp.eq.s32.totalorder %v6778_v23, %v2159_v4  ;;  %v3797_v26 = vsel %vm3691_vm13, %v3618_v43, 0.0  ;;  %v3494_v12 = vmul.f32 %v3369_v63, %v3369_v63  ;;  %v2619_v62 = vpop.xlane.xlu1 %2618  ;;  %v4937_v4 = vld [vmem:[%s9207_s0 + $0x308] sm:$0xff]  ;;  %v1749_v42 = vadd.f32 %v1561_v48, %v9641_v61  ;;  %v4939_v48 = vld [vmem:[%s9207_s0 + $0x3b0] sm:$0xff] }
 0x44f   :  { %v2429_v39 = vsel %vm2304_vm4, %v4933_v45, 0.0  ;;  %2726 = vadd.xlane.f32.xlu1 %v2725_v19  ;;  %v4478_v56 = vpop.eup %4477  ;;  %v3798_v20 = vadd.f32 %v3797_v26, %v3796_v37  ;;  %v3181_v27 = vmul.f32 1.442695, %v2998_v7  ;;  %v8308_v21 = vsub.f32 %v1747_v9, %v2619_v62  ;;  %v4938_v37 = vld [vmem:[%s9207_s0 + $0x310] sm:$0xff] }
 0x450   :  { %v2782_v31 = vsel %vm312_vm0, %v2429_v39, 0.0  ;;  %v3619_v51 = vmul.f32 %v3494_v12, %v8204_v59  ;;  %v3370_v22 = vsub.f32 1.0, %v4478_v56  ;;  %v2412_v29 = vsel %vm2287_vm6, %v4937_v4, 0.0 }
 0x451   :  { %2783 = vadd.xlane.f32.xlu0 %v2782_v31  ;;  %v8288_v55 = vpop.permute.xlu0 %2161  ;;  %4485 = vpow2.f32 %v3181_v27  ;;  %v2999_v10 = vsub.f32 0.0, %v8308_v21  ;;  %v2731_v18 = vsel %vm312_vm0, %v2412_v29, 0.0  ;;  %v2413_v5 = vsel %vm2288_vm8, %v4938_v37, 0.0  ;;  %v9642_v29 = vld [vmem:[#allocation70_spill] sm:$0xff] }
 0x452   :  { %v3799_v30 = vsel %vm3691_vm13, %v3619_v51, 0.0  ;;  %v3495_v1 = vmul.f32 %v3370_v22, %v3370_v22  ;;  %v2622_v0 = vpop.xlane.xlu1 %2621  ;;  %v2414_v12 = vsel %vm2289_vm9, %v4940_v47, 0.0  ;;  %vm2295_vm15 = vcmp.eq.s32.totalorder %v6778_v23, %v8063_v38 }
 0x453   :  { %2729 = vadd.xlane.f32.xlu1 %v2728_v33  ;;  %v4480_v45 = vpop.eup %4479  ;;  %v3800_v39 = vadd.f32 %v3799_v30, %v3798_v20  ;;  %v3183_v49 = vmul.f32 1.442695, %v2999_v10  ;;  %v8329_v52 = vsub.f32 %v1748_v2, %v2622_v0  ;;  %v1567_v2 = vmul.f32 0.6931472, %v8269_v57 }
 0x454   :  { %v4482_v31 = vpop.eup %4481  ;;  %v3620_v6 = vmul.f32 %v3495_v1, %v8224_v8  ;;  %v3371_v17 = vsub.f32 1.0, %v4480_v45  ;;  %v2734_v57 = vsel %vm312_vm0, %v2413_v5, 0.0  ;;  %v2737_v4 = vsel %vm312_vm0, %v2414_v12, 0.0  ;;  %v9643_v1 = vld [vmem:[#allocation67_spill] sm:$0xff]  ;;  %v4942_v5 = vld [vmem:[%s9207_s0 + $0x3c0] sm:$0xff]  ;;  %v4944_v12 = vld [vmem:[%s9207_s0 + $0x348] sm:$0xff] }
 0x455   :  { %v2165_v28 = vpop.permute.xlu0 %2164  ;;  %4487 = vpow2.f32 %v3183_v49  ;;  %v3000_v32 = vsub.f32 0.0, %v8329_v52  ;;  %v1752_v10 = vadd.f32 %v1567_v2, %v9642_v29  ;;  %v1751_v0 = vadd.f32 %v1565_v41, %v9643_v1  ;;  %v4946_v1 = vld [vmem:[%s9207_s0 + $0x358] sm:$0xff] }
 0x456   :  { %vm2306_vm7 = vcmp.eq.s32.totalorder %v6778_v23, %v2165_v28  ;;  %v3801_v8 = vsel %vm3691_vm13, %v3620_v6, 0.0  ;;  %v3496_v43 = vmul.f32 %v3371_v17, %v3371_v17  ;;  %v2625_v63 = vpop.xlane.xlu1 %2624  ;;  %v1569_v14 = vmul.f32 0.6931472, %v4482_v31  ;;  %v4943_v31 = vld [vmem:[%s9207_s0 + $0x338] sm:$0xff] }
 0x457   :  { %v2431_v46 = vsel %vm2306_vm7, %v4936_v16, 0.0  ;;  %2732 = vadd.xlane.f32.xlu1 %v2731_v18  ;;  %v4484_v9 = vpop.eup %4483  ;;  %v3802_v44 = vadd.f32 %v3801_v8, %v3800_v39  ;;  %v3185_v60 = vmul.f32 1.442695, %v3000_v32  ;;  %v8346_v36 = vsub.f32 %v1749_v42, %v2625_v63 }
 0x458   :  { %v2788_v59 = vsel %vm312_vm0, %v2431_v46, 0.0  ;;  %v3621_v24 = vmul.f32 %v3496_v43, %v8248_v25  ;;  %v3372_v7 = vsub.f32 1.0, %v4484_v9  ;;  %v2418_v2 = vsel %vm2293_vm12, %v4943_v31, 0.0  ;;  %v9644_v43 = vld [vmem:[#allocation146_spill] sm:$0xff] }
 0x459   :  { %2789 = vadd.xlane.f32.xlu0 %v2788_v59  ;;  %v8327_v13 = vpop.permute.xlu0 %2167  ;;  %4489 = vpow2.f32 %v3185_v60  ;;  %v3001_v62 = vsub.f32 0.0, %v8346_v36  ;;  %v2416_v59 = vsel %vm2291_vm11, %v4941_v58, 0.0  ;;  %v2749_v47 = vsel %vm312_vm0, %v2418_v2, 0.0 }
 0x45a   :  { %v3803_v28 = vsel %vm3691_vm13, %v3621_v24, 0.0  ;;  %v3497_v56 = vmul.f32 %v3372_v7, %v3372_v7  ;;  %v2628_v20 = vpop.xlane.xlu1 %2627  ;;  %v2743_v37 = vsel %vm312_vm0, %v2416_v59, 0.0  ;;  %vm2297_vm1 = vcmp.eq.s32.totalorder %v6778_v23, %v8109_v53  ;;  %v4945_v59 = vld [vmem:[%s9207_s0 + $0x3d0] sm:$0xff] }
 0x45b   :  { %2735 = vadd.xlane.f32.xlu1 %v2734_v57  ;;  %v4486_v51 = vpop.eup %4485  ;;  %v3804_v22 = vadd.f32 %v3803_v28, %v3802_v44  ;;  %v3187_v34 = vmul.f32 1.442695, %v3001_v62  ;;  %v8367_v33 = vsub.f32 %v1750_v15, %v2628_v20  ;;  %v9645_v44 = vld [vmem:[#allocation148_spill] sm:$0xff]  ;;  %v9646_v57 = vld [vmem:[#allocation149_spill] sm:$0xff]  ;;  %v2420_v62 = vsel %vm2295_vm15, %v4944_v12, 0.0  ;;  %v9648_v20 = vld [vmem:[#allocation150_spill] sm:$0xff] }
 0x45c   :  { %v3622_v16 = vmul.f32 %v3497_v56, %v8266_v35  ;;  %v3373_v46 = vsub.f32 1.0, %v4486_v51  ;;  %v9647_v28 = vld [vmem:[#allocation69_spill] sm:$0xff]  ;;  %v2755_v58 = vsel %vm312_vm0, %v2420_v62, 0.0  ;;  %vm2299_vm3 = vcmp.eq.s32.totalorder %v6778_v23, %v8156_v54  ;;  %v9654_v62 = vld [vmem:[#allocation156_spill] sm:$0xff] }
 0x45d   :  { %v2171_v19 = vpop.permute.xlu0 %2170  ;;  %4491 = vpow2.f32 %v3187_v34  ;;  %v3002_v30 = vsub.f32 0.0, %v8367_v33  ;;  %v1753_v56 = vadd.f32 %v1569_v14, %v9647_v28  ;;  %vm2301_vm4 = vcmp.eq.s32.totalorder %v6778_v23, %v8200_v3  ;;  %v9657_v3 = vld [vmem:[#allocation159_spill] sm:$0xff] }
 0x45e   :  { %vm2308_vm10 = vcmp.eq.s32.totalorder %v6778_v23, %v2171_v19  ;;  %v3805_v35 = vsel %vm3691_vm13, %v3622_v16, 0.0  ;;  %v3498_v45 = vmul.f32 %v3373_v46, %v3373_v46  ;;  %v2631_v39 = vpop.xlane.xlu1 %2630  ;;  %vm2303_vm6 = vcmp.eq.s32.totalorder %v6778_v23, %v8246_v11  ;;  %v4950_v11 = vld [vmem:[%s9207_s0 + $0x388] sm:$0xff] }
 0x45f   :  { %v2433_v26 = vsel %vm2308_vm10, %v4939_v48, 0.0  ;;  %2738 = vadd.xlane.f32.xlu1 %v2737_v4  ;;  %v4488_v15 = vpop.eup %4487  ;;  %v3806_v6 = vadd.f32 %v3805_v35, %v3804_v22  ;;  %v3189_v17 = vmul.f32 1.442695, %v3002_v30  ;;  %v8380_v18 = vsub.f32 %v1751_v0, %v2631_v39 }
 0x460   :  { %v2794_v25 = vsel %vm312_vm0, %v2433_v26, 0.0  ;;  %v3623_v61 = vmul.f32 %v3498_v45, %v8290_v40  ;;  %v3374_v42 = vsub.f32 1.0, %v4488_v15  ;;  %v2422_v0 = vsel %vm2297_vm1, %v4946_v1, 0.0  ;;  %v9649_v45 = vld [vmem:[#allocation151_spill] sm:$0xff] }
 0x461   :  { %2795 = vadd.xlane.f32.xlu0 %v2794_v25  ;;  %v8365_v27 = vpop.permute.xlu0 %2173  ;;  %4493 = vpow2.f32 %v3189_v17  ;;  %v3003_v8 = vsub.f32 0.0, %v8380_v18  ;;  %v2761_v31 = vsel %vm312_vm0, %v2422_v0, 0.0  ;;  %v9659_v0 = vld [vmem:[#allocation161_spill] sm:$0xff]  ;;  %vm2305_vm7 = vcmp.eq.s32.totalorder %v6778_v23, %v8288_v55  ;;  %v4951_v55 = vld [vmem:[%s9207_s0 + $0x398] sm:$0xff] }
 0x462   :  { %4495 = vlog2.f32 %v9644_v43  ;;  %v3807_v63 = vsel %vm3691_vm13, %v3623_v61, 0.0  ;;  %v3499_v19 = vmul.f32 %v3374_v42, %v3374_v42  ;;  %v2634_v41 = vpop.xlane.xlu1 %2633  ;;  %vm2307_vm8 = vcmp.eq.s32.totalorder %v6778_v23, %v8327_v13 }
 0x463   :  { %2744 = vadd.xlane.f32.xlu1 %v2743_v37  ;;  %v4490_v50 = vpop.eup %4489  ;;  %4497 = vlog2.f32 %v9645_v44  ;;  %v3808_v60 = vadd.f32 %v3807_v63, %v3806_v6  ;;  %v3191_v24 = vmul.f32 1.442695, %v3003_v8  ;;  %v8403_v7 = vsub.f32 %v1752_v10, %v2634_v41  ;;  %v9650_v6 = vld [vmem:[#allocation152_spill] sm:$0xff]  ;;  %v9651_v37 = vld [vmem:[#allocation153_spill] sm:$0xff]  ;;  %v9652_v63 = vld [vmem:[#allocation154_spill] sm:$0xff] }
 0x464   :  { %4499 = vlog2.f32 %v9646_v57  ;;  %v3624_v48 = vmul.f32 %v3499_v19, %v8308_v21  ;;  %v3375_v26 = vsub.f32 1.0, %v4490_v50  ;;  %v4947_v8 = vld [vmem:[%s9207_s0 + $0x368] sm:$0xff]  ;;  %vm2309_vm9 = vcmp.eq.s32.totalorder %v6778_v23, %v8365_v27 }
 0x465   :  { %v2177_v49 = vpop.permute.xlu0 %2176  ;;  %4501 = vpow2.f32 %v3191_v24  ;;  %v3004_v25 = vsub.f32 0.0, %v8403_v7  ;;  %v9678_v27 = vld [vmem:[#allocation5_spill] sm:$0xff] }
 0x466   :  { %vm2310_vm14 = vcmp.eq.s32.totalorder %v6778_v23, %v2177_v49  ;;  %4503 = vlog2.f32 %v9648_v20  ;;  %v3809_v21 = vsel %vm3691_vm13, %v3624_v48, 0.0  ;;  %v3500_v51 = vmul.f32 %v3375_v26, %v3375_v26  ;;  %v2637_v22 = vpop.xlane.xlu1 %2636 }
 0x467   :  { %v2435_v32 = vsel %vm2310_vm14, %v4942_v5, 0.0  ;;  %2750 = vadd.xlane.f32.xlu1 %v2749_v47  ;;  %v4492_v16 = vpop.eup %4491  ;;  %v3810_v46 = vadd.f32 %v3809_v21, %v3808_v60  ;;  %v3193_v38 = vmul.f32 1.442695, %v3004_v25  ;;  %v8420_v4 = vsub.f32 %v1753_v56, %v2637_v22  ;;  %v9653_v60 = vld [vmem:[#allocation155_spill] sm:$0xff]  ;;  %v4948_v47 = vld [vmem:[%s9207_s0 + $0x3e0] sm:$0xff] }
 0x468   :  { %v2800_v40 = vsel %vm312_vm0, %v2435_v32, 0.0  ;;  %v3625_v29 = vmul.f32 %v3500_v51, %v8329_v52  ;;  %v3376_v10 = vsub.f32 1.0, %v4492_v16  ;;  %v4949_v25 = vld [vmem:[%s9207_s0 + $0x378] sm:$0xff]  ;;  %v9655_v56 = vld [vmem:[#allocation157_spill] sm:$0xff] }
 0x469   :  { %2801 = vadd.xlane.f32.xlu0 %v2800_v40  ;;  %v8400_v9 = vpop.permute.xlu0 %2179  ;;  %4505 = vpow2.f32 %v3193_v38  ;;  %v3005_v35 = vsub.f32 0.0, %v8420_v4  ;;  %v2424_v40 = vsel %vm2299_vm3, %v4947_v8, 0.0  ;;  %v2426_v28 = vsel %vm2301_vm4, %v4949_v25, 0.0  ;;  %v9667_v25 = vld [vmem:[#allocation72_spill] sm:$0xff] }
 0x46a   :  { %4507 = vlog2.f32 %v9649_v45  ;;  %v3811_v39 = vsel %vm3691_vm13, %v3625_v29, 0.0  ;;  %v3501_v49 = vmul.f32 %v3376_v10, %v3376_v10  ;;  %v8440_v14 = vpop.xlane.xlu1 %2639  ;;  %v2767_v26 = vsel %vm312_vm0, %v2424_v40, 0.0 }
 0x46b   :  { %2756 = vadd.xlane.f32.xlu1 %v2755_v58  ;;  %v4494_v53 = vpop.eup %4493  ;;  %4509 = vlog2.f32 %v9650_v6  ;;  %v3812_v17 = vadd.f32 %v3811_v39, %v3810_v46  ;;  %v3195_v61 = vmul.f32 1.442695, %v3005_v35  ;;  %v2773_v29 = vsel %vm312_vm0, %v2426_v28, 0.0  ;;  %v9658_v58 = vld [vmem:[#allocation160_spill] sm:$0xff]  ;;  %v9660_v39 = vld [vmem:[#allocation162_spill] sm:$0xff]  ;;  %v9661_v6 = vld [vmem:[#allocation163_spill] sm:$0xff] }
 0x46c   :  { %v8445_v42 = vpop.eup %4495  ;;  %4511 = vlog2.f32 %v9651_v37  ;;  %v3626_v5 = vmul.f32 %v3501_v49, %v8346_v36  ;;  %v3377_v32 = vsub.f32 1.0, %v4494_v53  ;;  %vm2311_vm10 = vcmp.eq.s32.totalorder %v6778_v23, %v8400_v9 }
 0x46d   :  { %v2183_v34 = vpop.permute.xlu0 %2182  ;;  %v8450_v2 = vpop.eup %4497  ;;  %4513 = vpow2.f32 %v3195_v61  ;;  %v1571_v8 = vmul.f32 0.6931472, %v8445_v42 }
 0x46e   :  { %vm2312_vm2 = vcmp.eq.s32.totalorder %v6778_v23, %v2183_v34  ;;  %v8458_v43 = vpop.eup %4499  ;;  %4515 = vlog2.f32 %v9652_v63  ;;  %v3813_v36 = vsel %vm3691_vm13, %v3626_v5, 0.0  ;;  %v3502_v19 = vmul.f32 %v3377_v32, %v3377_v32  ;;  %v8464_v41 = vpop.xlane.xlu1 %2642  ;;  %v9656_v34 = vld [vmem:[#allocation158_spill] sm:$0xff]  ;;  %v9662_v32 = vld [vmem:[#allocation164_spill] sm:$0xff]  ;;  %v9663_v63 = vld [vmem:[#allocation165_spill] sm:$0xff] }
 0x46f   :  { %v2437_v30 = vsel %vm2312_vm2, %v4945_v59, 0.0  ;;  %2762 = vadd.xlane.f32.xlu1 %v2761_v31  ;;  %v4502_v44 = vpop.eup %4501  ;;  %4517 = vlog2.f32 %v9653_v60  ;;  %v3814_v54 = vadd.f32 %v3813_v36, %v3812_v17  ;;  %v2428_v59 = vsel %vm2303_vm6, %v4950_v11, 0.0 }
 0x470   :  { %v2806_v52 = vsel %vm312_vm0, %v2437_v30, 0.0  ;;  %v8468_v24 = vpop.eup %4503  ;;  %v3627_v57 = vmul.f32 %v3502_v19, %v8367_v33  ;;  %v3378_v48 = vsub.f32 1.0, %v4502_v44  ;;  %4519 = vlog2.f32 %v9654_v62  ;;  %v9664_v44 = vld [vmem:[#allocation166_spill] sm:$0xff] }
 0x471   :  { %2807 = vadd.xlane.f32.xlu0 %v2806_v52  ;;  %v8442_v15 = vpop.permute.xlu0 %2185  ;;  %4521 = vlog2.f32 %v9655_v56  ;;  %v2779_v37 = vsel %vm312_vm0, %v2428_v59, 0.0  ;;  %v2430_v31 = vsel %vm2305_vm7, %v4951_v55, 0.0  ;;  %v1575_v40 = vmul.f32 0.6931472, %v8450_v2  ;;  %v4952_v62 = vld [vmem:[%s9207_s0 + $0x3a8] sm:$0xff]  ;;  %v9673_v59 = vld [vmem:[#allocation75_spill] sm:$0xff] }
 0x472   :  { %v3815_v20 = vsel %vm3691_vm13, %v3627_v57, 0.0  ;;  %v3503_v21 = vmul.f32 %v3378_v48, %v3378_v48  ;;  %v8487_v51 = vpop.xlane.xlu1 %2645  ;;  %4523 = vlog2.f32 %v9656_v34  ;;  %v9665_v57 = vld [vmem:[#allocation167_spill] sm:$0xff]  ;;  %v1579_v48 = vmul.f32 0.6931472, %v8468_v24  ;;  %v9668_v24 = vld [vmem:[#allocation169_spill] sm:$0xff]  ;;  %v9670_v34 = vld [vmem:[#allocation170_spill] sm:$0xff] }
 0x473   :  { %2768 = vadd.xlane.f32.xlu1 %v2767_v26  ;;  %v4506_v22 = vpop.eup %4505  ;;  %4525 = vlog2.f32 %v9657_v3  ;;  %v3816_v30 = vadd.f32 %v3815_v20, %v3814_v54  ;;  %v1573_v54 = vmul.f32 0.6931472, %v8458_v43  ;;  %v2785_v26 = vsel %vm312_vm0, %v2430_v31, 0.0  ;;  %v9669_v20 = vld [vmem:[#allocation74_spill] sm:$0xff] }
 0x474   :  { %v4508_v16 = vpop.eup %4507  ;;  %v3628_v46 = vmul.f32 %v3503_v21, %v8380_v18  ;;  %v3379_v38 = vsub.f32 1.0, %v4506_v22  ;;  %4527 = vlog2.f32 %v9658_v58  ;;  %v2432_v43 = vsel %vm2307_vm8, %v4952_v62, 0.0  ;;  %v9672_v58 = vld [vmem:[#allocation71_spill] sm:$0xff]  ;;  %v9677_v31 = vld [vmem:[#allocation174_spill] sm:$0xff]  ;;  %v9683_v62 = vld [vmem:[#allocation177_spill] sm:$0xff] }
 0x475   :  { %v2189_v50 = vpop.permute.xlu0 %2188  ;;  %v4510_v10 = vpop.eup %4509  ;;  %4529 = vlog2.f32 %v9659_v0  ;;  %v8533_v28 = vadd.f32 %v1571_v8, %v9667_v25  ;;  %v8540_v21 = vadd.f32 %v1575_v40, %v9669_v20  ;;  %v8549_v11 = vadd.f32 %v1573_v54, %v9672_v58  ;;  %v9679_v40 = vld [vmem:[#allocation6_spill] sm:$0xff]  ;;  %v9689_v58 = vld [vmem:[#allocation77_spill] sm:$0xff] }
 0x476   :  { %vm2314_vm5 = vcmp.eq.s32.totalorder %v6778_v23, %v2189_v50  ;;  %v4512_v1 = vpop.eup %4511  ;;  %v3817_v18 = vsel %vm3691_vm13, %v3628_v46, 0.0  ;;  %v3504_v35 = vmul.f32 %v3379_v38, %v3379_v38  ;;  %4531 = vlog2.f32 %v9660_v39 }
 0x477   :  { %v2439_v12 = vsel %vm2314_vm5, %v4948_v47, 0.0  ;;  %2774 = vadd.xlane.f32.xlu1 %v2773_v29  ;;  %v4514_v45 = vpop.eup %4513  ;;  %v3818_v49 = vadd.f32 %v3817_v18, %v3816_v30  ;;  %4533 = vlog2.f32 %v9661_v6  ;;  %v1583_v46 = vmul.f32 0.6931472, %v4510_v10  ;;  %v9671_v29 = vld [vmem:[#allocation171_spill] sm:$0xff] }
 0x478   :  { %v2812_v33 = vsel %vm312_vm0, %v2439_v12, 0.0  ;;  %v8501_v52 = vpop.xlane.xlu1 %2648  ;;  %v4516_v53 = vpop.eup %4515  ;;  %v3629_v17 = vmul.f32 %v3504_v35, %v8403_v7  ;;  %v3380_v61 = vsub.f32 1.0, %v4514_v45  ;;  %4535 = vlog2.f32 %v9662_v32  ;;  %v9666_v12 = vld [vmem:[#allocation168_spill] sm:$0xff] }
 0x479   :  { %2813 = vadd.xlane.f32.xlu0 %v2812_v33  ;;  %v4518_v5 = vpop.eup %4517  ;;  %4537 = vlog2.f32 %v9663_v63  ;;  %v1577_v33 = vmul.f32 0.6931472, %v4508_v16  ;;  %v1581_v16 = vmul.f32 0.6931472, %v4512_v1  ;;  %v8552_v30 = vadd.f32 %v1579_v48, %v9673_v59  ;;  %v9674_v35 = vld [vmem:[#allocation172_spill] sm:$0xff]  ;;  %v9675_v1 = vld [vmem:[#allocation73_spill] sm:$0xff] }
 0x47a   :  { %v3819_v7 = vsel %vm3691_vm13, %v3629_v17, 0.0  ;;  %v3505_v36 = vmul.f32 %v3380_v61, %v3380_v61  ;;  %v4520_v50 = vpop.eup %4519  ;;  %4539 = vlog2.f32 %v9664_v44  ;;  %v2791_v0 = vsel %vm312_vm0, %v2432_v43, 0.0  ;;  %v4953_v45 = vld [vmem:[%s9207_s0 + $0x3b8] sm:$0xff]  ;;  %v9676_v17 = vld [vmem:[#allocation173_spill] sm:$0xff] }
 0x47b   :  { %2780 = vadd.xlane.f32.xlu1 %v2779_v37  ;;  %v3820_v60 = vadd.f32 %v3819_v7, %v3818_v49  ;;  %v4522_v42 = vpop.eup %4521  ;;  %4541 = vlog2.f32 %v9665_v57  ;;  %v2434_v10 = vsel %vm2309_vm9, %v4953_v45, 0.0  ;;  %v8563_v39 = vadd.f32 %v1577_v33, %v9675_v1  ;;  %v9685_v33 = vld [vmem:[#allocation78_spill] sm:$0xff]  ;;  %v4955_v1 = vld [vmem:[%s9207_s0 + $0x3d8] sm:$0xff] }
 0x47c   :  { %v8517_v19 = vpop.xlane.xlu1 %2651  ;;  %v3630_v2 = vmul.f32 %v3505_v36, %v8420_v4  ;;  %v4524_v47 = vpop.eup %4523  ;;  %4543 = vlog2.f32 %v9666_v12  ;;  %v1587_v49 = vmul.f32 0.6931472, %v4516_v53  ;;  %v1585_v37 = vmul.f32 0.6931472, %v4518_v5  ;;  %v9680_v36 = vld [vmem:[#allocation175_spill] sm:$0xff]  ;;  %v9681_v5 = vld [vmem:[#allocation176_spill] sm:$0xff] }
 0x47d   :  { %v4526_v4 = vpop.eup %4525  ;;  %4545 = vlog2.f32 %v9668_v24  ;;  %v1591_v32 = vmul.f32 0.6931472, %v4520_v50  ;;  %v8572_v8 = vadd.f32 %v1581_v16, %v9678_v27  ;;  %v8575_v63 = vadd.f32 %v1583_v46, %v9679_v40  ;;  %v4954_v50 = vld [vmem:[%s9207_s0 + $0x3c8] sm:$0xff]  ;;  %v9688_v46 = vld [vmem:[#allocation179_spill] sm:$0xff]  ;;  %s4982_s0 = smov [#allocation2]  }
 0x47e   :  { %v3821_v56 = vsel %vm3691_vm13, %v3630_v2, 0.0  ;;  %v4528_v13 = vpop.eup %4527  ;;  %4547 = vlog2.f32 %v9670_v34  ;;  %v1589_v53 = vmul.f32 0.6931472, %v4522_v42  ;;  %v2797_v44 = vsel %vm312_vm0, %v2434_v10, 0.0  ;;  %v9682_v42 = vld [vmem:[#allocation76_spill] sm:$0xff]  ;;  %v9686_v24 = vld [vmem:[#allocation178_spill] sm:$0xff] }
 0x47f   :  { %2786 = vadd.xlane.f32.xlu1 %v2785_v26  ;;  %v8545_v3 = vadd.f32 %v3821_v56, %v3820_v60  ;;  %v4530_v38 = vpop.eup %4529  ;;  %4549 = vlog2.f32 %v9671_v29  ;;  %v1593_v60 = vmul.f32 0.6931472, %v4526_v4  ;;  %v1595_v54 = vmul.f32 0.6931472, %v4524_v47  ;;  %v9684_v47 = vld [vmem:[#allocation7_spill] sm:$0xff]  ;;  %v9687_v56 = vld [vmem:[#allocation8_spill] sm:$0xff] }
 0x480   :  { %v8542_v22 = vpop.xlane.xlu1 %2654  ;;  %v4532_v18 = vpop.eup %4531  ;;  %4551 = vlog2.f32 %v9674_v35  ;;  %v2436_v2 = vsel %vm2311_vm10, %v4954_v50, 0.0  ;;  %v8587_v48 = vadd.f32 %v1587_v49, %v9682_v42  ;;  %v1599_v26 = vmul.f32 0.6931472, %v4528_v13  ;;  %v9691_v10 = vld [vmem:[#allocation180_spill] sm:$0xff]  ;;  %s3960_s19 = sshll.u32 %s4982_s0, 4  ;;  %s3961_s19 = int_to_ptr.vmem [resolvable:$true] %s3960_s19 }
 0x481   :  { %v4534_v6 = vpop.eup %4533  ;;  %4553 = vlog2.f32 %v9676_v17  ;;  %vm2313_vm11 = vcmp.eq.s32.totalorder %v6778_v23, %v8442_v15  ;;  %v8593_v43 = vadd.f32 %v1585_v37, %v9684_v47  ;;  %v8598_v4 = vadd.f32 %v1591_v32, %v9685_v33  ;;  %v9693_v32 = vld [vmem:[#allocation181_spill] sm:$0xff]  ;;  %v9696_v23 = vld [vmem:[#allocation84_spill] sm:$0xff]  ;;  %s4956_s21 = scalar_lea.vmem %s3961_s19, 16  ;;  %s4960_s22 = scalar_lea.vmem %s3961_s19, 32 }
 0x482   :  { %v4536_v55 = vpop.eup %4535  ;;  %4555 = vlog2.f32 %v9677_v31  ;;  %v8602_v20 = vadd.f32 %v1589_v53, %v9687_v56  ;;  %v1597_v13 = vmul.f32 0.6931472, %v4530_v38  ;;  %v1603_v34 = vmul.f32 0.6931472, %v4532_v18  ;;  %v9692_v18 = vld [vmem:[#allocation82_spill] sm:$0xff]  ;;  %v9698_v42 = vld [vmem:[#allocation184_spill] sm:$0xff]  ;;  %p4957_p0 = scmp.ne.s32.totalorder %s3961_s19, %s4956_s21  ;;  %p4961_p1 = scmp.lt.s32.totalorder %s3961_s19, %s3961_s19 }
 0x483   :  { %2792 = vadd.xlane.f32.xlu1 %v2791_v0  ;;  %v4538_v7 = vpop.eup %4537  ;;  %4557 = vlog2.f32 %v9680_v36  ;;  %v2803_v29 = vsel %vm312_vm0, %v2436_v2, 0.0  ;;  %v8607_v59 = vadd.f32 %v1593_v60, %v9689_v58  ;;  %v9690_v0 = vld [vmem:[#allocation80_spill] sm:$0xff]  ;;  %v2438_v38 = vsel %vm2313_vm11, %v4955_v1, 0.0  ;;  %v9695_v60 = vld [vmem:[#allocation79_spill] sm:$0xff]  ;;  %p4962_p2 = scmp.lt.s32.totalorder %s4960_s22, %s4956_s21 }
 0x484   :  { %v8568_v61 = vpop.xlane.xlu1 %2657  ;;  %v4540_v57 = vpop.eup %4539  ;;  %4559 = vlog2.f32 %v9681_v5  ;;  %v8610_v35 = vadd.f32 %v1595_v54, %v9690_v0  ;;  %v8620_v49 = vadd.f32 %v1599_v26, %v9692_v18  ;;  %v1601_v17 = vmul.f32 0.6931472, %v4534_v6  ;;  %v9697_v6 = vld [vmem:[#allocation183_spill] sm:$0xff]  ;;  %v9707_v18 = vld [vmem:[#allocation90_spill] sm:$0xff] }
 0x485   :  { %v4542_v12 = vpop.eup %4541  ;;  %4561 = vlog2.f32 %v9683_v62  ;;  %v1605_v27 = vmul.f32 0.6931472, %v4538_v7  ;;  %v1607_v40 = vmul.f32 0.6931472, %v4536_v55  ;;  %v1611_v53 = vmul.f32 0.6931472, %v4540_v57  ;;  %p4963_p3 = por %p4962_p2, %p4961_p1 }
 0x486   :  { %v4544_v9 = vpop.eup %4543  ;;  %4563 = vlog2.f32 %v9686_v24  ;;  %v8627_v54 = vadd.f32 %v1597_v13, %v9695_v60  ;;  %v8630_v15 = vadd.f32 %v1603_v34, %v9696_v23  ;;  %v1609_v5 = vmul.f32 0.6931472, %v4542_v12  ;;  %v9699_v62 = vld [vmem:[#allocation81_spill] sm:$0xff]  ;;  %v9703_v34 = vld [vmem:[#allocation88_spill] sm:$0xff]  ;;  %v9706_v1 = vld [vmem:[#allocation187_spill] sm:$0xff] }
 0x487   :  { %2798 = vadd.xlane.f32.xlu1 %v2797_v44  ;;  %v4546_v16 = vpop.eup %4545  ;;  %4565 = vlog2.f32 %v9688_v46  ;;  %v9694_v44 = vld [vmem:[#allocation182_spill] sm:$0xff]  ;;  %v8635_v2 = vsub.f32 %v8533_v28, %v8440_v14  ;;  %v2809_v55 = vsel %vm312_vm0, %v2438_v38, 0.0  ;;  %v1615_v7 = vmul.f32 0.6931472, %v4544_v9  ;;  %v9700_v24 = vld [vmem:[#allocation185_spill] sm:$0xff]  ;;  %v9701_v28 = vld [vmem:[#allocation83_spill] sm:$0xff]  ;;  %p4964_p4 = pnand %p4963_p3, %p4957_p0 }
 0x488   :  { %v8595_v25 = vpop.xlane.xlu1 %2660  ;;  %v4548_v45 = vpop.eup %4547  ;;  %4567 = vlog2.f32 %v9691_v10  ;;  %v8641_v26 = vsub.f32 %v8549_v11, %v8464_v41  ;;  %v8644_v12 = vadd.f32 %v1601_v17, %v9699_v62  ;;  %v1613_v47 = vmul.f32 0.6931472, %v4546_v16  ;;  %v9702_v9 = vld [vmem:[#allocation86_spill] sm:$0xff]  ;;  %v9712_v62 = vld [vmem:[#allocation92_spill] sm:$0xff] }
 0x489   :  { %v4550_v37 = vpop.eup %4549  ;;  %4569 = vlog2.f32 %v9693_v32  ;;  %v8650_v56 = vadd.f32 %v1605_v27, %v9701_v28  ;;  %v8653_v13 = vadd.f32 %v1607_v40, %v9702_v9  ;;  %v8656_v46 = vadd.f32 %v1611_v53, %v9703_v34  ;;  %v9704_v11 = vld [vmem:[#allocation186_spill] sm:$0xff]  ;;  %v9708_v40 = vld [vmem:[#allocation188_spill] sm:$0xff]  ;;  %v9713_v28 = vld [vmem:[#allocation191_spill] sm:$0xff] }
 0x48a   :  { %v4552_v36 = vpop.eup %4551  ;;  %4571 = vlog2.f32 %v9694_v44  ;;  %v8661_v16 = vsub.f32 %v8540_v21, %v8487_v51  ;;  %v1619_v0 = vmul.f32 0.6931472, %v4548_v45  ;;  %v3006_v38 = vsub.f32 0.0, %v8635_v2  ;;  %v9709_v51 = vld [vmem:[#allocation87_spill] sm:$0xff]  ;;  %v9710_v45 = vld [vmem:[#allocation189_spill] sm:$0xff] }
 0x48b   :  { %2804 = vadd.xlane.f32.xlu1 %v2803_v29  ;;  %v4554_v50 = vpop.eup %4553  ;;  %4573 = vlog2.f32 %v9697_v6  ;;  %v9705_v29 = vld [vmem:[#allocation85_spill] sm:$0xff]  ;;  %v8669_v17 = vadd.f32 %v1615_v7, %v9707_v18  ;;  %v1617_v32 = vmul.f32 0.6931472, %v4550_v37  ;;  %v3007_v53 = vsub.f32 0.0, %v8641_v26  ;;  %v9711_v7 = vld [vmem:[#allocation190_spill] sm:$0xff] }
 0x48c   :  { %v8623_v31 = vpop.xlane.xlu1 %2663  ;;  %v4556_v57 = vpop.eup %4555  ;;  %4575 = vlog2.f32 %v9698_v42  ;;  %v8664_v58 = vadd.f32 %v1609_v5, %v9705_v29  ;;  %v8674_v21 = vadd.f32 %v1613_v47, %v9709_v51  ;;  %v1623_v44 = vmul.f32 0.6931472, %v4552_v36  ;;  %v9714_v34 = vld [vmem:[#allocation89_spill] sm:$0xff]  ;;  %v9720_v51 = vld [vmem:[#allocation96_spill] sm:$0xff] }
 0x48d   :  { %v4558_v33 = vpop.eup %4557  ;;  %4577 = vlog2.f32 %v9700_v24  ;;  %v8679_v23 = vsub.f32 %v8563_v39, %v8501_v52  ;;  %v1621_v6 = vmul.f32 0.6931472, %v4554_v50  ;;  %v1627_v37 = vmul.f32 0.6931472, %v4556_v57  ;;  %v9715_v50 = vld [vmem:[#allocation192_spill] sm:$0xff]  ;;  %v9718_v18 = vld [vmem:[#allocation193_spill] sm:$0xff] }
 0x48e   :  { %v4560_v41 = vpop.eup %4559  ;;  %4579 = vlog2.f32 %v9704_v11  ;;  %v3008_v42 = vsub.f32 0.0, %v8661_v16  ;;  %v8686_v47 = vadd.f32 %v1619_v0, %v9712_v62  ;;  %v1625_v36 = vmul.f32 0.6931472, %v4558_v33 }
 0x48f   :  { %2810 = vadd.xlane.f32.xlu1 %v2809_v55  ;;  %v4562_v10 = vpop.eup %4561  ;;  %4581 = vlog2.f32 %v9706_v1  ;;  %v3197_v9 = vmul.f32 1.442695, %v3006_v38  ;;  %v8690_v52 = vadd.f32 %v1617_v32, %v9714_v34  ;;  %v1631_v39 = vmul.f32 0.6931472, %v4560_v41  ;;  %v9716_v1 = vld [vmem:[#allocation94_spill] sm:$0xff]  ;;  %v9719_v32 = vld [vmem:[#allocation91_spill] sm:$0xff] }
 0x490   :  { %v8647_v14 = vpop.xlane.xlu1 %2666  ;;  %v4564_v27 = vpop.eup %4563  ;;  %4583 = vlog2.f32 %v9708_v40  ;;  %v3199_v57 = vmul.f32 1.442695, %v3007_v53  ;;  %v8695_v29 = vsub.f32 %v8552_v30, %v8517_v19  ;;  %v8698_v0 = vadd.f32 %v1623_v44, %v9716_v1  ;;  %v9723_v44 = vld [vmem:[#allocation93_spill] sm:$0xff] }
 0x491   :  { %v4566_v60 = vpop.eup %4565  ;;  %4585 = vlog2.f32 %v9710_v45  ;;  %v3009_v38 = vsub.f32 0.0, %v8679_v23  ;;  %v8705_v41 = vadd.f32 %v1621_v6, %v9719_v32  ;;  %v8708_v45 = vadd.f32 %v1627_v37, %v9720_v51  ;;  %v9727_v32 = vld [vmem:[#allocation195_spill] sm:$0xff] }
 0x492   :  { %v4568_v55 = vpop.eup %4567  ;;  %4587 = vlog2.f32 %v9711_v7  ;;  %9717 = vst [vmem:[#allocation11_spill] sm:$0xff] %v8698_v0  ;;  %v9722_v7 = vld [vmem:[#allocation194_spill] sm:$0xff]  ;;  %v3201_v19 = vmul.f32 1.442695, %v3008_v42  ;;  %v8713_v30 = vsub.f32 %v8572_v8, %v8542_v22  ;;  %v8716_v62 = vadd.f32 %v1625_v36, %v9723_v44 }
 0x493   :  { %v4570_v24 = vpop.eup %4569  ;;  %4589 = vlog2.f32 %v9713_v28  ;;  %9721 = vst [vmem:[#allocation10_spill] sm:$0xff] %v8708_v45  ;;  %v1629_v34 = vmul.f32 0.6931472, %v4562_v10  ;;  %v1635_v1 = vmul.f32 0.6931472, %v4564_v27  ;;  %v8724_v42 = vsub.f32 %v8575_v63, %v8568_v61  ;;  %v9729_v63 = vld [vmem:[#allocation95_spill] sm:$0xff] }
 0x494   :  { %v8681_v5 = vpop.xlane.xlu1 %2669  ;;  %v4572_v11 = vpop.eup %4571  ;;  %4591 = vlog2.f32 %v9715_v50  ;;  %9724 = vst [vmem:[#allocation9_spill] sm:$0xff] %v8716_v62  ;;  %v9725_v50 = vld [vmem:[#allocation98_spill] sm:$0xff]  ;;  %v1633_v22 = vmul.f32 0.6931472, %v4566_v60  ;;  %v3203_v36 = vmul.f32 1.442695, %v3009_v38 }
 0x495   :  { %v4574_v33 = vpop.eup %4573  ;;  %4593 = vlog2.f32 %v9718_v18  ;;  %v8719_v6 = vadd.f32 %v1631_v39, %v9725_v50  ;;  %v3010_v18 = vsub.f32 0.0, %v8695_v29  ;;  %v1639_v10 = vmul.f32 0.6931472, %v4568_v55  ;;  %v9728_v50 = vld [vmem:[#allocation196_spill] sm:$0xff]  ;;  %v9731_v38 = vld [vmem:[#allocation197_spill] sm:$0xff] }
 0x496   :  { %v4576_v53 = vpop.eup %4575  ;;  %4595 = vlog2.f32 %v9722_v7  ;;  %v3011_v27 = vsub.f32 0.0, %v8713_v30  ;;  %v1641_v7 = vmul.f32 0.6931472, %v4574_v33  ;;  %v8732_v60 = vadd.f32 %v1629_v34, %v9729_v63  ;;  %v9734_v33 = vld [vmem:[#allocation102_spill] sm:$0xff] }
 0x497   :  { %v4578_v28 = vpop.eup %4577  ;;  %4597 = vpow2.f32 %v3197_v9  ;;  %9726 = vst [vmem:[#allocation12_spill] sm:$0xff] %v8719_v6  ;;  %v1637_v9 = vmul.f32 0.6931472, %v4570_v24  ;;  %v1647_v61 = vmul.f32 0.6931472, %v4576_v53  ;;  %v3012_v55 = vsub.f32 0.0, %v8724_v42 }
 0x498   :  { %v8702_v40 = vpop.xlane.xlu1 %2672  ;;  %v4580_v37 = vpop.eup %4579  ;;  %4599 = vpow2.f32 %v3199_v57  ;;  %v1643_v57 = vmul.f32 0.6931472, %v4572_v11  ;;  %9730 = vst [vmem:[#allocation14_spill] sm:$0xff] %v8732_v60  ;;  %v1645_v6 = vmul.f32 0.6931472, %v4578_v28  ;;  %v9732_v24 = vld [vmem:[#allocation100_spill] sm:$0xff]  ;;  %v8752_v60 = vsub.f32 %v8593_v43, %v8595_v25 }
 0x499   :  { %v4582_v8 = vpop.eup %4581  ;;  %4601 = vlog2.f32 %v9727_v32  ;;  %v3205_v45 = vmul.f32 1.442695, %v3010_v18  ;;  %v9735_v53 = vld [vmem:[#allocation97_spill] sm:$0xff]  ;;  %v9737_v28 = vld [vmem:[#allocation99_spill] sm:$0xff]  ;;  %v3207_v18 = vmul.f32 1.442695, %v3011_v27 }
 0x49a   :  { %v4584_v39 = vpop.eup %4583  ;;  %4603 = vpow2.f32 %v3201_v19  ;;  %v8737_v19 = vadd.f32 %v1635_v1, %v9732_v24  ;;  %v8745_v34 = vadd.f32 %v1633_v22, %v9735_v53  ;;  %v8748_v63 = vadd.f32 %v1637_v9, %v9737_v28  ;;  %v9739_v1 = vld [vmem:[#allocation104_spill] sm:$0xff]  ;;  %v9743_v53 = vld [vmem:[#allocation103_spill] sm:$0xff] }
 0x49b   :  { %v4586_v44 = vpop.eup %4585  ;;  %4605 = vlog2.f32 %v9728_v50  ;;  %v8742_v50 = vadd.f32 %v1639_v10, %v9734_v33  ;;  %v8755_v24 = vadd.f32 %v1643_v57, %v9739_v1  ;;  %v9742_v33 = vld [vmem:[#allocation106_spill] sm:$0xff]  ;;  %v1651_v22 = vmul.f32 0.6931472, %v4580_v37 }
 0x49c   :  { %v8727_v51 = vpop.xlane.xlu1 %2675  ;;  %v4588_v32 = vpop.eup %4587  ;;  %4607 = vlog2.f32 %v9731_v38  ;;  %9733 = vst [vmem:[#allocation16_spill] sm:$0xff] %v8737_v19  ;;  %9736 = vst [vmem:[#allocation13_spill] sm:$0xff] %v8745_v34  ;;  %v8761_v0 = vadd.f32 %v1647_v61, %v9742_v33  ;;  %v8764_v9 = vadd.f32 %v1645_v6, %v9743_v53  ;;  %v1649_v28 = vmul.f32 0.6931472, %v4582_v8  ;;  %v9745_v57 = vld [vmem:[#allocation198_spill] sm:$0xff]  ;;  %v9747_v33 = vld [vmem:[#allocation108_spill] sm:$0xff] }
 0x49d   :  { %v4590_v62 = vpop.eup %4589  ;;  %4609 = vpow2.f32 %v3203_v36  ;;  %9738 = vst [vmem:[#allocation18_spill] sm:$0xff] %v8748_v63  ;;  %v9740_v36 = vld [vmem:[#allocation101_spill] sm:$0xff]  ;;  %v3209_v63 = vmul.f32 1.442695, %v3012_v55  ;;  %v1655_v43 = vmul.f32 0.6931472, %v4584_v39 }
 0x49e   :  { %v4592_v38 = vpop.eup %4591  ;;  %v8758_v19 = vadd.f32 %v1641_v7, %v9740_v36  ;;  %9744 = vst [vmem:[#allocation17_spill] sm:$0xff] %v8764_v9  ;;  %4611 = vpow2.f32 %v3205_v45  ;;  %v1653_v25 = vmul.f32 0.6931472, %v4586_v44  ;;  %v8769_v7 = vsub.f32 %v8587_v48, %v8623_v31  ;;  %v9746_v39 = vld [vmem:[#allocation199_spill] sm:$0xff]  ;;  %v9748_v31 = vld [vmem:[#allocation105_spill] sm:$0xff] }
 0x49f   :  { %v4594_v10 = vpop.eup %4593  ;;  %4613 = vlog2.f32 %v9745_v57  ;;  %v1659_v61 = vmul.f32 0.6931472, %v4588_v32  ;;  %v1657_v37 = vmul.f32 0.6931472, %v4590_v62  ;;  %v3013_v6 = vsub.f32 0.0, %v8752_v60 }
 0x4a0   :  { %v8739_v11 = vpop.xlane.xlu1 %2678  ;;  %9741 = vst [vmem:[#allocation15_spill] sm:$0xff] %v8758_v19  ;;  %v4596_v27 = vpop.eup %4595  ;;  %4615 = vpow2.f32 %v3207_v18  ;;  %v1663_v8 = vmul.f32 0.6931472, %v4592_v38  ;;  %v1661_v45 = vmul.f32 0.6931472, %v4594_v10  ;;  %v8777_v44 = vsub.f32 %v8602_v20, %v8647_v14  ;;  %v9750_v18 = vld [vmem:[#allocation110_spill] sm:$0xff] }
 0x4a1   :  { %v4598_v34 = vpop.eup %4597  ;;  %4617 = vlog2.f32 %v9746_v39  ;;  %v8780_v48 = vadd.f32 %v1651_v22, %v9747_v33  ;;  %v8783_v53 = vadd.f32 %v1649_v28, %v9748_v31  ;;  %v8786_v57 = vadd.f32 %v1655_v43, %v9750_v18  ;;  %v9752_v38 = vld [vmem:[#allocation107_spill] sm:$0xff]  ;;  %v9754_v22 = vld [vmem:[#allocation112_spill] sm:$0xff]  ;;  %v9755_v28 = vld [vmem:[#allocation109_spill] sm:$0xff] }
 0x4a2   :  { %v4600_v36 = vpop.eup %4599  ;;  %v3381_v32 = vsub.f32 1.0, %v4598_v34  ;;  %4619 = vpow2.f32 %v3209_v63  ;;  %v8789_v10 = vadd.f32 %v1653_v25, %v9752_v38  ;;  %v3014_v20 = vsub.f32 0.0, %v8769_v7  ;;  %v9757_v25 = vld [vmem:[#allocation111_spill] sm:$0xff] }
 0x4a3   :  { %v4602_v55 = vpop.eup %4601  ;;  %9749 = vst [vmem:[#allocation20_spill] sm:$0xff] %v8783_v53  ;;  %9751 = vst [vmem:[#allocation22_spill] sm:$0xff] %v8786_v57  ;;  %v3382_v9 = vsub.f32 1.0, %v4600_v36  ;;  %v8795_v33 = vadd.f32 %v1659_v61, %v9754_v22  ;;  %v8798_v31 = vadd.f32 %v1657_v37, %v9755_v28  ;;  %v3211_v63 = vmul.f32 1.442695, %v3013_v6  ;;  %v9756_v53 = vld [vmem:[#allocation114_spill] sm:$0xff] }
 0x4a4   :  { %v8771_v1 = vpop.xlane.xlu1 %2681  ;;  %v4604_v62 = vpop.eup %4603  ;;  %9753 = vst [vmem:[#allocation19_spill] sm:$0xff] %v8789_v10  ;;  %v8801_v43 = vadd.f32 %v1663_v8, %v9756_v53  ;;  %v1667_v18 = vmul.f32 0.6931472, %v4596_v27  ;;  %v8804_v38 = vadd.f32 %v1661_v45, %v9757_v25  ;;  %v9759_v10 = vld [vmem:[#allocation200_spill] sm:$0xff]  ;;  %v3015_v57 = vsub.f32 0.0, %v8777_v44  ;;  %v9760_v22 = vld [vmem:[#allocation201_spill] sm:$0xff] }
 0x4a5   :  { %v4606_v39 = vpop.eup %4605  ;;  %4621 = vlog2.f32 %v9759_v10  ;;  %v3383_v19 = vsub.f32 1.0, %v4604_v62  ;;  %v1665_v61 = vmul.f32 0.6931472, %v4602_v55  ;;  %v3506_v37 = vmul.f32 %v3381_v32, %v3381_v32  ;;  %v9761_v53 = vld [vmem:[#allocation202_spill] sm:$0xff]  ;;  %v9762_v62 = vld [vmem:[#allocation116_spill] sm:$0xff] }
 0x4a6   :  { %v4608_v34 = vpop.eup %4607  ;;  %9758 = vst [vmem:[#allocation24_spill] sm:$0xff] %v8804_v38  ;;  %4623 = vlog2.f32 %v9760_v22  ;;  %v8811_v6 = vsub.f32 %v8598_v4, %v8681_v5  ;;  %v1671_v8 = vmul.f32 0.6931472, %v4606_v39  ;;  %v3507_v27 = vmul.f32 %v3382_v9, %v3382_v9  ;;  %v9763_v4 = vld [vmem:[#allocation203_spill] sm:$0xff] }
 0x4a7   :  { %v4610_v36 = vpop.eup %4609  ;;  %4625 = vlog2.f32 %v9761_v53  ;;  %v3213_v45 = vmul.f32 1.442695, %v3014_v20  ;;  %v1669_v25 = vmul.f32 0.6931472, %v4608_v34  ;;  %v8816_v55 = vsub.f32 %v8607_v59, %v8702_v40  ;;  %v9764_v53 = vld [vmem:[#allocation113_spill] sm:$0xff]  ;;  %v9766_v40 = vld [vmem:[#allocation118_spill] sm:$0xff] }
 0x4a8   :  { %v8792_v14 = vpop.xlane.xlu1 %2684  ;;  %v4612_v38 = vpop.eup %4611  ;;  %v3384_v10 = vsub.f32 1.0, %v4610_v36  ;;  %4627 = vpow2.f32 %v3211_v63  ;;  %v8819_v32 = vadd.f32 %v1667_v18, %v9762_v62  ;;  %v3508_v5 = vmul.f32 %v3383_v19, %v3383_v19 }
 0x4a9   :  { %v4614_v22 = vpop.eup %4613  ;;  %4629 = vlog2.f32 %v9763_v4  ;;  %v3215_v39 = vmul.f32 1.442695, %v3015_v57  ;;  %v8823_v9 = vadd.f32 %v1665_v61, %v9764_v53  ;;  %v3631_v34 = vmul.f32 %v3506_v37, %v8635_v2  ;;  %v9767_v61 = vld [vmem:[#allocation115_spill] sm:$0xff]  ;;  %v9768_v2 = vld [vmem:[#allocation204_spill] sm:$0xff] }
 0x4aa   :  { %v4616_v20 = vpop.eup %4615  ;;  %v3016_v63 = vsub.f32 0.0, %v8811_v6  ;;  %v8829_v59 = vsub.f32 %v8610_v35, %v8727_v51  ;;  %v8832_v18 = vadd.f32 %v1671_v8, %v9766_v40  ;;  %v3632_v62 = vmul.f32 %v3507_v27, %v8641_v26 }
 0x4ab   :  { %9765 = vst [vmem:[#allocation21_spill] sm:$0xff] %v8823_v9  ;;  %v4618_v36 = vpop.eup %4617  ;;  %v3385_v19 = vsub.f32 1.0, %v4612_v38  ;;  %4631 = vpow2.f32 %v3213_v45  ;;  %v8836_v4 = vadd.f32 %v1669_v25, %v9767_v61  ;;  %v3509_v37 = vmul.f32 %v3384_v10, %v3384_v10 }
 0x4ac   :  { %v2688_v28 = vpop.xlane.xlu1 %2687  ;;  %v4620_v53 = vpop.eup %4619  ;;  %4633 = vlog2.f32 %v9768_v2  ;;  %v3017_v9 = vsub.f32 0.0, %v8816_v55  ;;  %v8842_v35 = vsub.f32 %v8627_v54, %v8739_v11  ;;  %v3633_v51 = vmul.f32 %v3508_v5, %v8661_v16 }
 0x4ad   :  { %v3386_v8 = vsub.f32 1.0, %v4616_v20  ;;  %4635 = vpow2.f32 %v3215_v39  ;;  %v1675_v26 = vmul.f32 0.6931472, %v4614_v22  ;;  %v3823_v38 = vsel %vm3691_vm13, %v3631_v34, 0.0 }
 0x4ae   :  { %v3217_v27 = vmul.f32 1.442695, %v3016_v63  ;;  %v3018_v45 = vsub.f32 0.0, %v8829_v59  ;;  %v8849_v25 = vsub.f32 %v8620_v49, %v8771_v1  ;;  %v3825_v40 = vsel %vm3691_vm13, %v3632_v62, 0.0  ;;  %v9769_v1 = vld [vmem:[#allocation205_spill] sm:$0xff] }
 0x4af   :  { %v8851_v10 = vpop.eup %4621  ;;  %v3510_v54 = vmul.f32 %v3385_v19, %v3385_v19  ;;  %v3387_v11 = vsub.f32 1.0, %v4620_v53  ;;  %v1673_v16 = vmul.f32 0.6931472, %v4618_v36  ;;  %v3634_v22 = vmul.f32 %v3509_v37, %v8679_v23 }
 0x4b0   :  { %v2691_v57 = vpop.xlane.xlu1 %2690  ;;  %v8854_v5 = vpop.eup %4623  ;;  %v3219_v39 = vmul.f32 1.442695, %v3017_v9  ;;  %v3019_v20 = vsub.f32 0.0, %v8842_v35  ;;  %v8860_v34 = vsub.f32 %v8644_v12, %v8792_v14  ;;  %4637 = vlog2.f32 %v9769_v1 }
 0x4b1   :  { %v8862_v49 = vpop.eup %4625  ;;  %v3824_v63 = vadd.f32 %v3823_v38, %v8545_v3  ;;  %v3827_v62 = vsel %vm3691_vm13, %v3633_v51, 0.0  ;;  %v3511_v36 = vmul.f32 %v3386_v8, %v3386_v8  ;;  %4639 = vpow2.f32 %v3217_v27 }
 0x4b2   :  { %v4628_v19 = vpop.eup %4627  ;;  %v3221_v53 = vmul.f32 1.442695, %v3018_v45  ;;  %v3020_v23 = vsub.f32 0.0, %v8849_v25  ;;  %v8869_v9 = vsub.f32 %v8630_v15, %v2688_v28  ;;  %v3635_v14 = vmul.f32 %v3510_v54, %v8695_v29 }
 0x4b3   :  { %v8871_v2 = vpop.eup %4629  ;;  %v3826_v12 = vadd.f32 %v3825_v40, %v3824_v63  ;;  %v3512_v37 = vmul.f32 %v3387_v11, %v3387_v11  ;;  %v8875_v1 = vsub.f32 %v8650_v56, %v2691_v57  ;;  %v3829_v51 = vsel %vm3691_vm13, %v3634_v22, 0.0  ;;  %v2715_v57 = vpop.xlane.xlu0 %2714  ;;  %v9770_v11 = vld [vmem:[#allocation120_spill] sm:$0xff] }
 0x4b4   :  { %v2694_v61 = vpop.xlane.xlu1 %2693  ;;  %4641 = vpow2.f32 %v3219_v39  ;;  %v3223_v8 = vmul.f32 1.442695, %v3019_v20  ;;  %v3021_v38 = vsub.f32 0.0, %v8860_v34  ;;  %v3636_v15 = vmul.f32 %v3511_v36, %v8713_v30 }
 0x4b5   :  { %v4632_v27 = vpop.eup %4631  ;;  %v3828_v45 = vadd.f32 %v3827_v62, %v3826_v12  ;;  %v3388_v28 = vsub.f32 1.0, %v4628_v19  ;;  %v8881_v40 = vsub.f32 %v8653_v13, %v2694_v61  ;;  %4643 = vpow2.f32 %v3221_v53 }
 0x4b6   :  { %v8883_v29 = vpop.eup %4633  ;;  %v3225_v56 = vmul.f32 1.442695, %v3020_v23  ;;  %v3022_v54 = vsub.f32 0.0, %v8869_v9  ;;  %v8887_v22 = vadd.f32 %v1675_v26, %v9770_v11  ;;  %v3831_v63 = vsel %vm3691_vm13, %v3635_v14, 0.0 }
 0x4b7   :  { %v4636_v39 = vpop.eup %4635  ;;  %v3830_v20 = vadd.f32 %v3829_v51, %v3828_v45  ;;  %v3637_v30 = vmul.f32 %v3512_v37, %v8724_v42  ;;  %v3023_v62 = vsub.f32 0.0, %v8875_v1  ;;  %v3389_v61 = vsub.f32 1.0, %v4632_v27  ;;  %v9771_v27 = vld [vmem:[#allocation117_spill] sm:$0xff] }
 0x4b8   :  { %v2697_v3 = vpop.xlane.xlu1 %2696  ;;  %4645 = vpow2.f32 %v3223_v8  ;;  %v3227_v36 = vmul.f32 1.442695, %v3021_v38  ;;  %v3833_v53 = vsel %vm3691_vm13, %v3636_v15, 0.0  ;;  %v3513_v23 = vmul.f32 %v3388_v28, %v3388_v28 }
 0x4b9   :  { %v8893_v19 = vsub.f32 %v8664_v58, %v2697_v3  ;;  %v8897_v26 = vsub.f32 %v8705_v41, %v2715_v57  ;;  %v3024_v12 = vsub.f32 0.0, %v8881_v40  ;;  %v3390_v14 = vsub.f32 1.0, %v4636_v39 }
 0x4ba   :  { %4647 = vpow2.f32 %v3225_v56  ;;  %v3229_v42 = vmul.f32 1.442695, %v3022_v54  ;;  %v8903_v51 = vpop.eup %4637  ;;  %v3832_v8 = vadd.f32 %v3831_v63, %v3830_v20  ;;  %v3835_v58 = vsel %vm3691_vm13, %v3637_v30, 0.0 }
 0x4bb   :  { %v3231_v3 = vmul.f32 1.442695, %v3023_v62  ;;  %v8907_v45 = vadd.f32 %v1673_v16, %v9771_v27  ;;  %v4640_v41 = vpop.eup %4639  ;;  %v3514_v15 = vmul.f32 %v3389_v61, %v3389_v61  ;;  %4649 = vpow2.f32 %v3227_v36 }
 0x4bc   :  { %v2700_v13 = vpop.xlane.xlu1 %2699  ;;  %v3025_v28 = vsub.f32 0.0, %v8893_v19  ;;  %v3638_v57 = vmul.f32 %v3513_v23, %v8752_v60  ;;  %v3031_v54 = vsub.f32 0.0, %v8897_v26  ;;  %v3233_v11 = vmul.f32 1.442695, %v3024_v12 }
 0x4bd   :  { %v8901_v37 = vsub.f32 %v8656_v46, %v2700_v13  ;;  %v3834_v46 = vadd.f32 %v3833_v53, %v3832_v8  ;;  %v3515_v20 = vmul.f32 %v3390_v14, %v3390_v14  ;;  %4651 = vpow2.f32 %v3229_v42  ;;  %v2742_v13 = vpop.xlane.xlu0 %2741 }
 0x4be   :  { %v4642_v39 = vpop.eup %4641  ;;  %v1679_v63 = vmul.f32 0.6931472, %v8851_v10  ;;  %v3391_v62 = vsub.f32 1.0, %v4640_v41  ;;  %4653 = vpow2.f32 %v3231_v3  ;;  %v3639_v60 = vmul.f32 %v3514_v15, %v8769_v7  ;;  %v9772_v15 = vld [vmem:[#allocation122_spill] sm:$0xff] }
 0x4bf   :  { %v3026_v16 = vsub.f32 0.0, %v8901_v37  ;;  %v3836_v30 = vadd.f32 %v3835_v58, %v3834_v46  ;;  %v4644_v36 = vpop.eup %4643  ;;  %v3235_v53 = vmul.f32 1.442695, %v3025_v28  ;;  %v3837_v14 = vsel %vm3691_vm13, %v3638_v57, 0.0  ;;  %v9773_v28 = vld [vmem:[#allocation119_spill] sm:$0xff] }
 0x4c0   :  { %v2703_v38 = vpop.xlane.xlu1 %2702  ;;  %v3392_v42 = vsub.f32 1.0, %v4642_v39  ;;  %v3247_v10 = vmul.f32 1.442695, %v3031_v54  ;;  %4655 = vpow2.f32 %v3233_v11  ;;  %v3640_v58 = vmul.f32 %v3515_v20, %v8777_v44 }
 0x4c1   :  { %v8911_v56 = vsub.f32 %v8674_v21, %v2703_v38  ;;  %v1677_v21 = vmul.f32 0.6931472, %v8854_v5  ;;  %v8926_v3 = vsub.f32 %v8742_v50, %v2742_v13  ;;  %v3237_v5 = vmul.f32 1.442695, %v3026_v16 }
 0x4c2   :  { %v4646_v8 = vpop.eup %4645  ;;  %v3516_v38 = vmul.f32 %v3391_v62, %v3391_v62  ;;  %v3393_v27 = vsub.f32 1.0, %v4644_v36  ;;  %v3838_v54 = vadd.f32 %v3837_v14, %v3836_v30  ;;  %v3839_v11 = vsel %vm3691_vm13, %v3639_v60, 0.0 }
 0x4c3   :  { %v3027_v23 = vsub.f32 0.0, %v8911_v56  ;;  %v8933_v46 = vadd.f32 %v1677_v21, %v9773_v28  ;;  %4657 = vpow2.f32 %v3235_v53  ;;  %v3517_v50 = vmul.f32 %v3392_v42, %v3392_v42 }
 0x4c4   :  { %v2706_v61 = vpop.xlane.xlu1 %2705  ;;  %v4648_v57 = vpop.eup %4647  ;;  %v3394_v39 = vsub.f32 1.0, %v4646_v8  ;;  %4659 = vpow2.f32 %v3247_v10  ;;  %v3841_v62 = vsel %vm3691_vm13, %v3640_v58, 0.0  ;;  %v3518_v30 = vmul.f32 %v3393_v27, %v3393_v27 }
 0x4c5   :  { %v8921_v12 = vsub.f32 %v8669_v17, %v2706_v61  ;;  %v8930_v17 = vadd.f32 %v1679_v63, %v9772_v15  ;;  %v3239_v44 = vmul.f32 1.442695, %v3027_v23  ;;  %v4650_v16 = vpop.eup %4649  ;;  %v3040_v63 = vsub.f32 0.0, %v8926_v3 }
 0x4c6   :  { %4661 = vpow2.f32 %v3237_v5  ;;  %v3641_v61 = vmul.f32 %v3516_v38, %v8811_v6  ;;  %v3395_v21 = vsub.f32 1.0, %v4648_v57  ;;  %v3840_v23 = vadd.f32 %v3839_v11, %v3838_v54  ;;  %v2748_v38 = vpop.xlane.xlu0 %2747  ;;  %v9774_v11 = vld [vmem:[#allocation11_spill] sm:$0xff] }
 0x4c7   :  { %v3028_v7 = vsub.f32 0.0, %v8921_v12  ;;  %v4652_v53 = vpop.eup %4651  ;;  %4663 = vpow2.f32 %v3239_v44  ;;  %v1683_v14 = vmul.f32 0.6931472, %v8862_v49  ;;  %v3642_v10 = vmul.f32 %v3517_v50, %v8816_v55 }
 0x4c8   :  { %v2709_v41 = vpop.xlane.xlu1 %2708  ;;  %v4654_v42 = vpop.eup %4653  ;;  %v3519_v8 = vmul.f32 %v3394_v39, %v3394_v39  ;;  %v3396_v58 = vsub.f32 1.0, %v4650_v16  ;;  %v3842_v6 = vadd.f32 %v3841_v62, %v3840_v23  ;;  %v3843_v15 = vsel %vm3691_vm13, %v3641_v61, 0.0 }
 0x4c9   :  { %v8937_v20 = vsub.f32 %v8690_v52, %v2709_v41  ;;  %v3241_v13 = vmul.f32 1.442695, %v3028_v7  ;;  %v3265_v7 = vmul.f32 1.442695, %v3040_v63  ;;  %v3520_v28 = vmul.f32 %v3395_v21, %v3395_v21 }
 0x4ca   :  { %v4656_v41 = vpop.eup %4655  ;;  %v3397_v57 = vsub.f32 1.0, %v4652_v53  ;;  %v3398_v54 = vsub.f32 1.0, %v4654_v42  ;;  %v3845_v50 = vsel %vm3691_vm13, %v3642_v10, 0.0  ;;  %v3644_v39 = vmul.f32 %v3519_v8, %v8842_v35  ;;  %v9775_v10 = vld [vmem:[#allocation9_spill] sm:$0xff] }
 0x4cb   :  { %v3029_v36 = vsub.f32 0.0, %v8937_v20  ;;  %4665 = vpow2.f32 %v3241_v13  ;;  %v3521_v16 = vmul.f32 %v3396_v58, %v3396_v58  ;;  %v8957_v62 = vsub.f32 %v8755_v24, %v2748_v38 }
 0x4cc   :  { %v2712_v60 = vpop.xlane.xlu1 %2711  ;;  %v3844_v13 = vadd.f32 %v3843_v15, %v3842_v6  ;;  %v8965_v35 = vmul.f32 0.6931472, %v8871_v2  ;;  %v3523_v42 = vmul.f32 %v3398_v54, %v3398_v54  ;;  %v3849_v58 = vsel %vm3691_vm13, %v3644_v39, 0.0 }
 0x4cd   :  { %v8944_v52 = vsub.f32 %v8686_v47, %v2712_v60  ;;  %v3243_v5 = vmul.f32 1.442695, %v3029_v36  ;;  %v3643_v47 = vmul.f32 %v3518_v30, %v8829_v59  ;;  %v4658_v63 = vpop.eup %4657  ;;  %v3399_v59 = vsub.f32 1.0, %v4656_v41 }
 0x4ce   :  { %v8960_v30 = vpop.eup %4659  ;;  %v3645_v36 = vmul.f32 %v3520_v28, %v8849_v25  ;;  %v3522_v60 = vmul.f32 %v3397_v57, %v3397_v57  ;;  %v3846_v24 = vadd.f32 %v3845_v50, %v3844_v13  ;;  %v3042_v6 = vsub.f32 0.0, %v8957_v62  ;;  %v2754_v50 = vpop.xlane.xlu0 %2753 }
 0x4cf   :  { %v3030_v27 = vsub.f32 0.0, %v8944_v52  ;;  %4667 = vpow2.f32 %v3243_v5  ;;  %v3847_v21 = vsel %vm3691_vm13, %v3643_v47, 0.0  ;;  %v3646_v5 = vmul.f32 %v3521_v16, %v8860_v34  ;;  %v9777_v16 = vld [vmem:[#allocation10_spill] sm:$0xff] }
 0x4d0   :  { %v2718_v49 = vpop.xlane.xlu1 %2717  ;;  %v4662_v23 = vpop.eup %4661  ;;  %v3400_v38 = vsub.f32 1.0, %v4658_v63  ;;  %v3524_v41 = vmul.f32 %v3399_v59, %v3399_v59  ;;  %v3851_v47 = vsel %vm3691_vm13, %v3645_v36, 0.0  ;;  %v3269_v59 = vmul.f32 1.442695, %v3042_v6 }
 0x4d1   :  { %v3245_v55 = vmul.f32 1.442695, %v3030_v27  ;;  %v8952_v44 = vsub.f32 %v9774_v11, %v2718_v49  ;;  %v4664_v25 = vpop.eup %4663  ;;  %v3848_v27 = vadd.f32 %v3847_v21, %v3846_v24  ;;  %v3401_v28 = vsub.f32 1.0, %v4662_v23  ;;  %v9776_v49 = vld [vmem:[#allocation124_spill] sm:$0xff] }
 0x4d2   :  { %v8977_v54 = vadd.f32 %v1683_v14, %v9776_v49  ;;  %v3648_v11 = vmul.f32 %v3523_v42, %v8875_v1  ;;  %v3853_v13 = vsel %vm3691_vm13, %v3646_v5, 0.0  ;;  %v3402_v21 = vsub.f32 1.0, %v4664_v25  ;;  %v2760_v25 = vpop.xlane.xlu0 %2759 }
 0x4d3   :  { %4669 = vpow2.f32 %v3245_v55  ;;  %v3032_v61 = vsub.f32 0.0, %v8952_v44  ;;  %v3850_v34 = vadd.f32 %v3849_v58, %v3848_v27  ;;  %v8988_v1 = vsub.f32 %v8761_v0, %v2754_v50 }
 0x4d4   :  { %v2721_v53 = vpop.xlane.xlu1 %2720  ;;  %4671 = vpow2.f32 %v3265_v7  ;;  %v3647_v7 = vmul.f32 %v3522_v60, %v8869_v9  ;;  %v3649_v60 = vmul.f32 %v3524_v41, %v8881_v40  ;;  %v3526_v23 = vmul.f32 %v3401_v28, %v3401_v28  ;;  %v9778_v41 = vld [vmem:[#allocation14_spill] sm:$0xff] }
 0x4d5   :  { %v8968_v8 = vsub.f32 %v9775_v10, %v2721_v53  ;;  %v3249_v15 = vmul.f32 1.442695, %v3032_v61  ;;  %v4666_v55 = vpop.eup %4665  ;;  %v3525_v61 = vmul.f32 %v3400_v38, %v3400_v38  ;;  %v3852_v36 = vadd.f32 %v3851_v47, %v3850_v34 }
 0x4d6   :  { %v3855_v53 = vsel %vm3691_vm13, %v3647_v7, 0.0  ;;  %v3403_v24 = vsub.f32 1.0, %v4666_v55  ;;  %v3857_v5 = vsel %vm3691_vm13, %v3648_v11, 0.0  ;;  %v3527_v40 = vmul.f32 %v3402_v21, %v3402_v21 }
 0x4d7   :  { %v3033_v2 = vsub.f32 0.0, %v8968_v8  ;;  %4673 = vpow2.f32 %v3249_v15  ;;  %v3854_v58 = vadd.f32 %v3853_v13, %v3852_v36  ;;  %v3650_v38 = vmul.f32 %v3525_v61, %v8893_v19 }
 0x4d8   :  { %v2724_v57 = vpop.xlane.xlu1 %2723  ;;  %v3406_v0 = vsub.f32 1.0, %v8960_v30  ;;  %v3859_v7 = vsel %vm3691_vm13, %v3649_v60, 0.0  ;;  %v3651_v28 = vmul.f32 %v3526_v23, %v8901_v37  ;;  %v3044_v11 = vsub.f32 0.0, %v8988_v1 }
 0x4d9   :  { %v3251_v39 = vmul.f32 1.442695, %v3033_v2  ;;  %v8981_v63 = vsub.f32 %v9777_v16, %v2724_v57  ;;  %v4668_v9 = vpop.eup %4667  ;;  %v3856_v47 = vadd.f32 %v3855_v53, %v3854_v58  ;;  %v3528_v57 = vmul.f32 %v3403_v24, %v3403_v24  ;;  %v9780_v58 = vld [vmem:[#allocation13_spill] sm:$0xff] }
 0x4da   :  { %v3404_v27 = vsub.f32 1.0, %v4668_v9  ;;  %v9001_v50 = vsub.f32 %v8780_v48, %v2760_v25  ;;  %v3861_v30 = vsel %vm3691_vm13, %v3650_v38, 0.0  ;;  %v3652_v13 = vmul.f32 %v3527_v40, %v8911_v56  ;;  %v9781_v38 = vld [vmem:[#allocation121_spill] sm:$0xff] }
 0x4db   :  { %v3034_v14 = vsub.f32 0.0, %v8981_v63  ;;  %4675 = vpow2.f32 %v3251_v39  ;;  %v3858_v34 = vadd.f32 %v3857_v5, %v3856_v47  ;;  %v9779_v39 = vld [vmem:[#allocation12_spill] sm:$0xff]  ;;  %v3863_v60 = vsel %vm3691_vm13, %v3651_v28, 0.0 }
 0x4dc   :  { %v2727_v42 = vpop.xlane.xlu1 %2726  ;;  %v3529_v61 = vmul.f32 %v3404_v27, %v3404_v27  ;;  %v3865_v5 = vsel %vm3691_vm13, %v3652_v13, 0.0  ;;  %v9019_v40 = vadd.f32 %v8965_v35, %v9781_v38  ;;  %v3531_v25 = vmul.f32 %v3406_v0, %v3406_v0  ;;  %v9782_v35 = vld [vmem:[#allocation16_spill] sm:$0xff] }
 0x4dd   :  { %v4670_v10 = vpop.eup %4669  ;;  %v3253_v6 = vmul.f32 1.442695, %v3034_v14  ;;  %v8993_v15 = vsub.f32 %v9778_v41, %v2727_v42  ;;  %v3860_v9 = vadd.f32 %v3859_v7, %v3858_v34  ;;  %v3653_v14 = vmul.f32 %v3528_v57, %v8921_v12  ;;  %v2766_v41 = vpop.xlane.xlu0 %2765 }
 0x4de   :  { %v4672_v2 = vpop.eup %4671  ;;  %v3405_v49 = vsub.f32 1.0, %v4670_v10  ;;  %v3273_v42 = vmul.f32 1.442695, %v3044_v11  ;;  %vm60_vm0 = vcmask 0  }
 0x4df   :  { %4677 = vpow2.f32 %v3253_v6  ;;  %v3035_v55 = vsub.f32 0.0, %v8993_v15  ;;  %v3415_v21 = vsub.f32 1.0, %v4672_v2  ;;  %v3862_v24 = vadd.f32 %v3861_v30, %v3860_v9 }
 0x4e0   :  { %v2730_v19 = vpop.xlane.xlu1 %2729  ;;  %4679 = vpow2.f32 %v3269_v59  ;;  %v3530_v48 = vmul.f32 %v3405_v49, %v3405_v49  ;;  %v3046_v59 = vsub.f32 0.0, %v9001_v50  ;;  %v3654_v6 = vmul.f32 %v3529_v61, %v8937_v20 }
 0x4e1   :  { %v9004_v16 = vsub.f32 %v9779_v39, %v2730_v19  ;;  %v3255_v37 = vmul.f32 1.442695, %v3035_v55  ;;  %v4674_v23 = vpop.eup %4673  ;;  %v3864_v27 = vadd.f32 %v3863_v60, %v3862_v24  ;;  %v3540_v47 = vmul.f32 %v3415_v21, %v3415_v21  ;;  %v9783_v39 = vld [vmem:[#allocation22_spill] sm:$0xff] }
 0x4e2   :  { %v3867_v7 = vsel %vm3691_vm13, %v3653_v14, 0.0  ;;  %v3655_v28 = vmul.f32 %v3530_v48, %v8944_v52  ;;  %v3407_v57 = vsub.f32 1.0, %v4674_v23  ;;  %v3277_v0 = vmul.f32 1.442695, %v3046_v59  ;;  %v2772_v59 = vpop.xlane.xlu0 %2771 }
 0x4e3   :  { %v3036_v36 = vsub.f32 0.0, %v9004_v16  ;;  %4681 = vpow2.f32 %v3255_v37  ;;  %v3866_v20 = vadd.f32 %v3865_v5, %v3864_v27  ;;  %v3869_v11 = vsel %vm3691_vm13, %v3654_v6, 0.0 }
 0x4e4   :  { %v2733_v53 = vpop.xlane.xlu1 %2732  ;;  %v9029_v30 = vsub.f32 %v9783_v39, %v2766_v41  ;;  %v1687_v37 = vmul.f32 0.6931472, %v8883_v29  ;;  %v3871_v21 = vsel %vm3691_vm13, %v3655_v28, 0.0  ;;  %v3532_v9 = vmul.f32 %v3407_v57, %v3407_v57  ;;  %v9785_v41 = vld [vmem:[#allocation125_spill] sm:$0xff] }
 0x4e5   :  { %v3257_v10 = vmul.f32 1.442695, %v3036_v36  ;;  %v9012_v56 = vsub.f32 %v9780_v58, %v2733_v53  ;;  %v4676_v12 = vpop.eup %4675  ;;  %v3868_v61 = vadd.f32 %v3867_v7, %v3866_v20  ;;  %v1685_v14 = vmul.f32 0.6931472, %v8903_v51  ;;  %v9786_v7 = vld [vmem:[#allocation123_spill] sm:$0xff] }
 0x4e6   :  { %v3408_v13 = vsub.f32 1.0, %v4676_v12  ;;  %v3656_v53 = vmul.f32 %v3531_v25, %v8897_v26  ;;  %v3665_v5 = vmul.f32 %v3540_v47, %v8926_v3  ;;  %v3048_v29 = vsub.f32 0.0, %v9029_v30 }
 0x4e7   :  { %4683 = vpow2.f32 %v3257_v10  ;;  %v3037_v2 = vsub.f32 0.0, %v9012_v56  ;;  %v3870_v23 = vadd.f32 %v3869_v11, %v3868_v61  ;;  %v3657_v26 = vmul.f32 %v3532_v9, %v8952_v44 }
 0x4e8   :  { %v2736_v49 = vpop.xlane.xlu1 %2735  ;;  %4685 = vpow2.f32 %v3273_v42  ;;  %v9784_v42 = vld [vmem:[#allocation18_spill] sm:$0xff]  ;;  %v3533_v6 = vmul.f32 %v3408_v13, %v3408_v13  ;;  %v9047_v28 = vadd.f32 %v1685_v14, %v9786_v7  ;;  %v3873_v47 = vsel %vm3691_vm13, %v3656_v53, 0.0  ;;  %v9788_v53 = vld [vmem:[#allocation17_spill] sm:$0xff]  ;;  %v9789_v7 = vld [vmem:[#allocation20_spill] sm:$0xff] }
 0x4e9   :  { %v4678_v55 = vpop.eup %4677  ;;  %v3259_v19 = vmul.f32 1.442695, %v3037_v2  ;;  %v9025_v34 = vsub.f32 %v9782_v35, %v2736_v49  ;;  %v3872_v38 = vadd.f32 %v3871_v21, %v3870_v23  ;;  %v9044_v2 = vadd.f32 %v1687_v37, %v9785_v41 }
 0x4ea   :  { %v3409_v36 = vsub.f32 1.0, %v4678_v55  ;;  %v4680_v48 = vpop.eup %4679  ;;  %v9051_v49 = vsub.f32 %v8795_v33, %v2772_v59  ;;  %v3658_v20 = vmul.f32 %v3533_v6, %v8968_v8  ;;  %v9058_v13 = vsel %vm3691_vm13, %v3665_v5, 0.0 }
 0x4eb   :  { %4687 = vpow2.f32 %v3259_v19  ;;  %v3038_v52 = vsub.f32 0.0, %v9025_v34  ;;  %v3417_v57 = vsub.f32 1.0, %v4680_v48  ;;  %v2778_v19 = vpop.xlane.xlu0 %2777  ;;  %v3281_v61 = vmul.f32 1.442695, %v3048_v29 }
 0x4ec   :  { %v2739_v60 = vpop.xlane.xlu1 %2738  ;;  %4689 = vpow2.f32 %v3277_v0  ;;  %v3534_v25 = vmul.f32 %v3409_v36, %v3409_v36  ;;  %v9787_v0 = vld [vmem:[#allocation15_spill] sm:$0xff]  ;;  %v3875_v37 = vsel %vm3691_vm13, %v3657_v26, 0.0  ;;  %v3050_v14 = vsub.f32 0.0, %v9051_v49 }
 0x4ed   :  { %v3261_v24 = vmul.f32 1.442695, %v3038_v52  ;;  %v9037_v10 = vsub.f32 %v9784_v42, %v2739_v60  ;;  %v4682_v58 = vpop.eup %4681  ;;  %v3874_v52 = vadd.f32 %v3873_v47, %v3872_v38  ;;  %v3542_v60 = vmul.f32 %v3417_v57, %v3417_v57 }
 0x4ee   :  { %v3410_v12 = vsub.f32 1.0, %v4682_v58  ;;  %v3659_v33 = vmul.f32 %v3534_v25, %v8981_v63  ;;  %v9065_v48 = vsub.f32 %v8801_v43, %v2778_v19 }
 0x4ef   :  { %4691 = vpow2.f32 %v3261_v24  ;;  %v3039_v51 = vsub.f32 0.0, %v9037_v10  ;;  %v3877_v24 = vsel %vm3691_vm13, %v3658_v20, 0.0  ;;  %v3876_v29 = vadd.f32 %v3875_v37, %v3874_v52  ;;  %v2784_v59 = vpop.xlane.xlu0 %2783 }
 0x4f0   :  { %v2745_v27 = vpop.xlane.xlu1 %2744  ;;  %v3535_v44 = vmul.f32 %v3410_v12, %v3410_v12  ;;  %v3879_v12 = vsel %vm3691_vm13, %v3659_v33, 0.0  ;;  %v3052_v47 = vsub.f32 0.0, %v9065_v48 }
 0x4f1   :  { %v4684_v3 = vpop.eup %4683  ;;  %v3263_v55 = vmul.f32 1.442695, %v3039_v51  ;;  %v9055_v11 = vsub.f32 %v9787_v0, %v2745_v27  ;;  %v3285_v27 = vmul.f32 1.442695, %v3050_v14  ;;  %v3878_v41 = vadd.f32 %v3877_v24, %v3876_v29 }
 0x4f2   :  { %v3411_v35 = vsub.f32 1.0, %v4684_v3  ;;  %v4686_v39 = vpop.eup %4685  ;;  %v3660_v42 = vmul.f32 %v3535_v44, %v8993_v15 }
 0x4f3   :  { %4693 = vpow2.f32 %v3263_v55  ;;  %v3041_v8 = vsub.f32 0.0, %v9055_v11  ;;  %v3419_v5 = vsub.f32 1.0, %v4686_v39  ;;  %v3880_v44 = vadd.f32 %v3879_v12, %v3878_v41 }
 0x4f4   :  { %v3536_v21 = vmul.f32 %v3411_v35, %v3411_v35  ;;  %v2751_v9 = vpop.xlane.xlu1 %2750  ;;  %4695 = vpow2.f32 %v3281_v61  ;;  %v3881_v57 = vsel %vm3691_vm13, %v3660_v42, 0.0  ;;  %v9084_v61 = vsub.f32 %v8819_v32, %v2784_v59 }
 0x4f5   :  { %v4688_v36 = vpop.eup %4687  ;;  %v9068_v23 = vsub.f32 %v9788_v53, %v2751_v9  ;;  %v3267_v63 = vmul.f32 1.442695, %v3041_v8  ;;  %v3544_v19 = vmul.f32 %v3419_v5, %v3419_v5  ;;  %v3667_v42 = vmul.f32 %v3542_v60, %v8957_v62 }
 0x4f6   :  { %v3412_v58 = vsub.f32 1.0, %v4688_v36  ;;  %v4690_v38 = vpop.eup %4689  ;;  %v3661_v43 = vmul.f32 %v3536_v21, %v9004_v16  ;;  %v2790_v16 = vpop.xlane.xlu0 %2789  ;;  %v3882_v21 = vadd.f32 %v3881_v57, %v3880_v44  ;;  %v3289_v36 = vmul.f32 1.442695, %v3052_v47 }
 0x4f7   :  { %v3043_v6 = vsub.f32 0.0, %v9068_v23  ;;  %4697 = vpow2.f32 %v3267_v63  ;;  %v3421_v0 = vsub.f32 1.0, %v4690_v38  ;;  %v3054_v29 = vsub.f32 0.0, %v9084_v61 }
 0x4f8   :  { %v3537_v51 = vmul.f32 %v3412_v58, %v3412_v58  ;;  %v2757_v26 = vpop.xlane.xlu1 %2756  ;;  %v3883_v39 = vsel %vm3691_vm13, %v3661_v43, 0.0 }
 0x4f9   :  { %v4692_v25 = vpop.eup %4691  ;;  %v3271_v15 = vmul.f32 1.442695, %v3043_v6  ;;  %v9076_v3 = vsub.f32 %v9789_v7, %v2757_v26  ;;  %v3884_v58 = vadd.f32 %v3883_v39, %v3882_v21  ;;  %v3546_v5 = vmul.f32 %v3421_v0, %v3421_v0  ;;  %v9791_v39 = vld [vmem:[#allocation24_spill] sm:$0xff] }
 0x4fa   :  { %v3662_v55 = vmul.f32 %v3537_v51, %v9012_v56  ;;  %v3413_v20 = vsub.f32 1.0, %v4692_v25  ;;  %v9790_v56 = vld [vmem:[#allocation19_spill] sm:$0xff]  ;;  %v2796_v32 = vpop.xlane.xlu0 %2795  ;;  %v9096_v51 = vsub.f32 %v8832_v18, %v2790_v16  ;;  %v3669_v26 = vmul.f32 %v3544_v19, %v8988_v1 }
 0x4fb   :  { %4699 = vpow2.f32 %v3271_v15  ;;  %v3045_v35 = vsub.f32 0.0, %v9076_v3  ;;  %v3895_v18 = vsel %vm3691_vm13, %v3667_v42, 0.0  ;;  %v3671_v47 = vmul.f32 %v3546_v5, %v9001_v50 }
 0x4fc   :  { %v3538_v52 = vmul.f32 %v3413_v20, %v3413_v20  ;;  %v2763_v37 = vpop.xlane.xlu1 %2762  ;;  %4701 = vpow2.f32 %v3285_v27  ;;  %v3885_v14 = vsel %vm3691_vm13, %v3662_v55, 0.0  ;;  %v9104_v27 = vsub.f32 %v8887_v22, %v2796_v32 }
 0x4fd   :  { %v4694_v33 = vpop.eup %4693  ;;  %v3275_v8 = vmul.f32 1.442695, %v3045_v35  ;;  %v9087_v9 = vsub.f32 %v9790_v56, %v2763_v37  ;;  %v3886_v43 = vadd.f32 %v3885_v14, %v3884_v58  ;;  %v3056_v20 = vsub.f32 0.0, %v9096_v51 }
 0x4fe   :  { %v3663_v53 = vmul.f32 %v3538_v52, %v9025_v34  ;;  %v3414_v24 = vsub.f32 1.0, %v4694_v33  ;;  %v4696_v12 = vpop.eup %4695  ;;  %v3899_v44 = vsel %vm3691_vm13, %v3669_v26, 0.0  ;;  %v2802_v0 = vpop.xlane.xlu0 %2801  ;;  %v3058_v21 = vsub.f32 0.0, %v9104_v27 }
 0x4ff   :  { %4703 = vpow2.f32 %v3275_v8  ;;  %v3047_v63 = vsub.f32 0.0, %v9087_v9  ;;  %v3423_v16 = vsub.f32 1.0, %v4696_v12  ;;  %v3903_v8 = vsel %vm3691_vm13, %v3671_v47, 0.0 }
 0x500   :  { %v3887_v59 = vsel %vm3691_vm13, %v3663_v53, 0.0  ;;  %v3539_v6 = vmul.f32 %v3414_v24, %v3414_v24  ;;  %v2769_v38 = vpop.xlane.xlu1 %2768  ;;  %4705 = vpow2.f32 %v3289_v36  ;;  %v3297_v24 = vmul.f32 1.442695, %v3056_v20 }
 0x501   :  { %v3279_v34 = vmul.f32 1.442695, %v3047_v63  ;;  %v9099_v62 = vsub.f32 %v8798_v31, %v2769_v38  ;;  %v4698_v60 = vpop.eup %4697  ;;  %v3888_v41 = vadd.f32 %v3887_v59, %v3886_v43  ;;  %v3293_v31 = vmul.f32 1.442695, %v3054_v29 }
 0x502   :  { %v3664_v25 = vmul.f32 %v3539_v6, %v9037_v10  ;;  %v3416_v15 = vsub.f32 1.0, %v4698_v60  ;;  %v9122_v58 = vsub.f32 %v8930_v17, %v2802_v0  ;;  %v2808_v29 = vpop.xlane.xlu0 %2807  ;;  %v3548_v6 = vmul.f32 %v3423_v16, %v3423_v16 }
 0x503   :  { %4707 = vpow2.f32 %v3279_v34  ;;  %v3049_v7 = vsub.f32 0.0, %v9099_v62  ;;  %v3301_v12 = vmul.f32 1.442695, %v3058_v21 }
 0x504   :  { %v3889_v57 = vsel %vm3691_vm13, %v3664_v25, 0.0  ;;  %v2775_v55 = vpop.xlane.xlu1 %2774  ;;  %v3541_v19 = vmul.f32 %v3416_v15, %v3416_v15  ;;  %v3060_v15 = vsub.f32 0.0, %v9122_v58 }
 0x505   :  { %v4700_v1 = vpop.eup %4699  ;;  %v3890_v10 = vadd.f32 %v3889_v57, %v3888_v41  ;;  %v3283_v22 = vmul.f32 1.442695, %v3049_v7  ;;  %v9113_v52 = vsub.f32 %v9791_v39, %v2775_v55 }
 0x506   :  { %v3418_v35 = vsub.f32 1.0, %v4700_v1  ;;  %v4702_v37 = vpop.eup %4701  ;;  %v3666_v50 = vmul.f32 %v3541_v19, %v9055_v11  ;;  %v9792_v11 = vld [vmem:[#allocation21_spill] sm:$0xff]  ;;  %v2814_v20 = vpop.xlane.xlu0 %2813 }
 0x507   :  { %v3892_v33 = vadd.f32 %v9058_v13, %v3890_v10  ;;  %4709 = vpow2.f32 %v3283_v22  ;;  %v3051_v36 = vsub.f32 0.0, %v9113_v52  ;;  %v3425_v38 = vsub.f32 1.0, %v4702_v37 }
 0x508   :  { %4711 = vpow2.f32 %v3293_v31  ;;  %v3543_v56 = vmul.f32 %v3418_v35, %v3418_v35  ;;  %v2781_v14 = vpop.xlane.xlu1 %2780  ;;  %v3893_v42 = vsel %vm3691_vm13, %v3666_v50, 0.0 }
 0x509   :  { %v4704_v53 = vpop.eup %4703  ;;  %v9125_v32 = vsub.f32 %v9792_v11, %v2781_v14  ;;  %v3894_v13 = vadd.f32 %v3893_v42, %v3892_v33  ;;  %v3287_v59 = vmul.f32 1.442695, %v3051_v36  ;;  %v3550_v55 = vmul.f32 %v3425_v38, %v3425_v38 }
 0x50a   :  { %v3668_v63 = vmul.f32 %v3543_v56, %v9068_v23  ;;  %v3420_v5 = vsub.f32 1.0, %v4704_v53  ;;  %v4706_v34 = vpop.eup %4705  ;;  %v9132_v23 = vsub.f32 %v8977_v54, %v2808_v29  ;;  %v9146_v56 = vsub.f32 %v9044_v2, %v2814_v20 }
 0x50b   :  { %v3053_v43 = vsub.f32 0.0, %v9125_v32  ;;  %v3896_v60 = vadd.f32 %v3895_v18, %v3894_v13  ;;  %4713 = vpow2.f32 %v3287_v59  ;;  %v3427_v1 = vsub.f32 1.0, %v4706_v34 }
 0x50c   :  { %v3897_v26 = vsel %vm3691_vm13, %v3668_v63, 0.0  ;;  %v3545_v17 = vmul.f32 %v3420_v5, %v3420_v5  ;;  %v2787_v25 = vpop.xlane.xlu1 %2786  ;;  %4715 = vpow2.f32 %v3297_v24  ;;  %v3062_v0 = vsub.f32 0.0, %v9132_v23 }
 0x50d   :  { %v4708_v41 = vpop.eup %4707  ;;  %v3291_v7 = vmul.f32 1.442695, %v3053_v43  ;;  %v9135_v47 = vsub.f32 %v8836_v4, %v2787_v25  ;;  %v3898_v31 = vadd.f32 %v3897_v26, %v3896_v60  ;;  %v3305_v4 = vmul.f32 1.442695, %v3060_v15 }
 0x50e   :  { %v3670_v57 = vmul.f32 %v3545_v17, %v9076_v3  ;;  %v3422_v18 = vsub.f32 1.0, %v4708_v41  ;;  %v3675_v36 = vmul.f32 %v3550_v55, %v9051_v49  ;;  %v3552_v53 = vmul.f32 %v3427_v1, %v3427_v1 }
 0x50f   :  { %4717 = vpow2.f32 %v3291_v7  ;;  %v3055_v10 = vsub.f32 0.0, %v9135_v47  ;;  %v3900_v19 = vadd.f32 %v3899_v44, %v3898_v31  ;;  %v3673_v44 = vmul.f32 %v3548_v6, %v9029_v30 }
 0x510   :  { %4719 = vpow2.f32 %v3301_v12  ;;  %v3901_v54 = vsel %vm3691_vm13, %v3670_v57, 0.0  ;;  %v3547_v22 = vmul.f32 %v3422_v18, %v3422_v18  ;;  %v2793_v16 = vpop.xlane.xlu1 %2792  ;;  %v3309_v49 = vmul.f32 1.442695, %v3062_v0 }
 0x511   :  { %v4710_v35 = vpop.eup %4709  ;;  %v3295_v39 = vmul.f32 1.442695, %v3055_v10  ;;  %v9142_v3 = vsub.f32 %v8907_v45, %v2793_v16  ;;  %v3902_v50 = vadd.f32 %v3901_v54, %v3900_v19  ;;  %v3064_v29 = vsub.f32 0.0, %v9146_v56 }
 0x512   :  { %v4712_v37 = vpop.eup %4711  ;;  %v3672_v33 = vmul.f32 %v3547_v22, %v9087_v9  ;;  %v3424_v21 = vsub.f32 1.0, %v4710_v35  ;;  %v3907_v59 = vsel %vm3691_vm13, %v3673_v44, 0.0  ;;  %v3911_v12 = vsel %vm3691_vm13, %v3675_v36, 0.0 }
 0x513   :  { %4721 = vpow2.f32 %v3295_v39  ;;  %v3057_v14 = vsub.f32 0.0, %v9142_v3  ;;  %v3904_v24 = vadd.f32 %v3903_v8, %v3902_v50  ;;  %v3429_v13 = vsub.f32 1.0, %v4712_v37 }
 0x514   :  { %v3905_v45 = vsel %vm3691_vm13, %v3672_v33, 0.0  ;;  %v3549_v42 = vmul.f32 %v3424_v21, %v3424_v21  ;;  %v2799_v11 = vpop.xlane.xlu1 %2798  ;;  %4723 = vpow2.f32 %v3305_v4  ;;  %v3677_v43 = vmul.f32 %v3552_v53, %v9065_v48 }
 0x515   :  { %v3299_v9 = vmul.f32 1.442695, %v3057_v14  ;;  %v9153_v63 = vsub.f32 %v8933_v46, %v2799_v11  ;;  %v4714_v2 = vpop.eup %4713  ;;  %v3906_v5 = vadd.f32 %v3905_v45, %v3904_v24  ;;  %v3313_v57 = vmul.f32 1.442695, %v3064_v29 }
 0x516   :  { %v3674_v30 = vmul.f32 %v3549_v42, %v9099_v62  ;;  %v3426_v8 = vsub.f32 1.0, %v4714_v2  ;;  %v4716_v38 = vpop.eup %4715  ;;  %v3554_v62 = vmul.f32 %v3429_v13, %v3429_v13  ;;  %v3915_v1 = vsel %vm3691_vm13, %v3677_v43, 0.0 }
 0x517   :  { %4725 = vpow2.f32 %v3299_v9  ;;  %v3059_v6 = vsub.f32 0.0, %v9153_v63  ;;  %v3908_v46 = vadd.f32 %v3907_v59, %v3906_v5  ;;  %v3431_v18 = vsub.f32 1.0, %v4716_v38 }
 0x518   :  { %v3909_v34 = vsel %vm3691_vm13, %v3674_v30, 0.0  ;;  %v2805_v60 = vpop.xlane.xlu1 %2804  ;;  %v3551_v17 = vmul.f32 %v3426_v8, %v3426_v8  ;;  %4727 = vpow2.f32 %v3309_v49 }
 0x519   :  { %v4718_v26 = vpop.eup %4717  ;;  %v3303_v25 = vmul.f32 1.442695, %v3059_v6  ;;  %v9163_v41 = vsub.f32 %v9019_v40, %v2805_v60  ;;  %v3910_v7 = vadd.f32 %v3909_v34, %v3908_v46  ;;  %v3679_v40 = vmul.f32 %v3554_v62, %v9084_v61 }
 0x51a   :  { %v4720_v15 = vpop.eup %4719  ;;  %v3428_v31 = vsub.f32 1.0, %v4718_v26  ;;  %v3676_v55 = vmul.f32 %v3551_v17, %v9113_v52  ;;  %v3556_v37 = vmul.f32 %v3431_v18, %v3431_v18 }
 0x51b   :  { %4729 = vpow2.f32 %v3303_v25  ;;  %v3061_v48 = vsub.f32 0.0, %v9163_v41  ;;  %v3912_v20 = vadd.f32 %v3911_v12, %v3910_v7  ;;  %v3433_v50 = vsub.f32 1.0, %v4720_v15 }
 0x51c   :  { %v3553_v10 = vmul.f32 %v3428_v31, %v3428_v31  ;;  %v2811_v19 = vpop.xlane.xlu1 %2810  ;;  %v3913_v22 = vsel %vm3691_vm13, %v3676_v55, 0.0  ;;  %4731 = vpow2.f32 %v3313_v57  ;;  %v3919_v53 = vsel %vm3691_vm13, %v3679_v40, 0.0 }
 0x51d   :  { %v4722_v54 = vpop.eup %4721  ;;  %v3307_v16 = vmul.f32 1.442695, %v3061_v48  ;;  %v2938_v35 = vsub.f32 %v9047_v28, %v2811_v19  ;;  %v3914_v4 = vadd.f32 %v3913_v22, %v3912_v20  ;;  %v3558_v42 = vmul.f32 %v3433_v50, %v3433_v50 }
 0x51e   :  { %v3678_v0 = vmul.f32 %v3553_v10, %v9125_v32  ;;  %v3430_v52 = vsub.f32 1.0, %v4722_v54  ;;  %v4724_v39 = vpop.eup %4723  ;;  %v3681_v32 = vmul.f32 %v3556_v37, %v9096_v51 }
 0x51f   :  { %4733 = vpow2.f32 %v3307_v16  ;;  %v3063_v33 = vsub.f32 0.0, %v2938_v35  ;;  %v3916_v21 = vadd.f32 %v3915_v1, %v3914_v4  ;;  %v3435_v11 = vsub.f32 1.0, %v4724_v39 }
 0x520   :  { %v3917_v44 = vsel %vm3691_vm13, %v3678_v0, 0.0  ;;  %v3555_v36 = vmul.f32 %v3430_v52, %v3430_v52  ;;  %v3923_v8 = vsel %vm3691_vm13, %v3681_v32, 0.0 }
 0x521   :  { %v4726_v61 = vpop.eup %4725  ;;  %v3311_v14 = vmul.f32 1.442695, %v3063_v33  ;;  %v3918_v24 = vadd.f32 %v3917_v44, %v3916_v21  ;;  %v3560_v6 = vmul.f32 %v3435_v11, %v3435_v11 }
 0x522   :  { %v3680_v28 = vmul.f32 %v3555_v36, %v9135_v47  ;;  %v3432_v45 = vsub.f32 1.0, %v4726_v61  ;;  %v4728_v13 = vpop.eup %4727  ;;  %v3683_v47 = vmul.f32 %v3558_v42, %v9104_v27 }
 0x523   :  { %4735 = vpow2.f32 %v3311_v14  ;;  %v3920_v9 = vadd.f32 %v3919_v53, %v3918_v24  ;;  %v3437_v38 = vsub.f32 1.0, %v4728_v13 }
 0x524   :  { %v3921_v2 = vsel %vm3691_vm13, %v3680_v28, 0.0  ;;  %v3557_v5 = vmul.f32 %v3432_v45, %v3432_v45  ;;  %v3927_v17 = vsel %vm3691_vm13, %v3683_v47, 0.0 }
 0x525   :  { %v4730_v30 = vpop.eup %4729  ;;  %v3922_v49 = vadd.f32 %v3921_v2, %v3920_v9  ;;  %v3562_v25 = vmul.f32 %v3437_v38, %v3437_v38 }
 0x526   :  { %v3682_v29 = vmul.f32 %v3557_v5, %v9142_v3  ;;  %v3434_v59 = vsub.f32 1.0, %v4730_v30  ;;  %v4732_v51 = vpop.eup %4731  ;;  %v3685_v3 = vmul.f32 %v3560_v6, %v9122_v58 }
 0x527   :  { %v3924_v12 = vadd.f32 %v3923_v8, %v3922_v49  ;;  %v3439_v15 = vsub.f32 1.0, %v4732_v51 }
 0x528   :  { %v3925_v43 = vsel %vm3691_vm13, %v3682_v29, 0.0  ;;  %v3559_v46 = vmul.f32 %v3434_v59, %v3434_v59  ;;  %v3931_v1 = vsel %vm3691_vm13, %v3685_v3, 0.0 }
 0x529   :  { %v4734_v34 = vpop.eup %4733  ;;  %v3926_v60 = vadd.f32 %v3925_v43, %v3924_v12  ;;  %v3564_v20 = vmul.f32 %v3439_v15, %v3439_v15 }
 0x52a   :  { %v3684_v26 = vmul.f32 %v3559_v46, %v9153_v63  ;;  %v3436_v62 = vsub.f32 1.0, %v4734_v34  ;;  %v3687_v63 = vmul.f32 %v3562_v25, %v9132_v23  ;;  %v4981_v23 = vmov 0.0  }
 0x52b   :  { %v3928_v7 = vadd.f32 %v3927_v17, %v3926_v60  ;;  %v3689_v16 = vmul.f32 %v3564_v20, %v9146_v56  ;;  %61 = vst.msk [vmem:[#allocation2] sm:$0x1] %vm60_vm0, %v4981_v23 }
 0x52c   :  { %v3929_v27 = vsel %vm3691_vm13, %v3684_v26, 0.0  ;;  %v3561_v31 = vmul.f32 %v3436_v62, %v3436_v62  ;;  %v3935_v22 = vsel %vm3691_vm13, %v3687_v63, 0.0 }
 0x52d   :  { %v4736_v57 = vpop.eup %4735  ;;  %v3930_v18 = vadd.f32 %v3929_v27, %v3928_v7  ;;  %v3939_v52 = vsel %vm3691_vm13, %v3689_v16, 0.0 }
 0x52e   :  { %v3686_v55 = vmul.f32 %v3561_v31, %v9163_v41  ;;  %v3438_v48 = vsub.f32 1.0, %v4736_v57 }
 0x52f   :  { %v3932_v10 = vadd.f32 %v3931_v1, %v3930_v18 }
 0x530   :  { %v3933_v19 = vsel %vm3691_vm13, %v3686_v55, 0.0  ;;  %v3563_v58 = vmul.f32 %v3438_v48, %v3438_v48 }
 0x531   :  { %v3934_v54 = vadd.f32 %v3933_v19, %v3932_v10 }
 0x532   :  { %v3688_v40 = vmul.f32 %v3563_v58, %v2938_v35  ;;  %v3690_v56 = vld [vmem:[#allocation2] sm:$0x1] }
 0x533   :  { %v3936_v4 = vadd.f32 %v3935_v22, %v3934_v54 }
 0x534   :  { %v3937_v0 = vsel %vm3691_vm13, %v3688_v40, 0.0 }
 0x535   :  { %v3938_v41 = vadd.f32 %v3937_v0, %v3936_v4 }
 0x537   :  { %v3940_v39 = vadd.f32 %v3939_v52, %v3938_v41 }
 0x539   :  { %3941 = vadd.xlane.f32.xlu1 %v3940_v39 }
 0x5c6   :  { %v3942_v37 = vpop.xlane.xlu1 %3941 }
 0x5c7   :  { %v3943_v50 = vrot.slane %v3942_v37, 4 }
 0x5c9   :  { %v3944_v33 = vadd.f32 %v3943_v50, %v3942_v37 }
 0x5cb   :  { %v3945_v35 = vrot.slane %v3944_v33, 2 }
 0x5cd   :  { %v3946_v21 = vadd.f32 %v3945_v35, %v3944_v33 }
 0x5cf   :  { %v3947_v44 = vrot.slane %v3946_v21, 1 }
 0x5d1   :  { %v3948_v36 = vadd.f32 %v3947_v44, %v3946_v21 }
 0x5d3   :  { %3980 = vpush %v3948_v36 }
 0x604   :  { %s3981_s20 = spop %3980 }
 0x605   :  { %v3950_v61 = vstv %s3981_s20 }
 0x606   :  { %v3951_v14 = vadd.f32 %v3950_v61, %v3690_v56 }
 0x608   :  { %3953 = vst.msk [vmem:[#allocation2] sm:$0x1] %vm60_vm0, %v3951_v14 }
 0x609   :  { %4967 = shalt.err (!%p4964_p4)
}
 0x60a   :  { %s4968_s25 = scalar_lea.hbm %s9209_s2, 16 }
 0x60b   :  { %p4969_p5 = scmp.ne.s32.totalorder %s9209_s2, %s4968_s25  ;;  %p4972_p6 = scmp.lt.u32.totalorder %s4968_s25, %s9209_s2 }
 0x60d   :  { %p4974_p7 = pnand %p4972_p6, %p4969_p5 }
 0x60f   :  { %4977 = shalt.err (!%p4974_p7)
}
 0x610   :  { %3963 = dma.vmem_to_hbm [thread:$0]  %s3961_s19, 16, %s9209_s2, [#allocation3]  }
 0x611   :  { %4978 = dma.done.wait [#allocation3], 16  }
 0x612   :  { %4979 = vsyncadd [#allocation3], 4294967280 }
 0x613   :  { %3967 = vsyncpa [#allocation3], 1 }

</bundles_post_ra>
